<compile_context>
chip_gen: v7x
topology: tpu7x:2x2x1
jax: 0.10.0
libtpu: 0.0.40
codegen_flags: <defaults>
</compile_context>

<pallas_src>
import math

import jax
import jax.numpy as jnp
from jax.experimental import pallas as pl
from jax.experimental.pallas import tpu as pltpu

D_MODEL = 768
N_HEADS = 4
D_K = D_MODEL // N_HEADS          # 192
D_FF = 100                        # ContextAttention.hidden_dim
D_FF_PAD = 128                    # lane-dense padding of the FFN hidden dim
N_LAYERS = 6
LN_EPS = 1e-5                     # PyTorch nn.LayerNorm default

# Row layout of the packed per-layer small-parameter block (8, 3*D_MODEL) f32.
_ROW_BQKV = 0   # [bq | bk | bv]                      (width 2304)
_ROW_ATTN = 1   # [bo | ln1_gamma | ln1_beta]         (width 2304)
_ROW_FFN = 2    # [b2 | ln2_gamma | ln2_beta]         (width 2304)
_ROW_B1 = 3     # [b1 padded to 128 | zeros]
_ROW_FING = 4   # [final_ln_gamma | zeros]
_ROW_FINB = 5   # [final_ln_beta  | zeros]
# rows 6..7 are zero padding (sublane alignment to 8)


# ----------------------------- Pallas kernel -------------------------------

def _layernorm(x, g, b):
    mean = jnp.mean(x, axis=-1, keepdims=True)
    var = jnp.mean(jnp.square(x - mean), axis=-1, keepdims=True)
    return (x - mean) * jax.lax.rsqrt(var + LN_EPS) * g + b


def _encoder_stack_kernel(
        hidden_ref, mask_ref,
        wqkv_ref, wo_ref, w1_ref, w2_ref, sp_ref,
        out_ref,
        x_scr):
    """One grid step == one encoder layer. Activation is carried in x_scr."""
    layer = pl.program_id(0)
    last = pl.num_programs(0) - 1

    @pl.when(layer == 0)
    def _():
        x_scr[...] = hidden_ref[...]

    x = x_scr[...]                                   # (N, D) f32, N = batch*turns

    # Unpack the single per-layer small-parameter DMA (all offsets 128-aligned).
    sp = sp_ref[...]                                 # (8, 3*D) f32
    bqkv = sp[_ROW_BQKV:_ROW_BQKV + 1, :]
    bo = sp[_ROW_ATTN:_ROW_ATTN + 1, 0:D_MODEL]
    ln1_g = sp[_ROW_ATTN:_ROW_ATTN + 1, D_MODEL:2 * D_MODEL]
    ln1_b = sp[_ROW_ATTN:_ROW_ATTN + 1, 2 * D_MODEL:3 * D_MODEL]
    b2 = sp[_ROW_FFN:_ROW_FFN + 1, 0:D_MODEL]
    ln2_g = sp[_ROW_FFN:_ROW_FFN + 1, D_MODEL:2 * D_MODEL]
    ln2_b = sp[_ROW_FFN:_ROW_FFN + 1, 2 * D_MODEL:3 * D_MODEL]
    b1 = sp[_ROW_B1:_ROW_B1 + 1, 0:D_FF_PAD]
    fin_g = sp[_ROW_FING:_ROW_FING + 1, 0:D_MODEL]
    fin_b = sp[_ROW_FINB:_ROW_FINB + 1, 0:D_MODEL]

    # ---------------- sublayer 0: pre-norm multi-head self-attention --------
    xn = _layernorm(x, ln1_g, ln1_b)
    # Fused QKV projection: one MXU matmul (bf16 inputs, f32 accumulation).
    qkv = jnp.dot(xn.astype(jnp.bfloat16), wqkv_ref[...],
                  preferred_element_type=jnp.float32) + bqkv
    q16 = qkv[:, 0:D_MODEL].astype(jnp.bfloat16)
    k16 = qkv[:, D_MODEL:2 * D_MODEL].astype(jnp.bfloat16)
    v16 = qkv[:, 2 * D_MODEL:3 * D_MODEL].astype(jnp.bfloat16)

    # mask code: 0.0 where attended; -1e9 (in-batch masked) / -2e9 (cross-batch)
    # used as masked_fill replacement values (exact PyTorch semantics, including
    # the fully-masked-row edge case).
    code = mask_ref[...]                             # (N, N) f32
    scale = 1.0 / math.sqrt(D_K)

    # concat([h0|h1|h2|h3]) @ Wo  ==  sum_h  h_h @ Wo[h*d_k:(h+1)*d_k, :]
    attn_out = None
    for h in range(N_HEADS):
        c0 = h * D_K
        q_h = q16[:, c0:c0 + D_K]                    # (N, d_k) bf16
        k_h = k16[:, c0:c0 + D_K]
        v_h = v16[:, c0:c0 + D_K]
        # One score matmul / softmax / PV matmul per head over all N rows; the
        # block-diagonal mask keeps batch elements from attending to each other.
        s = jax.lax.dot_general(q_h, k_h, (((1,), (1,)), ((), ())),
                                preferred_element_type=jnp.float32) * scale
        s = jnp.where(code == 0.0, s, code)          # masked_fill
        s = s - jnp.max(s, axis=-1, keepdims=True)
        e = jnp.exp(s)
        # approx reciprocal on the EUP slot; error << bf16 projection error.
        p = e * pl.reciprocal(jnp.sum(e, axis=-1, keepdims=True), approx=True)
        pv = jnp.dot(p.astype(jnp.bfloat16), v_h,
                     preferred_element_type=jnp.float32)          # (N, d_k)
        contrib = jnp.dot(pv.astype(jnp.bfloat16), wo_ref[c0:c0 + D_K, :],
                          preferred_element_type=jnp.float32)     # (N, D)
        attn_out = contrib if attn_out is None else attn_out + contrib
    x = x + attn_out + bo                            # bias added once, after loop

    # ---------------- sublayer 1: pre-norm position-wise feed-forward -------
    xn2 = _layernorm(x, ln2_g, ln2_b)
    hmid = jnp.dot(xn2.astype(jnp.bfloat16), w1_ref[...],
                   preferred_element_type=jnp.float32) + b1
    hmid = jnp.maximum(hmid, 0.0)
    x = x + jnp.dot(hmid.astype(jnp.bfloat16), w2_ref[...],
                    preferred_element_type=jnp.float32) + b2

    x_scr[...] = x

    @pl.when(layer == last)
    def _():
        out_ref[...] = _layernorm(x, fin_g, fin_b)


# ----------------------------- JAX glue ------------------------------------

def positional_encoding(seq_len, d_model):
    position = jnp.arange(seq_len, dtype=jnp.float32)[:, None]
    div_term = jnp.exp(
        jnp.arange(0, d_model, 2, dtype=jnp.float32) * (-math.log(10000.0) / d_model)
    )
    pe = jnp.zeros((seq_len, d_model), jnp.float32)
    pe = pe.at[:, 0::2].set(jnp.sin(position * div_term))
    pe = pe.at[:, 1::2].set(jnp.cos(position * div_term))
    return pe


def context_attention_forward(input_ids, result_masks, params):
    ds, ts, dm = input_ids.shape
    n = ds * ts

    # PositionalEncoding (dropout p=0.0 -> identity)
    hidden = (input_ids + positional_encoding(ts, dm)[None, :, :])
    hidden = hidden.reshape(n, dm).astype(jnp.float32)

    # turn_mask[d, i, j] = (result_masks[d, j].sum() != 0) & (j <= i)
    padding_utter = jnp.sum(result_masks, axis=-1) != 0            # (ds, ts)
    causal = jnp.tril(jnp.ones((ts, ts), dtype=jnp.bool_))         # subsequent_mask
    turn_mask = padding_utter[:, None, :] & causal[None, :, :]     # (ds, ts, ts)

    # Block-diagonal (N, N) masked_fill code:
    #   0.0   -> attended (keep raw score)
    #   -1e9  -> same batch element but masked (PyTorch masked_fill value)
    #   -2e9  -> different batch element (always excluded; strictly below -1e9
    #            so fully-masked rows reproduce PyTorch's uniform-over-turn
    #            softmax exactly).
    eye = jnp.eye(ds, dtype=jnp.bool_)
    allowed = (eye[:, None, :, None] & turn_mask[:, :, None, :]).reshape(n, n)
    same_batch = (eye[:, None, :, None]
                  & jnp.ones((1, ts, 1, ts), jnp.bool_)).reshape(n, n)
    mask_code = jnp.where(allowed, 0.0,
                          jnp.where(same_batch, -1e9, -2e9)).astype(jnp.float32)

    def resident(shape):
        return pl.BlockSpec(shape, lambda l: (0, 0))

    def per_layer(r, c):
        return pl.BlockSpec((None, r, c), lambda l: (l, 0, 0))

    out = pl.pallas_call(
        _encoder_stack_kernel,
        out_shape=jax.ShapeDtypeStruct((n, dm), jnp.float32),
        grid=(N_LAYERS,),
        in_specs=[
            resident((n, dm)),                       # hidden (read at step 0)
            resident((n, n)),                        # block-diagonal mask code
            per_layer(dm, 3 * dm),                   # wqkv  (bf16)
            per_layer(dm, dm),                       # wo    (bf16)
            per_layer(dm, D_FF_PAD),                 # w1    (bf16, padded)
            per_layer(D_FF_PAD, dm),                 # w2    (bf16, padded)
            per_layer(8, 3 * dm),                    # packed small f32 params
        ],
        out_specs=resident((n, dm)),
        scratch_shapes=[pltpu.VMEM((n, dm), jnp.float32)],     # carried activation
        compiler_params=pltpu.CompilerParams(
            dimension_semantics=("arbitrary",),                # layer loop is sequential
            vmem_limit_bytes=32 * 1024 * 1024),                # ~10.2 MiB actually used
    )(hidden, mask_code,
      params["wqkv"], params["wo"], params["w1"], params["w2"], params["small"])
    return out.reshape(ds, ts, dm)


def init_params(key):
    def lin_init(k, din, dout):
        k1, k2 = jax.random.split(k)
        w = 0.02 * jax.random.normal(k1, (din, dout), jnp.float32)
        b = 0.02 * jax.random.normal(k2, (dout,), jnp.float32)
        return w, b

    wqkv, wo, w1, w2, small = [], [], [], [], []

    fin_g = jnp.ones((D_MODEL,), jnp.float32)        # final LayerNorm (Encoder.norm)
    fin_b = jnp.zeros((D_MODEL,), jnp.float32)
    ln_g = jnp.ones((D_MODEL,), jnp.float32)
    ln_b = jnp.zeros((D_MODEL,), jnp.float32)

    keys = jax.random.split(key, N_LAYERS)
    for li in range(N_LAYERS):
        ks = jax.random.split(keys[li], 6)
        wq, bq = lin_init(ks[0], D_MODEL, D_MODEL)
        wk, bk = lin_init(ks[1], D_MODEL, D_MODEL)
        wv, bv = lin_init(ks[2], D_MODEL, D_MODEL)
        wo_l, bo_l = lin_init(ks[3], D_MODEL, D_MODEL)
        w1_l, b1_l = lin_init(ks[4], D_MODEL, D_FF)
        w2_l, b2_l = lin_init(ks[5], D_FF, D_MODEL)

        # fused QKV projection weight (768, 2304)
        wqkv.append(jnp.concatenate([wq, wk, wv], axis=1))
        wo.append(wo_l)
        # pad FFN hidden dim 100 -> 128 with zeros (numerically exact)
        w1.append(jnp.pad(w1_l, ((0, 0), (0, D_FF_PAD - D_FF))))
        w2.append(jnp.pad(w2_l, ((0, D_FF_PAD - D_FF), (0, 0))))

        # One packed lane-dense (8, 2304) f32 block of all small per-layer params.
        row_bqkv = jnp.concatenate([bq, bk, bv])                         # 2304
        row_attn = jnp.concatenate([bo_l, ln_g, ln_b])                   # 2304
        row_ffn = jnp.concatenate([b2_l, ln_g, ln_b])                    # 2304
        row_b1 = jnp.pad(b1_l, (0, 3 * D_MODEL - D_FF))                  # 2304
        row_fing = jnp.pad(fin_g, (0, 2 * D_MODEL))
        row_finb = jnp.pad(fin_b, (0, 2 * D_MODEL))
        pad_rows = jnp.zeros((2, 3 * D_MODEL), jnp.float32)
        small.append(jnp.concatenate(
            [jnp.stack([row_bqkv, row_attn, row_ffn, row_b1, row_fing, row_finb]),
             pad_rows], axis=0))                                          # (8, 2304)

    stk = lambda xs: jnp.stack(xs, axis=0)
    bf16 = lambda x: x.astype(jnp.bfloat16)
    return dict(
        wqkv=bf16(stk(wqkv)),        # (6, 768, 2304) bf16
        wo=bf16(stk(wo)),            # (6, 768, 768)  bf16
        w1=bf16(stk(w1)),            # (6, 768, 128)  bf16
        w2=bf16(stk(w2)),            # (6, 128, 768)  bf16
        small=stk(small),            # (6, 8, 2304)   f32
    )


if __name__ == "__main__":
    key = jax.random.PRNGKey(0)
    k_x, k_m, k_p = jax.random.split(key, 3)

    ds, ts, mask_len = 2, 8, 5
    input_ids = jax.random.normal(k_x, (ds, ts, D_MODEL), jnp.float32)

    # result_masks: nonzero for real turns, all-zero for padded (last 2) turns.
    result_masks = (jax.random.uniform(k_m, (ds, ts, mask_len)) > 0.5).astype(jnp.float32)
    result_masks = result_masks.at[:, ts - 2:, :].set(0.0)
    result_masks = result_masks.at[:, : ts - 2, 0].set(1.0)

    params = init_params(k_p)

    fwd = jax.jit(context_attention_forward)
    out = fwd(input_ids, result_masks, params)
    jax.block_until_ready(out)
    assert out.shape == (ds, ts, D_MODEL)
    print("KERNEL_OK")
</pallas_src>

<mosaic_0001>
module attributes {stable_mosaic.version = 11 : i64} {
  func.func @_encoder_stack_kernel(%arg0: i32, %arg1: memref<16x768xf32, #tpu.memory_space<vmem>>, %arg2: memref<16x16xf32, #tpu.memory_space<vmem>>, %arg3: memref<1x768x2304xbf16, #tpu.memory_space<vmem>>, %arg4: memref<1x768x768xbf16, #tpu.memory_space<vmem>>, %arg5: memref<1x768x128xbf16, #tpu.memory_space<vmem>>, %arg6: memref<1x128x768xbf16, #tpu.memory_space<vmem>>, %arg7: memref<1x8x2304xf32, #tpu.memory_space<vmem>>, %arg8: memref<16x768xf32, #tpu.memory_space<vmem>>, %arg9: memref<16x768xf32, #tpu.memory_space<vmem>>) attributes {dimension_semantics = [#tpu.dimension_semantics<arbitrary>], iteration_bounds = array<i64: 6>, scalar_prefetch = 0 : i64, scratch_operands = 1 : i64, tpu.core_type = #tpu.core_type<tc>, window_params = [{pipeline_mode = #tpu.pipeline_mode<synchronous>, transform_indices = @transform_0, window_bounds = array<i64: 16, 768>}, {pipeline_mode = #tpu.pipeline_mode<synchronous>, transform_indices = @transform_1, window_bounds = array<i64: 16, 16>}, {transform_indices = @transform_2, window_bounds = array<i64: 1, 768, 2304>}, {transform_indices = @transform_3, window_bounds = array<i64: 1, 768, 768>}, {transform_indices = @transform_4, window_bounds = array<i64: 1, 768, 128>}, {transform_indices = @transform_5, window_bounds = array<i64: 1, 128, 768>}, {transform_indices = @transform_6, window_bounds = array<i64: 1, 8, 2304>}, {pipeline_mode = #tpu.pipeline_mode<synchronous>, transform_indices = @transform_7, window_bounds = array<i64: 16, 768>}]} {
    %c0_i32 = arith.constant 0 : i32
    %0 = arith.cmpi eq, %arg0, %c0_i32 : i32
    %1 = arith.extui %0 : i1 to i32
    %c0_i32_0 = arith.constant 0 : i32
    %2 = arith.cmpi ne, %1, %c0_i32_0 : i32
    scf.if %2 {
      %c0_69 = arith.constant 0 : index
      %c0_70 = arith.constant 0 : index
      %198 = vector.load %arg1[%c0_69, %c0_70] : memref<16x768xf32, #tpu.memory_space<vmem>>, vector<16x768xf32>
      %c0_71 = arith.constant 0 : index
      %c0_72 = arith.constant 0 : index
      %199 = vector.load %arg9[%c0_71, %c0_72] : memref<16x768xf32, #tpu.memory_space<vmem>>, vector<16x768xf32>
      tpu.vector_store %arg9[%c0_71, %c0_72], %198 {strides = array<i32>} : memref<16x768xf32, #tpu.memory_space<vmem>>, vector<16x768xf32>,
    } else {
    }
    %c0 = arith.constant 0 : index
    %c0_1 = arith.constant 0 : index
    %3 = vector.load %arg9[%c0, %c0_1] : memref<16x768xf32, #tpu.memory_space<vmem>>, vector<16x768xf32>
    %c0_2 = arith.constant 0 : index
    %c0_3 = arith.constant 0 : index
    %c0_4 = arith.constant 0 : index
    %4 = vector.load %arg7[%c0_2, %c0_3, %c0_4] : memref<1x8x2304xf32, #tpu.memory_space<vmem>>, vector<1x8x2304xf32>
    %5 = vector.shape_cast %4 : vector<1x8x2304xf32> to vector<8x2304xf32>
    %6 = vector.extract_strided_slice %5 {offsets = [0, 0], sizes = [1, 2304], strides = [1, 1]} : vector<8x2304xf32> to vector<1x2304xf32>
    %7 = vector.extract_strided_slice %5 {offsets = [1, 0], sizes = [1, 768], strides = [1, 1]} : vector<8x2304xf32> to vector<1x768xf32>
    %8 = vector.extract_strided_slice %5 {offsets = [1, 768], sizes = [1, 768], strides = [1, 1]} : vector<8x2304xf32> to vector<1x768xf32>
    %9 = vector.extract_strided_slice %5 {offsets = [1, 1536], sizes = [1, 768], strides = [1, 1]} : vector<8x2304xf32> to vector<1x768xf32>
    %10 = vector.extract_strided_slice %5 {offsets = [2, 0], sizes = [1, 768], strides = [1, 1]} : vector<8x2304xf32> to vector<1x768xf32>
    %11 = vector.extract_strided_slice %5 {offsets = [2, 768], sizes = [1, 768], strides = [1, 1]} : vector<8x2304xf32> to vector<1x768xf32>
    %12 = vector.extract_strided_slice %5 {offsets = [2, 1536], sizes = [1, 768], strides = [1, 1]} : vector<8x2304xf32> to vector<1x768xf32>
    %13 = vector.extract_strided_slice %5 {offsets = [3, 0], sizes = [1, 128], strides = [1, 1]} : vector<8x2304xf32> to vector<1x128xf32>
    %14 = vector.extract_strided_slice %5 {offsets = [4, 0], sizes = [1, 768], strides = [1, 1]} : vector<8x2304xf32> to vector<1x768xf32>
    %15 = vector.extract_strided_slice %5 {offsets = [5, 0], sizes = [1, 768], strides = [1, 1]} : vector<8x2304xf32> to vector<1x768xf32>
    %cst = arith.constant dense<0.000000e+00> : vector<16xf32>
    %16 = vector.multi_reduction <add>, %3, %cst [1] : vector<16x768xf32> to vector<16xf32>
    %17 = vector.shape_cast %16 : vector<16xf32> to vector<16x1xf32>
    %cst_5 = arith.constant 7.680000e+02 : f32
    %18 = vector.broadcast %cst_5 : f32 to vector<16x1xf32>
    %19 = arith.divf %17, %18 : vector<16x1xf32>
    %20 = vector.broadcast %19 : vector<16x1xf32> to vector<16x768xf32>
    %21 = arith.subf %3, %20 : vector<16x768xf32>
    %22 = arith.mulf %21, %21 : vector<16x768xf32>
    %cst_6 = arith.constant dense<0.000000e+00> : vector<16xf32>
    %23 = vector.multi_reduction <add>, %22, %cst_6 [1] : vector<16x768xf32> to vector<16xf32>
    %24 = vector.shape_cast %23 : vector<16xf32> to vector<16x1xf32>
    %cst_7 = arith.constant 7.680000e+02 : f32
    %25 = vector.broadcast %cst_7 : f32 to vector<16x1xf32>
    %26 = arith.divf %24, %25 : vector<16x1xf32>
    %27 = vector.broadcast %19 : vector<16x1xf32> to vector<16x768xf32>
    %28 = arith.subf %3, %27 : vector<16x768xf32>
    %cst_8 = arith.constant 9.99999974E-6 : f32
    %29 = vector.broadcast %cst_8 : f32 to vector<16x1xf32>
    %30 = arith.addf %26, %29 : vector<16x1xf32>
    %31 = math.rsqrt %30 : vector<16x1xf32>
    %32 = vector.broadcast %31 : vector<16x1xf32> to vector<16x768xf32>
    %33 = arith.mulf %28, %32 : vector<16x768xf32>
    %34 = vector.broadcast %8 : vector<1x768xf32> to vector<16x768xf32>
    %35 = arith.mulf %33, %34 : vector<16x768xf32>
    %36 = vector.broadcast %9 : vector<1x768xf32> to vector<16x768xf32>
    %37 = arith.addf %35, %36 : vector<16x768xf32>
    %38 = arith.truncf %37 : vector<16x768xf32> to vector<16x768xbf16>
    %c0_9 = arith.constant 0 : index
    %c0_10 = arith.constant 0 : index
    %c0_11 = arith.constant 0 : index
    %39 = vector.load %arg3[%c0_9, %c0_10, %c0_11] : memref<1x768x2304xbf16, #tpu.memory_space<vmem>>, vector<1x768x2304xbf16>
    %40 = vector.shape_cast %39 : vector<1x768x2304xbf16> to vector<768x2304xbf16>
    %cst_12 = arith.constant dense<0.000000e+00> : vector<16x2304xf32>
    %41 = tpu.matmul %38, %40, %cst_12 {dimension_numbers = #tpu.dot_dimension_numbers<[1], [0], [0], [1], [0, 0, 1, 1], [], []>} : vector<16x768xbf16>, vector<768x2304xbf16>, vector<16x2304xf32> -> vector<16x2304xf32>
    %42 = vector.broadcast %6 : vector<1x2304xf32> to vector<16x2304xf32>
    %43 = arith.addf %41, %42 : vector<16x2304xf32>
    %44 = vector.extract_strided_slice %43 {offsets = [0, 0], sizes = [16, 768], strides = [1, 1]} : vector<16x2304xf32> to vector<16x768xf32>
    %45 = arith.truncf %44 : vector<16x768xf32> to vector<16x768xbf16>
    %46 = vector.extract_strided_slice %43 {offsets = [0, 768], sizes = [16, 768], strides = [1, 1]} : vector<16x2304xf32> to vector<16x768xf32>
    %47 = arith.truncf %46 : vector<16x768xf32> to vector<16x768xbf16>
    %48 = vector.extract_strided_slice %43 {offsets = [0, 1536], sizes = [16, 768], strides = [1, 1]} : vector<16x2304xf32> to vector<16x768xf32>
    %49 = arith.truncf %48 : vector<16x768xf32> to vector<16x768xbf16>
    %c0_13 = arith.constant 0 : index
    %c0_14 = arith.constant 0 : index
    %50 = vector.load %arg2[%c0_13, %c0_14] : memref<16x16xf32, #tpu.memory_space<vmem>>, vector<16x16xf32>
    %51 = vector.extract_strided_slice %45 {offsets = [0, 0], sizes = [16, 192], strides = [1, 1]} : vector<16x768xbf16> to vector<16x192xbf16>
    %52 = vector.extract_strided_slice %47 {offsets = [0, 0], sizes = [16, 192], strides = [1, 1]} : vector<16x768xbf16> to vector<16x192xbf16>
    %53 = vector.extract_strided_slice %49 {offsets = [0, 0], sizes = [16, 192], strides = [1, 1]} : vector<16x768xbf16> to vector<16x192xbf16>
    %cst_15 = arith.constant dense<0.000000e+00> : vector<16x16xf32>
    %54 = tpu.matmul %51, %52, %cst_15 {dimension_numbers = #tpu.dot_dimension_numbers<[1], [1], [0], [0], [0, 0, 1, 0], [], []>} : vector<16x192xbf16>, vector<16x192xbf16>, vector<16x16xf32> -> vector<16x16xf32>
    %cst_16 = arith.constant 0.0721687824 : f32
    %55 = vector.broadcast %cst_16 : f32 to vector<16x16xf32>
    %56 = arith.mulf %54, %55 : vector<16x16xf32>
    %cst_17 = arith.constant 0.000000e+00 : f32
    %57 = vector.broadcast %cst_17 : f32 to vector<16x16xf32>
    %58 = arith.cmpf oeq, %50, %57 : vector<16x16xf32>
    %59 = arith.select %58, %56, %50 : vector<16x16xi1>, vector<16x16xf32>
    %cst_18 = arith.constant dense<0xFF800000> : vector<16xf32>
    %60 = vector.multi_reduction <maximumf>, %59, %cst_18 [1] : vector<16x16xf32> to vector<16xf32>
    %61 = vector.shape_cast %60 : vector<16xf32> to vector<16x1xf32>
    %62 = vector.broadcast %61 : vector<16x1xf32> to vector<16x16xf32>
    %63 = arith.subf %59, %62 : vector<16x16xf32>
    %64 = math.exp %63 : vector<16x16xf32>
    %cst_19 = arith.constant dense<0.000000e+00> : vector<16xf32>
    %65 = vector.multi_reduction <add>, %64, %cst_19 [1] : vector<16x16xf32> to vector<16xf32>
    %66 = vector.shape_cast %65 : vector<16xf32> to vector<16x1xf32>
    %67 = tpu.reciprocal %66 {approx = true} : vector<16x1xf32> -> vector<16x1xf32>
    %68 = vector.broadcast %67 : vector<16x1xf32> to vector<16x16xf32>
    %69 = arith.mulf %64, %68 : vector<16x16xf32>
    %70 = arith.truncf %69 : vector<16x16xf32> to vector<16x16xbf16>
    %cst_20 = arith.constant dense<0.000000e+00> : vector<16x192xf32>
    %71 = tpu.matmul %70, %53, %cst_20 {dimension_numbers = #tpu.dot_dimension_numbers<[1], [0], [0], [1], [0, 0, 1, 1], [], []>} : vector<16x16xbf16>, vector<16x192xbf16>, vector<16x192xf32> -> vector<16x192xf32>
    %72 = arith.truncf %71 : vector<16x192xf32> to vector<16x192xbf16>
    %c0_21 = arith.constant 0 : index
    %c0_22 = arith.constant 0 : index
    %c0_23 = arith.constant 0 : index
    %73 = vector.load %arg4[%c0_21, %c0_22, %c0_23] : memref<1x768x768xbf16, #tpu.memory_space<vmem>>, vector<1x192x768xbf16>
    %74 = vector.shape_cast %73 : vector<1x192x768xbf16> to vector<192x768xbf16>
    %cst_24 = arith.constant dense<0.000000e+00> : vector<16x768xf32>
    %75 = tpu.matmul %72, %74, %cst_24 {dimension_numbers = #tpu.dot_dimension_numbers<[1], [0], [0], [1], [0, 0, 1, 1], [], []>} : vector<16x192xbf16>, vector<192x768xbf16>, vector<16x768xf32> -> vector<16x768xf32>
    %76 = vector.extract_strided_slice %45 {offsets = [0, 192], sizes = [16, 192], strides = [1, 1]} : vector<16x768xbf16> to vector<16x192xbf16>
    %77 = vector.extract_strided_slice %47 {offsets = [0, 192], sizes = [16, 192], strides = [1, 1]} : vector<16x768xbf16> to vector<16x192xbf16>
    %78 = vector.extract_strided_slice %49 {offsets = [0, 192], sizes = [16, 192], strides = [1, 1]} : vector<16x768xbf16> to vector<16x192xbf16>
    %cst_25 = arith.constant dense<0.000000e+00> : vector<16x16xf32>
    %79 = tpu.matmul %76, %77, %cst_25 {dimension_numbers = #tpu.dot_dimension_numbers<[1], [1], [0], [0], [0, 0, 1, 0], [], []>} : vector<16x192xbf16>, vector<16x192xbf16>, vector<16x16xf32> -> vector<16x16xf32>
    %cst_26 = arith.constant 0.0721687824 : f32
    %80 = vector.broadcast %cst_26 : f32 to vector<16x16xf32>
    %81 = arith.mulf %79, %80 : vector<16x16xf32>
    %cst_27 = arith.constant 0.000000e+00 : f32
    %82 = vector.broadcast %cst_27 : f32 to vector<16x16xf32>
    %83 = arith.cmpf oeq, %50, %82 : vector<16x16xf32>
    %84 = arith.select %83, %81, %50 : vector<16x16xi1>, vector<16x16xf32>
    %cst_28 = arith.constant dense<0xFF800000> : vector<16xf32>
    %85 = vector.multi_reduction <maximumf>, %84, %cst_28 [1] : vector<16x16xf32> to vector<16xf32>
    %86 = vector.shape_cast %85 : vector<16xf32> to vector<16x1xf32>
    %87 = vector.broadcast %86 : vector<16x1xf32> to vector<16x16xf32>
    %88 = arith.subf %84, %87 : vector<16x16xf32>
    %89 = math.exp %88 : vector<16x16xf32>
    %cst_29 = arith.constant dense<0.000000e+00> : vector<16xf32>
    %90 = vector.multi_reduction <add>, %89, %cst_29 [1] : vector<16x16xf32> to vector<16xf32>
    %91 = vector.shape_cast %90 : vector<16xf32> to vector<16x1xf32>
    %92 = tpu.reciprocal %91 {approx = true} : vector<16x1xf32> -> vector<16x1xf32>
    %93 = vector.broadcast %92 : vector<16x1xf32> to vector<16x16xf32>
    %94 = arith.mulf %89, %93 : vector<16x16xf32>
    %95 = arith.truncf %94 : vector<16x16xf32> to vector<16x16xbf16>
    %cst_30 = arith.constant dense<0.000000e+00> : vector<16x192xf32>
    %96 = tpu.matmul %95, %78, %cst_30 {dimension_numbers = #tpu.dot_dimension_numbers<[1], [0], [0], [1], [0, 0, 1, 1], [], []>} : vector<16x16xbf16>, vector<16x192xbf16>, vector<16x192xf32> -> vector<16x192xf32>
    %97 = arith.truncf %96 : vector<16x192xf32> to vector<16x192xbf16>
    %c0_31 = arith.constant 0 : index
    %c192 = arith.constant 192 : index
    %c0_32 = arith.constant 0 : index
    %98 = vector.load %arg4[%c0_31, %c192, %c0_32] : memref<1x768x768xbf16, #tpu.memory_space<vmem>>, vector<1x192x768xbf16>
    %99 = vector.shape_cast %98 : vector<1x192x768xbf16> to vector<192x768xbf16>
    %cst_33 = arith.constant dense<0.000000e+00> : vector<16x768xf32>
    %100 = tpu.matmul %97, %99, %cst_33 {dimension_numbers = #tpu.dot_dimension_numbers<[1], [0], [0], [1], [0, 0, 1, 1], [], []>} : vector<16x192xbf16>, vector<192x768xbf16>, vector<16x768xf32> -> vector<16x768xf32>
    %101 = arith.addf %75, %100 : vector<16x768xf32>
    %102 = vector.extract_strided_slice %45 {offsets = [0, 384], sizes = [16, 192], strides = [1, 1]} : vector<16x768xbf16> to vector<16x192xbf16>
    %103 = vector.extract_strided_slice %47 {offsets = [0, 384], sizes = [16, 192], strides = [1, 1]} : vector<16x768xbf16> to vector<16x192xbf16>
    %104 = vector.extract_strided_slice %49 {offsets = [0, 384], sizes = [16, 192], strides = [1, 1]} : vector<16x768xbf16> to vector<16x192xbf16>
    %cst_34 = arith.constant dense<0.000000e+00> : vector<16x16xf32>
    %105 = tpu.matmul %102, %103, %cst_34 {dimension_numbers = #tpu.dot_dimension_numbers<[1], [1], [0], [0], [0, 0, 1, 0], [], []>} : vector<16x192xbf16>, vector<16x192xbf16>, vector<16x16xf32> -> vector<16x16xf32>
    %cst_35 = arith.constant 0.0721687824 : f32
    %106 = vector.broadcast %cst_35 : f32 to vector<16x16xf32>
    %107 = arith.mulf %105, %106 : vector<16x16xf32>
    %cst_36 = arith.constant 0.000000e+00 : f32
    %108 = vector.broadcast %cst_36 : f32 to vector<16x16xf32>
    %109 = arith.cmpf oeq, %50, %108 : vector<16x16xf32>
    %110 = arith.select %109, %107, %50 : vector<16x16xi1>, vector<16x16xf32>
    %cst_37 = arith.constant dense<0xFF800000> : vector<16xf32>
    %111 = vector.multi_reduction <maximumf>, %110, %cst_37 [1] : vector<16x16xf32> to vector<16xf32>
    %112 = vector.shape_cast %111 : vector<16xf32> to vector<16x1xf32>
    %113 = vector.broadcast %112 : vector<16x1xf32> to vector<16x16xf32>
    %114 = arith.subf %110, %113 : vector<16x16xf32>
    %115 = math.exp %114 : vector<16x16xf32>
    %cst_38 = arith.constant dense<0.000000e+00> : vector<16xf32>
    %116 = vector.multi_reduction <add>, %115, %cst_38 [1] : vector<16x16xf32> to vector<16xf32>
    %117 = vector.shape_cast %116 : vector<16xf32> to vector<16x1xf32>
    %118 = tpu.reciprocal %117 {approx = true} : vector<16x1xf32> -> vector<16x1xf32>
    %119 = vector.broadcast %118 : vector<16x1xf32> to vector<16x16xf32>
    %120 = arith.mulf %115, %119 : vector<16x16xf32>
    %121 = arith.truncf %120 : vector<16x16xf32> to vector<16x16xbf16>
    %cst_39 = arith.constant dense<0.000000e+00> : vector<16x192xf32>
    %122 = tpu.matmul %121, %104, %cst_39 {dimension_numbers = #tpu.dot_dimension_numbers<[1], [0], [0], [1], [0, 0, 1, 1], [], []>} : vector<16x16xbf16>, vector<16x192xbf16>, vector<16x192xf32> -> vector<16x192xf32>
    %123 = arith.truncf %122 : vector<16x192xf32> to vector<16x192xbf16>
    %c0_40 = arith.constant 0 : index
    %c384 = arith.constant 384 : index
    %c0_41 = arith.constant 0 : index
    %124 = vector.load %arg4[%c0_40, %c384, %c0_41] : memref<1x768x768xbf16, #tpu.memory_space<vmem>>, vector<1x192x768xbf16>
    %125 = vector.shape_cast %124 : vector<1x192x768xbf16> to vector<192x768xbf16>
    %cst_42 = arith.constant dense<0.000000e+00> : vector<16x768xf32>
    %126 = tpu.matmul %123, %125, %cst_42 {dimension_numbers = #tpu.dot_dimension_numbers<[1], [0], [0], [1], [0, 0, 1, 1], [], []>} : vector<16x192xbf16>, vector<192x768xbf16>, vector<16x768xf32> -> vector<16x768xf32>
    %127 = arith.addf %101, %126 : vector<16x768xf32>
    %128 = vector.extract_strided_slice %45 {offsets = [0, 576], sizes = [16, 192], strides = [1, 1]} : vector<16x768xbf16> to vector<16x192xbf16>
    %129 = vector.extract_strided_slice %47 {offsets = [0, 576], sizes = [16, 192], strides = [1, 1]} : vector<16x768xbf16> to vector<16x192xbf16>
    %130 = vector.extract_strided_slice %49 {offsets = [0, 576], sizes = [16, 192], strides = [1, 1]} : vector<16x768xbf16> to vector<16x192xbf16>
    %cst_43 = arith.constant dense<0.000000e+00> : vector<16x16xf32>
    %131 = tpu.matmul %128, %129, %cst_43 {dimension_numbers = #tpu.dot_dimension_numbers<[1], [1], [0], [0], [0, 0, 1, 0], [], []>} : vector<16x192xbf16>, vector<16x192xbf16>, vector<16x16xf32> -> vector<16x16xf32>
    %cst_44 = arith.constant 0.0721687824 : f32
    %132 = vector.broadcast %cst_44 : f32 to vector<16x16xf32>
    %133 = arith.mulf %131, %132 : vector<16x16xf32>
    %cst_45 = arith.constant 0.000000e+00 : f32
    %134 = vector.broadcast %cst_45 : f32 to vector<16x16xf32>
    %135 = arith.cmpf oeq, %50, %134 : vector<16x16xf32>
    %136 = arith.select %135, %133, %50 : vector<16x16xi1>, vector<16x16xf32>
    %cst_46 = arith.constant dense<0xFF800000> : vector<16xf32>
    %137 = vector.multi_reduction <maximumf>, %136, %cst_46 [1] : vector<16x16xf32> to vector<16xf32>
    %138 = vector.shape_cast %137 : vector<16xf32> to vector<16x1xf32>
    %139 = vector.broadcast %138 : vector<16x1xf32> to vector<16x16xf32>
    %140 = arith.subf %136, %139 : vector<16x16xf32>
    %141 = math.exp %140 : vector<16x16xf32>
    %cst_47 = arith.constant dense<0.000000e+00> : vector<16xf32>
    %142 = vector.multi_reduction <add>, %141, %cst_47 [1] : vector<16x16xf32> to vector<16xf32>
    %143 = vector.shape_cast %142 : vector<16xf32> to vector<16x1xf32>
    %144 = tpu.reciprocal %143 {approx = true} : vector<16x1xf32> -> vector<16x1xf32>
    %145 = vector.broadcast %144 : vector<16x1xf32> to vector<16x16xf32>
    %146 = arith.mulf %141, %145 : vector<16x16xf32>
    %147 = arith.truncf %146 : vector<16x16xf32> to vector<16x16xbf16>
    %cst_48 = arith.constant dense<0.000000e+00> : vector<16x192xf32>
    %148 = tpu.matmul %147, %130, %cst_48 {dimension_numbers = #tpu.dot_dimension_numbers<[1], [0], [0], [1], [0, 0, 1, 1], [], []>} : vector<16x16xbf16>, vector<16x192xbf16>, vector<16x192xf32> -> vector<16x192xf32>
    %149 = arith.truncf %148 : vector<16x192xf32> to vector<16x192xbf16>
    %c0_49 = arith.constant 0 : index
    %c576 = arith.constant 576 : index
    %c0_50 = arith.constant 0 : index
    %150 = vector.load %arg4[%c0_49, %c576, %c0_50] : memref<1x768x768xbf16, #tpu.memory_space<vmem>>, vector<1x192x768xbf16>
    %151 = vector.shape_cast %150 : vector<1x192x768xbf16> to vector<192x768xbf16>
    %cst_51 = arith.constant dense<0.000000e+00> : vector<16x768xf32>
    %152 = tpu.matmul %149, %151, %cst_51 {dimension_numbers = #tpu.dot_dimension_numbers<[1], [0], [0], [1], [0, 0, 1, 1], [], []>} : vector<16x192xbf16>, vector<192x768xbf16>, vector<16x768xf32> -> vector<16x768xf32>
    %153 = arith.addf %127, %152 : vector<16x768xf32>
    %154 = arith.addf %3, %153 : vector<16x768xf32>
    %155 = vector.broadcast %7 : vector<1x768xf32> to vector<16x768xf32>
    %156 = arith.addf %154, %155 : vector<16x768xf32>
    %cst_52 = arith.constant dense<0.000000e+00> : vector<16xf32>
    %157 = vector.multi_reduction <add>, %156, %cst_52 [1] : vector<16x768xf32> to vector<16xf32>
    %158 = vector.shape_cast %157 : vector<16xf32> to vector<16x1xf32>
    %cst_53 = arith.constant 7.680000e+02 : f32
    %159 = vector.broadcast %cst_53 : f32 to vector<16x1xf32>
    %160 = arith.divf %158, %159 : vector<16x1xf32>
    %161 = vector.broadcast %160 : vector<16x1xf32> to vector<16x768xf32>
    %162 = arith.subf %156, %161 : vector<16x768xf32>
    %163 = arith.mulf %162, %162 : vector<16x768xf32>
    %cst_54 = arith.constant dense<0.000000e+00> : vector<16xf32>
    %164 = vector.multi_reduction <add>, %163, %cst_54 [1] : vector<16x768xf32> to vector<16xf32>
    %165 = vector.shape_cast %164 : vector<16xf32> to vector<16x1xf32>
    %cst_55 = arith.constant 7.680000e+02 : f32
    %166 = vector.broadcast %cst_55 : f32 to vector<16x1xf32>
    %167 = arith.divf %165, %166 : vector<16x1xf32>
    %168 = vector.broadcast %160 : vector<16x1xf32> to vector<16x768xf32>
    %169 = arith.subf %156, %168 : vector<16x768xf32>
    %cst_56 = arith.constant 9.99999974E-6 : f32
    %170 = vector.broadcast %cst_56 : f32 to vector<16x1xf32>
    %171 = arith.addf %167, %170 : vector<16x1xf32>
    %172 = math.rsqrt %171 : vector<16x1xf32>
    %173 = vector.broadcast %172 : vector<16x1xf32> to vector<16x768xf32>
    %174 = arith.mulf %169, %173 : vector<16x768xf32>
    %175 = vector.broadcast %11 : vector<1x768xf32> to vector<16x768xf32>
    %176 = arith.mulf %174, %175 : vector<16x768xf32>
    %177 = vector.broadcast %12 : vector<1x768xf32> to vector<16x768xf32>
    %178 = arith.addf %176, %177 : vector<16x768xf32>
    %179 = arith.truncf %178 : vector<16x768xf32> to vector<16x768xbf16>
    %c0_57 = arith.constant 0 : index
    %c0_58 = arith.constant 0 : index
    %c0_59 = arith.constant 0 : index
    %180 = vector.load %arg5[%c0_57, %c0_58, %c0_59] : memref<1x768x128xbf16, #tpu.memory_space<vmem>>, vector<1x768x128xbf16>
    %181 = vector.shape_cast %180 : vector<1x768x128xbf16> to vector<768x128xbf16>
    %cst_60 = arith.constant dense<0.000000e+00> : vector<16x128xf32>
    %182 = tpu.matmul %179, %181, %cst_60 {dimension_numbers = #tpu.dot_dimension_numbers<[1], [0], [0], [1], [0, 0, 1, 1], [], []>} : vector<16x768xbf16>, vector<768x128xbf16>, vector<16x128xf32> -> vector<16x128xf32>
    %183 = vector.broadcast %13 : vector<1x128xf32> to vector<16x128xf32>
    %184 = arith.addf %182, %183 : vector<16x128xf32>
    %cst_61 = arith.constant 0.000000e+00 : f32
    %185 = vector.broadcast %cst_61 : f32 to vector<16x128xf32>
    %186 = arith.maximumf %184, %185 : vector<16x128xf32>
    %187 = arith.truncf %186 : vector<16x128xf32> to vector<16x128xbf16>
    %c0_62 = arith.constant 0 : index
    %c0_63 = arith.constant 0 : index
    %c0_64 = arith.constant 0 : index
    %188 = vector.load %arg6[%c0_62, %c0_63, %c0_64] : memref<1x128x768xbf16, #tpu.memory_space<vmem>>, vector<1x128x768xbf16>
    %189 = vector.shape_cast %188 : vector<1x128x768xbf16> to vector<128x768xbf16>
    %cst_65 = arith.constant dense<0.000000e+00> : vector<16x768xf32>
    %190 = tpu.matmul %187, %189, %cst_65 {dimension_numbers = #tpu.dot_dimension_numbers<[1], [0], [0], [1], [0, 0, 1, 1], [], []>} : vector<16x128xbf16>, vector<128x768xbf16>, vector<16x768xf32> -> vector<16x768xf32>
    %191 = arith.addf %156, %190 : vector<16x768xf32>
    %192 = vector.broadcast %10 : vector<1x768xf32> to vector<16x768xf32>
    %193 = arith.addf %191, %192 : vector<16x768xf32>
    %c0_66 = arith.constant 0 : index
    %c0_67 = arith.constant 0 : index
    %194 = vector.load %arg9[%c0_66, %c0_67] : memref<16x768xf32, #tpu.memory_space<vmem>>, vector<16x768xf32>
    tpu.vector_store %arg9[%c0_66, %c0_67], %193 {strides = array<i32>} : memref<16x768xf32, #tpu.memory_space<vmem>>, vector<16x768xf32>,
    %c5_i32 = arith.constant 5 : i32
    %195 = arith.cmpi eq, %arg0, %c5_i32 : i32
    %196 = arith.extui %195 : i1 to i32
    %c0_i32_68 = arith.constant 0 : i32
    %197 = arith.cmpi ne, %196, %c0_i32_68 : i32
    scf.if %197 {
      %cst_69 = arith.constant dense<0.000000e+00> : vector<16xf32>
      %198 = vector.multi_reduction <add>, %193, %cst_69 [1] : vector<16x768xf32> to vector<16xf32>
      %199 = vector.shape_cast %198 : vector<16xf32> to vector<16x1xf32>
      %cst_70 = arith.constant 7.680000e+02 : f32
      %200 = vector.broadcast %cst_70 : f32 to vector<16x1xf32>
      %201 = arith.divf %199, %200 : vector<16x1xf32>
      %202 = vector.broadcast %201 : vector<16x1xf32> to vector<16x768xf32>
      %203 = arith.subf %193, %202 : vector<16x768xf32>
      %204 = arith.mulf %203, %203 : vector<16x768xf32>
      %cst_71 = arith.constant dense<0.000000e+00> : vector<16xf32>
      %205 = vector.multi_reduction <add>, %204, %cst_71 [1] : vector<16x768xf32> to vector<16xf32>
      %206 = vector.shape_cast %205 : vector<16xf32> to vector<16x1xf32>
      %cst_72 = arith.constant 7.680000e+02 : f32
      %207 = vector.broadcast %cst_72 : f32 to vector<16x1xf32>
      %208 = arith.divf %206, %207 : vector<16x1xf32>
      %209 = vector.broadcast %201 : vector<16x1xf32> to vector<16x768xf32>
      %210 = arith.subf %193, %209 : vector<16x768xf32>
      %cst_73 = arith.constant 9.99999974E-6 : f32
      %211 = vector.broadcast %cst_73 : f32 to vector<16x1xf32>
      %212 = arith.addf %208, %211 : vector<16x1xf32>
      %213 = math.rsqrt %212 : vector<16x1xf32>
      %214 = vector.broadcast %213 : vector<16x1xf32> to vector<16x768xf32>
      %215 = arith.mulf %210, %214 : vector<16x768xf32>
      %216 = vector.broadcast %14 : vector<1x768xf32> to vector<16x768xf32>
      %217 = arith.mulf %215, %216 : vector<16x768xf32>
      %218 = vector.broadcast %15 : vector<1x768xf32> to vector<16x768xf32>
      %219 = arith.addf %217, %218 : vector<16x768xf32>
      %c0_74 = arith.constant 0 : index
      %c0_75 = arith.constant 0 : index
      %220 = vector.load %arg8[%c0_74, %c0_75] : memref<16x768xf32, #tpu.memory_space<vmem>>, vector<16x768xf32>
      tpu.vector_store %arg8[%c0_74, %c0_75], %219 {strides = array<i32>} : memref<16x768xf32, #tpu.memory_space<vmem>>, vector<16x768xf32>,
    } else {
    }
    return
  }
  func.func @transform_0(%arg0: i32) -> (i32, i32) {
    %c0_i32 = arith.constant 0 : i32
    %c0_i32_0 = arith.constant 0 : i32
    %c0_i32_1 = arith.constant 0 : i32
    return %c0_i32, %c0_i32_0 : i32, i32
  }
  func.func @transform_1(%arg0: i32) -> (i32, i32) {
    %c0_i32 = arith.constant 0 : i32
    %c0_i32_0 = arith.constant 0 : i32
    %c0_i32_1 = arith.constant 0 : i32
    return %c0_i32, %c0_i32_0 : i32, i32
  }
  func.func @transform_2(%arg0: i32) -> (i32, i32, i32) {
    %c0_i32 = arith.constant 0 : i32
    %c0_i32_0 = arith.constant 0 : i32
    %c0_i32_1 = arith.constant 0 : i32
    return %arg0, %c0_i32, %c0_i32_0 : i32, i32, i32
  }
  func.func @transform_3(%arg0: i32) -> (i32, i32, i32) {
    %c0_i32 = arith.constant 0 : i32
    %c0_i32_0 = arith.constant 0 : i32
    %c0_i32_1 = arith.constant 0 : i32
    return %arg0, %c0_i32, %c0_i32_0 : i32, i32, i32
  }
  func.func @transform_4(%arg0: i32) -> (i32, i32, i32) {
    %c0_i32 = arith.constant 0 : i32
    %c0_i32_0 = arith.constant 0 : i32
    %c0_i32_1 = arith.constant 0 : i32
    return %arg0, %c0_i32, %c0_i32_0 : i32, i32, i32
  }
  func.func @transform_5(%arg0: i32) -> (i32, i32, i32) {
    %c0_i32 = arith.constant 0 : i32
    %c0_i32_0 = arith.constant 0 : i32
    %c0_i32_1 = arith.constant 0 : i32
    return %arg0, %c0_i32, %c0_i32_0 : i32, i32, i32
  }
  func.func @transform_6(%arg0: i32) -> (i32, i32, i32) {
    %c0_i32 = arith.constant 0 : i32
    %c0_i32_0 = arith.constant 0 : i32
    %c0_i32_1 = arith.constant 0 : i32
    return %arg0, %c0_i32, %c0_i32_0 : i32, i32, i32
  }
  func.func @transform_7(%arg0: i32) -> (i32, i32) {
    %c0_i32 = arith.constant 0 : i32
    %c0_i32_0 = arith.constant 0 : i32
    %c0_i32_1 = arith.constant 0 : i32
    return %c0_i32, %c0_i32_0 : i32, i32
  }
}

</mosaic_0001>

<bundles_post_ra>
// kernel: context_attention_forward.1
= control target key start
LH: loop header
LB: loop body
LE: loop exit
PB: predicated region body
PF: predicated region fallthrough
CT: control target
= control target key end

     0   :  { %s17572_s0 = inlined_call_operand.vmem [shape: f32[16,768], index: 0, kind: input, shape index: {}]   ;;  %s17573_s1 = inlined_call_operand.vmem [shape: f32[16,16], index: 1, kind: input, shape index: {}]   ;;  %s17574_s2 = inlined_call_operand.hbm [shape: bf16[6,768,2304], index: 2, kind: input, shape index: {}]   ;;  %s17575_s3 = inlined_call_operand.hbm [shape: bf16[6,768,768], index: 3, kind: input, shape index: {}]   ;;  %s17576_s4 = inlined_call_operand.hbm [shape: bf16[6,768,128], index: 4, kind: input, shape index: {}]   ;;  %s17577_s5 = inlined_call_operand.hbm [shape: bf16[6,128,768], index: 5, kind: input, shape index: {}]   ;;  %s17578_s6 = inlined_call_operand.hbm [shape: f32[6,8,2304], index: 6, kind: input, shape index: {}]   ;;  %s17579_s7 = inlined_call_operand.hbm [shape: f32[16,768], index: 7, kind: output, shape index: {}]  }
   0x1   :  { %17587 = sst [smem:[#allocation19_spill]] %s17574_s2 }
   0x2   :  { %17588 = sst [smem:[#allocation20_spill]] %s17575_s3 }
   0x3   :  { %17589 = sst [smem:[#allocation21_spill]] %s17576_s4 }
   0x4   :  { %17590 = sst [smem:[#allocation22_spill]] %s17577_s5 }
   0x5   :  { %12 = vsyncpa [#allocation4], 0 }
   0x6   :  { %14 = vsyncpa [#allocation4 + $0x1], 0 }
   0x7   :  { %15 = vsyncpa [#allocation7], 0 }
   0x8   :  { %17 = vsyncpa [#allocation7 + $0x1], 0 }
   0x9   :  { %18 = vsyncpa [#allocation10], 0 }
   0xa   :  { %20 = vsyncpa [#allocation10 + $0x1], 0 }
   0xb   :  { %21 = vsyncpa [#allocation5], 0  ;;  %s15216_s24 = smov 0   ;;  %s15218_s25 = smov 0  }
   0xc   :  { %s15220_s26 = smov 0   ;;  %s15222_s27 = smov 0  }
   0xd LB: > { %17591 = sst [smem:[#allocation17_spill]] %s15154_s26  ;;  %s15235_s28 = sadd.s32 4294967295, %s15158_s27   ;;  %s15158_s27 = sphi %s15222_s27, %s17612_s27   ;;  %s15154_s26 = sphi %s15220_s26, %s17609_s26   ;;  %s15150_s25 = sphi %s15218_s25, %s17611_s25   ;;  %s15146_s24 = sphi %s15216_s24, %s17610_s24  }
   0xe   : > { %s15238_s29 = sadd.s32 1, %s15158_s27   ;;  %s76_s8 = sadd.s32 1, %s15154_s26 }
   0xf   : > { %s73_s30 = ssub.s32 %s15158_s27, %s15238_s29  ;;  %p83_p1 = scmp.ne.s32.totalorder %s15154_s26, %s15150_s25 }
  0x10   : > { %p74_p0 = scmp.eq.s32.totalorder %s73_s30, 0  ;;  %p84_p2 = scmp.eq.s32.totalorder %s15158_s27, 0 }
  0x11   : > { %p89_p3 = scmp.ne.s32.totalorder %s15150_s25, %s15146_s24  ;;  %p90_p5 = scmp.eq.s32.totalorder %s15235_s28, 0 }
  0x12   : > { %s15248_s9 = scalar_select %p74_p0, %s15154_s26, %s76_s8  }
  0x13   : > { %p85_p4 = por %p84_p2, %p83_p1  ;;  %p12942_p6 = scmp.lt.s32.totalorder %s15158_s27, 6 }
  0x14   : > { %17592 = sst [smem:[#allocation18_spill]] %s15248_s9  ;;  %p15252_p7 = por %p90_p5, %p89_p3 }
  0x15   : > { %s15257_s11 = sand.u32 1, %s15154_s26   ;;  %p15259_p8 = pnand %p12942_p6, %p85_p4 }
  0x16   : > { %s17593_s10 = scalar_select %p15252_p7, 1, 0 }
  0x17   : > { %s17594_s12 = scalar_select %p15259_p8, 1, 0 }
  0x18   : > { %s265_s13 = sand.u32 1, %s15158_s27   ;;  %s12900_s14 = smul.u32 2304, %s15257_s11 }
  0x19   : > { %s12901_s15 = smul.u32 36864, %s15158_s27  ;;  %s17595_s3 = sld [smem:[#allocation20_spill]] }
  0x1a   : > { %s269_s19 = scalar_lea.vmem [#allocation6], %s12900_s14  ;;  %s15275_s21 = scalar_lea.sflag [#allocation7], %s265_s13 }
  0x1b   : > { %s276_s20 = sshll.u32 %s269_s19, 4  ;;  %p15281_p10 = pneg %p15259_p8  ;;  %s15271_s20 = int_to_ptr.vmem [resolvable:$true] %s276_s20 }
  0x1f   : > { %s15269_s18 = scalar_lea.hbm %s17595_s3, %s12901_s15  ;;  %s14941_s8 = scalar_lea.hbm %s17595_s3, 221184 }
  0x20   : > { %s14936_s22 = scalar_lea.hbm %s15269_s18, 36864  ;;  %p14942_p13 = scmp.lt.u32.totalorder %s15269_s18, %s17595_s3 }
  0x21   : > { %p14937_p9 = scmp.ne.s32.totalorder %s15269_s18, %s14936_s22  ;;  %p14943_p0 = scmp.lt.u32.totalorder %s14941_s8, %s14936_s22 }
  0x22   : > { %p14945_p2 = scmp.lt.u32.totalorder %s14936_s22, %s15269_s18 }
  0x23   : > { %p14939_p11 = pnand %p15281_p10, %p14937_p9  ;;  %p14944_p1 = por %p14943_p0, %p14942_p13 }
  0x25   : > { %p14940_p12 = pneg %p14939_p11  ;;  %p14946_p3 = por %p14945_p2, %p14944_p1 }
  0x27   : > { %p14947_p4 = pnand %p14946_p3, %p14940_p12 }
  0x29   : > { %14950 = shalt.err (!%p14947_p4)
}
  0x2a   : > { %s14951_s16 = scalar_lea.vmem %s15271_s20, 36864  ;;  %s15160_s17 = smov [#allocation6]  }
  0x2b   : > { %p14952_p5 = scmp.ne.s32.totalorder %s15271_s20, %s14951_s16  ;;  %s14956_s19 = sshll.u32 %s15160_s17, 4  ;;  %s14957_s19 = int_to_ptr.vmem [resolvable:$false] %s14956_s19 }
  0x2c   : > { %s14958_s24 = scalar_lea.vmem %s14957_s19, 73728  ;;  %p14959_p11 = scmp.lt.s32.totalorder %s15271_s20, %s14957_s19 }
  0x2d   : > { %p14954_p6 = pnand %p14952_p5, %p15281_p10  ;;  %p14960_p7 = scmp.lt.s32.totalorder %s14958_s24, %s14951_s16 }
  0x2f   : > { %p14955_p9 = pneg %p14954_p6  ;;  %p14961_p13 = por %p14960_p7, %p14959_p11 }
  0x31   : > { %p14962_p0 = pnand %p14961_p13, %p14955_p9 }
  0x33   : > { %14965 = shalt.err (!%p14962_p0)
}
  0x34   : > { %s17581_s22 = smov 384   ;;  %s17582_s30 = smov 24  }
  0x35   : > { %12932 = dma.hbm_to_vmem [thread:$0]  (!%p15259_p8), %s15269_s18, 36864, %s15271_s20, %s15275_s21, %s17581_s22, %s17581_s22, %s17582_s30  }
  0x36   : > { %p11409_p7 = scmp.ge.s32.totalorder %s15158_s27, 1  ;;  %p345_p12 = scmp.lt.s32.totalorder %s15158_s27, 7 }
  0x37   : > { %s17584_s8 = smul.u32 384, %s15257_s11  ;;  %s17598_s5 = sld [smem:[#allocation22_spill]] }
  0x38   : > { %p15311_p1 = pnand %p11409_p7, %p345_p12  ;;  %s17583_s15 = smul.u32 6144, %s15158_s27 }
  0x39   : > { %s311_s18 = scalar_lea.vmem [#allocation9], %s17584_s8  ;;  %s12898_s24 = smul.u32 6912, %s15257_s11 }
  0x3a   : > { %s17597_s14 = scalar_select %p15311_p1, 1, 0 }
  0x3b   : > { %s318_s20 = sshll.u32 %s311_s18, 4  ;;  %s15330_s22 = scalar_lea.sflag [#allocation10], %s265_s13  ;;  %s15325_s20 = int_to_ptr.vmem [resolvable:$true] %s318_s20 }
  0x3d   : > { %s15321_s19 = scalar_lea.hbm %s17598_s5, %s17583_s15  ;;  %s14971_s15 = scalar_lea.hbm %s17598_s5, 36864 }
  0x3e   : > { %s14966_s30 = scalar_lea.hbm %s15321_s19, 6144  ;;  %p14972_p5 = scmp.lt.u32.totalorder %s15321_s19, %s17598_s5 }
  0x3f   : > { %p14967_p2 = scmp.ne.s32.totalorder %s15321_s19, %s14966_s30  ;;  %p14973_p6 = scmp.lt.u32.totalorder %s14971_s15, %s14966_s30 }
  0x40   : > { %p14975_p11 = scmp.lt.u32.totalorder %s14966_s30, %s15321_s19 }
  0x41   : > { %p14969_p3 = pnand %p14967_p2, %p15281_p10  ;;  %p14974_p9 = por %p14973_p6, %p14972_p5 }
  0x43   : > { %p14970_p4 = pneg %p14969_p3  ;;  %p14976_p13 = por %p14975_p11, %p14974_p9 }
  0x45   : > { %p14977_p0 = pnand %p14976_p13, %p14970_p4 }
  0x47   : > { %14980 = shalt.err (!%p14977_p0)
}
  0x48   : > { %s14981_s13 = scalar_lea.vmem %s15325_s20, 6144  ;;  %s15163_s18 = smov [#allocation9]  }
  0x49   : > { %p14982_p7 = scmp.ne.s32.totalorder %s15325_s20, %s14981_s13  ;;  %s14986_s16 = sshll.u32 %s15163_s18, 4  ;;  %s14987_s16 = int_to_ptr.vmem [resolvable:$false] %s14986_s16 }
  0x4a   : > { %s14988_s3 = scalar_lea.vmem %s14987_s16, 12288  ;;  %p14989_p3 = scmp.lt.s32.totalorder %s15325_s20, %s14987_s16 }
  0x4b   : > { %p14984_p12 = pnand %p14982_p7, %p15281_p10  ;;  %p14990_p1 = scmp.lt.s32.totalorder %s14988_s3, %s14981_s13 }
  0x4d   : > { %p14985_p2 = pneg %p14984_p12  ;;  %p14991_p5 = por %p14990_p1, %p14989_p3 }
  0x4f   : > { %p14992_p6 = pnand %p14991_p5, %p14985_p2 }
  0x51   : > { %14995 = shalt.err (!%p14992_p6)
}
  0x52   : > { %s17599_s9 = smov 24   ;;  %s17600_s30 = smov 384  }
  0x53   : > { %12938 = dma.hbm_to_vmem [thread:$0]  (!%p15259_p8), %s15321_s19, 6144, %s15325_s20, %s15330_s22, %s17600_s30, %s17600_s30, %s17599_s9  }
  0x54   : > { %s12899_s15 = smul.u32 110592, %s15158_s27  ;;  %s248_s17 = scalar_lea.vmem [#allocation3], %s12898_s24 }
  0x55   : > { %s255_s13 = sshll.u32 %s248_s17, 4  ;;  %s17601_s2 = sld [smem:[#allocation19_spill]]  ;;  %s15365_s13 = int_to_ptr.vmem [resolvable:$true] %s255_s13 }
  0x56   : > { %s245_s8 = scalar_lea.sflag [#allocation4], %s15257_s11 }
  0x5b   : > { %s15363_s3 = scalar_lea.hbm %s17601_s2, %s12899_s15  ;;  %s15001_s24 = scalar_lea.hbm %s17601_s2, 663552 }
  0x5c   : > { %s14996_s5 = scalar_lea.hbm %s15363_s3, 110592  ;;  %p15002_p11 = scmp.lt.u32.totalorder %s15363_s3, %s17601_s2 }
  0x5d   : > { %p14997_p1 = scmp.ne.s32.totalorder %s15363_s3, %s14996_s5  ;;  %p15003_p13 = scmp.lt.u32.totalorder %s15001_s24, %s14996_s5 }
  0x5e   : > { %p15005_p7 = scmp.lt.u32.totalorder %s14996_s5, %s15363_s3 }
  0x5f   : > { %p14999_p4 = pnand %p14997_p1, %p15281_p10  ;;  %p15004_p0 = por %p15003_p13, %p15002_p11 }
  0x61   : > { %p15000_p9 = pneg %p14999_p4  ;;  %p15006_p12 = por %p15005_p7, %p15004_p0 }
  0x63   : > { %p15007_p2 = pnand %p15006_p12, %p15000_p9 }
  0x65   : > { %15010 = shalt.err (!%p15007_p2)
}
  0x66   : > { %s15011_s15 = scalar_lea.vmem %s15365_s13, 110592  ;;  %s15164_s17 = smov [#allocation3]  }
  0x67   : > { %p15012_p3 = scmp.ne.s32.totalorder %s15365_s13, %s15011_s15  ;;  %s15016_s18 = sshll.u32 %s15164_s17, 4  ;;  %s15017_s18 = int_to_ptr.vmem [resolvable:$false] %s15016_s18 }
  0x68   : > { %s15018_s16 = scalar_lea.vmem %s15017_s18, 221184  ;;  %p15019_p1 = scmp.lt.s32.totalorder %s15365_s13, %s15017_s18 }
  0x69   : > { %p15014_p5 = pnand %p15012_p3, %p15281_p10  ;;  %p15020_p4 = scmp.lt.s32.totalorder %s15018_s16, %s15011_s15 }
  0x6b   : > { %p15015_p6 = pneg %p15014_p5  ;;  %p15021_p11 = por %p15020_p4, %p15019_p1 }
  0x6d   : > { %p15022_p13 = pnand %p15021_p11, %p15015_p6 }
  0x6f   : > { %15025 = shalt.err (!%p15022_p13)
}
  0x70   : > { %s15165_s5 = smov 1152   ;;  %s15166_s19 = smov 72  }
  0x71   : > { %12929 = dma.hbm_to_vmem [thread:$0]  (!%p15259_p8), %s15363_s3, 110592, %s15365_s13, %s245_s8, %s15165_s5, %s15165_s5, %s15166_s19  }
  0x72   : > { %s17602_s20 = smul.u32 6144, %s15158_s27  ;;  %s17603_s4 = sld [smem:[#allocation21_spill]] }
  0x73   : > { %s17604_s15 = smul.u32 384, %s15257_s11 }
  0x74   : > { %s12906_s16 = smul.u32 144, %s15257_s11 }
  0x75   : > { %s290_s17 = scalar_lea.vmem [#allocation8], %s17604_s15 }
  0x76   : > { %s297_s18 = sshll.u32 %s290_s17, 4  ;;  %s15400_s18 = int_to_ptr.vmem [resolvable:$true] %s297_s18 }
  0x78   : > { %s15396_s30 = scalar_lea.hbm %s17603_s4, %s17602_s20  ;;  %s15031_s3 = scalar_lea.hbm %s17603_s4, 36864 }
  0x79   : > { %s15026_s2 = scalar_lea.hbm %s15396_s30, 6144  ;;  %p15032_p12 = scmp.lt.u32.totalorder %s15396_s30, %s17603_s4 }
  0x7a   : > { %p15027_p9 = scmp.ne.s32.totalorder %s15396_s30, %s15026_s2  ;;  %p15033_p2 = scmp.lt.u32.totalorder %s15031_s3, %s15026_s2 }
  0x7b   : > { %p15035_p5 = scmp.lt.u32.totalorder %s15026_s2, %s15396_s30 }
  0x7c   : > { %p15029_p0 = pnand %p15027_p9, %p15281_p10  ;;  %p15034_p3 = por %p15033_p2, %p15032_p12 }
  0x7e   : > { %p15030_p7 = pneg %p15029_p0  ;;  %p15036_p6 = por %p15035_p5, %p15034_p3 }
  0x80   : > { %p15037_p1 = pnand %p15036_p6, %p15030_p7 }
  0x82   : > { %15040 = shalt.err (!%p15037_p1)
}
  0x83   : > { %s15041_s20 = scalar_lea.vmem %s15400_s18, 6144  ;;  %s15167_s24 = smov [#allocation8]  }
  0x84   : > { %p15042_p4 = scmp.ne.s32.totalorder %s15400_s18, %s15041_s20  ;;  %s15046_s9 = sshll.u32 %s15167_s24, 4  ;;  %s15047_s9 = int_to_ptr.vmem [resolvable:$false] %s15046_s9 }
  0x85   : > { %s15048_s15 = scalar_lea.vmem %s15047_s9, 12288  ;;  %p15049_p9 = scmp.lt.s32.totalorder %s15400_s18, %s15047_s9 }
  0x86   : > { %p15044_p11 = pnand %p15042_p4, %p15281_p10  ;;  %p15050_p0 = scmp.lt.s32.totalorder %s15048_s15, %s15041_s20 }
  0x88   : > { %p15045_p13 = pneg %p15044_p11  ;;  %p15051_p12 = por %p15050_p0, %p15049_p9 }
  0x8a   : > { %p15052_p2 = pnand %p15051_p12, %p15045_p13 }
  0x8c   : > { %15055 = shalt.err (!%p15052_p2)
}
  0x8d   : > { %s15168_s2 = smov 64   ;;  %s15169_s17 = smov 4  }
  0x8e   : > { %12935 = dma.hbm_to_vmem [thread:$0]  (!%p15259_p8), %s15396_s30, 6144, %s15400_s18, %s15275_s21, %s15168_s2, %s15168_s2, %s15169_s17  }
  0x8f   : > { %s12907_s8 = smul.u32 2304, %s15158_s27  ;;  %s332_s13 = scalar_lea.vmem [#allocation11], %s12906_s16 }
  0x90   : > { %s340_s3 = sshll.u32 %s332_s13, 4  ;;  %s15061_s4 = scalar_lea.hbm %s17578_s6, 13824  ;;  %s341_s3 = int_to_ptr.vmem [resolvable:$true] %s340_s3 }
  0x91   : > { %s338_s20 = scalar_lea.hbm %s17578_s6, %s12907_s8 }
  0x92   : > { %s15056_s24 = scalar_lea.hbm %s338_s20, 2304  ;;  %p15062_p6 = scmp.lt.u32.totalorder %s338_s20, %s17578_s6 }
  0x93   : > { %p15057_p7 = scmp.ne.s32.totalorder %s338_s20, %s15056_s24  ;;  %p15063_p1 = scmp.lt.u32.totalorder %s15061_s4, %s15056_s24 }
  0x94   : > { %p15065_p11 = scmp.lt.u32.totalorder %s15056_s24, %s338_s20 }
  0x95   : > { %p15059_p3 = pnand %p15057_p7, %p15281_p10  ;;  %p15064_p4 = por %p15063_p1, %p15062_p6 }
  0x97   : > { %p15060_p5 = pneg %p15059_p3  ;;  %p15066_p13 = por %p15065_p11, %p15064_p4 }
  0x99   : > { %p15067_p9 = pnand %p15066_p13, %p15060_p5 }
  0x9b   : > { %15070 = shalt.err (!%p15067_p9)
}
  0x9c   : > { %s15071_s27 = scalar_lea.vmem %s341_s3, 2304  ;;  %s15170_s11 = smov [#allocation11]  }
  0x9d   : > { %p15072_p0 = scmp.ne.s32.totalorder %s341_s3, %s15071_s27  ;;  %s15076_s30 = sshll.u32 %s15170_s11, 4  ;;  %s15077_s30 = int_to_ptr.vmem [resolvable:$false] %s15076_s30 }
  0x9e   : > { %s15078_s18 = scalar_lea.vmem %s15077_s30, 4608  ;;  %p15079_p7 = scmp.lt.s32.totalorder %s341_s3, %s15077_s30 }
  0x9f   : > { %p15074_p12 = pnand %p15072_p0, %p15281_p10  ;;  %p15080_p3 = scmp.lt.s32.totalorder %s15078_s18, %s15071_s27 }
  0xa1   : > { %p15075_p2 = pneg %p15074_p12  ;;  %p15081_p8 = por %p15080_p3, %p15079_p7 }
  0xa3   : > { %p15082_p1 = pnand %p15081_p8, %p15075_p2 }
  0xa5   : > { %15085 = shalt.err (!%p15082_p1)
}
  0xa6   : > { %p17605_p6 = scmp.ne.s32.totalorder %s17594_s12, 0  ;;  %p17606_p5 = scmp.ne.s32.totalorder %s17597_s14, 0 }
  0xa7   : > { %s351_s4 = sand.u32 (!%p17606_p5), 1, %s15150_s25   ;;  %p17607_p10 = scmp.ne.s32.totalorder (!%p17606_p5), %s17593_s10, 0 }
  0xa8   : > { %12941 = dma.hbm_to_vmem [thread:$0]  (!%p17605_p6), %s338_s20, 2304, %s341_s3, %s15330_s22  }
  0xa9   : > { %349 = sbr.rel (%p17606_p5) target bundleno = 5170 (0x1432), region = 48  ;;  %s352_s23 = scalar_lea.sflag (!%p17606_p5), [#allocation4], %s351_s4 }
  0xaa   : > { %s12908_s26 = smul.u32 (!%p17606_p5), 6912, %s351_s4 }
  0xac   : > { %s15447_s16 = scalar_lea.vmem (!%p17606_p5), [#allocation3], %s12908_s26 }
  0xb0   : > { %15129 = dma.done.wait (%p17607_p10), %s352_s23, 110592  }
  0xb1   : > { %15131 = vsyncadd (%p17607_p10), %s352_s23, 4294856704  ;;  %s360_s12 = sand.u32 1, %s15235_s28   ;;  %s12909_s2 = smul.u32 2304, %s351_s4 }
  0xb2   : > { %s361_s22 = scalar_lea.sflag [#allocation7], %s360_s12 }
  0xb3   : > { %s15454_s17 = scalar_lea.vmem [#allocation6], %s12909_s2 }
  0xb4   : > { %15133 = dma.done.wait (%p17607_p10), %s361_s22, 43008  }
  0xb5   : > { %15135 = vsyncadd (%p17607_p10), %s361_s22, 4294924288  ;;  %s12910_s14 = smul.u32 384, %s351_s4  ;;  %s379_s13 = scalar_lea.sflag [#allocation10], %s360_s12 }
  0xb7   : > { %s15460_s8 = scalar_lea.vmem [#allocation8], %s12910_s14  ;;  %s15462_s3 = scalar_lea.vmem [#allocation9], %s12910_s14 }
  0xb8   : > { %15137 = dma.done.wait (%p17607_p10), %s379_s13, 8448  }
  0xb9   : > { %15139 = vsyncadd (%p17607_p10), %s379_s13, 4294958848  ;;  %s12911_s5 = smul.u32 144, %s351_s4  ;;  %p11410_p8 = scmp.ne.s32.totalorder %s15235_s28, 0 }
  0xba   : > { %v442_v0 = vld [vmem:[%s17572_s0] sm:$0xff] (!%p11410_p8)  ;;  %v443_v1 = vld [vmem:[%s17572_s0 + $0x8] sm:$0xff] (!%p11410_p8)  ;;  %v444_v2 = vld [vmem:[%s17572_s0 + $0x10] sm:$0xff] (!%p11410_p8) }
  0xbb   : > { %s15468_s19 = scalar_lea.vmem [#allocation11], %s12911_s5  ;;  %441 = sbr.rel (%p11410_p8) target bundleno = 194 (0xc2), region = 72  ;;  %454 = vst [vmem:[#allocation2] sm:$0xff] (!%p11410_p8), %v442_v0  ;;  %455 = vst [vmem:[#allocation2 + $0x8] sm:$0xff] (!%p11410_p8), %v443_v1  ;;  %v445_v3 = vld [vmem:[%s17572_s0 + $0x18] sm:$0xff] (!%p11410_p8)  ;;  %v446_v4 = vld [vmem:[%s17572_s0 + $0x20] sm:$0xff] (!%p11410_p8) }
  0xbc   : > { %456 = vst [vmem:[#allocation2 + $0x10] sm:$0xff] (!%p11410_p8), %v444_v2  ;;  %v447_v5 = vld [vmem:[%s17572_s0 + $0x28] sm:$0xff] (!%p11410_p8)  ;;  %457 = vst [vmem:[#allocation2 + $0x18] sm:$0xff] (!%p11410_p8), %v445_v3  ;;  %v448_v6 = vld [vmem:[%s17572_s0 + $0x30] sm:$0xff] (!%p11410_p8) }
  0xbd   : > { %458 = vst [vmem:[#allocation2 + $0x20] sm:$0xff] (!%p11410_p8), %v446_v4  ;;  %459 = vst [vmem:[#allocation2 + $0x28] sm:$0xff] (!%p11410_p8), %v447_v5  ;;  %v449_v7 = vld [vmem:[%s17572_s0 + $0x38] sm:$0xff] (!%p11410_p8)  ;;  %v450_v8 = vld [vmem:[%s17572_s0 + $0x40] sm:$0xff] (!%p11410_p8) }
  0xbe   : > { %460 = vst [vmem:[#allocation2 + $0x30] sm:$0xff] (!%p11410_p8), %v448_v6  ;;  %461 = vst [vmem:[#allocation2 + $0x38] sm:$0xff] (!%p11410_p8), %v449_v7  ;;  %v451_v9 = vld [vmem:[%s17572_s0 + $0x48] sm:$0xff] (!%p11410_p8)  ;;  %v452_v10 = vld [vmem:[%s17572_s0 + $0x50] sm:$0xff] (!%p11410_p8) }
  0xbf   : > { %462 = vst [vmem:[#allocation2 + $0x40] sm:$0xff] (!%p11410_p8), %v450_v8  ;;  %v453_v11 = vld [vmem:[%s17572_s0 + $0x58] sm:$0xff] (!%p11410_p8)  ;;  %463 = vst [vmem:[#allocation2 + $0x48] sm:$0xff] (!%p11410_p8), %v451_v9 }
  0xc0   : > { %464 = vst [vmem:[#allocation2 + $0x50] sm:$0xff] (!%p11410_p8), %v452_v10  ;;  %465 = vst [vmem:[#allocation2 + $0x58] sm:$0xff] (!%p11410_p8), %v453_v11 }
  0xc2 PF: > { %v466_v12 = vld [vmem:[#allocation2] sm:$0xff]  ;;  %v467_v13 = vld [vmem:[#allocation2 + $0x8] sm:$0xff]  ;;  %v12994_v38 = vld [vmem:[%s15447_s16 + $0x94] ss:$72 sps:$4 sm:$0xff]   ;;  %vm7084_vm0 = vcmask 523264   ;;  %vm7138_vm2 = vcmask 130048  }
  0xc3   : > { %v468_v14 = vld [vmem:[#allocation2 + $0x10] sm:$0xff]  ;;  %v469_v15 = vld [vmem:[#allocation2 + $0x18] sm:$0xff]  ;;  %v496_v16 = vadd.f32 %v467_v13, %v466_v12  ;;  %v12988_v34 = vld [vmem:[%s15447_s16 + $0x4] ss:$72 sps:$4 sm:$0xff]   ;;  %s15171_s18 = smov 64   ;;  %p12683_p4 = scmp.ne.s32.totalorder %s15235_s28, 5 }
  0xc4   : > { %v470_v20 = vld [vmem:[#allocation2 + $0x20] sm:$0xff]  ;;  %v471_v24 = vld [vmem:[#allocation2 + $0x28] sm:$0xff]  ;;  %5903 = vmatprep.subr.bf16.mxu0 %v12988_v34  ;;  %v12998_v40 = vld [vmem:[%s15447_s16 + $0x90] ss:$72 sps:$4 sm:$0xff]  }
  0xc5   : > { %v472_v17 = vld [vmem:[#allocation2 + $0x30] sm:$0xff]  ;;  %v473_v18 = vld [vmem:[#allocation2 + $0x38] sm:$0xff]  ;;  %v497_v21 = vadd.f32 %v496_v16, %v468_v14  ;;  %v12992_v36 = vld [vmem:[%s15447_s16] ss:$72 sps:$4 sm:$0xff]  }
  0xc6   : > { %v474_v19 = vld [vmem:[#allocation2 + $0x40] sm:$0xff]  ;;  %v475_v22 = vld [vmem:[#allocation2 + $0x48] sm:$0xff]  ;;  %v503_v23 = vadd.f32 %v473_v18, %v472_v17  ;;  %5904 = vmatpush1.bf16.msra.mxu0 %v12992_v36  ;;  %v13006_v46 = vld [vmem:[%s15447_s16 + $0x1b4] ss:$72 sps:$4 sm:$0xff]  }
  0xc7   : > { %v476_v25 = vld [vmem:[#allocation2 + $0x50] sm:$0xff]  ;;  %v498_v26 = vadd.f32 %v497_v21, %v469_v15  ;;  %v477_v28 = vld [vmem:[#allocation2 + $0x58] sm:$0xff]  ;;  %5905 = vmatprep.subr.bf16.mxu0 %v12994_v38  ;;  %v13000_v42 = vld [vmem:[%s15447_s16 + $0x124] ss:$72 sps:$4 sm:$0xff]  }
  0xc8   : > { %v504_v27 = vadd.f32 %v503_v23, %v474_v19  ;;  %v12990_v35 = vld [vmem:[%s15447_s16 + $0x90c] ss:$72 sps:$4 sm:$0xff]   ;;  %v12993_v37 = vld [vmem:[%s15447_s16 + $0x908] ss:$72 sps:$4 sm:$0xff]   ;;  %v12996_v39 = vld [vmem:[%s15447_s16 + $0x99c] ss:$72 sps:$4 sm:$0xff]  }
  0xc9   : > { %v499_v29 = vadd.f32 %v498_v26, %v470_v20  ;;  %6075 = vmatprep.subr.bf16.mxu1 %v12990_v35  ;;  %v12999_v41 = vld [vmem:[%s15447_s16 + $0x998] ss:$72 sps:$4 sm:$0xff]   ;;  %v13002_v43 = vld [vmem:[%s15447_s16 + $0xa2c] ss:$72 sps:$4 sm:$0xff]   ;;  %v13005_v45 = vld [vmem:[%s15447_s16 + $0xa28] ss:$72 sps:$4 sm:$0xff]  }
  0xca   : > { %v505_v30 = vadd.f32 %v504_v27, %v475_v22  ;;  %6076 = vmatpush1.bf16.msra.mxu1 %v12993_v37  ;;  %5906 = vmatpush1.bf16.msra.mxu0 %v12998_v40  ;;  %v13004_v44 = vld [vmem:[%s15447_s16 + $0x120] ss:$72 sps:$4 sm:$0xff]   ;;  %v13008_v47 = vld [vmem:[%s15447_s16 + $0xabc] ss:$72 sps:$4 sm:$0xff]   ;;  %v13010_v48 = vld [vmem:[%s15447_s16 + $0x1b0] ss:$72 sps:$4 sm:$0xff]  }
  0xcb   : > { %v500_v31 = vadd.f32 %v499_v29, %v471_v24  ;;  %6077 = vmatprep.subr.bf16.mxu1 %v12996_v39  ;;  %5907 = vmatprep.subr.bf16.mxu0 %v13000_v42  ;;  %v13011_v49 = vld [vmem:[%s15447_s16 + $0xab8] ss:$72 sps:$4 sm:$0xff]   ;;  %v13012_v50 = vld [vmem:[%s15447_s16 + $0x244] ss:$72 sps:$4 sm:$0xff]   ;;  %v13017_v53 = vld [vmem:[%s15447_s16 + $0xb48] ss:$72 sps:$4 sm:$0xff]  }
  0xcc   : > { %v506_v32 = vadd.f32 %v505_v30, %v476_v25  ;;  %v13014_v51 = vld [vmem:[%s15447_s16 + $0xb4c] ss:$72 sps:$4 sm:$0xff]   ;;  %v13016_v52 = vld [vmem:[%s15447_s16 + $0x240] ss:$72 sps:$4 sm:$0xff]   ;;  %v13020_v55 = vld [vmem:[%s15447_s16 + $0xbdc] ss:$72 sps:$4 sm:$0xff]  }
  0xcd   : > { %501 = vadd.xlane.f32.xlu0 %v500_v31  ;;  %v13018_v54 = vld [vmem:[%s15447_s16 + $0x2d4] ss:$72 sps:$4 sm:$0xff]   ;;  %v13022_v56 = vld [vmem:[%s15447_s16 + $0x2d0] ss:$72 sps:$4 sm:$0xff]   ;;  %v13024_v58 = vld [vmem:[%s15447_s16 + $0x364] ss:$72 sps:$4 sm:$0xff]  }
  0xce   : > { %v507_v33 = vadd.f32 %v506_v32, %v477_v28  ;;  %6078 = vmatpush1.bf16.msra.mxu1 %v12999_v41  ;;  %5908 = vmatpush1.bf16.msra.mxu0 %v13004_v44  ;;  %v13023_v57 = vld [vmem:[%s15447_s16 + $0xbd8] ss:$72 sps:$4 sm:$0xff]   ;;  %v13026_v59 = vld [vmem:[%s15447_s16 + $0xc6c] ss:$72 sps:$4 sm:$0xff]   ;;  %v13029_v61 = vld [vmem:[%s15447_s16 + $0xc68] ss:$72 sps:$4 sm:$0xff]  }
  0xcf   : > { %6079 = vmatprep.subr.bf16.mxu1 %v13002_v43  ;;  %5909 = vmatprep.subr.bf16.mxu0 %v13006_v46  ;;  %v13028_v60 = vld [vmem:[%s15447_s16 + $0x360] ss:$72 sps:$4 sm:$0xff]   ;;  %v13030_v62 = vld [vmem:[%s15447_s16 + $0x3f4] ss:$72 sps:$4 sm:$0xff]   ;;  %v13034_v0 = vld [vmem:[%s15447_s16 + $0x3f0] ss:$72 sps:$4 sm:$0xff]  }
  0xd0   : > { %v13032_v63 = vld [vmem:[%s15447_s16 + $0xcfc] ss:$72 sps:$4 sm:$0xff]   ;;  %v13035_v1 = vld [vmem:[%s15447_s16 + $0xcf8] ss:$72 sps:$4 sm:$0xff]   ;;  %v13038_v3 = vld [vmem:[%s15447_s16 + $0xd8c] ss:$72 sps:$4 sm:$0xff]  }
  0xd1   : > { %508 = vadd.xlane.f32.xlu0 %v507_v33  ;;  %v13036_v2 = vld [vmem:[%s15447_s16 + $0x484] ss:$72 sps:$4 sm:$0xff]   ;;  %v13040_v4 = vld [vmem:[%s15447_s16 + $0x480] ss:$72 sps:$4 sm:$0xff]   ;;  %v13042_v6 = vld [vmem:[%s15447_s16 + $0x514] ss:$72 sps:$4 sm:$0xff]  }
  0xd2   : > { %6080 = vmatpush1.bf16.msra.mxu1 %v13005_v45  ;;  %5910 = vmatpush1.bf16.msra.mxu0 %v13010_v48  ;;  %v13041_v5 = vld [vmem:[%s15447_s16 + $0xd88] ss:$72 sps:$4 sm:$0xff]   ;;  %v13044_v7 = vld [vmem:[%s15447_s16 + $0xe1c] ss:$72 sps:$4 sm:$0xff]  }
  0xd3   : > { %6081 = vmatprep.subr.bf16.mxu1 %v13008_v47  ;;  %5911 = vmatprep.subr.bf16.mxu0 %v13012_v50  ;;  %v14876_v10 = vld [vmem:[#allocation2] sm:$0xff]  ;;  %v14877_v12 = vld [vmem:[#allocation2 + $0x8] sm:$0xff]  ;;  %v14878_v14 = vld [vmem:[#allocation2 + $0x10] sm:$0xff] }
  0xd4   : > { %v14879_v17 = vld [vmem:[#allocation2 + $0x18] sm:$0xff]  ;;  %v14880_v22 = vld [vmem:[#allocation2 + $0x20] sm:$0xff]  ;;  %v14881_v26 = vld [vmem:[#allocation2 + $0x30] sm:$0xff] }
  0xd5   : > { %v14882_v28 = vld [vmem:[#allocation2 + $0x38] sm:$0xff]  ;;  %v14883_v30 = vld [vmem:[#allocation2 + $0x40] sm:$0xff]  ;;  %v14884_v32 = vld [vmem:[#allocation2 + $0x28] sm:$0xff] }
  0xd6   : > { %6082 = vmatpush1.bf16.msra.mxu1 %v13011_v49  ;;  %5912 = vmatpush1.bf16.msra.mxu0 %v13016_v52  ;;  %v14885_v36 = vld [vmem:[#allocation2 + $0x48] sm:$0xff]  ;;  %v14886_v42 = vld [vmem:[#allocation2 + $0x50] sm:$0xff]  ;;  %v14887_v48 = vld [vmem:[#allocation2 + $0x58] sm:$0xff] }
  0xd7   : > { %6083 = vmatprep.subr.bf16.mxu1 %v13014_v51  ;;  %5913 = vmatprep.subr.bf16.mxu0 %v13018_v54 }
  0xda   : > { %6084 = vmatpush1.bf16.msra.mxu1 %v13017_v53  ;;  %5914 = vmatpush1.bf16.msra.mxu0 %v13022_v56 }
  0xdb   : > { %6085 = vmatprep.subr.bf16.mxu1 %v13020_v55  ;;  %5915 = vmatprep.subr.bf16.mxu0 %v13024_v58  ;;  %v13046_v58 = vld [vmem:[%s15447_s16 + $0x510] ss:$72 sps:$4 sm:$0xff]  }
  0xde   : > { %6086 = vmatpush1.bf16.msra.mxu1 %v13023_v57  ;;  %5916 = vmatpush1.bf16.msra.mxu0 %v13028_v60  ;;  %v13048_v60 = vld [vmem:[%s15447_s16 + $0x5a4] ss:$72 sps:$4 sm:$0xff]  }
  0xdf   : > { %6087 = vmatprep.subr.bf16.mxu1 %v13026_v59  ;;  %5917 = vmatprep.subr.bf16.mxu0 %v13030_v62  ;;  %v13047_v59 = vld [vmem:[%s15447_s16 + $0xe18] ss:$72 sps:$4 sm:$0xff]  }
  0xe0   : > { %v13052_v62 = vld [vmem:[%s15447_s16 + $0x5a0] ss:$72 sps:$4 sm:$0xff]  }
  0xe2   : > { %6088 = vmatpush1.bf16.msra.mxu1 %v13029_v61  ;;  %5918 = vmatpush1.bf16.msra.mxu0 %v13034_v0  ;;  %v13050_v61 = vld [vmem:[%s15447_s16 + $0xeac] ss:$72 sps:$4 sm:$0xff]  }
  0xe3   : > { %6089 = vmatprep.subr.bf16.mxu1 %v13032_v63  ;;  %5919 = vmatprep.subr.bf16.mxu0 %v13036_v2  ;;  %v13053_v63 = vld [vmem:[%s15447_s16 + $0xea8] ss:$72 sps:$4 sm:$0xff]   ;;  %v13054_v0 = vld [vmem:[%s15447_s16 + $0x634] ss:$72 sps:$4 sm:$0xff]  }
  0xe4   : > { %v13058_v2 = vld [vmem:[%s15447_s16 + $0x630] ss:$72 sps:$4 sm:$0xff]  }
  0xe6   : > { %6090 = vmatpush1.bf16.msra.mxu1 %v13035_v1  ;;  %5920 = vmatpush1.bf16.msra.mxu0 %v13040_v4  ;;  %v13056_v1 = vld [vmem:[%s15447_s16 + $0xf3c] ss:$72 sps:$4 sm:$0xff]  }
  0xe7   : > { %6091 = vmatprep.subr.bf16.mxu1 %v13038_v3  ;;  %5921 = vmatprep.subr.bf16.mxu0 %v13042_v6  ;;  %v13059_v3 = vld [vmem:[%s15447_s16 + $0xf38] ss:$72 sps:$4 sm:$0xff]   ;;  %v13060_v4 = vld [vmem:[%s15447_s16 + $0x6c4] ss:$72 sps:$4 sm:$0xff]  }
  0xe8   : > { %v13064_v6 = vld [vmem:[%s15447_s16 + $0x6c0] ss:$72 sps:$4 sm:$0xff]  }
  0xea   : > { %6092 = vmatpush1.bf16.msra.mxu1 %v13041_v5  ;;  %5922 = vmatpush1.bf16.msra.mxu0 %v13046_v58  ;;  %v13062_v5 = vld [vmem:[%s15447_s16 + $0xfcc] ss:$72 sps:$4 sm:$0xff]  }
  0xeb   : > { %6093 = vmatprep.subr.bf16.mxu1 %v13044_v7  ;;  %5923 = vmatprep.subr.bf16.mxu0 %v13048_v60  ;;  %v13065_v7 = vld [vmem:[%s15447_s16 + $0xfc8] ss:$72 sps:$4 sm:$0xff]  }
  0xec   : > { %v495_v58 = vld [vmem:[%s15468_s19 + $0x88] sm:$0xff] }
  0xee   : > { %6094 = vmatpush1.bf16.msra.mxu1 %v13047_v59  ;;  %5924 = vmatpush1.bf16.msra.mxu0 %v13052_v62 }
  0xef   : > { %6095 = vmatprep.subr.bf16.mxu1 %v13050_v61  ;;  %5925 = vmatprep.subr.bf16.mxu0 %v13054_v0 }
  0xf2   : > { %6096 = vmatpush1.bf16.msra.mxu1 %v13053_v63  ;;  %5926 = vmatpush1.bf16.msra.mxu0 %v13058_v2  ;;  %v494_v63 = vld [vmem:[%s15468_s19 + $0x80] sm:$0xff] }
  0xf3   : > { %6097 = vmatprep.subr.bf16.mxu1 %v13056_v1  ;;  %5927 = vmatprep.subr.bf16.mxu0 %v13060_v4 }
  0xf6   : > { %6098 = vmatpush1.bf16.msra.mxu1 %v13059_v3  ;;  %5928 = vmatpush1.bf16.msra.mxu0 %v13064_v6 }
  0xf7   : > { %6099 = vmatprep.subr.bf16.mxu1 %v13062_v5 }
  0xfa   : > { %6100 = vmatpush1.bf16.msra.mxu1 %v13065_v7 }
 0x15a   : > { %v502_v8 = vpop.xlane.xlu0 %501 }
 0x15b   : > { %v511_v9 = vmul.f32 0.0013020834, %v502_v8  ;;  %v13066_v8 = vld [vmem:[%s15447_s16 + $0x754] ss:$72 sps:$4 sm:$0xff]  }
 0x15c   : > { %5929 = vmatprep.subr.bf16.mxu0 %v13066_v8 }
 0x15d   : > { %v15545_v11 = vsub.f32 %v14876_v10, %v511_v9  ;;  %v15547_v13 = vsub.f32 %v14877_v12, %v511_v9  ;;  %v15549_v15 = vsub.f32 %v14878_v14, %v511_v9  ;;  %v15551_v18 = vsub.f32 %v14879_v17, %v511_v9  ;;  %v13070_v10 = vld [vmem:[%s15447_s16 + $0x750] ss:$72 sps:$4 sm:$0xff]   ;;  %v13072_v14 = vld [vmem:[%s15447_s16 + $0x7e4] ss:$72 sps:$4 sm:$0xff]   ;;  %v13076_v17 = vld [vmem:[%s15447_s16 + $0x7e0] ss:$72 sps:$4 sm:$0xff]  }
 0x15e   : > { %v509_v16 = vpop.xlane.xlu0 %508  ;;  %v15557_v23 = vsub.f32 %v14880_v22, %v511_v9  ;;  %v15567_v33 = vsub.f32 %v14884_v32, %v511_v9  ;;  %v13068_v9 = vld [vmem:[%s15447_s16 + $0x105c] ss:$72 sps:$4 sm:$0xff]   ;;  %v13071_v12 = vld [vmem:[%s15447_s16 + $0x1058] ss:$72 sps:$4 sm:$0xff]   ;;  %5930 = vmatpush1.bf16.msra.mxu0 %v13070_v10  ;;  %v569_v32 = vlaneseq }
 0x15f   : > { %v512_v19 = vmul.f32 0.0013020834, %v509_v16  ;;  %v525_v20 = vmul.f32 %v15545_v11, %v15545_v11  ;;  %v526_v21 = vmul.f32 %v15547_v13, %v15547_v13  ;;  %v527_v24 = vmul.f32 %v15549_v15, %v15549_v15  ;;  %v13074_v16 = vld [vmem:[%s15447_s16 + $0x10ec] ss:$72 sps:$4 sm:$0xff]   ;;  %6101 = vmatprep.subr.bf16.mxu1 %v13068_v9  ;;  %5931 = vmatprep.subr.bf16.mxu0 %v13072_v14  ;;  %v13082_v22 = vld [vmem:[%s15447_s16 + $0x870] ss:$72 sps:$4 sm:$0xff]  }
 0x160   : > { %v528_v34 = vmul.f32 %v15551_v18, %v15551_v18  ;;  %v529_v40 = vmul.f32 %v15557_v23, %v15557_v23  ;;  %v530_v46 = vmul.f32 %v15567_v33, %v15567_v33  ;;  %6102 = vmatpush1.bf16.msra.mxu1 %v13071_v12 }
 0x161   : > { %v537_v25 = vadd.f32 %v526_v21, %v525_v20  ;;  %v15561_v27 = vsub.f32 %v14881_v26, %v512_v19  ;;  %v15563_v29 = vsub.f32 %v14882_v28, %v512_v19  ;;  %v15565_v31 = vsub.f32 %v14883_v30, %v512_v19  ;;  %6103 = vmatprep.subr.bf16.mxu1 %v13074_v16  ;;  %v13078_v20 = vld [vmem:[%s15447_s16 + $0x874] ss:$72 sps:$4 sm:$0xff]  }
 0x162   : > { %v15571_v37 = vsub.f32 %v14885_v36, %v512_v19  ;;  %v15579_v43 = vsub.f32 %v14886_v42, %v512_v19  ;;  %v15585_v49 = vsub.f32 %v14887_v48, %v512_v19  ;;  %v13077_v19 = vld [vmem:[%s15447_s16 + $0x10e8] ss:$72 sps:$4 sm:$0xff]   ;;  %v13080_v21 = vld [vmem:[%s15447_s16 + $0x117c] ss:$72 sps:$4 sm:$0xff]   ;;  %5932 = vmatpush1.bf16.msra.mxu0 %v13076_v17  ;;  %v13089_v26 = vld [vmem:[%s15447_s16 + $0x120c] ss:$72 sps:$4 sm:$0xff]  }
 0x163   : > { %v538_v35 = vadd.f32 %v537_v25, %v527_v24  ;;  %v531_v38 = vmul.f32 %v15561_v27, %v15561_v27  ;;  %v532_v39 = vmul.f32 %v15563_v29, %v15563_v29  ;;  %v533_v44 = vmul.f32 %v15565_v31, %v15565_v31  ;;  %v13083_v24 = vld [vmem:[%s15447_s16 + $0x1178] ss:$72 sps:$4 sm:$0xff]   ;;  %5933 = vmatprep.subr.bf16.mxu0 %v13078_v20  ;;  %v13086_v25 = vld [vmem:[%s15447_s16 + $0x904] ss:$72 sps:$4 sm:$0xff]  }
 0x164   : > { %v534_v50 = vmul.f32 %v15571_v37, %v15571_v37  ;;  %v535_v53 = vmul.f32 %v15579_v43, %v15579_v43  ;;  %v536_v55 = vmul.f32 %v15585_v49, %v15585_v49  ;;  %6104 = vmatpush1.bf16.msra.mxu1 %v13077_v19  ;;  %v487_v42 = vld [vmem:[%s15468_s19 + $0x48] sm:$0xff] }
 0x165   : > { %v539_v41 = vadd.f32 %v538_v35, %v528_v34  ;;  %v544_v45 = vadd.f32 %v532_v39, %v531_v38  ;;  %6105 = vmatprep.subr.bf16.mxu1 %v13080_v21  ;;  %v15621_v38 = vshrl.u32 %v569_v32, 7  ;;  %v491_v48 = vld [vmem:[%s15468_s19 + $0x68] sm:$0xff] }
 0x166   : > { %5934 = vmatpush1.bf16.msra.mxu0 %v13082_v22 }
 0x167   : > { %v540_v47 = vadd.f32 %v539_v41, %v529_v40  ;;  %v545_v51 = vadd.f32 %v544_v45, %v533_v44  ;;  %5946 = vmatprep.subr.bf16.mxu0 %v13086_v25  ;;  %v485_v40 = vld [vmem:[%s15468_s19 + $0x38] sm:$0xff]  ;;  %v15625_v41 = vsub.s32 1, %v15621_v38  ;;  %v484_v44 = vld [vmem:[%s15468_s19 + $0x30] sm:$0xff]  ;;  %v486_v45 = vld [vmem:[%s15468_s19 + $0x40] sm:$0xff] }
 0x168   : > { %6106 = vmatpush1.bf16.msra.mxu1 %v13083_v24 }
 0x169   : > { %v541_v52 = vadd.f32 %v540_v47, %v530_v46  ;;  %v546_v54 = vadd.f32 %v545_v51, %v534_v50  ;;  %6118 = vmatprep.subr.bf16.mxu1 %v13089_v26  ;;  %v489_v46 = vld [vmem:[%s15468_s19 + $0x58] sm:$0xff]  ;;  %v488_v47 = vld [vmem:[%s15468_s19 + $0x50] sm:$0xff]  ;;  %v576_v51 = vrot.slane %v485_v40, %v15625_v41  ;;  %v612_v5 = vrot.slane %v491_v48, %v15625_v41 }
 0x16a   : > { %v493_v50 = vld [vmem:[%s15468_s19 + $0x78] sm:$0xff]  ;;  %v592_v1 = vrot.slane %v489_v46, %v15625_v41  ;;  %v588_v3 = vrot.slane %v488_v47, %v15625_v41  ;;  %v628_v7 = vrot.slane %v495_v58, %v15625_v41 }
 0x16b   : > { %542 = vadd.xlane.f32.xlu1 %v541_v52  ;;  %v547_v56 = vadd.f32 %v546_v54, %v535_v53  ;;  %v584_v53 = vrot.slane %v487_v42, %v15625_v41  ;;  %v490_v54 = vld [vmem:[%s15468_s19 + $0x60] sm:$0xff] }
 0x16c   : > { %v13099_v58 = vld [vmem:[%s15447_s16 + $0x1328] ss:$72 sps:$4 sm:$0xff]  }
 0x16d   : > { %v548_v57 = vadd.f32 %v547_v56, %v536_v55  ;;  %v572_v55 = vrot.slane %v484_v44, %v15625_v41  ;;  %v492_v56 = vld [vmem:[%s15468_s19 + $0x70] sm:$0xff] }
 0x16e   : > { %v13092_v44 = vld [vmem:[%s15447_s16 + $0x994] ss:$72 sps:$4 sm:$0xff]  }
 0x16f   : > { %549 = vadd.xlane.f32.xlu1 %v548_v57  ;;  %v580_v57 = vrot.slane %v486_v45, %v15625_v41  ;;  %v13095_v45 = vld [vmem:[%s15447_s16 + $0x129c] ss:$72 sps:$4 sm:$0xff]  }
 0x1f8   : > { %v543_v28 = vpop.xlane.xlu1 %542 }
 0x1f9   : > { %v551_v30 = vmul.f32 0.0013020834, %v543_v28  ;;  %v13084_v28 = vld [vmem:[%s15447_s16 + $0x900] ss:$72 sps:$4 sm:$0xff]  }
 0x1fb   : > { %v553_v34 = vadd.f32 1e-05, %v551_v30 }
 0x1fc   : > { %v550_v35 = vpop.xlane.xlu1 %549 }
 0x1fd   : > { %14836 = vrsqrt.f32 %v553_v34  ;;  %v552_v36 = vmul.f32 0.0013020834, %v550_v35 }
 0x1ff   : > { %v554_v39 = vadd.f32 1e-05, %v552_v36 }
 0x201   : > { %14838 = vrsqrt.f32 %v554_v39 }
 0x207   : > { %v14837_v52 = vpop.eup %14836 }
 0x208   : > { %v558_v59 = vmul.f32 %v14837_v52, %v15547_v13  ;;  %v560_v60 = vmul.f32 %v14837_v52, %v15551_v18  ;;  %v557_v61 = vmul.f32 %v14837_v52, %v15545_v11  ;;  %v559_v62 = vmul.f32 %v14837_v52, %v15549_v15 }
 0x209   : > { %v562_v0 = vmul.f32 %v14837_v52, %v15567_v33  ;;  %v561_v2 = vmul.f32 %v14837_v52, %v15557_v23  ;;  %v620_v13 = vrot.slane %v493_v50, %v15625_v41  ;;  %v608_v18 = vrot.slane %v490_v54, %v15625_v41  ;;  %v13090_v52 = vld [vmem:[%s15447_s16 + $0x990] ss:$72 sps:$4 sm:$0xff]   ;;  %v13098_v54 = vld [vmem:[%s15447_s16 + $0xa24] ss:$72 sps:$4 sm:$0xff]  }
 0x20a   : > { %v594_v4 = vmul.f32 %v576_v51, %v558_v59  ;;  %v596_v11 = vmul.f32 %v584_v53, %v560_v60  ;;  %v616_v15 = vrot.slane %v492_v56, %v15625_v41  ;;  %v624_v33 = vrot.slane %v494_v63, %v15625_v41  ;;  %v13101_v56 = vld [vmem:[%s15447_s16 + $0x132c] ss:$72 sps:$4 sm:$0xff]   ;;  %v13107_v60 = vld [vmem:[%s15447_s16 + $0x13bc] ss:$72 sps:$4 sm:$0xff]  }
 0x20b   : > { %v14839_v6 = vpop.eup %14838  ;;  %v593_v9 = vmul.f32 %v572_v55, %v557_v61  ;;  %v595_v10 = vmul.f32 %v580_v57, %v559_v62  ;;  %v598_v16 = vmul.f32 %v592_v1, %v562_v0  ;;  %v597_v17 = vmul.f32 %v588_v3, %v561_v2  ;;  %v13104_v59 = vld [vmem:[%s15447_s16 + $0xab4] ss:$72 sps:$4 sm:$0xff]   ;;  %v13102_v61 = vld [vmem:[%s15447_s16 + $0xab0] ss:$72 sps:$4 sm:$0xff]   ;;  %v13110_v63 = vld [vmem:[%s15447_s16 + $0xb44] ss:$72 sps:$4 sm:$0xff]  }
 0x20c   : > { %v564_v8 = vmul.f32 %v14839_v6, %v15563_v29  ;;  %v566_v23 = vmul.f32 %v14839_v6, %v15571_v37  ;;  %v563_v12 = vmul.f32 %v14839_v6, %v15561_v27  ;;  %v565_v14 = vmul.f32 %v14839_v6, %v15565_v31  ;;  %v13087_v27 = vld [vmem:[%s15447_s16 + $0x1208] ss:$72 sps:$4 sm:$0xff]   ;;  %v13105_v62 = vld [vmem:[%s15447_s16 + $0x13b8] ss:$72 sps:$4 sm:$0xff]   ;;  %v13113_v0 = vld [vmem:[%s15447_s16 + $0x144c] ss:$72 sps:$4 sm:$0xff]  }
 0x20d   : > { %v630_v20 = vadd.f32 %v612_v5, %v594_v4  ;;  %v568_v22 = vmul.f32 %v14839_v6, %v15585_v49  ;;  %v632_v24 = vadd.f32 %v620_v13, %v596_v11  ;;  %v567_v37 = vmul.f32 %v14839_v6, %v15579_v43  ;;  %v13111_v2 = vld [vmem:[%s15447_s16 + $0x1448] ss:$72 sps:$4 sm:$0xff]   ;;  %v13119_v4 = vld [vmem:[%s15447_s16 + $0x14dc] ss:$72 sps:$4 sm:$0xff]   ;;  %v13125_v6 = vld [vmem:[%s15447_s16 + $0x156c] ss:$72 sps:$4 sm:$0xff]  }
 0x20e   : > { %v600_v19 = vmul.f32 %v576_v51, %v564_v8  ;;  %v602_v21 = vmul.f32 %v584_v53, %v566_v23  ;;  %v599_v25 = vmul.f32 %v572_v55, %v563_v12  ;;  %v601_v29 = vmul.f32 %v580_v57, %v565_v14  ;;  %v13093_v53 = vld [vmem:[%s15447_s16 + $0x1298] ss:$72 sps:$4 sm:$0xff]   ;;  %v13135_v14 = vld [vmem:[%s15447_s16 + $0x1688] ss:$72 sps:$4 sm:$0xff]  }
 0x20f   : > { %v629_v32 = vadd.f32 %v608_v18, %v593_v9  ;;  %v604_v31 = vmul.f32 %v592_v1, %v568_v22  ;;  %v631_v35 = vadd.f32 %v616_v15, %v595_v10  ;;  %v603_v39 = vmul.f32 %v588_v3, %v567_v37  ;;  %v13096_v57 = vld [vmem:[%s15447_s16 + $0xa20] ss:$72 sps:$4 sm:$0xff]   ;;  %v13116_v3 = vld [vmem:[%s15447_s16 + $0xbd4] ss:$72 sps:$4 sm:$0xff]   ;;  %v13126_v8 = vld [vmem:[%s15447_s16 + $0xcf0] ss:$72 sps:$4 sm:$0xff]  }
 0x210   : > { %v636_v26 = vadd.f32 %v612_v5, %v600_v19  ;;  %v638_v30 = vadd.f32 %v620_v13, %v602_v21  ;;  %v635_v34 = vadd.f32 %v608_v18, %v599_v25  ;;  %v637_v36 = vadd.f32 %v616_v15, %v601_v29  ;;  %v13108_v1 = vld [vmem:[%s15447_s16 + $0xb40] ss:$72 sps:$4 sm:$0xff]   ;;  %v13114_v5 = vld [vmem:[%s15447_s16 + $0xbd0] ss:$72 sps:$4 sm:$0xff]   ;;  %v13122_v18 = vld [vmem:[%s15447_s16 + $0xc64] ss:$72 sps:$4 sm:$0xff]  }
 0x211   : > { %v634_v42 = vadd.f32 %v628_v7, %v598_v16  ;;  %v640_v43 = vadd.f32 %v628_v7, %v604_v31  ;;  %v633_v48 = vadd.f32 %v624_v33, %v597_v17  ;;  %v639_v50 = vadd.f32 %v624_v33, %v603_v39  ;;  %v13117_v13 = vld [vmem:[%s15447_s16 + $0x14d8] ss:$72 sps:$4 sm:$0xff]   ;;  %v13123_v15 = vld [vmem:[%s15447_s16 + $0x1568] ss:$72 sps:$4 sm:$0xff]   ;;  %v13128_v7 = vld [vmem:[%s15447_s16 + $0xcf4] ss:$72 sps:$4 sm:$0xff]  }
 0x212   : > { %v15664_v40 = vpack.c.bf16 %v636_v26, %v630_v20  ;;  %v15666_v49 = vpack.c.bf16 %v638_v30, %v632_v24  ;;  %v15670_v46 = vpack.c.bf16 %v635_v34, %v629_v32  ;;  %v15672_v47 = vpack.c.bf16 %v637_v36, %v631_v35  ;;  %v13120_v11 = vld [vmem:[%s15447_s16 + $0xc60] ss:$72 sps:$4 sm:$0xff]   ;;  %v13131_v33 = vld [vmem:[%s15447_s16 + $0x15fc] ss:$72 sps:$4 sm:$0xff]   ;;  %v13137_v10 = vld [vmem:[%s15447_s16 + $0x168c] ss:$72 sps:$4 sm:$0xff]  }
 0x213   : > { %v15678_v51 = vpack.c.bf16 %v640_v43, %v634_v42  ;;  %v15683_v55 = vpack.c.bf16 %v639_v50, %v633_v48  ;;  %v13129_v23 = vld [vmem:[%s15447_s16 + $0x15f8] ss:$72 sps:$4 sm:$0xff]   ;;  %v13134_v9 = vld [vmem:[%s15447_s16 + $0xd84] ss:$72 sps:$4 sm:$0xff]   ;;  %v13140_v16 = vld [vmem:[%s15447_s16 + $0xe14] ss:$72 sps:$4 sm:$0xff]  }
 0x214   : > { %5935 = vmatprep.mubr.bf16.mxu0 %v15664_v40  ;;  %6107 = vmatprep.mubr.bf16.mxu1 %v15666_v49  ;;  %v13132_v12 = vld [vmem:[%s15447_s16 + $0xd80] ss:$72 sps:$4 sm:$0xff]   ;;  %v13143_v17 = vld [vmem:[%s15447_s16 + $0x171c] ss:$72 sps:$4 sm:$0xff]   ;;  %v13138_v19 = vld [vmem:[%s15447_s16 + $0xe10] ss:$72 sps:$4 sm:$0xff]  }
 0x215   : > { %5936 = vmatmul.mubr.bf16.vlgmr.msra.gmra.mrb[0].mxu0 %v15670_v46  ;;  %6108 = vmatmul.mubr.bf16.vlgmr.msra.gmra.mrb[0].mxu1 %v15672_v47  ;;  %v13141_v20 = vld [vmem:[%s15447_s16 + $0x1718] ss:$72 sps:$4 sm:$0xff]   ;;  %v13146_v21 = vld [vmem:[%s15447_s16 + $0xea4] ss:$72 sps:$4 sm:$0xff]   ;;  %v13147_v25 = vld [vmem:[%s15447_s16 + $0x17a8] ss:$72 sps:$4 sm:$0xff]  }
 0x216   : > { %5947 = vmatpush1.bf16.msra.mxu0 %v13084_v28  ;;  %6119 = vmatpush1.bf16.msra.mxu1 %v13087_v27  ;;  %v13149_v22 = vld [vmem:[%s15447_s16 + $0x17ac] ss:$72 sps:$4 sm:$0xff]   ;;  %v13144_v24 = vld [vmem:[%s15447_s16 + $0xea0] ss:$72 sps:$4 sm:$0xff]   ;;  %v13155_v37 = vld [vmem:[%s15447_s16 + $0x183c] ss:$72 sps:$4 sm:$0xff]  }
 0x217   : > { %5978 = vmatprep.mubr.bf16.mxu0 %v15666_v49  ;;  %6150 = vmatprep.mubr.bf16.mxu1 %v15678_v51  ;;  %v13152_v29 = vld [vmem:[%s15447_s16 + $0xf34] ss:$72 sps:$4 sm:$0xff]   ;;  %v13150_v26 = vld [vmem:[%s15447_s16 + $0xf30] ss:$72 sps:$4 sm:$0xff]   ;;  %v13158_v30 = vld [vmem:[%s15447_s16 + $0xfc4] ss:$72 sps:$4 sm:$0xff]  }
 0x218   : > { %5948 = vmatprep.subr.bf16.mxu0 %v13092_v44  ;;  %6120 = vmatprep.subr.bf16.mxu1 %v13095_v45  ;;  %v13153_v28 = vld [vmem:[%s15447_s16 + $0x1838] ss:$72 sps:$4 sm:$0xff]   ;;  %v13161_v27 = vld [vmem:[%s15447_s16 + $0x18cc] ss:$72 sps:$4 sm:$0xff]   ;;  %v13159_v31 = vld [vmem:[%s15447_s16 + $0x18c8] ss:$72 sps:$4 sm:$0xff]  }
 0x219   : > { %v13156_v32 = vld [vmem:[%s15447_s16 + $0xfc0] ss:$72 sps:$4 sm:$0xff]   ;;  %v13164_v34 = vld [vmem:[%s15447_s16 + $0x1054] ss:$72 sps:$4 sm:$0xff]   ;;  %v13162_v36 = vld [vmem:[%s15447_s16 + $0x1050] ss:$72 sps:$4 sm:$0xff]  }
 0x21a   : > { %5949 = vmatpush1.bf16.msra.mxu0 %v13090_v52  ;;  %6121 = vmatpush1.bf16.msra.mxu1 %v13093_v53  ;;  %v13167_v35 = vld [vmem:[%s15447_s16 + $0x195c] ss:$72 sps:$4 sm:$0xff]   ;;  %v13165_v39 = vld [vmem:[%s15447_s16 + $0x1958] ss:$72 sps:$4 sm:$0xff]   ;;  %v13173_v43 = vld [vmem:[%s15447_s16 + $0x19ec] ss:$72 sps:$4 sm:$0xff]  }
 0x21b   : > { %5950 = vmatprep.subr.bf16.mxu0 %v13098_v54  ;;  %6122 = vmatprep.subr.bf16.mxu1 %v13101_v56  ;;  %v13170_v42 = vld [vmem:[%s15447_s16 + $0x10e4] ss:$72 sps:$4 sm:$0xff]   ;;  %v13168_v44 = vld [vmem:[%s15447_s16 + $0x10e0] ss:$72 sps:$4 sm:$0xff]   ;;  %v13176_v48 = vld [vmem:[%s15447_s16 + $0x1174] ss:$72 sps:$4 sm:$0xff]  }
 0x21c   : > { %v13171_v45 = vld [vmem:[%s15447_s16 + $0x19e8] ss:$72 sps:$4 sm:$0xff]   ;;  %v13179_v50 = vld [vmem:[%s15447_s16 + $0x1a7c] ss:$72 sps:$4 sm:$0xff]   ;;  %v13177_v53 = vld [vmem:[%s15447_s16 + $0x1a78] ss:$72 sps:$4 sm:$0xff]  }
 0x21d   : > { %v13174_v52 = vld [vmem:[%s15447_s16 + $0x1170] ss:$72 sps:$4 sm:$0xff]   ;;  %v13182_v54 = vld [vmem:[%s15447_s16 + $0x1204] ss:$72 sps:$4 sm:$0xff]  }
 0x21e   : > { %5951 = vmatpush1.bf16.msra.mxu0 %v13096_v57  ;;  %6123 = vmatpush1.bf16.msra.mxu1 %v13099_v58  ;;  %v13185_v56 = vld [vmem:[%s15447_s16 + $0x1c] ss:$72 sps:$4 sm:$0xff]   ;;  %v13180_v57 = vld [vmem:[%s15447_s16 + $0x1200] ss:$72 sps:$4 sm:$0xff]  }
 0x21f   : > { %5952 = vmatprep.subr.bf16.mxu0 %v13104_v59  ;;  %6124 = vmatprep.subr.bf16.mxu1 %v13107_v60  ;;  %v13183_v58 = vld [vmem:[%s15447_s16 + $0x18] ss:$72 sps:$4 sm:$0xff]   ;;  %v13188_v59 = vld [vmem:[%s15447_s16 + $0x1294] ss:$72 sps:$4 sm:$0xff]  }
 0x220   : > { %v13191_v60 = vld [vmem:[%s15447_s16 + $0xac] ss:$72 sps:$4 sm:$0xff]  }
 0x222   : > { %5953 = vmatpush1.bf16.msra.mxu0 %v13102_v61  ;;  %6125 = vmatpush1.bf16.msra.mxu1 %v13105_v62  ;;  %v13186_v61 = vld [vmem:[%s15447_s16 + $0x1290] ss:$72 sps:$4 sm:$0xff]  }
 0x223   : > { %5954 = vmatprep.subr.bf16.mxu0 %v13110_v63  ;;  %6126 = vmatprep.subr.bf16.mxu1 %v13113_v0  ;;  %v13189_v62 = vld [vmem:[%s15447_s16 + $0xa8] ss:$72 sps:$4 sm:$0xff]   ;;  %v13194_v63 = vld [vmem:[%s15447_s16 + $0x1324] ss:$72 sps:$4 sm:$0xff]  }
 0x224   : > { %v13197_v0 = vld [vmem:[%s15447_s16 + $0x13c] ss:$72 sps:$4 sm:$0xff]  }
 0x226   : > { %5955 = vmatpush1.bf16.msra.mxu0 %v13108_v1  ;;  %6127 = vmatpush1.bf16.msra.mxu1 %v13111_v2  ;;  %v13192_v1 = vld [vmem:[%s15447_s16 + $0x1320] ss:$72 sps:$4 sm:$0xff]  }
 0x227   : > { %5956 = vmatprep.subr.bf16.mxu0 %v13116_v3  ;;  %6128 = vmatprep.subr.bf16.mxu1 %v13119_v4  ;;  %v13195_v2 = vld [vmem:[%s15447_s16 + $0x138] ss:$72 sps:$4 sm:$0xff]   ;;  %v13200_v3 = vld [vmem:[%s15447_s16 + $0x13b4] ss:$72 sps:$4 sm:$0xff]  }
 0x228   : > { %v13198_v4 = vld [vmem:[%s15447_s16 + $0x13b0] ss:$72 sps:$4 sm:$0xff]  }
 0x22a   : > { %5957 = vmatpush1.bf16.msra.mxu0 %v13114_v5  ;;  %6129 = vmatpush1.bf16.msra.mxu1 %v13117_v13  ;;  %v13203_v5 = vld [vmem:[%s15447_s16 + $0x1cc] ss:$72 sps:$4 sm:$0xff]   ;;  %v13201_v13 = vld [vmem:[%s15447_s16 + $0x1c8] ss:$72 sps:$4 sm:$0xff]  }
 0x22b   : > { %5958 = vmatprep.subr.bf16.mxu0 %v13122_v18  ;;  %6130 = vmatprep.subr.bf16.mxu1 %v13125_v6  ;;  %v13206_v18 = vld [vmem:[%s15447_s16 + $0x1444] ss:$72 sps:$4 sm:$0xff]   ;;  %v13204_v6 = vld [vmem:[%s15447_s16 + $0x1440] ss:$72 sps:$4 sm:$0xff]  }
 0x22e   : > { %5959 = vmatpush1.bf16.msra.mxu0 %v13120_v11  ;;  %6131 = vmatpush1.bf16.msra.mxu1 %v13123_v15  ;;  %v13209_v11 = vld [vmem:[%s15447_s16 + $0x25c] ss:$72 sps:$4 sm:$0xff]   ;;  %v13207_v15 = vld [vmem:[%s15447_s16 + $0x258] ss:$72 sps:$4 sm:$0xff]  }
 0x22f   : > { %5960 = vmatprep.subr.bf16.mxu0 %v13128_v7  ;;  %6132 = vmatprep.subr.bf16.mxu1 %v13131_v33  ;;  %v13212_v7 = vld [vmem:[%s15447_s16 + $0x14d4] ss:$72 sps:$4 sm:$0xff]   ;;  %v13210_v33 = vld [vmem:[%s15447_s16 + $0x14d0] ss:$72 sps:$4 sm:$0xff]  }
 0x232   : > { %5961 = vmatpush1.bf16.msra.mxu0 %v13126_v8  ;;  %6133 = vmatpush1.bf16.msra.mxu1 %v13129_v23  ;;  %v13215_v8 = vld [vmem:[%s15447_s16 + $0x2ec] ss:$72 sps:$4 sm:$0xff]   ;;  %v13213_v23 = vld [vmem:[%s15447_s16 + $0x2e8] ss:$72 sps:$4 sm:$0xff]  }
 0x233   : > { %5962 = vmatprep.subr.bf16.mxu0 %v13134_v9  ;;  %6134 = vmatprep.subr.bf16.mxu1 %v13137_v10  ;;  %v13218_v9 = vld [vmem:[%s15447_s16 + $0x1564] ss:$72 sps:$4 sm:$0xff]   ;;  %v13216_v10 = vld [vmem:[%s15447_s16 + $0x1560] ss:$72 sps:$4 sm:$0xff]  }
 0x236   : > { %5963 = vmatpush1.bf16.msra.mxu0 %v13132_v12  ;;  %6135 = vmatpush1.bf16.msra.mxu1 %v13135_v14  ;;  %v13221_v12 = vld [vmem:[%s15447_s16 + $0x37c] ss:$72 sps:$4 sm:$0xff]   ;;  %v13219_v14 = vld [vmem:[%s15447_s16 + $0x378] ss:$72 sps:$4 sm:$0xff]  }
 0x237   : > { %5964 = vmatprep.subr.bf16.mxu0 %v13140_v16  ;;  %6136 = vmatprep.subr.bf16.mxu1 %v13143_v17  ;;  %v13224_v16 = vld [vmem:[%s15447_s16 + $0x15f4] ss:$72 sps:$4 sm:$0xff]   ;;  %v13222_v17 = vld [vmem:[%s15447_s16 + $0x15f0] ss:$72 sps:$4 sm:$0xff]  }
 0x23a   : > { %5965 = vmatpush1.bf16.msra.mxu0 %v13138_v19  ;;  %6137 = vmatpush1.bf16.msra.mxu1 %v13141_v20  ;;  %v13227_v19 = vld [vmem:[%s15447_s16 + $0x40c] ss:$72 sps:$4 sm:$0xff]   ;;  %v13225_v20 = vld [vmem:[%s15447_s16 + $0x408] ss:$72 sps:$4 sm:$0xff]  }
 0x23b   : > { %5966 = vmatprep.subr.bf16.mxu0 %v13146_v21  ;;  %6138 = vmatprep.subr.bf16.mxu1 %v13149_v22  ;;  %v13230_v21 = vld [vmem:[%s15447_s16 + $0x1684] ss:$72 sps:$4 sm:$0xff]   ;;  %v13228_v22 = vld [vmem:[%s15447_s16 + $0x1680] ss:$72 sps:$4 sm:$0xff]  }
 0x23e   : > { %5967 = vmatpush1.bf16.msra.mxu0 %v13144_v24  ;;  %6139 = vmatpush1.bf16.msra.mxu1 %v13147_v25  ;;  %v13233_v24 = vld [vmem:[%s15447_s16 + $0x49c] ss:$72 sps:$4 sm:$0xff]   ;;  %v13231_v25 = vld [vmem:[%s15447_s16 + $0x498] ss:$72 sps:$4 sm:$0xff]  }
 0x23f   : > { %5968 = vmatprep.subr.bf16.mxu0 %v13152_v29  ;;  %6140 = vmatprep.subr.bf16.mxu1 %v13155_v37  ;;  %v13236_v29 = vld [vmem:[%s15447_s16 + $0x1714] ss:$72 sps:$4 sm:$0xff]   ;;  %v13234_v37 = vld [vmem:[%s15447_s16 + $0x1710] ss:$72 sps:$4 sm:$0xff]  }
 0x242   : > { %5969 = vmatpush1.bf16.msra.mxu0 %v13150_v26  ;;  %6141 = vmatpush1.bf16.msra.mxu1 %v13153_v28  ;;  %v13239_v26 = vld [vmem:[%s15447_s16 + $0x52c] ss:$72 sps:$4 sm:$0xff]   ;;  %v13237_v28 = vld [vmem:[%s15447_s16 + $0x528] ss:$72 sps:$4 sm:$0xff]  }
 0x243   : > { %5970 = vmatprep.subr.bf16.mxu0 %v13158_v30  ;;  %6142 = vmatprep.subr.bf16.mxu1 %v13161_v27  ;;  %v13242_v30 = vld [vmem:[%s15447_s16 + $0x17a4] ss:$72 sps:$4 sm:$0xff]   ;;  %v13240_v27 = vld [vmem:[%s15447_s16 + $0x17a0] ss:$72 sps:$4 sm:$0xff]  }
 0x246   : > { %5971 = vmatpush1.bf16.msra.mxu0 %v13156_v32  ;;  %6143 = vmatpush1.bf16.msra.mxu1 %v13159_v31  ;;  %v13245_v32 = vld [vmem:[%s15447_s16 + $0x5bc] ss:$72 sps:$4 sm:$0xff]   ;;  %v13243_v31 = vld [vmem:[%s15447_s16 + $0x5b8] ss:$72 sps:$4 sm:$0xff]  }
 0x247   : > { %5972 = vmatprep.subr.bf16.mxu0 %v13164_v34  ;;  %6144 = vmatprep.subr.bf16.mxu1 %v13167_v35  ;;  %v13248_v34 = vld [vmem:[%s15447_s16 + $0x1834] ss:$72 sps:$4 sm:$0xff]   ;;  %v13246_v35 = vld [vmem:[%s15447_s16 + $0x1830] ss:$72 sps:$4 sm:$0xff]  }
 0x24a   : > { %5973 = vmatpush1.bf16.msra.mxu0 %v13162_v36  ;;  %6145 = vmatpush1.bf16.msra.mxu1 %v13165_v39  ;;  %v13251_v36 = vld [vmem:[%s15447_s16 + $0x64c] ss:$72 sps:$4 sm:$0xff]   ;;  %v13249_v39 = vld [vmem:[%s15447_s16 + $0x648] ss:$72 sps:$4 sm:$0xff]  }
 0x24b   : > { %5974 = vmatprep.subr.bf16.mxu0 %v13170_v42  ;;  %6146 = vmatprep.subr.bf16.mxu1 %v13173_v43  ;;  %v13254_v42 = vld [vmem:[%s15447_s16 + $0x18c4] ss:$72 sps:$4 sm:$0xff]   ;;  %v13252_v43 = vld [vmem:[%s15447_s16 + $0x18c0] ss:$72 sps:$4 sm:$0xff]  }
 0x24e   : > { %5975 = vmatpush1.bf16.msra.mxu0 %v13168_v44  ;;  %6147 = vmatpush1.bf16.msra.mxu1 %v13171_v45  ;;  %v13257_v44 = vld [vmem:[%s15447_s16 + $0x6dc] ss:$72 sps:$4 sm:$0xff]   ;;  %v13255_v45 = vld [vmem:[%s15447_s16 + $0x6d8] ss:$72 sps:$4 sm:$0xff]  }
 0x24f   : > { %5976 = vmatprep.subr.bf16.mxu0 %v13176_v48  ;;  %6148 = vmatprep.subr.bf16.mxu1 %v13179_v50  ;;  %v13260_v48 = vld [vmem:[%s15447_s16 + $0x1954] ss:$72 sps:$4 sm:$0xff]   ;;  %v13258_v50 = vld [vmem:[%s15447_s16 + $0x1950] ss:$72 sps:$4 sm:$0xff]  }
 0x252   : > { %5977 = vmatpush1.bf16.msra.mxu0 %v13174_v52  ;;  %6149 = vmatpush1.bf16.msra.mxu1 %v13177_v53  ;;  %v13263_v52 = vld [vmem:[%s15447_s16 + $0x76c] ss:$72 sps:$4 sm:$0xff]   ;;  %v13261_v53 = vld [vmem:[%s15447_s16 + $0x768] ss:$72 sps:$4 sm:$0xff]  }
 0x253   : > { %5989 = vmatprep.subr.bf16.mxu0 %v13182_v54  ;;  %6290 = vmatprep.subr.bf16.mxu1 %v13185_v56  ;;  %v13266_v54 = vld [vmem:[%s15447_s16 + $0x19e4] ss:$72 sps:$4 sm:$0xff]   ;;  %v13264_v56 = vld [vmem:[%s15447_s16 + $0x19e0] ss:$72 sps:$4 sm:$0xff]  }
 0x255   : > { %5979 = vmatmul.mubr.bf16.vlgmr.msra.gmra.mrb[0].mxu0 %v15672_v47  ;;  %6151 = vmatmul.mubr.bf16.vlgmr.msra.gmra.mrb[0].mxu1 %v15683_v55 }
 0x256   : > { %5990 = vmatpush1.bf16.msra.mxu0 %v13180_v57  ;;  %6021 = vmatprep.mubr.bf16.mxu0 %v15678_v51  ;;  %v13269_v57 = vld [vmem:[%s15447_s16 + $0x7fc] ss:$72 sps:$4 sm:$0xff]  }
 0x257   : > { %6291 = vmatpush1.bf16.msra.mxu1 %v13183_v58  ;;  %6322 = vmatprep.mubr.bf16.mxu1 %v15664_v40  ;;  %v13267_v58 = vld [vmem:[%s15447_s16 + $0x7f8] ss:$72 sps:$4 sm:$0xff]  }
 0x258   : > { %5991 = vmatprep.subr.bf16.mxu0 %v13188_v59  ;;  %6292 = vmatprep.subr.bf16.mxu1 %v13191_v60  ;;  %v13272_v59 = vld [vmem:[%s15447_s16 + $0x1a74] ss:$72 sps:$4 sm:$0xff]   ;;  %v13270_v60 = vld [vmem:[%s15447_s16 + $0x1a70] ss:$72 sps:$4 sm:$0xff]  }
 0x25a   : > { %5992 = vmatpush1.bf16.msra.mxu0 %v13186_v61  ;;  %v13275_v61 = vld [vmem:[%s15447_s16 + $0x88c] ss:$72 sps:$4 sm:$0xff]  }
 0x25b   : > { %6293 = vmatpush1.bf16.msra.mxu1 %v13189_v62  ;;  %5993 = vmatprep.subr.bf16.mxu0 %v13194_v63  ;;  %v13273_v62 = vld [vmem:[%s15447_s16 + $0x888] ss:$72 sps:$4 sm:$0xff]   ;;  %v13278_v63 = vld [vmem:[%s15447_s16 + $0xc] ss:$72 sps:$4 sm:$0xff]  }
 0x25c   : > { %6294 = vmatprep.subr.bf16.mxu1 %v13197_v0  ;;  %v13276_v0 = vld [vmem:[%s15447_s16 + $0x8] ss:$72 sps:$4 sm:$0xff]  }
 0x25e   : > { %5994 = vmatpush1.bf16.msra.mxu0 %v13192_v1  ;;  %v13281_v1 = vld [vmem:[%s15447_s16 + $0x91c] ss:$72 sps:$4 sm:$0xff]  }
 0x25f   : > { %6295 = vmatpush1.bf16.msra.mxu1 %v13195_v2  ;;  %5995 = vmatprep.subr.bf16.mxu0 %v13200_v3  ;;  %v13279_v2 = vld [vmem:[%s15447_s16 + $0x918] ss:$72 sps:$4 sm:$0xff]   ;;  %v13284_v3 = vld [vmem:[%s15447_s16 + $0x9c] ss:$72 sps:$4 sm:$0xff]  }
 0x260   : > { %6296 = vmatprep.subr.bf16.mxu1 %v13203_v5  ;;  %v13285_v5 = vld [vmem:[%s15447_s16 + $0x9a8] ss:$72 sps:$4 sm:$0xff]  }
 0x262   : > { %5996 = vmatpush1.bf16.msra.mxu0 %v13198_v4  ;;  %v13282_v4 = vld [vmem:[%s15447_s16 + $0x98] ss:$72 sps:$4 sm:$0xff]  }
 0x263   : > { %6297 = vmatpush1.bf16.msra.mxu1 %v13201_v13  ;;  %5997 = vmatprep.subr.bf16.mxu0 %v13206_v18  ;;  %v13287_v13 = vld [vmem:[%s15447_s16 + $0x9ac] ss:$72 sps:$4 sm:$0xff]  }
 0x264   : > { %6298 = vmatprep.subr.bf16.mxu1 %v13209_v11  ;;  %v13290_v18 = vld [vmem:[%s15447_s16 + $0x12c] ss:$72 sps:$4 sm:$0xff]   ;;  %v13288_v11 = vld [vmem:[%s15447_s16 + $0x128] ss:$72 sps:$4 sm:$0xff]  }
 0x266   : > { %5998 = vmatpush1.bf16.msra.mxu0 %v13204_v6  ;;  %v13293_v6 = vld [vmem:[%s15447_s16 + $0xa3c] ss:$72 sps:$4 sm:$0xff]  }
 0x267   : > { %6299 = vmatpush1.bf16.msra.mxu1 %v13207_v15  ;;  %5999 = vmatprep.subr.bf16.mxu0 %v13212_v7  ;;  %v13291_v15 = vld [vmem:[%s15447_s16 + $0xa38] ss:$72 sps:$4 sm:$0xff]   ;;  %v13296_v7 = vld [vmem:[%s15447_s16 + $0x1bc] ss:$72 sps:$4 sm:$0xff]  }
 0x268   : > { %6300 = vmatprep.subr.bf16.mxu1 %v13215_v8  ;;  %v13299_v8 = vld [vmem:[%s15447_s16 + $0xacc] ss:$72 sps:$4 sm:$0xff]  }
 0x26a   : > { %6000 = vmatpush1.bf16.msra.mxu0 %v13210_v33  ;;  %v13294_v33 = vld [vmem:[%s15447_s16 + $0x1b8] ss:$72 sps:$4 sm:$0xff]  }
 0x26b   : > { %6301 = vmatpush1.bf16.msra.mxu1 %v13213_v23  ;;  %6001 = vmatprep.subr.bf16.mxu0 %v13218_v9  ;;  %v13297_v23 = vld [vmem:[%s15447_s16 + $0xac8] ss:$72 sps:$4 sm:$0xff]   ;;  %v13302_v9 = vld [vmem:[%s15447_s16 + $0x24c] ss:$72 sps:$4 sm:$0xff]  }
 0x26c   : > { %6302 = vmatprep.subr.bf16.mxu1 %v13221_v12  ;;  %v13305_v12 = vld [vmem:[%s15447_s16 + $0xb5c] ss:$72 sps:$4 sm:$0xff]  }
 0x26e   : > { %6002 = vmatpush1.bf16.msra.mxu0 %v13216_v10  ;;  %v13300_v10 = vld [vmem:[%s15447_s16 + $0x248] ss:$72 sps:$4 sm:$0xff]  }
 0x26f   : > { %6303 = vmatpush1.bf16.msra.mxu1 %v13219_v14  ;;  %6003 = vmatprep.subr.bf16.mxu0 %v13224_v16  ;;  %v13303_v14 = vld [vmem:[%s15447_s16 + $0xb58] ss:$72 sps:$4 sm:$0xff]   ;;  %v13308_v16 = vld [vmem:[%s15447_s16 + $0x2dc] ss:$72 sps:$4 sm:$0xff]  }
 0x270   : > { %6304 = vmatprep.subr.bf16.mxu1 %v13227_v19  ;;  %v13311_v19 = vld [vmem:[%s15447_s16 + $0xbec] ss:$72 sps:$4 sm:$0xff]  }
 0x272   : > { %6004 = vmatpush1.bf16.msra.mxu0 %v13222_v17  ;;  %v13306_v17 = vld [vmem:[%s15447_s16 + $0x2d8] ss:$72 sps:$4 sm:$0xff]  }
 0x273   : > { %6305 = vmatpush1.bf16.msra.mxu1 %v13225_v20  ;;  %6005 = vmatprep.subr.bf16.mxu0 %v13230_v21  ;;  %v13309_v20 = vld [vmem:[%s15447_s16 + $0xbe8] ss:$72 sps:$4 sm:$0xff]   ;;  %v13314_v21 = vld [vmem:[%s15447_s16 + $0x36c] ss:$72 sps:$4 sm:$0xff]  }
 0x274   : > { %6306 = vmatprep.subr.bf16.mxu1 %v13233_v24  ;;  %v13312_v24 = vld [vmem:[%s15447_s16 + $0x368] ss:$72 sps:$4 sm:$0xff]  }
 0x276   : > { %6006 = vmatpush1.bf16.msra.mxu0 %v13228_v22  ;;  %v13317_v22 = vld [vmem:[%s15447_s16 + $0xc7c] ss:$72 sps:$4 sm:$0xff]  }
 0x277   : > { %6307 = vmatpush1.bf16.msra.mxu1 %v13231_v25  ;;  %6007 = vmatprep.subr.bf16.mxu0 %v13236_v29  ;;  %v13315_v25 = vld [vmem:[%s15447_s16 + $0xc78] ss:$72 sps:$4 sm:$0xff]   ;;  %v13320_v29 = vld [vmem:[%s15447_s16 + $0x3fc] ss:$72 sps:$4 sm:$0xff]  }
 0x278   : > { %6308 = vmatprep.subr.bf16.mxu1 %v13239_v26  ;;  %v13323_v26 = vld [vmem:[%s15447_s16 + $0xd0c] ss:$72 sps:$4 sm:$0xff]  }
 0x27a   : > { %6008 = vmatpush1.bf16.msra.mxu0 %v13234_v37  ;;  %v13318_v37 = vld [vmem:[%s15447_s16 + $0x3f8] ss:$72 sps:$4 sm:$0xff]  }
 0x27b   : > { %6309 = vmatpush1.bf16.msra.mxu1 %v13237_v28  ;;  %6009 = vmatprep.subr.bf16.mxu0 %v13242_v30  ;;  %v13321_v28 = vld [vmem:[%s15447_s16 + $0xd08] ss:$72 sps:$4 sm:$0xff]   ;;  %v13326_v30 = vld [vmem:[%s15447_s16 + $0x48c] ss:$72 sps:$4 sm:$0xff]  }
 0x27c   : > { %6310 = vmatprep.subr.bf16.mxu1 %v13245_v32  ;;  %v13329_v32 = vld [vmem:[%s15447_s16 + $0xd9c] ss:$72 sps:$4 sm:$0xff]  }
 0x27e   : > { %6010 = vmatpush1.bf16.msra.mxu0 %v13240_v27  ;;  %v13324_v27 = vld [vmem:[%s15447_s16 + $0x488] ss:$72 sps:$4 sm:$0xff]  }
 0x27f   : > { %6311 = vmatpush1.bf16.msra.mxu1 %v13243_v31  ;;  %6011 = vmatprep.subr.bf16.mxu0 %v13248_v34  ;;  %v13327_v31 = vld [vmem:[%s15447_s16 + $0xd98] ss:$72 sps:$4 sm:$0xff]   ;;  %v13332_v34 = vld [vmem:[%s15447_s16 + $0x51c] ss:$72 sps:$4 sm:$0xff]  }
 0x280   : > { %6312 = vmatprep.subr.bf16.mxu1 %v13251_v36  ;;  %v13335_v36 = vld [vmem:[%s15447_s16 + $0xe2c] ss:$72 sps:$4 sm:$0xff]  }
 0x282   : > { %6012 = vmatpush1.bf16.msra.mxu0 %v13246_v35  ;;  %v13330_v35 = vld [vmem:[%s15447_s16 + $0x518] ss:$72 sps:$4 sm:$0xff]  }
 0x283   : > { %6313 = vmatpush1.bf16.msra.mxu1 %v13249_v39  ;;  %6013 = vmatprep.subr.bf16.mxu0 %v13254_v42  ;;  %v13333_v39 = vld [vmem:[%s15447_s16 + $0xe28] ss:$72 sps:$4 sm:$0xff]   ;;  %v13338_v42 = vld [vmem:[%s15447_s16 + $0x5ac] ss:$72 sps:$4 sm:$0xff]  }
 0x284   : > { %6314 = vmatprep.subr.bf16.mxu1 %v13257_v44  ;;  %v13341_v44 = vld [vmem:[%s15447_s16 + $0xebc] ss:$72 sps:$4 sm:$0xff]  }
 0x286   : > { %6014 = vmatpush1.bf16.msra.mxu0 %v13252_v43  ;;  %v13336_v43 = vld [vmem:[%s15447_s16 + $0x5a8] ss:$72 sps:$4 sm:$0xff]  }
 0x287   : > { %6315 = vmatpush1.bf16.msra.mxu1 %v13255_v45  ;;  %6015 = vmatprep.subr.bf16.mxu0 %v13260_v48  ;;  %v13339_v45 = vld [vmem:[%s15447_s16 + $0xeb8] ss:$72 sps:$4 sm:$0xff]   ;;  %v13344_v48 = vld [vmem:[%s15447_s16 + $0x63c] ss:$72 sps:$4 sm:$0xff]  }
 0x288   : > { %6316 = vmatprep.subr.bf16.mxu1 %v13263_v52  ;;  %v13347_v52 = vld [vmem:[%s15447_s16 + $0xf4c] ss:$72 sps:$4 sm:$0xff]  }
 0x28a   : > { %6016 = vmatpush1.bf16.msra.mxu0 %v13258_v50  ;;  %v13342_v50 = vld [vmem:[%s15447_s16 + $0x638] ss:$72 sps:$4 sm:$0xff]  }
 0x28b   : > { %6317 = vmatpush1.bf16.msra.mxu1 %v13261_v53  ;;  %6017 = vmatprep.subr.bf16.mxu0 %v13266_v54  ;;  %v13345_v53 = vld [vmem:[%s15447_s16 + $0xf48] ss:$72 sps:$4 sm:$0xff]   ;;  %v13350_v54 = vld [vmem:[%s15447_s16 + $0x6cc] ss:$72 sps:$4 sm:$0xff]  }
 0x28c   : > { %6318 = vmatprep.subr.bf16.mxu1 %v13269_v57  ;;  %v13353_v57 = vld [vmem:[%s15447_s16 + $0xfdc] ss:$72 sps:$4 sm:$0xff]  }
 0x28e   : > { %6018 = vmatpush1.bf16.msra.mxu0 %v13264_v56  ;;  %v13348_v56 = vld [vmem:[%s15447_s16 + $0x6c8] ss:$72 sps:$4 sm:$0xff]  }
 0x28f   : > { %6319 = vmatpush1.bf16.msra.mxu1 %v13267_v58  ;;  %6019 = vmatprep.subr.bf16.mxu0 %v13272_v59  ;;  %v13351_v58 = vld [vmem:[%s15447_s16 + $0xfd8] ss:$72 sps:$4 sm:$0xff]   ;;  %v13356_v59 = vld [vmem:[%s15447_s16 + $0x75c] ss:$72 sps:$4 sm:$0xff]  }
 0x290   : > { %6320 = vmatprep.subr.bf16.mxu1 %v13275_v61  ;;  %v13359_v61 = vld [vmem:[%s15447_s16 + $0x106c] ss:$72 sps:$4 sm:$0xff]  }
 0x292   : > { %6020 = vmatpush1.bf16.msra.mxu0 %v13270_v60  ;;  %v13354_v60 = vld [vmem:[%s15447_s16 + $0x758] ss:$72 sps:$4 sm:$0xff]  }
 0x293   : > { %6321 = vmatpush1.bf16.msra.mxu1 %v13273_v62  ;;  %6032 = vmatprep.subr.bf16.mxu0 %v13278_v63  ;;  %v13357_v62 = vld [vmem:[%s15447_s16 + $0x1068] ss:$72 sps:$4 sm:$0xff]   ;;  %v13362_v63 = vld [vmem:[%s15447_s16 + $0x7ec] ss:$72 sps:$4 sm:$0xff]  }
 0x294   : > { %6333 = vmatprep.subr.bf16.mxu1 %v13281_v1  ;;  %v13365_v1 = vld [vmem:[%s15447_s16 + $0x10fc] ss:$72 sps:$4 sm:$0xff]  }
 0x295   : > { %6022 = vmatmul.mubr.bf16.vlgmr.msra.gmra.mrb[0].mxu0 %v15683_v55 }
 0x296   : > { %6323 = vmatmul.mubr.bf16.vlgmr.msra.gmra.mrb[4].mxu1 %v15670_v46  ;;  %6033 = vmatpush1.bf16.msra.mxu0 %v13276_v0  ;;  %v13360_v0 = vld [vmem:[%s15447_s16 + $0x7e8] ss:$72 sps:$4 sm:$0xff]  }
 0x297   : > { %6064 = vmatprep.mubr.bf16.mxu0 %v15664_v40  ;;  %6334 = vmatpush1.bf16.msra.mxu1 %v13279_v2  ;;  %v13363_v2 = vld [vmem:[%s15447_s16 + $0x10f8] ss:$72 sps:$4 sm:$0xff]  }
 0x298   : > { %6365 = vmatprep.mubr.bf16.mxu1 %v15666_v49  ;;  %6034 = vmatprep.subr.bf16.mxu0 %v13284_v3  ;;  %v13368_v3 = vld [vmem:[%s15447_s16 + $0x87c] ss:$72 sps:$4 sm:$0xff]  }
 0x299   : > { %6335 = vmatprep.subr.bf16.mxu1 %v13287_v13  ;;  %v13369_v13 = vld [vmem:[%s15447_s16 + $0x1188] ss:$72 sps:$4 sm:$0xff]  }
 0x29a   : > { %6035 = vmatpush1.bf16.msra.mxu0 %v13282_v4  ;;  %v13366_v4 = vld [vmem:[%s15447_s16 + $0x878] ss:$72 sps:$4 sm:$0xff]  }
 0x29b   : > { %6336 = vmatpush1.bf16.msra.mxu1 %v13285_v5  ;;  %6036 = vmatprep.subr.bf16.mxu0 %v13290_v18  ;;  %v13371_v5 = vld [vmem:[%s15447_s16 + $0x118c] ss:$72 sps:$4 sm:$0xff]  }
 0x29c   : > { %6337 = vmatprep.subr.bf16.mxu1 %v13293_v6  ;;  %v13374_v18 = vld [vmem:[%s15447_s16 + $0x14] ss:$72 sps:$4 sm:$0xff]   ;;  %v13372_v6 = vld [vmem:[%s15447_s16 + $0x10] ss:$72 sps:$4 sm:$0xff]  }
 0x29e   : > { %6037 = vmatpush1.bf16.msra.mxu0 %v13288_v11  ;;  %v13377_v11 = vld [vmem:[%s15447_s16 + $0x121c] ss:$72 sps:$4 sm:$0xff]  }
 0x29f   : > { %6338 = vmatpush1.bf16.msra.mxu1 %v13291_v15  ;;  %6038 = vmatprep.subr.bf16.mxu0 %v13296_v7  ;;  %v13375_v15 = vld [vmem:[%s15447_s16 + $0x1218] ss:$72 sps:$4 sm:$0xff]   ;;  %v13380_v7 = vld [vmem:[%s15447_s16 + $0xa4] ss:$72 sps:$4 sm:$0xff]  }
 0x2a0   : > { %6339 = vmatprep.subr.bf16.mxu1 %v13299_v8  ;;  %v13381_v8 = vld [vmem:[%s15447_s16 + $0x12a8] ss:$72 sps:$4 sm:$0xff]  }
 0x2a2   : > { %6039 = vmatpush1.bf16.msra.mxu0 %v13294_v33  ;;  %v13378_v33 = vld [vmem:[%s15447_s16 + $0xa0] ss:$72 sps:$4 sm:$0xff]  }
 0x2a3   : > { %6340 = vmatpush1.bf16.msra.mxu1 %v13297_v23  ;;  %6040 = vmatprep.subr.bf16.mxu0 %v13302_v9  ;;  %v13383_v23 = vld [vmem:[%s15447_s16 + $0x12ac] ss:$72 sps:$4 sm:$0xff]  }
 0x2a4   : > { %6341 = vmatprep.subr.bf16.mxu1 %v13305_v12  ;;  %v13386_v9 = vld [vmem:[%s15447_s16 + $0x134] ss:$72 sps:$4 sm:$0xff]   ;;  %v13384_v12 = vld [vmem:[%s15447_s16 + $0x130] ss:$72 sps:$4 sm:$0xff]  }
 0x2a6   : > { %6041 = vmatpush1.bf16.msra.mxu0 %v13300_v10  ;;  %v13389_v10 = vld [vmem:[%s15447_s16 + $0x133c] ss:$72 sps:$4 sm:$0xff]  }
 0x2a7   : > { %6342 = vmatpush1.bf16.msra.mxu1 %v13303_v14  ;;  %6042 = vmatprep.subr.bf16.mxu0 %v13308_v16  ;;  %v13387_v14 = vld [vmem:[%s15447_s16 + $0x1338] ss:$72 sps:$4 sm:$0xff]   ;;  %v13392_v16 = vld [vmem:[%s15447_s16 + $0x1c4] ss:$72 sps:$4 sm:$0xff]  }
 0x2a8   : > { %6343 = vmatprep.subr.bf16.mxu1 %v13311_v19  ;;  %v13395_v19 = vld [vmem:[%s15447_s16 + $0x13cc] ss:$72 sps:$4 sm:$0xff]  }
 0x2aa   : > { %6043 = vmatpush1.bf16.msra.mxu0 %v13306_v17  ;;  %v13390_v17 = vld [vmem:[%s15447_s16 + $0x1c0] ss:$72 sps:$4 sm:$0xff]  }
 0x2ab   : > { %6344 = vmatpush1.bf16.msra.mxu1 %v13309_v20  ;;  %6044 = vmatprep.subr.bf16.mxu0 %v13314_v21  ;;  %v13393_v20 = vld [vmem:[%s15447_s16 + $0x13c8] ss:$72 sps:$4 sm:$0xff]   ;;  %v13398_v21 = vld [vmem:[%s15447_s16 + $0x254] ss:$72 sps:$4 sm:$0xff]  }
 0x2ac   : > { %6345 = vmatprep.subr.bf16.mxu1 %v13317_v22  ;;  %v13396_v22 = vld [vmem:[%s15447_s16 + $0x250] ss:$72 sps:$4 sm:$0xff]  }
 0x2ae   : > { %6045 = vmatpush1.bf16.msra.mxu0 %v13312_v24  ;;  %v13401_v24 = vld [vmem:[%s15447_s16 + $0x145c] ss:$72 sps:$4 sm:$0xff]  }
 0x2af   : > { %6346 = vmatpush1.bf16.msra.mxu1 %v13315_v25  ;;  %6046 = vmatprep.subr.bf16.mxu0 %v13320_v29  ;;  %v13399_v25 = vld [vmem:[%s15447_s16 + $0x1458] ss:$72 sps:$4 sm:$0xff]   ;;  %v13404_v29 = vld [vmem:[%s15447_s16 + $0x2e4] ss:$72 sps:$4 sm:$0xff]  }
 0x2b0   : > { %6347 = vmatprep.subr.bf16.mxu1 %v13323_v26  ;;  %v13407_v26 = vld [vmem:[%s15447_s16 + $0x14ec] ss:$72 sps:$4 sm:$0xff]  }
 0x2b2   : > { %6047 = vmatpush1.bf16.msra.mxu0 %v13318_v37  ;;  %v13402_v37 = vld [vmem:[%s15447_s16 + $0x2e0] ss:$72 sps:$4 sm:$0xff]  }
 0x2b3   : > { %6348 = vmatpush1.bf16.msra.mxu1 %v13321_v28  ;;  %6048 = vmatprep.subr.bf16.mxu0 %v13326_v30  ;;  %v13405_v28 = vld [vmem:[%s15447_s16 + $0x14e8] ss:$72 sps:$4 sm:$0xff]   ;;  %v13410_v30 = vld [vmem:[%s15447_s16 + $0x374] ss:$72 sps:$4 sm:$0xff]  }
 0x2b4   : > { %6349 = vmatprep.subr.bf16.mxu1 %v13329_v32  ;;  %v13408_v32 = vld [vmem:[%s15447_s16 + $0x370] ss:$72 sps:$4 sm:$0xff]  }
 0x2b6   : > { %6049 = vmatpush1.bf16.msra.mxu0 %v13324_v27  ;;  %v13413_v27 = vld [vmem:[%s15447_s16 + $0x157c] ss:$72 sps:$4 sm:$0xff]  }
 0x2b7   : > { %6350 = vmatpush1.bf16.msra.mxu1 %v13327_v31  ;;  %6050 = vmatprep.subr.bf16.mxu0 %v13332_v34  ;;  %v13411_v31 = vld [vmem:[%s15447_s16 + $0x1578] ss:$72 sps:$4 sm:$0xff]   ;;  %v13416_v34 = vld [vmem:[%s15447_s16 + $0x404] ss:$72 sps:$4 sm:$0xff]  }
 0x2b8   : > { %6351 = vmatprep.subr.bf16.mxu1 %v13335_v36  ;;  %v13414_v36 = vld [vmem:[%s15447_s16 + $0x400] ss:$72 sps:$4 sm:$0xff]  }
 0x2ba   : > { %6051 = vmatpush1.bf16.msra.mxu0 %v13330_v35  ;;  %v13419_v35 = vld [vmem:[%s15447_s16 + $0x160c] ss:$72 sps:$4 sm:$0xff]  }
 0x2bb   : > { %6352 = vmatpush1.bf16.msra.mxu1 %v13333_v39  ;;  %6052 = vmatprep.subr.bf16.mxu0 %v13338_v42  ;;  %v13417_v39 = vld [vmem:[%s15447_s16 + $0x1608] ss:$72 sps:$4 sm:$0xff]   ;;  %v13422_v42 = vld [vmem:[%s15447_s16 + $0x494] ss:$72 sps:$4 sm:$0xff]  }
 0x2bc   : > { %6353 = vmatprep.subr.bf16.mxu1 %v13341_v44  ;;  %v13425_v44 = vld [vmem:[%s15447_s16 + $0x169c] ss:$72 sps:$4 sm:$0xff]  }
 0x2be   : > { %6053 = vmatpush1.bf16.msra.mxu0 %v13336_v43  ;;  %v13420_v43 = vld [vmem:[%s15447_s16 + $0x490] ss:$72 sps:$4 sm:$0xff]  }
 0x2bf   : > { %6354 = vmatpush1.bf16.msra.mxu1 %v13339_v45  ;;  %6054 = vmatprep.subr.bf16.mxu0 %v13344_v48  ;;  %v13423_v45 = vld [vmem:[%s15447_s16 + $0x1698] ss:$72 sps:$4 sm:$0xff]   ;;  %v13428_v48 = vld [vmem:[%s15447_s16 + $0x524] ss:$72 sps:$4 sm:$0xff]  }
 0x2c0   : > { %6355 = vmatprep.subr.bf16.mxu1 %v13347_v52  ;;  %v13431_v52 = vld [vmem:[%s15447_s16 + $0x172c] ss:$72 sps:$4 sm:$0xff]  }
 0x2c2   : > { %6055 = vmatpush1.bf16.msra.mxu0 %v13342_v50  ;;  %v13426_v50 = vld [vmem:[%s15447_s16 + $0x520] ss:$72 sps:$4 sm:$0xff]  }
 0x2c3   : > { %6356 = vmatpush1.bf16.msra.mxu1 %v13345_v53  ;;  %6056 = vmatprep.subr.bf16.mxu0 %v13350_v54  ;;  %v13429_v53 = vld [vmem:[%s15447_s16 + $0x1728] ss:$72 sps:$4 sm:$0xff]   ;;  %v13434_v54 = vld [vmem:[%s15447_s16 + $0x5b4] ss:$72 sps:$4 sm:$0xff]  }
 0x2c4   : > { %6357 = vmatprep.subr.bf16.mxu1 %v13353_v57  ;;  %v13437_v57 = vld [vmem:[%s15447_s16 + $0x17bc] ss:$72 sps:$4 sm:$0xff]  }
 0x2c6   : > { %6057 = vmatpush1.bf16.msra.mxu0 %v13348_v56  ;;  %v13432_v56 = vld [vmem:[%s15447_s16 + $0x5b0] ss:$72 sps:$4 sm:$0xff]  }
 0x2c7   : > { %6358 = vmatpush1.bf16.msra.mxu1 %v13351_v58  ;;  %6058 = vmatprep.subr.bf16.mxu0 %v13356_v59  ;;  %v13435_v58 = vld [vmem:[%s15447_s16 + $0x17b8] ss:$72 sps:$4 sm:$0xff]   ;;  %v13440_v59 = vld [vmem:[%s15447_s16 + $0x644] ss:$72 sps:$4 sm:$0xff]  }
 0x2c8   : > { %6359 = vmatprep.subr.bf16.mxu1 %v13359_v61  ;;  %v13443_v61 = vld [vmem:[%s15447_s16 + $0x184c] ss:$72 sps:$4 sm:$0xff]  }
 0x2ca   : > { %6059 = vmatpush1.bf16.msra.mxu0 %v13354_v60  ;;  %v13438_v60 = vld [vmem:[%s15447_s16 + $0x640] ss:$72 sps:$4 sm:$0xff]  }
 0x2cb   : > { %6360 = vmatpush1.bf16.msra.mxu1 %v13357_v62  ;;  %6060 = vmatprep.subr.bf16.mxu0 %v13362_v63  ;;  %v13441_v62 = vld [vmem:[%s15447_s16 + $0x1848] ss:$72 sps:$4 sm:$0xff]   ;;  %v13446_v63 = vld [vmem:[%s15447_s16 + $0x6d4] ss:$72 sps:$4 sm:$0xff]  }
 0x2cc   : > { %6361 = vmatprep.subr.bf16.mxu1 %v13365_v1  ;;  %v13449_v1 = vld [vmem:[%s15447_s16 + $0x18dc] ss:$72 sps:$4 sm:$0xff]  }
 0x2ce   : > { %6061 = vmatpush1.bf16.msra.mxu0 %v13360_v0  ;;  %v13444_v0 = vld [vmem:[%s15447_s16 + $0x6d0] ss:$72 sps:$4 sm:$0xff]  }
 0x2cf   : > { %6362 = vmatpush1.bf16.msra.mxu1 %v13363_v2  ;;  %6062 = vmatprep.subr.bf16.mxu0 %v13368_v3  ;;  %v13447_v2 = vld [vmem:[%s15447_s16 + $0x18d8] ss:$72 sps:$4 sm:$0xff]   ;;  %v13452_v3 = vld [vmem:[%s15447_s16 + $0x764] ss:$72 sps:$4 sm:$0xff]  }
 0x2d0   : > { %6363 = vmatprep.subr.bf16.mxu1 %v13371_v5  ;;  %v13455_v5 = vld [vmem:[%s15447_s16 + $0x196c] ss:$72 sps:$4 sm:$0xff]  }
 0x2d2   : > { %6063 = vmatpush1.bf16.msra.mxu0 %v13366_v4  ;;  %v13450_v4 = vld [vmem:[%s15447_s16 + $0x760] ss:$72 sps:$4 sm:$0xff]  }
 0x2d3   : > { %6364 = vmatpush1.bf16.msra.mxu1 %v13369_v13  ;;  %6161 = vmatprep.subr.bf16.mxu0 %v13374_v18  ;;  %v13453_v13 = vld [vmem:[%s15447_s16 + $0x1968] ss:$72 sps:$4 sm:$0xff]   ;;  %v13458_v18 = vld [vmem:[%s15447_s16 + $0x7f4] ss:$72 sps:$4 sm:$0xff]  }
 0x2d4   : > { %6376 = vmatprep.subr.bf16.mxu1 %v13377_v11  ;;  %v13461_v11 = vld [vmem:[%s15447_s16 + $0x19fc] ss:$72 sps:$4 sm:$0xff]  }
 0x2d5   : > { %6065 = vmatmul.mubr.bf16.vlgmr.msra.gmra.mrb[4].mxu0 %v15670_v46 }
 0x2d6   : > { %6366 = vmatmul.mubr.bf16.vlgmr.msra.gmra.mrb[4].mxu1 %v15672_v47  ;;  %6162 = vmatpush1.bf16.msra.mxu0 %v13372_v6  ;;  %v13456_v6 = vld [vmem:[%s15447_s16 + $0x7f0] ss:$72 sps:$4 sm:$0xff]  }
 0x2d7   : > { %6193 = vmatprep.mubr.bf16.mxu0 %v15664_v40  ;;  %6377 = vmatpush1.bf16.msra.mxu1 %v13375_v15  ;;  %v13459_v15 = vld [vmem:[%s15447_s16 + $0x19f8] ss:$72 sps:$4 sm:$0xff]  }
 0x2d8   : > { %6408 = vmatprep.mubr.bf16.mxu1 %v15678_v51  ;;  %6163 = vmatprep.subr.bf16.mxu0 %v13380_v7  ;;  %v13464_v7 = vld [vmem:[%s15447_s16 + $0x884] ss:$72 sps:$4 sm:$0xff]  }
 0x2d9   : > { %6378 = vmatprep.subr.bf16.mxu1 %v13383_v23  ;;  %v13465_v23 = vld [vmem:[%s15447_s16 + $0x1a88] ss:$72 sps:$4 sm:$0xff]  }
 0x2da   : > { %6164 = vmatpush1.bf16.msra.mxu0 %v13378_v33  ;;  %v13462_v33 = vld [vmem:[%s15447_s16 + $0x880] ss:$72 sps:$4 sm:$0xff]  }
 0x2db   : > { %6379 = vmatpush1.bf16.msra.mxu1 %v13381_v8  ;;  %6165 = vmatprep.subr.bf16.mxu0 %v13386_v9  ;;  %v13467_v8 = vld [vmem:[%s15447_s16 + $0x1a8c] ss:$72 sps:$4 sm:$0xff]  }
 0x2dc   : > { %6380 = vmatprep.subr.bf16.mxu1 %v13389_v10  ;;  %v13470_v9 = vld [vmem:[%s15447_s16 + $0x914] ss:$72 sps:$4 sm:$0xff]  }
 0x2dd   : > { %v13473_v10 = vld [vmem:[%s15447_s16 + $0x2c] ss:$72 sps:$4 sm:$0xff]  }
 0x2de   : > { %6166 = vmatpush1.bf16.msra.mxu0 %v13384_v12  ;;  %v13468_v12 = vld [vmem:[%s15447_s16 + $0x910] ss:$72 sps:$4 sm:$0xff]  }
 0x2df   : > { %6381 = vmatpush1.bf16.msra.mxu1 %v13387_v14  ;;  %6167 = vmatprep.subr.bf16.mxu0 %v13392_v16  ;;  %v13471_v14 = vld [vmem:[%s15447_s16 + $0x28] ss:$72 sps:$4 sm:$0xff]   ;;  %v13476_v16 = vld [vmem:[%s15447_s16 + $0x9a4] ss:$72 sps:$4 sm:$0xff]  }
 0x2e0   : > { %6382 = vmatprep.subr.bf16.mxu1 %v13395_v19  ;;  %v13474_v19 = vld [vmem:[%s15447_s16 + $0x9a0] ss:$72 sps:$4 sm:$0xff]  }
 0x2e2   : > { %6168 = vmatpush1.bf16.msra.mxu0 %v13390_v17  ;;  %v13479_v17 = vld [vmem:[%s15447_s16 + $0xbc] ss:$72 sps:$4 sm:$0xff]  }
 0x2e3   : > { %6383 = vmatpush1.bf16.msra.mxu1 %v13393_v20  ;;  %6169 = vmatprep.subr.bf16.mxu0 %v13398_v21  ;;  %v13477_v20 = vld [vmem:[%s15447_s16 + $0xb8] ss:$72 sps:$4 sm:$0xff]   ;;  %v13482_v21 = vld [vmem:[%s15447_s16 + $0xa34] ss:$72 sps:$4 sm:$0xff]  }
 0x2e4   : > { %6384 = vmatprep.subr.bf16.mxu1 %v13401_v24  ;;  %v13480_v24 = vld [vmem:[%s15447_s16 + $0xa30] ss:$72 sps:$4 sm:$0xff]  }
 0x2e6   : > { %6170 = vmatpush1.bf16.msra.mxu0 %v13396_v22  ;;  %v13485_v22 = vld [vmem:[%s15447_s16 + $0x14c] ss:$72 sps:$4 sm:$0xff]  }
 0x2e7   : > { %6385 = vmatpush1.bf16.msra.mxu1 %v13399_v25  ;;  %6171 = vmatprep.subr.bf16.mxu0 %v13404_v29  ;;  %v13483_v25 = vld [vmem:[%s15447_s16 + $0x148] ss:$72 sps:$4 sm:$0xff]   ;;  %v13488_v29 = vld [vmem:[%s15447_s16 + $0xac4] ss:$72 sps:$4 sm:$0xff]  }
 0x2e8   : > { %6386 = vmatprep.subr.bf16.mxu1 %v13407_v26  ;;  %v13486_v26 = vld [vmem:[%s15447_s16 + $0xac0] ss:$72 sps:$4 sm:$0xff]  }
 0x2ea   : > { %6172 = vmatpush1.bf16.msra.mxu0 %v13402_v37  ;;  %v13491_v37 = vld [vmem:[%s15447_s16 + $0x1dc] ss:$72 sps:$4 sm:$0xff]  }
 0x2eb   : > { %6387 = vmatpush1.bf16.msra.mxu1 %v13405_v28  ;;  %6173 = vmatprep.subr.bf16.mxu0 %v13410_v30  ;;  %v13489_v28 = vld [vmem:[%s15447_s16 + $0x1d8] ss:$72 sps:$4 sm:$0xff]   ;;  %v13494_v30 = vld [vmem:[%s15447_s16 + $0xb54] ss:$72 sps:$4 sm:$0xff]  }
 0x2ec   : > { %6388 = vmatprep.subr.bf16.mxu1 %v13413_v27  ;;  %v13497_v27 = vld [vmem:[%s15447_s16 + $0x26c] ss:$72 sps:$4 sm:$0xff]  }
 0x2ee   : > { %6174 = vmatpush1.bf16.msra.mxu0 %v13408_v32  ;;  %v13492_v32 = vld [vmem:[%s15447_s16 + $0xb50] ss:$72 sps:$4 sm:$0xff]  }
 0x2ef   : > { %6389 = vmatpush1.bf16.msra.mxu1 %v13411_v31  ;;  %6175 = vmatprep.subr.bf16.mxu0 %v13416_v34  ;;  %v13495_v31 = vld [vmem:[%s15447_s16 + $0x268] ss:$72 sps:$4 sm:$0xff]   ;;  %v13500_v34 = vld [vmem:[%s15447_s16 + $0xbe4] ss:$72 sps:$4 sm:$0xff]  }
 0x2f0   : > { %6390 = vmatprep.subr.bf16.mxu1 %v13419_v35  ;;  %v13503_v35 = vld [vmem:[%s15447_s16 + $0x2fc] ss:$72 sps:$4 sm:$0xff]  }
 0x2f2   : > { %6176 = vmatpush1.bf16.msra.mxu0 %v13414_v36  ;;  %v13498_v36 = vld [vmem:[%s15447_s16 + $0xbe0] ss:$72 sps:$4 sm:$0xff]  }
 0x2f3   : > { %6391 = vmatpush1.bf16.msra.mxu1 %v13417_v39  ;;  %6177 = vmatprep.subr.bf16.mxu0 %v13422_v42  ;;  %v13501_v39 = vld [vmem:[%s15447_s16 + $0x2f8] ss:$72 sps:$4 sm:$0xff]   ;;  %v13506_v42 = vld [vmem:[%s15447_s16 + $0xc74] ss:$72 sps:$4 sm:$0xff]  }
 0x2f4   : > { %6392 = vmatprep.subr.bf16.mxu1 %v13425_v44  ;;  %v13509_v44 = vld [vmem:[%s15447_s16 + $0x38c] ss:$72 sps:$4 sm:$0xff]  }
 0x2f6   : > { %6178 = vmatpush1.bf16.msra.mxu0 %v13420_v43 }
 0x2f7   : > { %6393 = vmatpush1.bf16.msra.mxu1 %v13423_v45  ;;  %6179 = vmatprep.subr.bf16.mxu0 %v13428_v48 }
 0x2f8   : > { %6394 = vmatprep.subr.bf16.mxu1 %v13431_v52 }
 0x2fa   : > { %6180 = vmatpush1.bf16.msra.mxu0 %v13426_v50  ;;  %v13504_v50 = vld [vmem:[%s15447_s16 + $0xc70] ss:$72 sps:$4 sm:$0xff]  }
 0x2fb   : > { %6395 = vmatpush1.bf16.msra.mxu1 %v13429_v53  ;;  %6181 = vmatprep.subr.bf16.mxu0 %v13434_v54  ;;  %v13507_v53 = vld [vmem:[%s15447_s16 + $0x388] ss:$72 sps:$4 sm:$0xff]   ;;  %v13512_v54 = vld [vmem:[%s15447_s16 + $0xd04] ss:$72 sps:$4 sm:$0xff]  }
 0x2fc   : > { %6396 = vmatprep.subr.bf16.mxu1 %v13437_v57  ;;  %v13510_v57 = vld [vmem:[%s15447_s16 + $0xd00] ss:$72 sps:$4 sm:$0xff]  }
 0x2fe   : > { %6182 = vmatpush1.bf16.msra.mxu0 %v13432_v56  ;;  %v13515_v56 = vld [vmem:[%s15447_s16 + $0x41c] ss:$72 sps:$4 sm:$0xff]  }
 0x2ff   : > { %6397 = vmatpush1.bf16.msra.mxu1 %v13435_v58  ;;  %6183 = vmatprep.subr.bf16.mxu0 %v13440_v59  ;;  %v13513_v58 = vld [vmem:[%s15447_s16 + $0x418] ss:$72 sps:$4 sm:$0xff]   ;;  %v13518_v59 = vld [vmem:[%s15447_s16 + $0xd94] ss:$72 sps:$4 sm:$0xff]  }
 0x300   : > { %6398 = vmatprep.subr.bf16.mxu1 %v13443_v61  ;;  %v13516_v61 = vld [vmem:[%s15447_s16 + $0xd90] ss:$72 sps:$4 sm:$0xff]  }
 0x302   : > { %6184 = vmatpush1.bf16.msra.mxu0 %v13438_v60  ;;  %v13521_v60 = vld [vmem:[%s15447_s16 + $0x4ac] ss:$72 sps:$4 sm:$0xff]  }
 0x303   : > { %6399 = vmatpush1.bf16.msra.mxu1 %v13441_v62  ;;  %6185 = vmatprep.subr.bf16.mxu0 %v13446_v63  ;;  %v13519_v62 = vld [vmem:[%s15447_s16 + $0x4a8] ss:$72 sps:$4 sm:$0xff]   ;;  %v13524_v63 = vld [vmem:[%s15447_s16 + $0xe24] ss:$72 sps:$4 sm:$0xff]  }
 0x304   : > { %6400 = vmatprep.subr.bf16.mxu1 %v13449_v1  ;;  %v13522_v1 = vld [vmem:[%s15447_s16 + $0xe20] ss:$72 sps:$4 sm:$0xff]  }
 0x306   : > { %6186 = vmatpush1.bf16.msra.mxu0 %v13444_v0  ;;  %v13527_v0 = vld [vmem:[%s15447_s16 + $0x53c] ss:$72 sps:$4 sm:$0xff]  }
 0x307   : > { %6401 = vmatpush1.bf16.msra.mxu1 %v13447_v2  ;;  %6187 = vmatprep.subr.bf16.mxu0 %v13452_v3  ;;  %v13525_v2 = vld [vmem:[%s15447_s16 + $0x538] ss:$72 sps:$4 sm:$0xff]   ;;  %v13530_v3 = vld [vmem:[%s15447_s16 + $0xeb4] ss:$72 sps:$4 sm:$0xff]  }
 0x308   : > { %6402 = vmatprep.subr.bf16.mxu1 %v13455_v5  ;;  %v13528_v5 = vld [vmem:[%s15447_s16 + $0xeb0] ss:$72 sps:$4 sm:$0xff]  }
 0x30a   : > { %6188 = vmatpush1.bf16.msra.mxu0 %v13450_v4  ;;  %v13533_v4 = vld [vmem:[%s15447_s16 + $0x5cc] ss:$72 sps:$4 sm:$0xff]  }
 0x30b   : > { %6403 = vmatpush1.bf16.msra.mxu1 %v13453_v13  ;;  %6189 = vmatprep.subr.bf16.mxu0 %v13458_v18  ;;  %v13531_v13 = vld [vmem:[%s15447_s16 + $0x5c8] ss:$72 sps:$4 sm:$0xff]   ;;  %v13536_v18 = vld [vmem:[%s15447_s16 + $0xf44] ss:$72 sps:$4 sm:$0xff]  }
 0x30c   : > { %6404 = vmatprep.subr.bf16.mxu1 %v13461_v11  ;;  %v13534_v11 = vld [vmem:[%s15447_s16 + $0xf40] ss:$72 sps:$4 sm:$0xff]  }
 0x30e   : > { %6190 = vmatpush1.bf16.msra.mxu0 %v13456_v6  ;;  %v13539_v6 = vld [vmem:[%s15447_s16 + $0x65c] ss:$72 sps:$4 sm:$0xff]  }
 0x30f   : > { %6405 = vmatpush1.bf16.msra.mxu1 %v13459_v15  ;;  %6191 = vmatprep.subr.bf16.mxu0 %v13464_v7  ;;  %v13537_v15 = vld [vmem:[%s15447_s16 + $0x658] ss:$72 sps:$4 sm:$0xff]   ;;  %v13542_v7 = vld [vmem:[%s15447_s16 + $0xfd4] ss:$72 sps:$4 sm:$0xff]  }
 0x310   : > { %6406 = vmatprep.subr.bf16.mxu1 %v13467_v8  ;;  %v13540_v8 = vld [vmem:[%s15447_s16 + $0xfd0] ss:$72 sps:$4 sm:$0xff]  }
 0x312   : > { %6192 = vmatpush1.bf16.msra.mxu0 %v13462_v33  ;;  %v13545_v33 = vld [vmem:[%s15447_s16 + $0x6ec] ss:$72 sps:$4 sm:$0xff]  }
 0x313   : > { %6407 = vmatpush1.bf16.msra.mxu1 %v13465_v23  ;;  %6204 = vmatprep.subr.bf16.mxu0 %v13470_v9  ;;  %v13543_v23 = vld [vmem:[%s15447_s16 + $0x6e8] ss:$72 sps:$4 sm:$0xff]   ;;  %v13548_v9 = vld [vmem:[%s15447_s16 + $0x1064] ss:$72 sps:$4 sm:$0xff]  }
 0x314   : > { %6548 = vmatprep.subr.bf16.mxu1 %v13473_v10  ;;  %v13551_v10 = vld [vmem:[%s15447_s16 + $0x77c] ss:$72 sps:$4 sm:$0xff]  }
 0x315   : > { %6194 = vmatmul.mubr.bf16.vlgmr.msra.gmra.mrb[8].mxu0 %v15670_v46 }
 0x316   : > { %6409 = vmatmul.mubr.bf16.vlgmr.msra.gmra.mrb[4].mxu1 %v15683_v55  ;;  %6205 = vmatpush1.bf16.msra.mxu0 %v13468_v12  ;;  %v13546_v12 = vld [vmem:[%s15447_s16 + $0x1060] ss:$72 sps:$4 sm:$0xff]  }
 0x317   : > { %6236 = vmatprep.mubr.bf16.mxu0 %v15666_v49  ;;  %6549 = vmatpush1.bf16.msra.mxu1 %v13471_v14  ;;  %v13549_v14 = vld [vmem:[%s15447_s16 + $0x778] ss:$72 sps:$4 sm:$0xff]  }
 0x318   : > { %6580 = vmatprep.mubr.bf16.mxu1 %v15664_v40  ;;  %6206 = vmatprep.subr.bf16.mxu0 %v13476_v16  ;;  %v13554_v16 = vld [vmem:[%s15447_s16 + $0x10f4] ss:$72 sps:$4 sm:$0xff]  }
 0x319   : > { %6550 = vmatprep.subr.bf16.mxu1 %v13479_v17  ;;  %v13557_v17 = vld [vmem:[%s15447_s16 + $0x80c] ss:$72 sps:$4 sm:$0xff]  }
 0x31a   : > { %6207 = vmatpush1.bf16.msra.mxu0 %v13474_v19  ;;  %v13552_v19 = vld [vmem:[%s15447_s16 + $0x10f0] ss:$72 sps:$4 sm:$0xff]  }
 0x31b   : > { %6551 = vmatpush1.bf16.msra.mxu1 %v13477_v20  ;;  %6208 = vmatprep.subr.bf16.mxu0 %v13482_v21  ;;  %v13555_v20 = vld [vmem:[%s15447_s16 + $0x808] ss:$72 sps:$4 sm:$0xff]   ;;  %v13560_v21 = vld [vmem:[%s15447_s16 + $0x1184] ss:$72 sps:$4 sm:$0xff]  }
 0x31c   : > { %6552 = vmatprep.subr.bf16.mxu1 %v13485_v22  ;;  %v13563_v22 = vld [vmem:[%s15447_s16 + $0x89c] ss:$72 sps:$4 sm:$0xff]  }
 0x31e   : > { %6209 = vmatpush1.bf16.msra.mxu0 %v13480_v24  ;;  %v13558_v24 = vld [vmem:[%s15447_s16 + $0x1180] ss:$72 sps:$4 sm:$0xff]  }
 0x31f   : > { %6553 = vmatpush1.bf16.msra.mxu1 %v13483_v25  ;;  %6210 = vmatprep.subr.bf16.mxu0 %v13488_v29  ;;  %v13561_v25 = vld [vmem:[%s15447_s16 + $0x898] ss:$72 sps:$4 sm:$0xff]   ;;  %v13566_v29 = vld [vmem:[%s15447_s16 + $0x1214] ss:$72 sps:$4 sm:$0xff]  }
 0x320   : > { %6554 = vmatprep.subr.bf16.mxu1 %v13491_v37  ;;  %v13569_v37 = vld [vmem:[%s15447_s16 + $0x92c] ss:$72 sps:$4 sm:$0xff]  }
 0x322   : > { %6211 = vmatpush1.bf16.msra.mxu0 %v13486_v26  ;;  %v13564_v26 = vld [vmem:[%s15447_s16 + $0x1210] ss:$72 sps:$4 sm:$0xff]  }
 0x323   : > { %6555 = vmatpush1.bf16.msra.mxu1 %v13489_v28  ;;  %6212 = vmatprep.subr.bf16.mxu0 %v13494_v30  ;;  %v13567_v28 = vld [vmem:[%s15447_s16 + $0x928] ss:$72 sps:$4 sm:$0xff]   ;;  %v13572_v30 = vld [vmem:[%s15447_s16 + $0x12a4] ss:$72 sps:$4 sm:$0xff]  }
 0x324   : > { %6556 = vmatprep.subr.bf16.mxu1 %v13497_v27  ;;  %v13575_v27 = vld [vmem:[%s15447_s16 + $0x9bc] ss:$72 sps:$4 sm:$0xff]  }
 0x326   : > { %6213 = vmatpush1.bf16.msra.mxu0 %v13492_v32  ;;  %v13570_v32 = vld [vmem:[%s15447_s16 + $0x12a0] ss:$72 sps:$4 sm:$0xff]  }
 0x327   : > { %6557 = vmatpush1.bf16.msra.mxu1 %v13495_v31  ;;  %6214 = vmatprep.subr.bf16.mxu0 %v13500_v34  ;;  %v13573_v31 = vld [vmem:[%s15447_s16 + $0x9b8] ss:$72 sps:$4 sm:$0xff]   ;;  %v13578_v34 = vld [vmem:[%s15447_s16 + $0x1334] ss:$72 sps:$4 sm:$0xff]  }
 0x328   : > { %v15975_v43 = vpop.f32.mrb[0].mxu1  ;;  %6558 = vmatprep.subr.bf16.mxu1 %v13503_v35  ;;  %v13581_v35 = vld [vmem:[%s15447_s16 + $0xa4c] ss:$72 sps:$4 sm:$0xff]  }
 0x329   : > { %v15978_v45 = vpop.f32.mrb[1].mxu1 }
 0x32a   : > { %v15980_v48 = vpop.f32.mrb[2].mxu1  ;;  %6215 = vmatpush1.bf16.msra.mxu0 %v13498_v36  ;;  %v13576_v36 = vld [vmem:[%s15447_s16 + $0x1330] ss:$72 sps:$4 sm:$0xff]  }
 0x32b   : > { %6559 = vmatpush1.bf16.msra.mxu1 %v13501_v39  ;;  %v15983_v52 = vpop.f32.mrb[3].mxu1  ;;  %6216 = vmatprep.subr.bf16.mxu0 %v13506_v42  ;;  %v13579_v39 = vld [vmem:[%s15447_s16 + $0xa48] ss:$72 sps:$4 sm:$0xff]   ;;  %v13584_v42 = vld [vmem:[%s15447_s16 + $0x13c4] ss:$72 sps:$4 sm:$0xff]  }
 0x32c   : > { %6560 = vmatprep.subr.bf16.mxu1 %v13509_v44  ;;  %v13587_v44 = vld [vmem:[%s15447_s16 + $0xadc] ss:$72 sps:$4 sm:$0xff]  }
 0x32e   : > { %6217 = vmatpush1.bf16.msra.mxu0 %v13504_v50  ;;  %v13582_v50 = vld [vmem:[%s15447_s16 + $0x13c0] ss:$72 sps:$4 sm:$0xff]  }
 0x32f   : > { %6561 = vmatpush1.bf16.msra.mxu1 %v13507_v53  ;;  %6218 = vmatprep.subr.bf16.mxu0 %v13512_v54  ;;  %v13585_v53 = vld [vmem:[%s15447_s16 + $0xad8] ss:$72 sps:$4 sm:$0xff]   ;;  %v13590_v54 = vld [vmem:[%s15447_s16 + $0x1454] ss:$72 sps:$4 sm:$0xff]  }
 0x330   : > { %6562 = vmatprep.subr.bf16.mxu1 %v13515_v56  ;;  %v13593_v56 = vld [vmem:[%s15447_s16 + $0xb6c] ss:$72 sps:$4 sm:$0xff]  }
 0x332   : > { %6219 = vmatpush1.bf16.msra.mxu0 %v13510_v57  ;;  %v13588_v57 = vld [vmem:[%s15447_s16 + $0x1450] ss:$72 sps:$4 sm:$0xff]  }
 0x333   : > { %6563 = vmatpush1.bf16.msra.mxu1 %v13513_v58  ;;  %6220 = vmatprep.subr.bf16.mxu0 %v13518_v59  ;;  %v13591_v58 = vld [vmem:[%s15447_s16 + $0xb68] ss:$72 sps:$4 sm:$0xff]   ;;  %v16047_v59 = vsub.s32 0, %v15621_v38 }
 0x334   : > { %6564 = vmatprep.subr.bf16.mxu1 %v13521_v60  ;;  %v13596_v60 = vld [vmem:[%s15447_s16 + $0x14e4] ss:$72 sps:$4 sm:$0xff]  }
 0x336   : > { %6221 = vmatpush1.bf16.msra.mxu0 %v13516_v61  ;;  %v16051_v61 = vld [vmem:[%s15468_s19] sm:$0xff] }
 0x337   : > { %6565 = vmatpush1.bf16.msra.mxu1 %v13519_v62  ;;  %6222 = vmatprep.subr.bf16.mxu0 %v13524_v63  ;;  %v13599_v62 = vld [vmem:[%s15447_s16 + $0xbfc] ss:$72 sps:$4 sm:$0xff]  }
 0x338   : > { %6566 = vmatprep.subr.bf16.mxu1 %v13527_v0  ;;  %v16055_v63 = vld [vmem:[%s15468_s19 + $0x8] sm:$0xff] }
 0x339   : > { %v13594_v0 = vld [vmem:[%s15447_s16 + $0x14e0] ss:$72 sps:$4 sm:$0xff]  }
 0x33a   : > { %6223 = vmatpush1.bf16.msra.mxu0 %v13522_v1  ;;  %v1514_v1 = vrot.slane %v16051_v61, %v16047_v59 }
 0x33b   : > { %6567 = vmatpush1.bf16.msra.mxu1 %v13525_v2  ;;  %6224 = vmatprep.subr.bf16.mxu0 %v13530_v3  ;;  %v13597_v2 = vld [vmem:[%s15447_s16 + $0xbf8] ss:$72 sps:$4 sm:$0xff]   ;;  %v13602_v3 = vld [vmem:[%s15447_s16 + $0x1574] ss:$72 sps:$4 sm:$0xff]  }
 0x33c   : > { %6568 = vmatprep.subr.bf16.mxu1 %v13533_v4 }
 0x33e   : > { %6225 = vmatpush1.bf16.msra.mxu0 %v13528_v5  ;;  %v1518_v5 = vrot.slane %v16055_v63, %v16047_v59 }
 0x33f   : > { %6569 = vmatpush1.bf16.msra.mxu1 %v13531_v13  ;;  %6226 = vmatprep.subr.bf16.mxu0 %v13536_v18  ;;  %v13605_v13 = vld [vmem:[%s15447_s16 + $0xc8c] ss:$72 sps:$4 sm:$0xff]  }
 0x340   : > { %6570 = vmatprep.subr.bf16.mxu1 %v13539_v6 }
 0x342   : > { %6227 = vmatpush1.bf16.msra.mxu0 %v13534_v11  ;;  %v13600_v11 = vld [vmem:[%s15447_s16 + $0x1570] ss:$72 sps:$4 sm:$0xff]  }
 0x343   : > { %6571 = vmatpush1.bf16.msra.mxu1 %v13537_v15  ;;  %6228 = vmatprep.subr.bf16.mxu0 %v13542_v7 }
 0x344   : > { %6572 = vmatprep.subr.bf16.mxu1 %v13545_v33 }
 0x346   : > { %6229 = vmatpush1.bf16.msra.mxu0 %v13540_v8  ;;  %v13603_v8 = vld [vmem:[%s15447_s16 + $0xc88] ss:$72 sps:$4 sm:$0xff]  }
 0x347   : > { %6573 = vmatpush1.bf16.msra.mxu1 %v13543_v23  ;;  %6230 = vmatprep.subr.bf16.mxu0 %v13548_v9  ;;  %v13608_v23 = vld [vmem:[%s15447_s16 + $0x1604] ss:$72 sps:$4 sm:$0xff]  }
 0x348   : > { %6574 = vmatprep.subr.bf16.mxu1 %v13551_v10 }
 0x34a   : > { %6231 = vmatpush1.bf16.msra.mxu0 %v13546_v12  ;;  %v13611_v12 = vld [vmem:[%s15447_s16 + $0xd1c] ss:$72 sps:$4 sm:$0xff]  }
 0x34b   : > { %6575 = vmatpush1.bf16.msra.mxu1 %v13549_v14  ;;  %6232 = vmatprep.subr.bf16.mxu0 %v13554_v16 }
 0x34c   : > { %6576 = vmatprep.subr.bf16.mxu1 %v13557_v17  ;;  %v13606_v17 = vld [vmem:[%s15447_s16 + $0x1600] ss:$72 sps:$4 sm:$0xff]  }
 0x34e   : > { %6233 = vmatpush1.bf16.msra.mxu0 %v13552_v19  ;;  %v13609_v19 = vld [vmem:[%s15447_s16 + $0xd18] ss:$72 sps:$4 sm:$0xff]  }
 0x34f   : > { %6577 = vmatpush1.bf16.msra.mxu1 %v13555_v20  ;;  %6234 = vmatprep.subr.bf16.mxu0 %v13560_v21  ;;  %v13614_v20 = vld [vmem:[%s15447_s16 + $0x1694] ss:$72 sps:$4 sm:$0xff]  }
 0x350   : > { %6578 = vmatprep.subr.bf16.mxu1 %v13563_v22  ;;  %v13617_v21 = vld [vmem:[%s15447_s16 + $0xdac] ss:$72 sps:$4 sm:$0xff]   ;;  %v13612_v22 = vld [vmem:[%s15447_s16 + $0x1690] ss:$72 sps:$4 sm:$0xff]  }
 0x352   : > { %6235 = vmatpush1.bf16.msra.mxu0 %v13558_v24  ;;  %v13615_v24 = vld [vmem:[%s15447_s16 + $0xda8] ss:$72 sps:$4 sm:$0xff]  }
 0x353   : > { %6579 = vmatpush1.bf16.msra.mxu1 %v13561_v25  ;;  %6247 = vmatprep.subr.bf16.mxu0 %v13566_v29  ;;  %v13620_v25 = vld [vmem:[%s15447_s16 + $0x1724] ss:$72 sps:$4 sm:$0xff]  }
 0x354   : > { %6591 = vmatprep.subr.bf16.mxu1 %v13569_v37  ;;  %v13623_v29 = vld [vmem:[%s15447_s16 + $0xe3c] ss:$72 sps:$4 sm:$0xff]   ;;  %v13618_v37 = vld [vmem:[%s15447_s16 + $0x1720] ss:$72 sps:$4 sm:$0xff]  }
 0x355   : > { %6237 = vmatmul.mubr.bf16.vlgmr.msra.gmra.mrb[8].mxu0 %v15672_v47 }
 0x356   : > { %6581 = vmatmul.mubr.bf16.vlgmr.msra.gmra.mrb[8].mxu1 %v15670_v46  ;;  %6248 = vmatpush1.bf16.msra.mxu0 %v13564_v26  ;;  %v13621_v26 = vld [vmem:[%s15447_s16 + $0xe38] ss:$72 sps:$4 sm:$0xff]  }
 0x357   : > { %6279 = vmatprep.mubr.bf16.mxu0 %v15678_v51  ;;  %6592 = vmatpush1.bf16.msra.mxu1 %v13567_v28  ;;  %v13626_v28 = vld [vmem:[%s15447_s16 + $0x17b4] ss:$72 sps:$4 sm:$0xff]  }
 0x358   : > { %6623 = vmatprep.mubr.bf16.mxu1 %v15666_v49  ;;  %6249 = vmatprep.subr.bf16.mxu0 %v13572_v30  ;;  %v13629_v30 = vld [vmem:[%s15447_s16 + $0xecc] ss:$72 sps:$4 sm:$0xff]  }
 0x359   : > { %6593 = vmatprep.subr.bf16.mxu1 %v13575_v27  ;;  %v13624_v27 = vld [vmem:[%s15447_s16 + $0x17b0] ss:$72 sps:$4 sm:$0xff]  }
 0x35a   : > { %6250 = vmatpush1.bf16.msra.mxu0 %v13570_v32  ;;  %v13627_v32 = vld [vmem:[%s15447_s16 + $0xec8] ss:$72 sps:$4 sm:$0xff]  }
 0x35b   : > { %6594 = vmatpush1.bf16.msra.mxu1 %v13573_v31  ;;  %6251 = vmatprep.subr.bf16.mxu0 %v13578_v34  ;;  %v13632_v31 = vld [vmem:[%s15447_s16 + $0x1844] ss:$72 sps:$4 sm:$0xff]  }
 0x35c   : > { %6595 = vmatprep.subr.bf16.mxu1 %v13581_v35  ;;  %v13635_v34 = vld [vmem:[%s15447_s16 + $0xf5c] ss:$72 sps:$4 sm:$0xff]   ;;  %v13630_v35 = vld [vmem:[%s15447_s16 + $0x1840] ss:$72 sps:$4 sm:$0xff]  }
 0x35e   : > { %6252 = vmatpush1.bf16.msra.mxu0 %v13576_v36  ;;  %v13633_v36 = vld [vmem:[%s15447_s16 + $0xf58] ss:$72 sps:$4 sm:$0xff]  }
 0x35f   : > { %6596 = vmatpush1.bf16.msra.mxu1 %v13579_v39  ;;  %6253 = vmatprep.subr.bf16.mxu0 %v13584_v42  ;;  %v13638_v39 = vld [vmem:[%s15447_s16 + $0x18d4] ss:$72 sps:$4 sm:$0xff]  }
 0x360   : > { %6597 = vmatprep.subr.bf16.mxu1 %v13587_v44  ;;  %v13641_v42 = vld [vmem:[%s15447_s16 + $0xfec] ss:$72 sps:$4 sm:$0xff]   ;;  %v13636_v44 = vld [vmem:[%s15447_s16 + $0x18d0] ss:$72 sps:$4 sm:$0xff]  }
 0x362   : > { %6254 = vmatpush1.bf16.msra.mxu0 %v13582_v50  ;;  %v13639_v50 = vld [vmem:[%s15447_s16 + $0xfe8] ss:$72 sps:$4 sm:$0xff]  }
 0x363   : > { %6598 = vmatpush1.bf16.msra.mxu1 %v13585_v53  ;;  %6255 = vmatprep.subr.bf16.mxu0 %v13590_v54  ;;  %v13644_v53 = vld [vmem:[%s15447_s16 + $0x1964] ss:$72 sps:$4 sm:$0xff]  }
 0x364   : > { %6599 = vmatprep.subr.bf16.mxu1 %v13593_v56  ;;  %v13647_v54 = vld [vmem:[%s15447_s16 + $0x107c] ss:$72 sps:$4 sm:$0xff]   ;;  %v13642_v56 = vld [vmem:[%s15447_s16 + $0x1960] ss:$72 sps:$4 sm:$0xff]  }
 0x366   : > { %6256 = vmatpush1.bf16.msra.mxu0 %v13588_v57  ;;  %v13645_v57 = vld [vmem:[%s15447_s16 + $0x1078] ss:$72 sps:$4 sm:$0xff]  }
 0x367   : > { %6600 = vmatpush1.bf16.msra.mxu1 %v13591_v58  ;;  %6257 = vmatprep.subr.bf16.mxu0 %v13596_v60  ;;  %v13650_v58 = vld [vmem:[%s15447_s16 + $0x19f4] ss:$72 sps:$4 sm:$0xff]  }
 0x368   : > { %v6023_v4 = vpop.f32.mrb[0].mxu0  ;;  %6601 = vmatprep.subr.bf16.mxu1 %v13599_v62  ;;  %v13653_v60 = vld [vmem:[%s15447_s16 + $0x110c] ss:$72 sps:$4 sm:$0xff]   ;;  %v13648_v62 = vld [vmem:[%s15447_s16 + $0x19f0] ss:$72 sps:$4 sm:$0xff]  }
 0x369   : > { %v6025_v18 = vpop.f32.mrb[1].mxu0  ;;  %v16066_v15 = vadd.f32 %v6023_v4, %v1514_v1  ;;  %v13657_v4 = vld [vmem:[%s15447_s16 + $0x1198] ss:$72 sps:$4 sm:$0xff]  }
 0x36a   : > { %v6027_v6 = vpop.f32.mrb[2].mxu0  ;;  %6258 = vmatpush1.bf16.msra.mxu0 %v13594_v0  ;;  %v12755_v9 = vadd.f32 %v6025_v18, %v1518_v5  ;;  %v13651_v0 = vld [vmem:[%s15447_s16 + $0x1108] ss:$72 sps:$4 sm:$0xff]  }
 0x36b   : > { %v16068_v7 = vadd.f32 %v6027_v6, %v1514_v1  ;;  %6602 = vmatpush1.bf16.msra.mxu1 %v13597_v2  ;;  %v6029_v33 = vpop.f32.mrb[3].mxu0  ;;  %6259 = vmatprep.subr.bf16.mxu0 %v13602_v3  ;;  %v13656_v1 = vld [vmem:[%s15447_s16 + $0x1a84] ss:$72 sps:$4 sm:$0xff]   ;;  %v13654_v3 = vld [vmem:[%s15447_s16 + $0x1a80] ss:$72 sps:$4 sm:$0xff]  }
 0x36c   : > { %v12757_v10 = vadd.f32 %v6029_v33, %v1518_v5  ;;  %6603 = vmatprep.subr.bf16.mxu1 %v13605_v13  ;;  %v13659_v2 = vld [vmem:[%s15447_s16 + $0x119c] ss:$72 sps:$4 sm:$0xff]   ;;  %v13665_v13 = vld [vmem:[%s15447_s16 + $0x122c] ss:$72 sps:$4 sm:$0xff]   ;;  %v13660_v18 = vld [vmem:[%s15447_s16 + $0x20] ss:$72 sps:$4 sm:$0xff]  }
 0x36d   : > { %v7064_v14 = vpack.c.bf16 %v16068_v7, %v16066_v15  ;;  %v13662_v5 = vld [vmem:[%s15447_s16 + $0x24] ss:$72 sps:$4 sm:$0xff]   ;;  %v13663_v6 = vld [vmem:[%s15447_s16 + $0x1228] ss:$72 sps:$4 sm:$0xff]  }
 0x36e   : > { %v16075_v16 = vpack.c.bf16 %v12757_v10, %v12755_v9  ;;  %6260 = vmatpush1.bf16.msra.mxu0 %v13600_v11  ;;  %v13668_v11 = vld [vmem:[%s15447_s16 + $0xb4] ss:$72 sps:$4 sm:$0xff]   ;;  %v13674_v9 = vld [vmem:[%s15447_s16 + $0x144] ss:$72 sps:$4 sm:$0xff]   ;;  %v14062_v15 = vld [vmem:[%s15447_s16 + $0xc90] ss:$72 sps:$4 sm:$0xff]  }
 0x36f   : > { %6604 = vmatpush1.bf16.msra.mxu1 %v13603_v8  ;;  %6261 = vmatprep.subr.bf16.mxu0 %v13608_v23  ;;  %v13671_v33 = vld [vmem:[%s15447_s16 + $0x12bc] ss:$72 sps:$4 sm:$0xff]   ;;  %v13666_v8 = vld [vmem:[%s15447_s16 + $0xb0] ss:$72 sps:$4 sm:$0xff]   ;;  %v13677_v10 = vld [vmem:[%s15447_s16 + $0x134c] ss:$72 sps:$4 sm:$0xff]  }
 0x370   : > { %6605 = vmatprep.subr.bf16.mxu1 %v13611_v12  ;;  %v13669_v23 = vld [vmem:[%s15447_s16 + $0x12b8] ss:$72 sps:$4 sm:$0xff]  }
 0x371   : > { %v13672_v12 = vld [vmem:[%s15447_s16 + $0x140] ss:$72 sps:$4 sm:$0xff]  }
 0x372   : > { %6262 = vmatpush1.bf16.msra.mxu0 %v13606_v17  ;;  %v13675_v17 = vld [vmem:[%s15447_s16 + $0x1348] ss:$72 sps:$4 sm:$0xff]  }
 0x373   : > { %6606 = vmatpush1.bf16.msra.mxu1 %v13609_v19  ;;  %6263 = vmatprep.subr.bf16.mxu0 %v13614_v20  ;;  %v13680_v19 = vld [vmem:[%s15447_s16 + $0x1d4] ss:$72 sps:$4 sm:$0xff]  }
 0x374   : > { %6607 = vmatprep.subr.bf16.mxu1 %v13617_v21  ;;  %v13683_v20 = vld [vmem:[%s15447_s16 + $0x13dc] ss:$72 sps:$4 sm:$0xff]   ;;  %v13678_v21 = vld [vmem:[%s15447_s16 + $0x1d0] ss:$72 sps:$4 sm:$0xff]  }
 0x376   : > { %6264 = vmatpush1.bf16.msra.mxu0 %v13612_v22  ;;  %v13681_v22 = vld [vmem:[%s15447_s16 + $0x13d8] ss:$72 sps:$4 sm:$0xff]  }
 0x377   : > { %6608 = vmatpush1.bf16.msra.mxu1 %v13615_v24  ;;  %6265 = vmatprep.subr.bf16.mxu0 %v13620_v25  ;;  %v13686_v24 = vld [vmem:[%s15447_s16 + $0x264] ss:$72 sps:$4 sm:$0xff]  }
 0x378   : > { %6609 = vmatprep.subr.bf16.mxu1 %v13623_v29  ;;  %v13689_v25 = vld [vmem:[%s15447_s16 + $0x146c] ss:$72 sps:$4 sm:$0xff]   ;;  %v13684_v29 = vld [vmem:[%s15447_s16 + $0x260] ss:$72 sps:$4 sm:$0xff]  }
 0x37a   : > { %6266 = vmatpush1.bf16.msra.mxu0 %v13618_v37  ;;  %v16135_v37 = vld [vmem:[%s15468_s19 + $0x10] sm:$0xff] }
 0x37b   : > { %6610 = vmatpush1.bf16.msra.mxu1 %v13621_v26  ;;  %6267 = vmatprep.subr.bf16.mxu0 %v13626_v28  ;;  %v13687_v26 = vld [vmem:[%s15447_s16 + $0x1468] ss:$72 sps:$4 sm:$0xff]  }
 0x37c   : > { %6611 = vmatprep.subr.bf16.mxu1 %v13629_v30  ;;  %v16139_v28 = vld [vmem:[%s15468_s19 + $0x18] sm:$0xff] }
 0x37d   : > { %v13692_v30 = vld [vmem:[%s15447_s16 + $0x2f4] ss:$72 sps:$4 sm:$0xff]  }
 0x37e   : > { %6268 = vmatpush1.bf16.msra.mxu0 %v13624_v27  ;;  %v13695_v27 = vld [vmem:[%s15447_s16 + $0x14fc] ss:$72 sps:$4 sm:$0xff]  }
 0x37f   : > { %6612 = vmatpush1.bf16.msra.mxu1 %v13627_v32  ;;  %6269 = vmatprep.subr.bf16.mxu0 %v13632_v31  ;;  %v1522_v32 = vrot.slane %v16135_v37, %v16047_v59  ;;  %v1526_v31 = vrot.slane %v16139_v28, %v16047_v59 }
 0x380   : > { %6613 = vmatprep.subr.bf16.mxu1 %v13635_v34  ;;  %v13690_v34 = vld [vmem:[%s15447_s16 + $0x2f0] ss:$72 sps:$4 sm:$0xff]  }
 0x382   : > { %6270 = vmatpush1.bf16.msra.mxu0 %v13630_v35  ;;  %v13693_v35 = vld [vmem:[%s15447_s16 + $0x14f8] ss:$72 sps:$4 sm:$0xff]  }
 0x383   : > { %6614 = vmatpush1.bf16.msra.mxu1 %v13633_v36  ;;  %6271 = vmatprep.subr.bf16.mxu0 %v13638_v39  ;;  %v13698_v36 = vld [vmem:[%s15447_s16 + $0x384] ss:$72 sps:$4 sm:$0xff]  }
 0x384   : > { %6615 = vmatprep.subr.bf16.mxu1 %v13641_v42  ;;  %v13701_v42 = vld [vmem:[%s15447_s16 + $0x158c] ss:$72 sps:$4 sm:$0xff]  }
 0x386   : > { %6272 = vmatpush1.bf16.msra.mxu0 %v13636_v44 }
 0x387   : > { %6616 = vmatpush1.bf16.msra.mxu1 %v13639_v50  ;;  %6273 = vmatprep.subr.bf16.mxu0 %v13644_v53 }
 0x388   : > { %6617 = vmatprep.subr.bf16.mxu1 %v13647_v54 }
 0x38a   : > { %6274 = vmatpush1.bf16.msra.mxu0 %v13642_v56  ;;  %v13696_v56 = vld [vmem:[%s15447_s16 + $0x380] ss:$72 sps:$4 sm:$0xff]  }
 0x38b   : > { %6618 = vmatpush1.bf16.msra.mxu1 %v13645_v57  ;;  %6275 = vmatprep.subr.bf16.mxu0 %v13650_v58 }
 0x38c   : > { %6619 = vmatprep.subr.bf16.mxu1 %v13653_v60 }
 0x38e   : > { %6276 = vmatpush1.bf16.msra.mxu0 %v13648_v62  ;;  %v13699_v62 = vld [vmem:[%s15447_s16 + $0x1588] ss:$72 sps:$4 sm:$0xff]  }
 0x38f   : > { %6620 = vmatpush1.bf16.msra.mxu1 %v13651_v0  ;;  %6277 = vmatprep.subr.bf16.mxu0 %v13656_v1  ;;  %v13704_v0 = vld [vmem:[%s15447_s16 + $0x414] ss:$72 sps:$4 sm:$0xff]  }
 0x390   : > { %6621 = vmatprep.subr.bf16.mxu1 %v13659_v2 }
 0x392   : > { %6278 = vmatpush1.bf16.msra.mxu0 %v13654_v3  ;;  %v13707_v3 = vld [vmem:[%s15447_s16 + $0x161c] ss:$72 sps:$4 sm:$0xff]  }
 0x393   : > { %6622 = vmatpush1.bf16.msra.mxu1 %v13657_v4  ;;  %6419 = vmatprep.subr.bf16.mxu0 %v13662_v5  ;;  %v13702_v5 = vld [vmem:[%s15447_s16 + $0x410] ss:$72 sps:$4 sm:$0xff]  }
 0x394   : > { %6634 = vmatprep.subr.bf16.mxu1 %v13665_v13  ;;  %v13710_v13 = vld [vmem:[%s15447_s16 + $0x4a4] ss:$72 sps:$4 sm:$0xff]  }
 0x395   : > { %6280 = vmatmul.mubr.bf16.vlgmr.msra.gmra.mrb[8].mxu0 %v15683_v55 }
 0x396   : > { %6624 = vmatmul.mubr.bf16.vlgmr.msra.gmra.mrb[8].mxu1 %v15672_v47  ;;  %6420 = vmatpush1.bf16.msra.mxu0 %v13660_v18 }
 0x397   : > { %6451 = vmatprep.mubr.bf16.mxu0 %v15664_v40  ;;  %6635 = vmatpush1.bf16.msra.mxu1 %v13663_v6  ;;  %v13708_v6 = vld [vmem:[%s15447_s16 + $0x4a0] ss:$72 sps:$4 sm:$0xff]  }
 0x398   : > { %6666 = vmatprep.mubr.bf16.mxu1 %v15678_v51  ;;  %6421 = vmatprep.subr.bf16.mxu0 %v13668_v11  ;;  %v13711_v11 = vld [vmem:[%s15447_s16 + $0x16a8] ss:$72 sps:$4 sm:$0xff]  }
 0x399   : > { %6636 = vmatprep.subr.bf16.mxu1 %v13671_v33  ;;  %v13716_v33 = vld [vmem:[%s15447_s16 + $0x534] ss:$72 sps:$4 sm:$0xff]  }
 0x39a   : > { %6422 = vmatpush1.bf16.msra.mxu0 %v13666_v8  ;;  %v13719_v8 = vld [vmem:[%s15447_s16 + $0x173c] ss:$72 sps:$4 sm:$0xff]  }
 0x39b   : > { %6637 = vmatpush1.bf16.msra.mxu1 %v13669_v23  ;;  %6423 = vmatprep.subr.bf16.mxu0 %v13674_v9  ;;  %v13714_v23 = vld [vmem:[%s15447_s16 + $0x530] ss:$72 sps:$4 sm:$0xff]  }
 0x39c   : > { %6638 = vmatprep.subr.bf16.mxu1 %v13677_v10  ;;  %v13717_v9 = vld [vmem:[%s15447_s16 + $0x1738] ss:$72 sps:$4 sm:$0xff]   ;;  %v13722_v10 = vld [vmem:[%s15447_s16 + $0x5c4] ss:$72 sps:$4 sm:$0xff]  }
 0x39e   : > { %6424 = vmatpush1.bf16.msra.mxu0 %v13672_v12  ;;  %v13725_v12 = vld [vmem:[%s15447_s16 + $0x17cc] ss:$72 sps:$4 sm:$0xff]  }
 0x39f   : > { %6639 = vmatpush1.bf16.msra.mxu1 %v13675_v17  ;;  %6425 = vmatprep.subr.bf16.mxu0 %v13680_v19  ;;  %v13720_v17 = vld [vmem:[%s15447_s16 + $0x5c0] ss:$72 sps:$4 sm:$0xff]  }
 0x3a0   : > { %6640 = vmatprep.subr.bf16.mxu1 %v13683_v20  ;;  %v13723_v19 = vld [vmem:[%s15447_s16 + $0x17c8] ss:$72 sps:$4 sm:$0xff]   ;;  %v13728_v20 = vld [vmem:[%s15447_s16 + $0x654] ss:$72 sps:$4 sm:$0xff]  }
 0x3a2   : > { %6426 = vmatpush1.bf16.msra.mxu0 %v13678_v21  ;;  %v13731_v21 = vld [vmem:[%s15447_s16 + $0x185c] ss:$72 sps:$4 sm:$0xff]  }
 0x3a3   : > { %6641 = vmatpush1.bf16.msra.mxu1 %v13681_v22  ;;  %6427 = vmatprep.subr.bf16.mxu0 %v13686_v24  ;;  %v13726_v22 = vld [vmem:[%s15447_s16 + $0x650] ss:$72 sps:$4 sm:$0xff]  }
 0x3a4   : > { %6642 = vmatprep.subr.bf16.mxu1 %v13689_v25  ;;  %v13729_v24 = vld [vmem:[%s15447_s16 + $0x1858] ss:$72 sps:$4 sm:$0xff]   ;;  %v13734_v25 = vld [vmem:[%s15447_s16 + $0x6e4] ss:$72 sps:$4 sm:$0xff]  }
 0x3a6   : > { %6428 = vmatpush1.bf16.msra.mxu0 %v13684_v29  ;;  %v13737_v29 = vld [vmem:[%s15447_s16 + $0x18ec] ss:$72 sps:$4 sm:$0xff]  }
 0x3a7   : > { %6643 = vmatpush1.bf16.msra.mxu1 %v13687_v26  ;;  %6429 = vmatprep.subr.bf16.mxu0 %v13692_v30  ;;  %v13732_v26 = vld [vmem:[%s15447_s16 + $0x6e0] ss:$72 sps:$4 sm:$0xff]  }
 0x3a8   : > { %v6066_v39 = vpop.f32.mrb[4].mxu0  ;;  %6644 = vmatprep.subr.bf16.mxu1 %v13695_v27  ;;  %v13735_v30 = vld [vmem:[%s15447_s16 + $0x18e8] ss:$72 sps:$4 sm:$0xff]   ;;  %v13740_v27 = vld [vmem:[%s15447_s16 + $0x774] ss:$72 sps:$4 sm:$0xff]  }
 0x3a9   : > { %v6067_v44 = vadd.f32 %v6066_v39, %v1522_v32  ;;  %v6068_v50 = vpop.f32.mrb[5].mxu0  ;;  %v13744_v39 = vld [vmem:[%s15447_s16 + $0x800] ss:$72 sps:$4 sm:$0xff]  }
 0x3aa   : > { %v6069_v53 = vadd.f32 %v6068_v50, %v1526_v31  ;;  %v6070_v54 = vpop.f32.mrb[6].mxu0  ;;  %6430 = vmatpush1.bf16.msra.mxu0 %v13690_v34  ;;  %v13741_v34 = vld [vmem:[%s15447_s16 + $0x1978] ss:$72 sps:$4 sm:$0xff]   ;;  %v13755_v50 = vld [vmem:[%s15447_s16 + $0x1a9c] ss:$72 sps:$4 sm:$0xff]  }
 0x3ab   : > { %v16153_v57 = vadd.f32 %v15975_v43, %v6067_v44  ;;  %v6071_v58 = vadd.f32 %v6070_v54, %v1522_v32  ;;  %6645 = vmatpush1.bf16.msra.mxu1 %v13693_v35  ;;  %v6072_v60 = vpop.f32.mrb[7].mxu0  ;;  %6431 = vmatprep.subr.bf16.mxu0 %v13698_v36  ;;  %v13743_v32 = vld [vmem:[%s15447_s16 + $0x197c] ss:$72 sps:$4 sm:$0xff]   ;;  %v13749_v36 = vld [vmem:[%s15447_s16 + $0x1a0c] ss:$72 sps:$4 sm:$0xff]  }
 0x3ac   : > { %v16158_v1 = vadd.f32 %v15978_v45, %v6069_v53  ;;  %v6073_v2 = vadd.f32 %v6072_v60, %v1526_v31  ;;  %6646 = vmatprep.subr.bf16.mxu1 %v13701_v42  ;;  %v13705_v45 = vld [vmem:[%s15447_s16 + $0x1618] ss:$72 sps:$4 sm:$0xff]   ;;  %v13746_v35 = vld [vmem:[%s15447_s16 + $0x804] ss:$72 sps:$4 sm:$0xff]   ;;  %v13747_v42 = vld [vmem:[%s15447_s16 + $0x1a08] ss:$72 sps:$4 sm:$0xff]  }
 0x3ad   : > { %v16162_v4 = vadd.f32 %v15980_v48, %v6071_v58  ;;  %v13738_v31 = vld [vmem:[%s15447_s16 + $0x770] ss:$72 sps:$4 sm:$0xff]   ;;  %v13752_v44 = vld [vmem:[%s15447_s16 + $0x894] ss:$72 sps:$4 sm:$0xff]   ;;  %v13756_v60 = vld [vmem:[%s15447_s16 + $0x920] ss:$72 sps:$4 sm:$0xff]  }
 0x3ae   : > { %v16165_v43 = vadd.f32 %v15983_v52, %v6073_v2  ;;  %6432 = vmatpush1.bf16.msra.mxu0 %v13696_v56  ;;  %v13713_v52 = vld [vmem:[%s15447_s16 + $0x16ac] ss:$72 sps:$4 sm:$0xff]   ;;  %v13750_v53 = vld [vmem:[%s15447_s16 + $0x890] ss:$72 sps:$4 sm:$0xff]   ;;  %v13761_v58 = vld [vmem:[%s15447_s16 + $0x3c] ss:$72 sps:$4 sm:$0xff]  }
 0x3af   : > { %6647 = vmatpush1.bf16.msra.mxu1 %v13699_v62  ;;  %6433 = vmatprep.subr.bf16.mxu0 %v13704_v0  ;;  %v7066_v18 = vpack.c.bf16 %v16162_v4, %v16153_v57  ;;  %v13753_v54 = vld [vmem:[%s15447_s16 + $0x1a98] ss:$72 sps:$4 sm:$0xff]   ;;  %v13758_v56 = vld [vmem:[%s15447_s16 + $0x924] ss:$72 sps:$4 sm:$0xff]   ;;  %v13764_v0 = vld [vmem:[%s15447_s16 + $0x9b4] ss:$72 sps:$4 sm:$0xff]  }
 0x3b0   : > { %v7067_v48 = vpack.c.bf16 %v16165_v43, %v16158_v1  ;;  %6648 = vmatprep.subr.bf16.mxu1 %v13707_v3  ;;  %v13759_v62 = vld [vmem:[%s15447_s16 + $0x38] ss:$72 sps:$4 sm:$0xff]   ;;  %v13767_v2 = vld [vmem:[%s15447_s16 + $0xcc] ss:$72 sps:$4 sm:$0xff]  }
 0x3b1   : > { %v13762_v3 = vld [vmem:[%s15447_s16 + $0x9b0] ss:$72 sps:$4 sm:$0xff]  }
 0x3b2   : > { %6434 = vmatpush1.bf16.msra.mxu0 %v13702_v5  ;;  %v13765_v5 = vld [vmem:[%s15447_s16 + $0xc8] ss:$72 sps:$4 sm:$0xff]  }
 0x3b3   : > { %6649 = vmatpush1.bf16.msra.mxu1 %v13705_v45  ;;  %6435 = vmatprep.subr.bf16.mxu0 %v13710_v13  ;;  %v13770_v45 = vld [vmem:[%s15447_s16 + $0xa44] ss:$72 sps:$4 sm:$0xff]  }
 0x3b4   : > { %6650 = vmatprep.subr.bf16.mxu1 %v13713_v52  ;;  %v13773_v13 = vld [vmem:[%s15447_s16 + $0x15c] ss:$72 sps:$4 sm:$0xff]   ;;  %v13768_v52 = vld [vmem:[%s15447_s16 + $0xa40] ss:$72 sps:$4 sm:$0xff]  }
 0x3b6   : > { %6436 = vmatpush1.bf16.msra.mxu0 %v13708_v6  ;;  %v13771_v6 = vld [vmem:[%s15447_s16 + $0x158] ss:$72 sps:$4 sm:$0xff]  }
 0x3b7   : > { %6651 = vmatpush1.bf16.msra.mxu1 %v13711_v11  ;;  %6437 = vmatprep.subr.bf16.mxu0 %v13716_v33  ;;  %v13776_v11 = vld [vmem:[%s15447_s16 + $0xad4] ss:$72 sps:$4 sm:$0xff]  }
 0x3b8   : > { %6652 = vmatprep.subr.bf16.mxu1 %v13719_v8  ;;  %v13779_v33 = vld [vmem:[%s15447_s16 + $0x1ec] ss:$72 sps:$4 sm:$0xff]   ;;  %v13774_v8 = vld [vmem:[%s15447_s16 + $0xad0] ss:$72 sps:$4 sm:$0xff]  }
 0x3ba   : > { %6438 = vmatpush1.bf16.msra.mxu0 %v13714_v23  ;;  %v13777_v23 = vld [vmem:[%s15447_s16 + $0x1e8] ss:$72 sps:$4 sm:$0xff]  }
 0x3bb   : > { %6653 = vmatpush1.bf16.msra.mxu1 %v13717_v9  ;;  %6439 = vmatprep.subr.bf16.mxu0 %v13722_v10  ;;  %v13782_v9 = vld [vmem:[%s15447_s16 + $0xb64] ss:$72 sps:$4 sm:$0xff]  }
 0x3bc   : > { %6654 = vmatprep.subr.bf16.mxu1 %v13725_v12  ;;  %v13785_v10 = vld [vmem:[%s15447_s16 + $0x27c] ss:$72 sps:$4 sm:$0xff]   ;;  %v13780_v12 = vld [vmem:[%s15447_s16 + $0xb60] ss:$72 sps:$4 sm:$0xff]  }
 0x3be   : > { %6440 = vmatpush1.bf16.msra.mxu0 %v13720_v17  ;;  %v13783_v17 = vld [vmem:[%s15447_s16 + $0x278] ss:$72 sps:$4 sm:$0xff]  }
 0x3bf   : > { %6655 = vmatpush1.bf16.msra.mxu1 %v13723_v19  ;;  %6441 = vmatprep.subr.bf16.mxu0 %v13728_v20  ;;  %v13788_v19 = vld [vmem:[%s15447_s16 + $0xbf4] ss:$72 sps:$4 sm:$0xff]  }
 0x3c0   : > { %6656 = vmatprep.subr.bf16.mxu1 %v13731_v21  ;;  %v13791_v20 = vld [vmem:[%s15447_s16 + $0x30c] ss:$72 sps:$4 sm:$0xff]   ;;  %v13786_v21 = vld [vmem:[%s15447_s16 + $0xbf0] ss:$72 sps:$4 sm:$0xff]  }
 0x3c2   : > { %6442 = vmatpush1.bf16.msra.mxu0 %v13726_v22  ;;  %v13789_v22 = vld [vmem:[%s15447_s16 + $0x308] ss:$72 sps:$4 sm:$0xff]  }
 0x3c3   : > { %6657 = vmatpush1.bf16.msra.mxu1 %v13729_v24  ;;  %6443 = vmatprep.subr.bf16.mxu0 %v13734_v25  ;;  %v13794_v24 = vld [vmem:[%s15447_s16 + $0xc84] ss:$72 sps:$4 sm:$0xff]  }
 0x3c4   : > { %6658 = vmatprep.subr.bf16.mxu1 %v13737_v29  ;;  %v14888_v25 = vld [vmem:[%s15468_s19 + $0x30] sm:$0xff] }
 0x3c5   : > { %v1538_v29 = vrot.slane %v14888_v25, %v16047_v59  ;;  %v13836_v25 = vld [vmem:[%s15447_s16 + $0x1074] ss:$72 sps:$4 sm:$0xff]  }
 0x3c6   : > { %6444 = vmatpush1.bf16.msra.mxu0 %v13732_v26  ;;  %v13797_v26 = vld [vmem:[%s15447_s16 + $0x39c] ss:$72 sps:$4 sm:$0xff]  }
 0x3c7   : > { %6659 = vmatpush1.bf16.msra.mxu1 %v13735_v30  ;;  %6445 = vmatprep.subr.bf16.mxu0 %v13740_v27  ;;  %v14889_v27 = vld [vmem:[%s15468_s19 + $0x38] sm:$0xff] }
 0x3c8   : > { %6660 = vmatprep.subr.bf16.mxu1 %v13743_v32  ;;  %v1542_v32 = vrot.slane %v14889_v27, %v16047_v59  ;;  %v13842_v27 = vld [vmem:[%s15447_s16 + $0x1104] ss:$72 sps:$4 sm:$0xff]  }
 0x3ca   : > { %6446 = vmatpush1.bf16.msra.mxu0 %v13738_v31 }
 0x3cb   : > { %6661 = vmatpush1.bf16.msra.mxu1 %v13741_v34  ;;  %6447 = vmatprep.subr.bf16.mxu0 %v13746_v35  ;;  %v13792_v34 = vld [vmem:[%s15447_s16 + $0xc80] ss:$72 sps:$4 sm:$0xff]  }
 0x3cc   : > { %6662 = vmatprep.subr.bf16.mxu1 %v13749_v36  ;;  %v13795_v36 = vld [vmem:[%s15447_s16 + $0x398] ss:$72 sps:$4 sm:$0xff]  }
 0x3ce   : > { %6448 = vmatpush1.bf16.msra.mxu0 %v13744_v39  ;;  %v13800_v39 = vld [vmem:[%s15447_s16 + $0xd14] ss:$72 sps:$4 sm:$0xff]  }
 0x3cf   : > { %6663 = vmatpush1.bf16.msra.mxu1 %v13747_v42  ;;  %6449 = vmatprep.subr.bf16.mxu0 %v13752_v44 }
 0x3d0   : > { %6664 = vmatprep.subr.bf16.mxu1 %v13755_v50 }
 0x3d2   : > { %6450 = vmatpush1.bf16.msra.mxu0 %v13750_v53  ;;  %v13803_v53 = vld [vmem:[%s15447_s16 + $0x42c] ss:$72 sps:$4 sm:$0xff]  }
 0x3d3   : > { %6665 = vmatpush1.bf16.msra.mxu1 %v13753_v54  ;;  %6462 = vmatprep.subr.bf16.mxu0 %v13758_v56 }
 0x3d4   : > { %6806 = vmatprep.subr.bf16.mxu1 %v13761_v58 }
 0x3d5   : > { %6452 = vmatmul.mubr.bf16.vlgmr.msra.gmra.mrb[12].mxu0 %v15670_v46 }
 0x3d6   : > { %6667 = vmatmul.mubr.bf16.vlgmr.msra.gmra.mrb[8].mxu1 %v15683_v55  ;;  %6463 = vmatpush1.bf16.msra.mxu0 %v13756_v60  ;;  %v13798_v60 = vld [vmem:[%s15447_s16 + $0xd10] ss:$72 sps:$4 sm:$0xff]  }
 0x3d7   : > { %6494 = vmatprep.mubr.bf16.mxu0 %v15666_v49  ;;  %6807 = vmatpush1.bf16.msra.mxu1 %v13759_v62 }
 0x3d8   : > { %6838 = vmatprep.mubr.bf16.mxu1 %v15664_v40  ;;  %6464 = vmatprep.subr.bf16.mxu0 %v13764_v0  ;;  %v13801_v0 = vld [vmem:[%s15447_s16 + $0x428] ss:$72 sps:$4 sm:$0xff]  }
 0x3d9   : > { %6808 = vmatprep.subr.bf16.mxu1 %v13767_v2  ;;  %v13806_v2 = vld [vmem:[%s15447_s16 + $0xda4] ss:$72 sps:$4 sm:$0xff]  }
 0x3da   : > { %6465 = vmatpush1.bf16.msra.mxu0 %v13762_v3  ;;  %v13809_v3 = vld [vmem:[%s15447_s16 + $0x4bc] ss:$72 sps:$4 sm:$0xff]  }
 0x3db   : > { %6809 = vmatpush1.bf16.msra.mxu1 %v13765_v5  ;;  %6466 = vmatprep.subr.bf16.mxu0 %v13770_v45  ;;  %v13804_v5 = vld [vmem:[%s15447_s16 + $0xda0] ss:$72 sps:$4 sm:$0xff]  }
 0x3dc   : > { %6810 = vmatprep.subr.bf16.mxu1 %v13773_v13  ;;  %v13807_v45 = vld [vmem:[%s15447_s16 + $0x4b8] ss:$72 sps:$4 sm:$0xff]   ;;  %v13812_v13 = vld [vmem:[%s15447_s16 + $0xe34] ss:$72 sps:$4 sm:$0xff]  }
 0x3de   : > { %6467 = vmatpush1.bf16.msra.mxu0 %v13768_v52  ;;  %v13815_v52 = vld [vmem:[%s15447_s16 + $0x54c] ss:$72 sps:$4 sm:$0xff]  }
 0x3df   : > { %6811 = vmatpush1.bf16.msra.mxu1 %v13771_v6  ;;  %6468 = vmatprep.subr.bf16.mxu0 %v13776_v11  ;;  %v13810_v6 = vld [vmem:[%s15447_s16 + $0xe30] ss:$72 sps:$4 sm:$0xff]  }
 0x3e0   : > { %6812 = vmatprep.subr.bf16.mxu1 %v13779_v33  ;;  %v13813_v11 = vld [vmem:[%s15447_s16 + $0x548] ss:$72 sps:$4 sm:$0xff]   ;;  %v13818_v33 = vld [vmem:[%s15447_s16 + $0xec4] ss:$72 sps:$4 sm:$0xff]  }
 0x3e2   : > { %6469 = vmatpush1.bf16.msra.mxu0 %v13774_v8  ;;  %v13821_v8 = vld [vmem:[%s15447_s16 + $0x5dc] ss:$72 sps:$4 sm:$0xff]  }
 0x3e3   : > { %6813 = vmatpush1.bf16.msra.mxu1 %v13777_v23  ;;  %6470 = vmatprep.subr.bf16.mxu0 %v13782_v9  ;;  %v13816_v23 = vld [vmem:[%s15447_s16 + $0xec0] ss:$72 sps:$4 sm:$0xff]  }
 0x3e4   : > { %6814 = vmatprep.subr.bf16.mxu1 %v13785_v10  ;;  %v13819_v9 = vld [vmem:[%s15447_s16 + $0x5d8] ss:$72 sps:$4 sm:$0xff]   ;;  %v13824_v10 = vld [vmem:[%s15447_s16 + $0xf54] ss:$72 sps:$4 sm:$0xff]  }
 0x3e6   : > { %6471 = vmatpush1.bf16.msra.mxu0 %v13780_v12  ;;  %v13827_v12 = vld [vmem:[%s15447_s16 + $0x66c] ss:$72 sps:$4 sm:$0xff]  }
 0x3e7   : > { %6815 = vmatpush1.bf16.msra.mxu1 %v13783_v17  ;;  %6472 = vmatprep.subr.bf16.mxu0 %v13788_v19  ;;  %v13822_v17 = vld [vmem:[%s15447_s16 + $0xf50] ss:$72 sps:$4 sm:$0xff]  }
 0x3e8   : > { %6816 = vmatprep.subr.bf16.mxu1 %v13791_v20  ;;  %v13825_v19 = vld [vmem:[%s15447_s16 + $0x668] ss:$72 sps:$4 sm:$0xff]   ;;  %v13830_v20 = vld [vmem:[%s15447_s16 + $0xfe4] ss:$72 sps:$4 sm:$0xff]  }
 0x3e9   : > { %v6410_v30 = vpop.f32.mrb[4].mxu1 }
 0x3ea   : > { %v6412_v31 = vpop.f32.mrb[5].mxu1  ;;  %6473 = vmatpush1.bf16.msra.mxu0 %v13786_v21  ;;  %v16242_v42 = vadd.f32 %v6410_v30, %v1538_v29  ;;  %v13833_v21 = vld [vmem:[%s15447_s16 + $0x6fc] ss:$72 sps:$4 sm:$0xff]   ;;  %v13837_v30 = vld [vmem:[%s15447_s16 + $0x788] ss:$72 sps:$4 sm:$0xff]  }
 0x3eb   : > { %v6414_v35 = vpop.f32.mrb[6].mxu1  ;;  %6817 = vmatpush1.bf16.msra.mxu1 %v13789_v22  ;;  %6474 = vmatprep.subr.bf16.mxu0 %v13794_v24  ;;  %v12771_v54 = vadd.f32 %v6412_v31, %v1542_v32  ;;  %v13828_v22 = vld [vmem:[%s15447_s16 + $0xfe0] ss:$72 sps:$4 sm:$0xff]  }
 0x3ec   : > { %v16244_v44 = vadd.f32 %v6414_v35, %v1538_v29  ;;  %v6416_v50 = vpop.f32.mrb[7].mxu1  ;;  %6818 = vmatprep.subr.bf16.mxu1 %v13797_v26  ;;  %v13831_v24 = vld [vmem:[%s15447_s16 + $0x6f8] ss:$72 sps:$4 sm:$0xff]   ;;  %v13839_v29 = vld [vmem:[%s15447_s16 + $0x78c] ss:$72 sps:$4 sm:$0xff]  }
 0x3ed   : > { %v12773_v56 = vadd.f32 %v6416_v50, %v1542_v32  ;;  %v13834_v26 = vld [vmem:[%s15447_s16 + $0x1070] ss:$72 sps:$4 sm:$0xff]   ;;  %v13845_v32 = vld [vmem:[%s15447_s16 + $0x81c] ss:$72 sps:$4 sm:$0xff]   ;;  %v13840_v31 = vld [vmem:[%s15447_s16 + $0x1100] ss:$72 sps:$4 sm:$0xff]  }
 0x3ee   : > { %v7070_v58 = vpack.c.bf16 %v16244_v44, %v16242_v42  ;;  %6475 = vmatpush1.bf16.msra.mxu0 %v13792_v34  ;;  %v13843_v34 = vld [vmem:[%s15447_s16 + $0x818] ss:$72 sps:$4 sm:$0xff]   ;;  %v13848_v35 = vld [vmem:[%s15447_s16 + $0x1194] ss:$72 sps:$4 sm:$0xff]   ;;  %v13849_v50 = vld [vmem:[%s15447_s16 + $0x8a8] ss:$72 sps:$4 sm:$0xff]  }
 0x3ef   : > { %v16250_v62 = vpack.c.bf16 %v12773_v56, %v12771_v54  ;;  %6819 = vmatpush1.bf16.msra.mxu1 %v13795_v36  ;;  %6476 = vmatprep.subr.bf16.mxu0 %v13800_v39  ;;  %v13851_v36 = vld [vmem:[%s15447_s16 + $0x8ac] ss:$72 sps:$4 sm:$0xff]   ;;  %v13846_v39 = vld [vmem:[%s15447_s16 + $0x1190] ss:$72 sps:$4 sm:$0xff]   ;;  %v13857_v54 = vld [vmem:[%s15447_s16 + $0x93c] ss:$72 sps:$4 sm:$0xff]  }
 0x3f0   : > { %6820 = vmatprep.subr.bf16.mxu1 %v13803_v53  ;;  %v13854_v53 = vld [vmem:[%s15447_s16 + $0x1224] ss:$72 sps:$4 sm:$0xff]   ;;  %v13852_v56 = vld [vmem:[%s15447_s16 + $0x1220] ss:$72 sps:$4 sm:$0xff]   ;;  %v14064_v42 = vld [vmem:[%s15447_s16 + $0xc94] ss:$72 sps:$4 sm:$0xff]  }
 0x3f1   : > { %v14890_v44 = vld [vmem:[%s15468_s19 + $0x50] sm:$0xff] }
 0x3f2   : > { %6477 = vmatpush1.bf16.msra.mxu0 %v13798_v60  ;;  %v13855_v60 = vld [vmem:[%s15447_s16 + $0x938] ss:$72 sps:$4 sm:$0xff]  }
 0x3f3   : > { %6821 = vmatpush1.bf16.msra.mxu1 %v13801_v0  ;;  %6478 = vmatprep.subr.bf16.mxu0 %v13806_v2  ;;  %v13860_v0 = vld [vmem:[%s15447_s16 + $0x12b4] ss:$72 sps:$4 sm:$0xff]  }
 0x3f4   : > { %6822 = vmatprep.subr.bf16.mxu1 %v13809_v3  ;;  %v13863_v2 = vld [vmem:[%s15447_s16 + $0x9cc] ss:$72 sps:$4 sm:$0xff]   ;;  %v13858_v3 = vld [vmem:[%s15447_s16 + $0x12b0] ss:$72 sps:$4 sm:$0xff]  }
 0x3f6   : > { %6479 = vmatpush1.bf16.msra.mxu0 %v13804_v5  ;;  %v13861_v5 = vld [vmem:[%s15447_s16 + $0x9c8] ss:$72 sps:$4 sm:$0xff]  }
 0x3f7   : > { %6823 = vmatpush1.bf16.msra.mxu1 %v13807_v45  ;;  %6480 = vmatprep.subr.bf16.mxu0 %v13812_v13  ;;  %v13866_v45 = vld [vmem:[%s15447_s16 + $0x1344] ss:$72 sps:$4 sm:$0xff]  }
 0x3f8   : > { %6824 = vmatprep.subr.bf16.mxu1 %v13815_v52  ;;  %v13869_v13 = vld [vmem:[%s15447_s16 + $0xa5c] ss:$72 sps:$4 sm:$0xff]   ;;  %v13864_v52 = vld [vmem:[%s15447_s16 + $0x1340] ss:$72 sps:$4 sm:$0xff]  }
 0x3fa   : > { %6481 = vmatpush1.bf16.msra.mxu0 %v13810_v6  ;;  %v13867_v6 = vld [vmem:[%s15447_s16 + $0xa58] ss:$72 sps:$4 sm:$0xff]  }
 0x3fb   : > { %6825 = vmatpush1.bf16.msra.mxu1 %v13813_v11  ;;  %6482 = vmatprep.subr.bf16.mxu0 %v13818_v33  ;;  %v13872_v11 = vld [vmem:[%s15447_s16 + $0x13d4] ss:$72 sps:$4 sm:$0xff]  }
 0x3fc   : > { %6826 = vmatprep.subr.bf16.mxu1 %v13821_v8  ;;  %v13875_v33 = vld [vmem:[%s15447_s16 + $0xaec] ss:$72 sps:$4 sm:$0xff]   ;;  %v13870_v8 = vld [vmem:[%s15447_s16 + $0x13d0] ss:$72 sps:$4 sm:$0xff]  }
 0x3fe   : > { %6483 = vmatpush1.bf16.msra.mxu0 %v13816_v23  ;;  %v13873_v23 = vld [vmem:[%s15447_s16 + $0xae8] ss:$72 sps:$4 sm:$0xff]  }
 0x3ff   : > { %6827 = vmatpush1.bf16.msra.mxu1 %v13819_v9  ;;  %6484 = vmatprep.subr.bf16.mxu0 %v13824_v10  ;;  %v13878_v9 = vld [vmem:[%s15447_s16 + $0x1464] ss:$72 sps:$4 sm:$0xff]  }
 0x400   : > { %6828 = vmatprep.subr.bf16.mxu1 %v13827_v12  ;;  %v13881_v10 = vld [vmem:[%s15447_s16 + $0xb7c] ss:$72 sps:$4 sm:$0xff]   ;;  %v13876_v12 = vld [vmem:[%s15447_s16 + $0x1460] ss:$72 sps:$4 sm:$0xff]  }
 0x402   : > { %6485 = vmatpush1.bf16.msra.mxu0 %v13822_v17  ;;  %v13879_v17 = vld [vmem:[%s15447_s16 + $0xb78] ss:$72 sps:$4 sm:$0xff]  }
 0x403   : > { %6829 = vmatpush1.bf16.msra.mxu1 %v13825_v19  ;;  %6486 = vmatprep.subr.bf16.mxu0 %v13830_v20  ;;  %v13884_v19 = vld [vmem:[%s15447_s16 + $0x14f4] ss:$72 sps:$4 sm:$0xff]  }
 0x404   : > { %6830 = vmatprep.subr.bf16.mxu1 %v13833_v21  ;;  %v13887_v20 = vld [vmem:[%s15447_s16 + $0xc0c] ss:$72 sps:$4 sm:$0xff]   ;;  %v13882_v21 = vld [vmem:[%s15447_s16 + $0x14f0] ss:$72 sps:$4 sm:$0xff]  }
 0x406   : > { %6487 = vmatpush1.bf16.msra.mxu0 %v13828_v22  ;;  %v13885_v22 = vld [vmem:[%s15447_s16 + $0xc08] ss:$72 sps:$4 sm:$0xff]  }
 0x407   : > { %6831 = vmatpush1.bf16.msra.mxu1 %v13831_v24  ;;  %6488 = vmatprep.subr.bf16.mxu0 %v13836_v25  ;;  %v13890_v24 = vld [vmem:[%s15447_s16 + $0x1584] ss:$72 sps:$4 sm:$0xff]  }
 0x408   : > { %6832 = vmatprep.subr.bf16.mxu1 %v13839_v29  ;;  %v13893_v25 = vld [vmem:[%s15447_s16 + $0xc9c] ss:$72 sps:$4 sm:$0xff]   ;;  %v13888_v29 = vld [vmem:[%s15447_s16 + $0x1580] ss:$72 sps:$4 sm:$0xff]  }
 0x40a   : > { %6489 = vmatpush1.bf16.msra.mxu0 %v13834_v26  ;;  %v13891_v26 = vld [vmem:[%s15447_s16 + $0xc98] ss:$72 sps:$4 sm:$0xff]  }
 0x40b   : > { %6833 = vmatpush1.bf16.msra.mxu1 %v13837_v30  ;;  %6490 = vmatprep.subr.bf16.mxu0 %v13842_v27  ;;  %v13896_v30 = vld [vmem:[%s15447_s16 + $0x1614] ss:$72 sps:$4 sm:$0xff]  }
 0x40c   : > { %6834 = vmatprep.subr.bf16.mxu1 %v13845_v32  ;;  %v13899_v27 = vld [vmem:[%s15447_s16 + $0xd2c] ss:$72 sps:$4 sm:$0xff]   ;;  %v13894_v32 = vld [vmem:[%s15447_s16 + $0x1610] ss:$72 sps:$4 sm:$0xff]  }
 0x40e   : > { %6491 = vmatpush1.bf16.msra.mxu0 %v13840_v31  ;;  %v13897_v31 = vld [vmem:[%s15447_s16 + $0xd28] ss:$72 sps:$4 sm:$0xff]  }
 0x40f   : > { %6835 = vmatpush1.bf16.msra.mxu1 %v13843_v34  ;;  %6492 = vmatprep.subr.bf16.mxu0 %v13848_v35  ;;  %v13902_v34 = vld [vmem:[%s15447_s16 + $0x16a4] ss:$72 sps:$4 sm:$0xff]  }
 0x410   : > { %6836 = vmatprep.subr.bf16.mxu1 %v13851_v36  ;;  %v13905_v35 = vld [vmem:[%s15447_s16 + $0xdbc] ss:$72 sps:$4 sm:$0xff]   ;;  %v13900_v36 = vld [vmem:[%s15447_s16 + $0x16a0] ss:$72 sps:$4 sm:$0xff]  }
 0x412   : > { %6493 = vmatpush1.bf16.msra.mxu0 %v13846_v39  ;;  %v13903_v39 = vld [vmem:[%s15447_s16 + $0xdb8] ss:$72 sps:$4 sm:$0xff]  }
 0x413   : > { %6837 = vmatpush1.bf16.msra.mxu1 %v13849_v50  ;;  %6505 = vmatprep.subr.bf16.mxu0 %v13854_v53  ;;  %v13908_v50 = vld [vmem:[%s15447_s16 + $0x1734] ss:$72 sps:$4 sm:$0xff]  }
 0x414   : > { %6849 = vmatprep.subr.bf16.mxu1 %v13857_v54  ;;  %v13911_v53 = vld [vmem:[%s15447_s16 + $0xe4c] ss:$72 sps:$4 sm:$0xff]   ;;  %v13906_v54 = vld [vmem:[%s15447_s16 + $0x1730] ss:$72 sps:$4 sm:$0xff]  }
 0x415   : > { %6495 = vmatmul.mubr.bf16.vlgmr.msra.gmra.mrb[12].mxu0 %v15672_v47 }
 0x416   : > { %6839 = vmatmul.mubr.bf16.vlgmr.msra.gmra.mrb[12].mxu1 %v15670_v46  ;;  %6506 = vmatpush1.bf16.msra.mxu0 %v13852_v56  ;;  %v13909_v56 = vld [vmem:[%s15447_s16 + $0xe48] ss:$72 sps:$4 sm:$0xff]  }
 0x417   : > { %6537 = vmatprep.mubr.bf16.mxu0 %v15678_v51  ;;  %6850 = vmatpush1.bf16.msra.mxu1 %v13855_v60  ;;  %v13914_v60 = vld [vmem:[%s15447_s16 + $0x17c4] ss:$72 sps:$4 sm:$0xff]  }
 0x418   : > { %6881 = vmatprep.mubr.bf16.mxu1 %v15666_v49  ;;  %6507 = vmatprep.subr.bf16.mxu0 %v13860_v0  ;;  %v13917_v0 = vld [vmem:[%s15447_s16 + $0xedc] ss:$72 sps:$4 sm:$0xff]  }
 0x419   : > { %6851 = vmatprep.subr.bf16.mxu1 %v13863_v2  ;;  %v13912_v2 = vld [vmem:[%s15447_s16 + $0x17c0] ss:$72 sps:$4 sm:$0xff]  }
 0x41a   : > { %6508 = vmatpush1.bf16.msra.mxu0 %v13858_v3  ;;  %v13915_v3 = vld [vmem:[%s15447_s16 + $0xed8] ss:$72 sps:$4 sm:$0xff]  }
 0x41b   : > { %6852 = vmatpush1.bf16.msra.mxu1 %v13861_v5  ;;  %6509 = vmatprep.subr.bf16.mxu0 %v13866_v45  ;;  %v13920_v5 = vld [vmem:[%s15447_s16 + $0x1854] ss:$72 sps:$4 sm:$0xff]  }
 0x41c   : > { %6853 = vmatprep.subr.bf16.mxu1 %v13869_v13  ;;  %v13923_v45 = vld [vmem:[%s15447_s16 + $0xf6c] ss:$72 sps:$4 sm:$0xff]   ;;  %v13918_v13 = vld [vmem:[%s15447_s16 + $0x1850] ss:$72 sps:$4 sm:$0xff]  }
 0x41e   : > { %6510 = vmatpush1.bf16.msra.mxu0 %v13864_v52  ;;  %v13921_v52 = vld [vmem:[%s15447_s16 + $0xf68] ss:$72 sps:$4 sm:$0xff]  }
 0x41f   : > { %6854 = vmatpush1.bf16.msra.mxu1 %v13867_v6  ;;  %6511 = vmatprep.subr.bf16.mxu0 %v13872_v11  ;;  %v13926_v6 = vld [vmem:[%s15447_s16 + $0x18e4] ss:$72 sps:$4 sm:$0xff]  }
 0x420   : > { %6855 = vmatprep.subr.bf16.mxu1 %v13875_v33  ;;  %v13929_v11 = vld [vmem:[%s15447_s16 + $0xffc] ss:$72 sps:$4 sm:$0xff]   ;;  %v13924_v33 = vld [vmem:[%s15447_s16 + $0x18e0] ss:$72 sps:$4 sm:$0xff]  }
 0x422   : > { %6512 = vmatpush1.bf16.msra.mxu0 %v13870_v8  ;;  %v13927_v8 = vld [vmem:[%s15447_s16 + $0xff8] ss:$72 sps:$4 sm:$0xff]  }
 0x423   : > { %6856 = vmatpush1.bf16.msra.mxu1 %v13873_v23  ;;  %6513 = vmatprep.subr.bf16.mxu0 %v13878_v9  ;;  %v13932_v23 = vld [vmem:[%s15447_s16 + $0x1974] ss:$72 sps:$4 sm:$0xff]  }
 0x424   : > { %6857 = vmatprep.subr.bf16.mxu1 %v13881_v10  ;;  %v13935_v9 = vld [vmem:[%s15447_s16 + $0x108c] ss:$72 sps:$4 sm:$0xff]   ;;  %v13930_v10 = vld [vmem:[%s15447_s16 + $0x1970] ss:$72 sps:$4 sm:$0xff]  }
 0x426   : > { %6514 = vmatpush1.bf16.msra.mxu0 %v13876_v12  ;;  %v13933_v12 = vld [vmem:[%s15447_s16 + $0x1088] ss:$72 sps:$4 sm:$0xff]  }
 0x427   : > { %6858 = vmatpush1.bf16.msra.mxu1 %v13879_v17  ;;  %6515 = vmatprep.subr.bf16.mxu0 %v13884_v19  ;;  %v13938_v17 = vld [vmem:[%s15447_s16 + $0x1a04] ss:$72 sps:$4 sm:$0xff]  }
 0x428   : > { %6859 = vmatprep.subr.bf16.mxu1 %v13887_v20  ;;  %v13941_v19 = vld [vmem:[%s15447_s16 + $0x111c] ss:$72 sps:$4 sm:$0xff]   ;;  %v13936_v20 = vld [vmem:[%s15447_s16 + $0x1a00] ss:$72 sps:$4 sm:$0xff]  }
 0x42a   : > { %6516 = vmatpush1.bf16.msra.mxu0 %v13882_v21  ;;  %v13939_v21 = vld [vmem:[%s15447_s16 + $0x1118] ss:$72 sps:$4 sm:$0xff]  }
 0x42b   : > { %6860 = vmatpush1.bf16.msra.mxu1 %v13885_v22  ;;  %6517 = vmatprep.subr.bf16.mxu0 %v13890_v24  ;;  %v13944_v22 = vld [vmem:[%s15447_s16 + $0x1a94] ss:$72 sps:$4 sm:$0xff]  }
 0x42c   : > { %6861 = vmatprep.subr.bf16.mxu1 %v13893_v25  ;;  %v13947_v24 = vld [vmem:[%s15447_s16 + $0x11ac] ss:$72 sps:$4 sm:$0xff]   ;;  %v13942_v25 = vld [vmem:[%s15447_s16 + $0x1a90] ss:$72 sps:$4 sm:$0xff]  }
 0x42e   : > { %6518 = vmatpush1.bf16.msra.mxu0 %v13888_v29  ;;  %v13945_v29 = vld [vmem:[%s15447_s16 + $0x11a8] ss:$72 sps:$4 sm:$0xff]  }
 0x42f   : > { %6862 = vmatpush1.bf16.msra.mxu1 %v13891_v26  ;;  %6519 = vmatprep.subr.bf16.mxu0 %v13896_v30  ;;  %v13950_v26 = vld [vmem:[%s15447_s16 + $0x34] ss:$72 sps:$4 sm:$0xff]  }
 0x430   : > { %6863 = vmatprep.subr.bf16.mxu1 %v13899_v27  ;;  %v13953_v30 = vld [vmem:[%s15447_s16 + $0x123c] ss:$72 sps:$4 sm:$0xff]   ;;  %v13948_v27 = vld [vmem:[%s15447_s16 + $0x30] ss:$72 sps:$4 sm:$0xff]  }
 0x432   : > { %6520 = vmatpush1.bf16.msra.mxu0 %v13894_v32  ;;  %v13951_v32 = vld [vmem:[%s15447_s16 + $0x1238] ss:$72 sps:$4 sm:$0xff]  }
 0x433   : > { %6864 = vmatpush1.bf16.msra.mxu1 %v13897_v31  ;;  %6521 = vmatprep.subr.bf16.mxu0 %v13902_v34  ;;  %v13956_v31 = vld [vmem:[%s15447_s16 + $0xc4] ss:$72 sps:$4 sm:$0xff]  }
 0x434   : > { %6865 = vmatprep.subr.bf16.mxu1 %v13905_v35  ;;  %v13959_v34 = vld [vmem:[%s15447_s16 + $0x12cc] ss:$72 sps:$4 sm:$0xff]   ;;  %v13954_v35 = vld [vmem:[%s15447_s16 + $0xc0] ss:$72 sps:$4 sm:$0xff]  }
 0x436   : > { %6522 = vmatpush1.bf16.msra.mxu0 %v13900_v36  ;;  %v13957_v36 = vld [vmem:[%s15447_s16 + $0x12c8] ss:$72 sps:$4 sm:$0xff]  }
 0x437   : > { %6866 = vmatpush1.bf16.msra.mxu1 %v13903_v39  ;;  %6523 = vmatprep.subr.bf16.mxu0 %v13908_v50  ;;  %v13962_v39 = vld [vmem:[%s15447_s16 + $0x154] ss:$72 sps:$4 sm:$0xff]  }
 0x438   : > { %6867 = vmatprep.subr.bf16.mxu1 %v13911_v53  ;;  %v13965_v50 = vld [vmem:[%s15447_s16 + $0x135c] ss:$72 sps:$4 sm:$0xff]   ;;  %v13960_v53 = vld [vmem:[%s15447_s16 + $0x150] ss:$72 sps:$4 sm:$0xff]  }
 0x43a   : > { %6524 = vmatpush1.bf16.msra.mxu0 %v13906_v54  ;;  %v13963_v54 = vld [vmem:[%s15447_s16 + $0x1358] ss:$72 sps:$4 sm:$0xff]  }
 0x43b   : > { %6868 = vmatpush1.bf16.msra.mxu1 %v13909_v56  ;;  %6525 = vmatprep.subr.bf16.mxu0 %v13914_v60  ;;  %v13968_v56 = vld [vmem:[%s15447_s16 + $0x1e4] ss:$72 sps:$4 sm:$0xff]  }
 0x43c   : > { %6869 = vmatprep.subr.bf16.mxu1 %v13917_v0  ;;  %v13971_v60 = vld [vmem:[%s15447_s16 + $0x13ec] ss:$72 sps:$4 sm:$0xff]   ;;  %v13966_v0 = vld [vmem:[%s15447_s16 + $0x1e0] ss:$72 sps:$4 sm:$0xff]  }
 0x43e   : > { %6526 = vmatpush1.bf16.msra.mxu0 %v13912_v2  ;;  %v13969_v2 = vld [vmem:[%s15447_s16 + $0x13e8] ss:$72 sps:$4 sm:$0xff]  }
 0x43f   : > { %6870 = vmatpush1.bf16.msra.mxu1 %v13915_v3  ;;  %6527 = vmatprep.subr.bf16.mxu0 %v13920_v5  ;;  %v13974_v3 = vld [vmem:[%s15447_s16 + $0x274] ss:$72 sps:$4 sm:$0xff]  }
 0x440   : > { %6871 = vmatprep.subr.bf16.mxu1 %v13923_v45  ;;  %v13977_v5 = vld [vmem:[%s15447_s16 + $0x147c] ss:$72 sps:$4 sm:$0xff]   ;;  %v13972_v45 = vld [vmem:[%s15447_s16 + $0x270] ss:$72 sps:$4 sm:$0xff]  }
 0x442   : > { %6528 = vmatpush1.bf16.msra.mxu0 %v13918_v13  ;;  %v13975_v13 = vld [vmem:[%s15447_s16 + $0x1478] ss:$72 sps:$4 sm:$0xff]  }
 0x443   : > { %6872 = vmatpush1.bf16.msra.mxu1 %v13921_v52  ;;  %6529 = vmatprep.subr.bf16.mxu0 %v13926_v6  ;;  %v13980_v52 = vld [vmem:[%s15447_s16 + $0x304] ss:$72 sps:$4 sm:$0xff]  }
 0x444   : > { %6873 = vmatprep.subr.bf16.mxu1 %v13929_v11  ;;  %v16379_v6 = vld [vmem:[%s15468_s19 + $0x20] sm:$0xff] }
 0x445   : > { %v13983_v11 = vld [vmem:[%s15447_s16 + $0x150c] ss:$72 sps:$4 sm:$0xff]  }
 0x446   : > { %6530 = vmatpush1.bf16.msra.mxu0 %v13924_v33  ;;  %v16383_v33 = vld [vmem:[%s15468_s19 + $0x28] sm:$0xff] }
 0x447   : > { %6874 = vmatpush1.bf16.msra.mxu1 %v13927_v8  ;;  %6531 = vmatprep.subr.bf16.mxu0 %v13932_v23  ;;  %v13978_v8 = vld [vmem:[%s15447_s16 + $0x300] ss:$72 sps:$4 sm:$0xff]   ;;  %v1530_v23 = vrot.slane %v16379_v6, %v16047_v59 }
 0x448   : > { %6875 = vmatprep.subr.bf16.mxu1 %v13935_v9  ;;  %v13981_v9 = vld [vmem:[%s15447_s16 + $0x1508] ss:$72 sps:$4 sm:$0xff]  }
 0x44a   : > { %6532 = vmatpush1.bf16.msra.mxu0 %v13930_v10  ;;  %v13986_v10 = vld [vmem:[%s15447_s16 + $0x394] ss:$72 sps:$4 sm:$0xff]  }
 0x44b   : > { %6876 = vmatpush1.bf16.msra.mxu1 %v13933_v12  ;;  %6533 = vmatprep.subr.bf16.mxu0 %v13938_v17  ;;  %v1534_v17 = vrot.slane %v16383_v33, %v16047_v59 }
 0x44c   : > { %6877 = vmatprep.subr.bf16.mxu1 %v13941_v19  ;;  %v13989_v19 = vld [vmem:[%s15447_s16 + $0x159c] ss:$72 sps:$4 sm:$0xff]  }
 0x44e   : > { %6534 = vmatpush1.bf16.msra.mxu0 %v13936_v20 }
 0x44f   : > { %6878 = vmatpush1.bf16.msra.mxu1 %v13939_v21  ;;  %6535 = vmatprep.subr.bf16.mxu0 %v13944_v22  ;;  %v13984_v22 = vld [vmem:[%s15447_s16 + $0x390] ss:$72 sps:$4 sm:$0xff]  }
 0x450   : > { %6879 = vmatprep.subr.bf16.mxu1 %v13947_v24 }
 0x452   : > { %6536 = vmatpush1.bf16.msra.mxu0 %v13942_v25 }
 0x453   : > { %6880 = vmatpush1.bf16.msra.mxu1 %v13945_v29  ;;  %6677 = vmatprep.subr.bf16.mxu0 %v13950_v26  ;;  %v13987_v26 = vld [vmem:[%s15447_s16 + $0x1598] ss:$72 sps:$4 sm:$0xff]  }
 0x454   : > { %6892 = vmatprep.subr.bf16.mxu1 %v13953_v30  ;;  %v13992_v30 = vld [vmem:[%s15447_s16 + $0x424] ss:$72 sps:$4 sm:$0xff]  }
 0x455   : > { %6538 = vmatmul.mubr.bf16.vlgmr.msra.gmra.mrb[12].mxu0 %v15683_v55 }
 0x456   : > { %6882 = vmatmul.mubr.bf16.vlgmr.msra.gmra.mrb[12].mxu1 %v15672_v47  ;;  %6678 = vmatpush1.bf16.msra.mxu0 %v13948_v27 }
 0x457   : > { %6709 = vmatprep.mubr.bf16.mxu0 %v15664_v40  ;;  %6893 = vmatpush1.bf16.msra.mxu1 %v13951_v32 }
 0x458   : > { %6924 = vmatprep.mubr.bf16.mxu1 %v15678_v51  ;;  %6679 = vmatprep.subr.bf16.mxu0 %v13956_v31  ;;  %v13995_v31 = vld [vmem:[%s15447_s16 + $0x162c] ss:$72 sps:$4 sm:$0xff]  }
 0x459   : > { %6894 = vmatprep.subr.bf16.mxu1 %v13959_v34 }
 0x45a   : > { %6680 = vmatpush1.bf16.msra.mxu0 %v13954_v35 }
 0x45b   : > { %6895 = vmatpush1.bf16.msra.mxu1 %v13957_v36  ;;  %6681 = vmatprep.subr.bf16.mxu0 %v13962_v39  ;;  %v13990_v36 = vld [vmem:[%s15447_s16 + $0x420] ss:$72 sps:$4 sm:$0xff]  }
 0x45c   : > { %6896 = vmatprep.subr.bf16.mxu1 %v13965_v50  ;;  %v13993_v39 = vld [vmem:[%s15447_s16 + $0x1628] ss:$72 sps:$4 sm:$0xff]   ;;  %v13998_v50 = vld [vmem:[%s15447_s16 + $0x4b4] ss:$72 sps:$4 sm:$0xff]  }
 0x45e   : > { %6682 = vmatpush1.bf16.msra.mxu0 %v13960_v53  ;;  %v14001_v53 = vld [vmem:[%s15447_s16 + $0x16bc] ss:$72 sps:$4 sm:$0xff]  }
 0x45f   : > { %6897 = vmatpush1.bf16.msra.mxu1 %v13963_v54  ;;  %6683 = vmatprep.subr.bf16.mxu0 %v13968_v56  ;;  %v13996_v54 = vld [vmem:[%s15447_s16 + $0x4b0] ss:$72 sps:$4 sm:$0xff]  }
 0x460   : > { %6898 = vmatprep.subr.bf16.mxu1 %v13971_v60  ;;  %v13999_v56 = vld [vmem:[%s15447_s16 + $0x16b8] ss:$72 sps:$4 sm:$0xff]   ;;  %v14004_v60 = vld [vmem:[%s15447_s16 + $0x544] ss:$72 sps:$4 sm:$0xff]  }
 0x462   : > { %6684 = vmatpush1.bf16.msra.mxu0 %v13966_v0  ;;  %v14007_v0 = vld [vmem:[%s15447_s16 + $0x174c] ss:$72 sps:$4 sm:$0xff]  }
 0x463   : > { %6899 = vmatpush1.bf16.msra.mxu1 %v13969_v2  ;;  %6685 = vmatprep.subr.bf16.mxu0 %v13974_v3  ;;  %v14002_v2 = vld [vmem:[%s15447_s16 + $0x540] ss:$72 sps:$4 sm:$0xff]  }
 0x464   : > { %6900 = vmatprep.subr.bf16.mxu1 %v13977_v5  ;;  %v14005_v3 = vld [vmem:[%s15447_s16 + $0x1748] ss:$72 sps:$4 sm:$0xff]   ;;  %v14010_v5 = vld [vmem:[%s15447_s16 + $0x5d4] ss:$72 sps:$4 sm:$0xff]  }
 0x466   : > { %6686 = vmatpush1.bf16.msra.mxu0 %v13972_v45  ;;  %v14013_v45 = vld [vmem:[%s15447_s16 + $0x17dc] ss:$72 sps:$4 sm:$0xff]  }
 0x467   : > { %6901 = vmatpush1.bf16.msra.mxu1 %v13975_v13  ;;  %6687 = vmatprep.subr.bf16.mxu0 %v13980_v52  ;;  %v14008_v13 = vld [vmem:[%s15447_s16 + $0x5d0] ss:$72 sps:$4 sm:$0xff]  }
 0x468   : > { %v6281_v12 = vpop.f32.mrb[8].mxu0  ;;  %6902 = vmatprep.subr.bf16.mxu1 %v13983_v11  ;;  %v14011_v52 = vld [vmem:[%s15447_s16 + $0x17d8] ss:$72 sps:$4 sm:$0xff]   ;;  %v14016_v11 = vld [vmem:[%s15447_s16 + $0x664] ss:$72 sps:$4 sm:$0xff]  }
 0x469   : > { %v6283_v20 = vpop.f32.mrb[9].mxu0  ;;  %v12766_v24 = vadd.f32 %v6281_v12, %v1530_v23  ;;  %v14025_v12 = vld [vmem:[%s15447_s16 + $0x18fc] ss:$72 sps:$4 sm:$0xff]  }
 0x46a   : > { %v6285_v21 = vpop.f32.mrb[10].mxu0  ;;  %6688 = vmatpush1.bf16.msra.mxu0 %v13978_v8  ;;  %v16396_v27 = vadd.f32 %v6283_v20, %v1534_v17  ;;  %v14019_v8 = vld [vmem:[%s15447_s16 + $0x186c] ss:$72 sps:$4 sm:$0xff]  }
 0x46b   : > { %v12768_v25 = vadd.f32 %v6285_v21, %v1530_v23  ;;  %6903 = vmatpush1.bf16.msra.mxu1 %v13981_v9  ;;  %v6287_v29 = vpop.f32.mrb[11].mxu0  ;;  %6689 = vmatprep.subr.bf16.mxu0 %v13986_v10  ;;  %v14014_v23 = vld [vmem:[%s15447_s16 + $0x660] ss:$72 sps:$4 sm:$0xff]   ;;  %v14022_v10 = vld [vmem:[%s15447_s16 + $0x6f4] ss:$72 sps:$4 sm:$0xff]  }
 0x46c   : > { %v16398_v32 = vadd.f32 %v6287_v29, %v1534_v17  ;;  %6904 = vmatprep.subr.bf16.mxu1 %v13989_v19  ;;  %v14017_v9 = vld [vmem:[%s15447_s16 + $0x1868] ss:$72 sps:$4 sm:$0xff]   ;;  %v14023_v19 = vld [vmem:[%s15447_s16 + $0x18f8] ss:$72 sps:$4 sm:$0xff]   ;;  %v14028_v20 = vld [vmem:[%s15447_s16 + $0x784] ss:$72 sps:$4 sm:$0xff]  }
 0x46d   : > { %v16401_v34 = vpack.c.bf16 %v12768_v25, %v12766_v24  ;;  %v14020_v17 = vld [vmem:[%s15447_s16 + $0x6f0] ss:$72 sps:$4 sm:$0xff]   ;;  %v14031_v21 = vld [vmem:[%s15447_s16 + $0x198c] ss:$72 sps:$4 sm:$0xff]   ;;  %v14037_v29 = vld [vmem:[%s15447_s16 + $0x1a1c] ss:$72 sps:$4 sm:$0xff]  }
 0x46e   : > { %v7069_v35 = vpack.c.bf16 %v16398_v32, %v16396_v27  ;;  %6690 = vmatpush1.bf16.msra.mxu0 %v13984_v22  ;;  %v14026_v22 = vld [vmem:[%s15447_s16 + $0x780] ss:$72 sps:$4 sm:$0xff]   ;;  %v14034_v25 = vld [vmem:[%s15447_s16 + $0x814] ss:$72 sps:$4 sm:$0xff]  }
 0x46f   : > { %6905 = vmatpush1.bf16.msra.mxu1 %v13987_v26  ;;  %6691 = vmatprep.subr.bf16.mxu0 %v13992_v30  ;;  %v14029_v24 = vld [vmem:[%s15447_s16 + $0x1988] ss:$72 sps:$4 sm:$0xff]   ;;  %v14035_v30 = vld [vmem:[%s15447_s16 + $0x1a18] ss:$72 sps:$4 sm:$0xff]  }
 0x470   : > { %6906 = vmatprep.subr.bf16.mxu1 %v13995_v31  ;;  %v14032_v26 = vld [vmem:[%s15447_s16 + $0x810] ss:$72 sps:$4 sm:$0xff]   ;;  %v14040_v31 = vld [vmem:[%s15447_s16 + $0x8a4] ss:$72 sps:$4 sm:$0xff]  }
 0x472   : > { %6692 = vmatpush1.bf16.msra.mxu0 %v13990_v36  ;;  %v14043_v36 = vld [vmem:[%s15447_s16 + $0x1aac] ss:$72 sps:$4 sm:$0xff]  }
 0x473   : > { %6907 = vmatpush1.bf16.msra.mxu1 %v13993_v39  ;;  %6693 = vmatprep.subr.bf16.mxu0 %v13998_v50  ;;  %v14038_v39 = vld [vmem:[%s15447_s16 + $0x8a0] ss:$72 sps:$4 sm:$0xff]  }
 0x474   : > { %6908 = vmatprep.subr.bf16.mxu1 %v14001_v53  ;;  %v14041_v50 = vld [vmem:[%s15447_s16 + $0x1aa8] ss:$72 sps:$4 sm:$0xff]   ;;  %v14046_v53 = vld [vmem:[%s15447_s16 + $0x934] ss:$72 sps:$4 sm:$0xff]  }
 0x476   : > { %6694 = vmatpush1.bf16.msra.mxu0 %v13996_v54  ;;  %v14044_v54 = vld [vmem:[%s15447_s16 + $0x930] ss:$72 sps:$4 sm:$0xff]  }
 0x477   : > { %6909 = vmatpush1.bf16.msra.mxu1 %v13999_v56  ;;  %6695 = vmatprep.subr.bf16.mxu0 %v14004_v60  ;;  %v14049_v56 = vld [vmem:[%s15447_s16 + $0x9c4] ss:$72 sps:$4 sm:$0xff]   ;;  %v14047_v60 = vld [vmem:[%s15447_s16 + $0x9c0] ss:$72 sps:$4 sm:$0xff]  }
 0x478   : > { %6910 = vmatprep.subr.bf16.mxu1 %v14007_v0  ;;  %v14052_v0 = vld [vmem:[%s15447_s16 + $0xa54] ss:$72 sps:$4 sm:$0xff]  }
 0x47a   : > { %6696 = vmatpush1.bf16.msra.mxu0 %v14002_v2  ;;  %v14050_v2 = vld [vmem:[%s15447_s16 + $0xa50] ss:$72 sps:$4 sm:$0xff]  }
 0x47b   : > { %6911 = vmatpush1.bf16.msra.mxu1 %v14005_v3  ;;  %6697 = vmatprep.subr.bf16.mxu0 %v14010_v5  ;;  %v14055_v3 = vld [vmem:[%s15447_s16 + $0xae4] ss:$72 sps:$4 sm:$0xff]   ;;  %v14053_v5 = vld [vmem:[%s15447_s16 + $0xae0] ss:$72 sps:$4 sm:$0xff]  }
 0x47c   : > { %6912 = vmatprep.subr.bf16.mxu1 %v14013_v45  ;;  %v14058_v45 = vld [vmem:[%s15447_s16 + $0xb74] ss:$72 sps:$4 sm:$0xff]  }
 0x47e   : > { %6698 = vmatpush1.bf16.msra.mxu0 %v14008_v13  ;;  %v14056_v13 = vld [vmem:[%s15447_s16 + $0xb70] ss:$72 sps:$4 sm:$0xff]  }
 0x47f   : > { %6913 = vmatpush1.bf16.msra.mxu1 %v14011_v52  ;;  %6699 = vmatprep.subr.bf16.mxu0 %v14016_v11  ;;  %v14061_v52 = vld [vmem:[%s15447_s16 + $0xc04] ss:$72 sps:$4 sm:$0xff]   ;;  %v14059_v11 = vld [vmem:[%s15447_s16 + $0xc00] ss:$72 sps:$4 sm:$0xff]  }
 0x480   : > { %6914 = vmatprep.subr.bf16.mxu1 %v14019_v8 }
 0x482   : > { %6700 = vmatpush1.bf16.msra.mxu0 %v14014_v23  ;;  %v14891_v23 = vld [vmem:[%s15468_s19 + $0x58] sm:$0xff] }
 0x483   : > { %6915 = vmatpush1.bf16.msra.mxu1 %v14017_v9  ;;  %6701 = vmatprep.subr.bf16.mxu0 %v14022_v10  ;;  %v1558_v9 = vrot.slane %v14891_v23, %v16047_v59  ;;  %v14101_v23 = vld [vmem:[%s15447_s16 + $0x13e0] ss:$72 sps:$4 sm:$0xff]  }
 0x484   : > { %6916 = vmatprep.subr.bf16.mxu1 %v14025_v12 }
 0x486   : > { %6702 = vmatpush1.bf16.msra.mxu0 %v14020_v17 }
 0x487   : > { %6917 = vmatpush1.bf16.msra.mxu1 %v14023_v19  ;;  %6703 = vmatprep.subr.bf16.mxu0 %v14028_v20 }
 0x488   : > { %6918 = vmatprep.subr.bf16.mxu1 %v14031_v21 }
 0x48a   : > { %6704 = vmatpush1.bf16.msra.mxu0 %v14026_v22 }
 0x48b   : > { %6919 = vmatpush1.bf16.msra.mxu1 %v14029_v24  ;;  %6705 = vmatprep.subr.bf16.mxu0 %v14034_v25  ;;  %v14065_v24 = vld [vmem:[%s15447_s16 + $0xd20] ss:$72 sps:$4 sm:$0xff]  }
 0x48c   : > { %6920 = vmatprep.subr.bf16.mxu1 %v14037_v29  ;;  %v14070_v29 = vld [vmem:[%s15447_s16 + $0xdb4] ss:$72 sps:$4 sm:$0xff]  }
 0x48e   : > { %6706 = vmatpush1.bf16.msra.mxu0 %v14032_v26  ;;  %v14068_v26 = vld [vmem:[%s15447_s16 + $0xdb0] ss:$72 sps:$4 sm:$0xff]  }
 0x48f   : > { %6921 = vmatpush1.bf16.msra.mxu1 %v14035_v30  ;;  %6707 = vmatprep.subr.bf16.mxu0 %v14040_v31  ;;  %v14073_v30 = vld [vmem:[%s15447_s16 + $0xe44] ss:$72 sps:$4 sm:$0xff]   ;;  %v14071_v31 = vld [vmem:[%s15447_s16 + $0xe40] ss:$72 sps:$4 sm:$0xff]  }
 0x490   : > { %6922 = vmatprep.subr.bf16.mxu1 %v14043_v36  ;;  %v14076_v36 = vld [vmem:[%s15447_s16 + $0xed4] ss:$72 sps:$4 sm:$0xff]  }
 0x492   : > { %6708 = vmatpush1.bf16.msra.mxu0 %v14038_v39  ;;  %v14074_v39 = vld [vmem:[%s15447_s16 + $0xed0] ss:$72 sps:$4 sm:$0xff]  }
 0x493   : > { %6923 = vmatpush1.bf16.msra.mxu1 %v14041_v50  ;;  %6720 = vmatprep.subr.bf16.mxu0 %v14046_v53  ;;  %v14079_v50 = vld [vmem:[%s15447_s16 + $0xf64] ss:$72 sps:$4 sm:$0xff]   ;;  %v14077_v53 = vld [vmem:[%s15447_s16 + $0xf60] ss:$72 sps:$4 sm:$0xff]  }
 0x494   : > { %12275 = vmatprep.subr.msk.bf16.mxu1 %vm7084_vm0, %v16250_v62 }
 0x495   : > { %6710 = vmatmul.mubr.bf16.vlgmr.msra.gmra.mrb[16].mxu0 %v15670_v46 }
 0x496   : > { %6925 = vmatmul.mubr.bf16.vlgmr.msra.gmra.mrb[12].mxu1 %v15683_v55  ;;  %6721 = vmatpush1.bf16.msra.mxu0 %v14044_v54  ;;  %v14082_v54 = vld [vmem:[%s15447_s16 + $0xff4] ss:$72 sps:$4 sm:$0xff]  }
 0x497   : > { %6752 = vmatprep.mubr.bf16.mxu0 %v15666_v49  ;;  %12276 = vmatprep.mubr.msk.bf16.mxu1 %vm7084_vm0, %v16075_v16 }
 0x498   : > { %6722 = vmatprep.subr.bf16.mxu0 %v14049_v56  ;;  %v14080_v56 = vld [vmem:[%s15447_s16 + $0xff0] ss:$72 sps:$4 sm:$0xff]  }
 0x49a   : > { %6723 = vmatpush1.bf16.msra.mxu0 %v14047_v60  ;;  %v14085_v60 = vld [vmem:[%s15447_s16 + $0x1084] ss:$72 sps:$4 sm:$0xff]  }
 0x49b   : > { %6724 = vmatprep.subr.bf16.mxu0 %v14052_v0  ;;  %v14083_v0 = vld [vmem:[%s15447_s16 + $0x1080] ss:$72 sps:$4 sm:$0xff]  }
 0x49c   : > { %7092 = vmatpush1.bf16.xpose.msra.mxu1 %v7070_v58  ;;  %v1554_v58 = vrot.slane %v14890_v44, %v16047_v59  ;;  %v14100_v44 = vld [vmem:[%s15447_s16 + $0x1354] ss:$72 sps:$4 sm:$0xff]  }
 0x49e   : > { %6725 = vmatpush1.bf16.msra.mxu0 %v14050_v2  ;;  %v14088_v2 = vld [vmem:[%s15447_s16 + $0x1114] ss:$72 sps:$4 sm:$0xff]  }
 0x49f   : > { %6726 = vmatprep.subr.bf16.mxu0 %v14055_v3  ;;  %v14086_v3 = vld [vmem:[%s15447_s16 + $0x1110] ss:$72 sps:$4 sm:$0xff]  }
 0x4a2   : > { %6727 = vmatpush1.bf16.msra.mxu0 %v14053_v5  ;;  %v14091_v5 = vld [vmem:[%s15447_s16 + $0x11a4] ss:$72 sps:$4 sm:$0xff]  }
 0x4a3   : > { %7124 = vmatmul.mubr.bf16.vlgmr.msra.gmra.mrb[16].mxu1 %v7064_v14  ;;  %6728 = vmatprep.subr.bf16.mxu0 %v14058_v45  ;;  %v14067_v14 = vld [vmem:[%s15447_s16 + $0xd24] ss:$72 sps:$4 sm:$0xff]   ;;  %v14089_v45 = vld [vmem:[%s15447_s16 + $0x11a0] ss:$72 sps:$4 sm:$0xff]  }
 0x4a6   : > { %6729 = vmatpush1.bf16.msra.mxu0 %v14056_v13  ;;  %v14094_v13 = vld [vmem:[%s15447_s16 + $0x1234] ss:$72 sps:$4 sm:$0xff]  }
 0x4a7   : > { %6730 = vmatprep.subr.bf16.mxu0 %v14061_v52  ;;  %v14092_v52 = vld [vmem:[%s15447_s16 + $0x1230] ss:$72 sps:$4 sm:$0xff]  }
 0x4a9   : > { %v6668_v8 = vpop.f32.mrb[8].mxu1 }
 0x4aa   : > { %v6670_v10 = vpop.f32.mrb[9].mxu1  ;;  %6731 = vmatpush1.bf16.msra.mxu0 %v14059_v11  ;;  %v12778_v12 = vadd.f32 %v6668_v8, %v1554_v58  ;;  %v14097_v11 = vld [vmem:[%s15447_s16 + $0x12c4] ss:$72 sps:$4 sm:$0xff]  }
 0x4ab   : > { %v6672_v7 = vpop.f32.mrb[10].mxu1  ;;  %6732 = vmatprep.subr.bf16.mxu0 %v14064_v42  ;;  %v16471_v20 = vadd.f32 %v6670_v10, %v1558_v9  ;;  %v14095_v42 = vld [vmem:[%s15447_s16 + $0x12c0] ss:$72 sps:$4 sm:$0xff]   ;;  %v14103_v8 = vld [vmem:[%s15447_s16 + $0x13e4] ss:$72 sps:$4 sm:$0xff]  }
 0x4ac   : > { %v12780_v17 = vadd.f32 %v6672_v7, %v1554_v58  ;;  %v6674_v19 = vpop.f32.mrb[11].mxu1  ;;  %v14098_v58 = vld [vmem:[%s15447_s16 + $0x1350] ss:$72 sps:$4 sm:$0xff]   ;;  %v14107_v7 = vld [vmem:[%s15447_s16 + $0x1500] ss:$72 sps:$4 sm:$0xff]  }
 0x4ad   : > { %v16473_v21 = vadd.f32 %v6674_v19, %v1558_v9  ;;  %v14106_v9 = vld [vmem:[%s15447_s16 + $0x1474] ss:$72 sps:$4 sm:$0xff]   ;;  %v14104_v10 = vld [vmem:[%s15447_s16 + $0x1470] ss:$72 sps:$4 sm:$0xff]   ;;  %v14113_v19 = vld [vmem:[%s15447_s16 + $0x1620] ss:$72 sps:$4 sm:$0xff]  }
 0x4ae   : > { %v16475_v22 = vpack.c.bf16 %v12780_v17, %v12778_v12  ;;  %6733 = vmatpush1.bf16.msra.mxu0 %v14062_v15  ;;  %v14109_v15 = vld [vmem:[%s15447_s16 + $0x1504] ss:$72 sps:$4 sm:$0xff]   ;;  %v14110_v12 = vld [vmem:[%s15447_s16 + $0x1590] ss:$72 sps:$4 sm:$0xff]  }
 0x4af   : > { %v7075_v25 = vpack.c.bf16 %v16473_v21, %v16471_v20  ;;  %6734 = vmatprep.subr.bf16.mxu0 %v14067_v14  ;;  %v14112_v14 = vld [vmem:[%s15447_s16 + $0x1594] ss:$72 sps:$4 sm:$0xff]   ;;  %v14115_v17 = vld [vmem:[%s15447_s16 + $0x1624] ss:$72 sps:$4 sm:$0xff]  }
 0x4b2   : > { %6735 = vmatpush1.bf16.msra.mxu0 %v14065_v24  ;;  %v14118_v24 = vld [vmem:[%s15447_s16 + $0x16b4] ss:$72 sps:$4 sm:$0xff]  }
 0x4b3   : > { %6736 = vmatprep.subr.bf16.mxu0 %v14070_v29  ;;  %v14116_v29 = vld [vmem:[%s15447_s16 + $0x16b0] ss:$72 sps:$4 sm:$0xff]  }
 0x4b6   : > { %6737 = vmatpush1.bf16.msra.mxu0 %v14068_v26  ;;  %v14121_v26 = vld [vmem:[%s15447_s16 + $0x1744] ss:$72 sps:$4 sm:$0xff]  }
 0x4b7   : > { %6738 = vmatprep.subr.bf16.mxu0 %v14073_v30  ;;  %v14119_v30 = vld [vmem:[%s15447_s16 + $0x1740] ss:$72 sps:$4 sm:$0xff]  }
 0x4ba   : > { %6739 = vmatpush1.bf16.msra.mxu0 %v14071_v31  ;;  %v14124_v31 = vld [vmem:[%s15447_s16 + $0x17d4] ss:$72 sps:$4 sm:$0xff]  }
 0x4bb   : > { %6740 = vmatprep.subr.bf16.mxu0 %v14076_v36  ;;  %v14122_v36 = vld [vmem:[%s15447_s16 + $0x17d0] ss:$72 sps:$4 sm:$0xff]  }
 0x4be   : > { %6741 = vmatpush1.bf16.msra.mxu0 %v14074_v39  ;;  %v14127_v39 = vld [vmem:[%s15447_s16 + $0x1864] ss:$72 sps:$4 sm:$0xff]  }
 0x4bf   : > { %6742 = vmatprep.subr.bf16.mxu0 %v14079_v50  ;;  %v14125_v50 = vld [vmem:[%s15447_s16 + $0x1860] ss:$72 sps:$4 sm:$0xff]  }
 0x4c2   : > { %6743 = vmatpush1.bf16.msra.mxu0 %v14077_v53  ;;  %v14130_v53 = vld [vmem:[%s15447_s16 + $0x18f4] ss:$72 sps:$4 sm:$0xff]  }
 0x4c3   : > { %6744 = vmatprep.subr.bf16.mxu0 %v14082_v54  ;;  %v14128_v54 = vld [vmem:[%s15447_s16 + $0x18f0] ss:$72 sps:$4 sm:$0xff]  }
 0x4c6   : > { %6745 = vmatpush1.bf16.msra.mxu0 %v14080_v56  ;;  %v14133_v56 = vld [vmem:[%s15447_s16 + $0x1984] ss:$72 sps:$4 sm:$0xff]  }
 0x4c7   : > { %6746 = vmatprep.subr.bf16.mxu0 %v14085_v60  ;;  %v14131_v60 = vld [vmem:[%s15447_s16 + $0x1980] ss:$72 sps:$4 sm:$0xff]  }
 0x4ca   : > { %6747 = vmatpush1.bf16.msra.mxu0 %v14083_v0  ;;  %v14136_v0 = vld [vmem:[%s15447_s16 + $0x1a14] ss:$72 sps:$4 sm:$0xff]  }
 0x4cb   : > { %6748 = vmatprep.subr.bf16.mxu0 %v14088_v2  ;;  %v14134_v2 = vld [vmem:[%s15447_s16 + $0x1a10] ss:$72 sps:$4 sm:$0xff]  }
 0x4ce   : > { %6749 = vmatpush1.bf16.msra.mxu0 %v14086_v3  ;;  %v14139_v3 = vld [vmem:[%s15447_s16 + $0x1aa4] ss:$72 sps:$4 sm:$0xff]  }
 0x4cf   : > { %6750 = vmatprep.subr.bf16.mxu0 %v14091_v5  ;;  %v14137_v5 = vld [vmem:[%s15447_s16 + $0x1aa0] ss:$72 sps:$4 sm:$0xff]  }
 0x4d2   : > { %6751 = vmatpush1.bf16.msra.mxu0 %v14089_v45  ;;  %v14142_v45 = vld [vmem:[%s15447_s16 + $0x44] ss:$72 sps:$4 sm:$0xff]  }
 0x4d3   : > { %6763 = vmatprep.subr.bf16.mxu0 %v14094_v13  ;;  %v14140_v13 = vld [vmem:[%s15447_s16 + $0x40] ss:$72 sps:$4 sm:$0xff]  }
 0x4d5   : > { %6753 = vmatmul.mubr.bf16.vlgmr.msra.gmra.mrb[16].mxu0 %v15672_v47 }
 0x4d6   : > { %6764 = vmatpush1.bf16.msra.mxu0 %v14092_v52  ;;  %6795 = vmatprep.mubr.bf16.mxu0 %v15678_v51  ;;  %v14145_v52 = vld [vmem:[%s15447_s16 + $0xd4] ss:$72 sps:$4 sm:$0xff]  }
 0x4d7   : > { %6765 = vmatprep.subr.bf16.mxu0 %v14097_v11  ;;  %v14143_v11 = vld [vmem:[%s15447_s16 + $0xd0] ss:$72 sps:$4 sm:$0xff]  }
 0x4da   : > { %6766 = vmatpush1.bf16.msra.mxu0 %v14095_v42  ;;  %v14148_v42 = vld [vmem:[%s15447_s16 + $0x164] ss:$72 sps:$4 sm:$0xff]  }
 0x4db   : > { %6767 = vmatprep.subr.bf16.mxu0 %v14100_v44  ;;  %v14146_v44 = vld [vmem:[%s15447_s16 + $0x160] ss:$72 sps:$4 sm:$0xff]  }
 0x4de   : > { %6768 = vmatpush1.bf16.msra.mxu0 %v14098_v58  ;;  %v14151_v58 = vld [vmem:[%s15447_s16 + $0x1f4] ss:$72 sps:$4 sm:$0xff]  }
 0x4df   : > { %6769 = vmatprep.subr.bf16.mxu0 %v14103_v8  ;;  %v14149_v8 = vld [vmem:[%s15447_s16 + $0x1f0] ss:$72 sps:$4 sm:$0xff]  }
 0x4e2   : > { %6770 = vmatpush1.bf16.msra.mxu0 %v14101_v23  ;;  %v14154_v23 = vld [vmem:[%s15447_s16 + $0x284] ss:$72 sps:$4 sm:$0xff]  }
 0x4e3   : > { %6771 = vmatprep.subr.bf16.mxu0 %v14106_v9  ;;  %v14152_v9 = vld [vmem:[%s15447_s16 + $0x280] ss:$72 sps:$4 sm:$0xff]  }
 0x4e6   : > { %6772 = vmatpush1.bf16.msra.mxu0 %v14104_v10  ;;  %v14155_v10 = vld [vmem:[%s15447_s16 + $0x310] ss:$72 sps:$4 sm:$0xff]  }
 0x4e7   : > { %6773 = vmatprep.subr.bf16.mxu0 %v14109_v15  ;;  %v14892_v15 = vld [vmem:[%s15468_s19 + $0x40] sm:$0xff] }
 0x4ea   : > { %6774 = vmatpush1.bf16.msra.mxu0 %v14107_v7  ;;  %v1546_v7 = vrot.slane %v14892_v15, %v16047_v59  ;;  %v14190_v15 = vld [vmem:[%s15447_s16 + $0x944] ss:$72 sps:$4 sm:$0xff]  }
 0x4eb   : > { %6775 = vmatprep.subr.bf16.mxu0 %v14112_v14  ;;  %v14160_v14 = vld [vmem:[%s15447_s16 + $0x3a4] ss:$72 sps:$4 sm:$0xff]  }
 0x4ee   : > { %6776 = vmatpush1.bf16.msra.mxu0 %v14110_v12 }
 0x4ef   : > { %6777 = vmatprep.subr.bf16.mxu0 %v14115_v17  ;;  %v14893_v17 = vld [vmem:[%s15468_s19 + $0x48] sm:$0xff] }
 0x4f2   : > { %6778 = vmatpush1.bf16.msra.mxu0 %v14113_v19  ;;  %v1550_v19 = vrot.slane %v14893_v17, %v16047_v59  ;;  %v14196_v17 = vld [vmem:[%s15447_s16 + $0xa64] ss:$72 sps:$4 sm:$0xff]  }
 0x4f3   : > { %6779 = vmatprep.subr.bf16.mxu0 %v14118_v24 }
 0x4f6   : > { %6780 = vmatpush1.bf16.msra.mxu0 %v14116_v29 }
 0x4f7   : > { %6781 = vmatprep.subr.bf16.mxu0 %v14121_v26  ;;  %v14158_v26 = vld [vmem:[%s15447_s16 + $0x3a0] ss:$72 sps:$4 sm:$0xff]  }
 0x4fa   : > { %6782 = vmatpush1.bf16.msra.mxu0 %v14119_v30 }
 0x4fb   : > { %6783 = vmatprep.subr.bf16.mxu0 %v14124_v31 }
 0x4fe   : > { %6784 = vmatpush1.bf16.msra.mxu0 %v14122_v36 }
 0x4ff   : > { %6785 = vmatprep.subr.bf16.mxu0 %v14127_v39  ;;  %v14163_v39 = vld [vmem:[%s15447_s16 + $0x434] ss:$72 sps:$4 sm:$0xff]  }
 0x502   : > { %6786 = vmatpush1.bf16.msra.mxu0 %v14125_v50 }
 0x503   : > { %6787 = vmatprep.subr.bf16.mxu0 %v14130_v53 }
 0x506   : > { %6788 = vmatpush1.bf16.msra.mxu0 %v14128_v54 }
 0x507   : > { %6789 = vmatprep.subr.bf16.mxu0 %v14133_v56 }
 0x50a   : > { %6790 = vmatpush1.bf16.msra.mxu0 %v14131_v60  ;;  %v14161_v60 = vld [vmem:[%s15447_s16 + $0x430] ss:$72 sps:$4 sm:$0xff]  }
 0x50b   : > { %6791 = vmatprep.subr.bf16.mxu0 %v14136_v0  ;;  %v14166_v0 = vld [vmem:[%s15447_s16 + $0x4c4] ss:$72 sps:$4 sm:$0xff]  }
 0x50e   : > { %6792 = vmatpush1.bf16.msra.mxu0 %v14134_v2  ;;  %v14164_v2 = vld [vmem:[%s15447_s16 + $0x4c0] ss:$72 sps:$4 sm:$0xff]  }
 0x50f   : > { %6793 = vmatprep.subr.bf16.mxu0 %v14139_v3  ;;  %v14169_v3 = vld [vmem:[%s15447_s16 + $0x554] ss:$72 sps:$4 sm:$0xff]  }
 0x512   : > { %6794 = vmatpush1.bf16.msra.mxu0 %v14137_v5  ;;  %v14167_v5 = vld [vmem:[%s15447_s16 + $0x550] ss:$72 sps:$4 sm:$0xff]  }
 0x513   : > { %6935 = vmatprep.subr.bf16.mxu0 %v14142_v45  ;;  %v14172_v45 = vld [vmem:[%s15447_s16 + $0x5e4] ss:$72 sps:$4 sm:$0xff]  }
 0x515   : > { %6796 = vmatmul.mubr.bf16.vlgmr.msra.gmra.mrb[16].mxu0 %v15683_v55 }
 0x516   : > { %6936 = vmatpush1.bf16.msra.mxu0 %v14140_v13  ;;  %6967 = vmatprep.mubr.bf16.mxu0 %v15664_v40  ;;  %v14157_v40 = vld [vmem:[%s15447_s16 + $0x314] ss:$72 sps:$4 sm:$0xff]   ;;  %v14170_v13 = vld [vmem:[%s15447_s16 + $0x5e0] ss:$72 sps:$4 sm:$0xff]  }
 0x517   : > { %6937 = vmatprep.subr.bf16.mxu0 %v14145_v52  ;;  %v14175_v52 = vld [vmem:[%s15447_s16 + $0x674] ss:$72 sps:$4 sm:$0xff]  }
 0x51a   : > { %6938 = vmatpush1.bf16.msra.mxu0 %v14143_v11  ;;  %v14173_v11 = vld [vmem:[%s15447_s16 + $0x670] ss:$72 sps:$4 sm:$0xff]  }
 0x51b   : > { %6939 = vmatprep.subr.bf16.mxu0 %v14148_v42  ;;  %v14178_v42 = vld [vmem:[%s15447_s16 + $0x704] ss:$72 sps:$4 sm:$0xff]  }
 0x51e   : > { %6940 = vmatpush1.bf16.msra.mxu0 %v14146_v44  ;;  %v14176_v44 = vld [vmem:[%s15447_s16 + $0x700] ss:$72 sps:$4 sm:$0xff]  }
 0x51f   : > { %6941 = vmatprep.subr.bf16.mxu0 %v14151_v58  ;;  %v14181_v58 = vld [vmem:[%s15447_s16 + $0x794] ss:$72 sps:$4 sm:$0xff]  }
 0x522   : > { %6942 = vmatpush1.bf16.msra.mxu0 %v14149_v8  ;;  %v14179_v8 = vld [vmem:[%s15447_s16 + $0x790] ss:$72 sps:$4 sm:$0xff]  }
 0x523   : > { %6943 = vmatprep.subr.bf16.mxu0 %v14154_v23  ;;  %v14184_v23 = vld [vmem:[%s15447_s16 + $0x824] ss:$72 sps:$4 sm:$0xff]  }
 0x526   : > { %6944 = vmatpush1.bf16.msra.mxu0 %v14152_v9  ;;  %v14182_v9 = vld [vmem:[%s15447_s16 + $0x820] ss:$72 sps:$4 sm:$0xff]  }
 0x527   : > { %6945 = vmatprep.subr.bf16.mxu0 %v14157_v40  ;;  %v14187_v40 = vld [vmem:[%s15447_s16 + $0x8b4] ss:$72 sps:$4 sm:$0xff]  }
 0x528   : > { %v6539_v12 = vpop.f32.mrb[12].mxu0 }
 0x529   : > { %v6541_v24 = vpop.f32.mrb[13].mxu0  ;;  %v16550_v30 = vadd.f32 %v6539_v12, %v1546_v7  ;;  %v14191_v12 = vld [vmem:[%s15447_s16 + $0x9d0] ss:$72 sps:$4 sm:$0xff]  }
 0x52a   : > { %v6543_v29 = vpop.f32.mrb[14].mxu0  ;;  %6946 = vmatpush1.bf16.msra.mxu0 %v14155_v10  ;;  %v16555_v50 = vadd.f32 %v6541_v24, %v1550_v19  ;;  %v14185_v10 = vld [vmem:[%s15447_s16 + $0x8b0] ss:$72 sps:$4 sm:$0xff]   ;;  %v14199_v24 = vld [vmem:[%s15447_s16 + $0xaf4] ss:$72 sps:$4 sm:$0xff]  }
 0x52b   : > { %v16552_v31 = vadd.f32 %v6543_v29, %v1546_v7  ;;  %v6545_v36 = vpop.f32.mrb[15].mxu0  ;;  %6947 = vmatprep.subr.bf16.mxu0 %v14160_v14  ;;  %v14188_v7 = vld [vmem:[%s15447_s16 + $0x940] ss:$72 sps:$4 sm:$0xff]   ;;  %v14193_v14 = vld [vmem:[%s15447_s16 + $0x9d4] ss:$72 sps:$4 sm:$0xff]  }
 0x52c   : > { %v16557_v53 = vadd.f32 %v6545_v36, %v1550_v19  ;;  %v14194_v19 = vld [vmem:[%s15447_s16 + $0xa60] ss:$72 sps:$4 sm:$0xff]   ;;  %v14197_v29 = vld [vmem:[%s15447_s16 + $0xaf0] ss:$72 sps:$4 sm:$0xff]  }
 0x52d   : > { %v7072_v54 = vpack.c.bf16 %v16552_v31, %v16550_v30  ;;  %v14203_v36 = vld [vmem:[%s15447_s16 + $0xc10] ss:$72 sps:$4 sm:$0xff]   ;;  %v14244_v31 = vld [vmem:[%s15447_s16 + $0x1364] ss:$72 sps:$4 sm:$0xff]  }
 0x52e   : > { %v7073_v56 = vpack.c.bf16 %v16557_v53, %v16555_v50  ;;  %6948 = vmatpush1.bf16.msra.mxu0 %v14158_v26  ;;  %v14202_v26 = vld [vmem:[%s15447_s16 + $0xb84] ss:$72 sps:$4 sm:$0xff]   ;;  %v14239_v30 = vld [vmem:[%s15447_s16 + $0x12d0] ss:$72 sps:$4 sm:$0xff]  }
 0x52f   : > { %6949 = vmatprep.subr.bf16.mxu0 %v14163_v39  ;;  %v14208_v39 = vld [vmem:[%s15447_s16 + $0xca4] ss:$72 sps:$4 sm:$0xff]  }
 0x532   : > { %6950 = vmatpush1.bf16.msra.mxu0 %v14161_v60  ;;  %v14894_v60 = vld [vmem:[%s15468_s19 + $0x70] sm:$0xff] }
 0x533   : > { %6951 = vmatprep.subr.bf16.mxu0 %v14166_v0  ;;  %v1570_v0 = vrot.slane %v14894_v60, %v16047_v59 }
 0x536   : > { %6952 = vmatpush1.bf16.msra.mxu0 %v14164_v2 }
 0x537   : > { %6953 = vmatprep.subr.bf16.mxu0 %v14169_v3  ;;  %v14895_v3 = vld [vmem:[%s15468_s19 + $0x78] sm:$0xff] }
 0x53a   : > { %6954 = vmatpush1.bf16.msra.mxu0 %v14167_v5  ;;  %v1574_v5 = vrot.slane %v14895_v3, %v16047_v59 }
 0x53b   : > { %6955 = vmatprep.subr.bf16.mxu0 %v14172_v45 }
 0x53e   : > { %6956 = vmatpush1.bf16.msra.mxu0 %v14170_v13  ;;  %v14206_v13 = vld [vmem:[%s15447_s16 + $0xca0] ss:$72 sps:$4 sm:$0xff]  }
 0x53f   : > { %6957 = vmatprep.subr.bf16.mxu0 %v14175_v52 }
 0x542   : > { %6958 = vmatpush1.bf16.msra.mxu0 %v14173_v11  ;;  %v14211_v11 = vld [vmem:[%s15447_s16 + $0xd34] ss:$72 sps:$4 sm:$0xff]  }
 0x543   : > { %6959 = vmatprep.subr.bf16.mxu0 %v14178_v42 }
 0x546   : > { %6960 = vmatpush1.bf16.msra.mxu0 %v14176_v44 }
 0x547   : > { %6961 = vmatprep.subr.bf16.mxu0 %v14181_v58 }
 0x54a   : > { %6962 = vmatpush1.bf16.msra.mxu0 %v14179_v8 }
 0x54b   : > { %6963 = vmatprep.subr.bf16.mxu0 %v14184_v23 }
 0x54e   : > { %6964 = vmatpush1.bf16.msra.mxu0 %v14182_v9 }
 0x54f   : > { %6965 = vmatprep.subr.bf16.mxu0 %v14187_v40  ;;  %v14209_v40 = vld [vmem:[%s15447_s16 + $0xd30] ss:$72 sps:$4 sm:$0xff]  }
 0x552   : > { %6966 = vmatpush1.bf16.msra.mxu0 %v14185_v10 }
 0x553   : > { %6978 = vmatprep.subr.bf16.mxu0 %v14190_v15  ;;  %v14214_v15 = vld [vmem:[%s15447_s16 + $0xdc4] ss:$72 sps:$4 sm:$0xff]  }
 0x555   : > { %6968 = vmatmul.mubr.bf16.vlgmr.msra.gmra.mrb[20].mxu0 %v15670_v46  ;;  %v14200_v46 = vld [vmem:[%s15447_s16 + $0xb80] ss:$72 sps:$4 sm:$0xff]  }
 0x556   : > { %6979 = vmatpush1.bf16.msra.mxu0 %v14188_v7  ;;  %7010 = vmatprep.mubr.bf16.mxu0 %v15666_v49  ;;  %v14205_v49 = vld [vmem:[%s15447_s16 + $0xc14] ss:$72 sps:$4 sm:$0xff]   ;;  %v14212_v7 = vld [vmem:[%s15447_s16 + $0xdc0] ss:$72 sps:$4 sm:$0xff]  }
 0x557   : > { %6980 = vmatprep.subr.bf16.mxu0 %v14193_v14  ;;  %v14217_v14 = vld [vmem:[%s15447_s16 + $0xe54] ss:$72 sps:$4 sm:$0xff]  }
 0x55a   : > { %6981 = vmatpush1.bf16.msra.mxu0 %v14191_v12  ;;  %v16620_v12 = vld [vmem:[%s17573_s1] sm:$0xff] }
 0x55b   : > { %6982 = vmatprep.subr.bf16.mxu0 %v14196_v17  ;;  %v16625_v17 = vld [vmem:[%s17573_s1 + $0x8] sm:$0xff]  ;;  %vm7134_vm1 = vcmp.eq.f32.partialorder %v16620_v12, 0.0 }
 0x55c   : > { %vm7135_vm3 = vcmp.eq.f32.partialorder %v16625_v17, 0.0 }
 0x55e   : > { %6983 = vmatpush1.bf16.msra.mxu0 %v14194_v19 }
 0x55f   : > { %6984 = vmatprep.subr.bf16.mxu0 %v14199_v24  ;;  %v14215_v24 = vld [vmem:[%s15447_s16 + $0xe50] ss:$72 sps:$4 sm:$0xff]  }
 0x562   : > { %6985 = vmatpush1.bf16.msra.mxu0 %v14197_v29 }
 0x563   : > { %6986 = vmatprep.subr.bf16.mxu0 %v14202_v26 }
 0x566   : > { %6987 = vmatpush1.bf16.msra.mxu0 %v14200_v46  ;;  %v14220_v46 = vld [vmem:[%s15447_s16 + $0xee4] ss:$72 sps:$4 sm:$0xff]  }
 0x567   : > { %6988 = vmatprep.subr.bf16.mxu0 %v14205_v49 }
 0x569   : > { %v6926_v2 = vpop.f32.mrb[12].mxu1 }
 0x56a   : > { %v6928_v45 = vpop.f32.mrb[13].mxu1  ;;  %6989 = vmatpush1.bf16.msra.mxu0 %v14203_v36  ;;  %v16601_v42 = vadd.f32 %v6926_v2, %v1570_v0  ;;  %v14218_v2 = vld [vmem:[%s15447_s16 + $0xee0] ss:$72 sps:$4 sm:$0xff]  }
 0x56b   : > { %v6930_v52 = vpop.f32.mrb[14].mxu1  ;;  %6990 = vmatprep.subr.bf16.mxu0 %v14208_v39  ;;  %v16605_v8 = vadd.f32 %v6928_v45, %v1574_v5 }
 0x56c   : > { %v16603_v44 = vadd.f32 %v6930_v52, %v1570_v0  ;;  %v6932_v58 = vpop.f32.mrb[15].mxu1  ;;  %v14226_v52 = vld [vmem:[%s15447_s16 + $0x1004] ss:$72 sps:$4 sm:$0xff]  }
 0x56d   : > { %v16607_v23 = vadd.f32 %v6932_v58, %v1574_v5  ;;  %v14223_v5 = vld [vmem:[%s15447_s16 + $0xf74] ss:$72 sps:$4 sm:$0xff]  }
 0x56e   : > { %v7078_v9 = vpack.c.bf16 %v16603_v44, %v16601_v42  ;;  %6991 = vmatpush1.bf16.msra.mxu0 %v14206_v13  ;;  %v14221_v13 = vld [vmem:[%s15447_s16 + $0xf70] ss:$72 sps:$4 sm:$0xff]   ;;  %v14229_v58 = vld [vmem:[%s15447_s16 + $0x1094] ss:$72 sps:$4 sm:$0xff]  }
 0x56f   : > { %v7079_v10 = vpack.c.bf16 %v16607_v23, %v16605_v8  ;;  %6992 = vmatprep.subr.bf16.mxu0 %v14211_v11  ;;  %v14224_v11 = vld [vmem:[%s15447_s16 + $0x1000] ss:$72 sps:$4 sm:$0xff]  }
 0x572   : > { %6993 = vmatpush1.bf16.msra.mxu0 %v14209_v40  ;;  %v14227_v40 = vld [vmem:[%s15447_s16 + $0x1090] ss:$72 sps:$4 sm:$0xff]  }
 0x573   : > { %6994 = vmatprep.subr.bf16.mxu0 %v14214_v15  ;;  %v14232_v15 = vld [vmem:[%s15447_s16 + $0x1124] ss:$72 sps:$4 sm:$0xff]  }
 0x576   : > { %v7125_v19 = vpop.f32.mrb[16].mxu1  ;;  %6995 = vmatpush1.bf16.msra.mxu0 %v14212_v7  ;;  %v14230_v7 = vld [vmem:[%s15447_s16 + $0x1120] ss:$72 sps:$4 sm:$0xff]  }
 0x577   : > { %v7132_v29 = vmul.f32 0.07216878, %v7125_v19  ;;  %v7127_v26 = vpop.f32.mrb[17].mxu1  ;;  %6996 = vmatprep.subr.bf16.mxu0 %v14217_v14  ;;  %v14235_v14 = vld [vmem:[%s15447_s16 + $0x11b4] ss:$72 sps:$4 sm:$0xff]  }
 0x578   : > { %v7128_v49 = vpop.f32.mrb[18].mxu1  ;;  %v14233_v19 = vld [vmem:[%s15447_s16 + $0x11b0] ss:$72 sps:$4 sm:$0xff]   ;;  %v14241_v26 = vld [vmem:[%s15447_s16 + $0x12d4] ss:$72 sps:$4 sm:$0xff]  }
 0x579   : > { %v7133_v36 = vmul.f32 0.07216878, %v7128_v49  ;;  %v7130_v39 = vpop.f32.mrb[19].mxu1  ;;  %v16634_v60 = vsel %vm7134_vm1, %v7132_v29, %v16620_v12  ;;  %v14236_v29 = vld [vmem:[%s15447_s16 + $0x1240] ss:$72 sps:$4 sm:$0xff]  }
 0x57a   : > { %6997 = vmatpush1.bf16.msra.mxu0 %v14215_v24  ;;  %v7139_v0 = vsel %vm7138_vm2, %v16634_v60, -inf  ;;  %v14238_v24 = vld [vmem:[%s15447_s16 + $0x1244] ss:$72 sps:$4 sm:$0xff]   ;;  %v14248_v49 = vld [vmem:[%s15447_s16 + $0x1480] ss:$72 sps:$4 sm:$0xff]  }
 0x57b   : > { %7140 = vmax.xlane.f32.xlu0 %v7139_v0  ;;  %v16642_v3 = vsel %vm7135_vm3, %v7133_v36, %v16625_v17  ;;  %6998 = vmatprep.subr.bf16.mxu0 %v14220_v46  ;;  %v14245_v46 = vld [vmem:[%s15447_s16 + $0x13f0] ss:$72 sps:$4 sm:$0xff]   ;;  %v14256_v39 = vld [vmem:[%s15447_s16 + $0x15a4] ss:$72 sps:$4 sm:$0xff]   ;;  %v14254_v0 = vld [vmem:[%s15447_s16 + $0x15a0] ss:$72 sps:$4 sm:$0xff]  }
 0x57c   : > { %v7142_v45 = vsel %vm7138_vm2, %v16642_v3, -inf  ;;  %v14251_v36 = vld [vmem:[%s15447_s16 + $0x1510] ss:$72 sps:$4 sm:$0xff]  }
 0x57d   : > { %7143 = vmax.xlane.f32.xlu1 %v7142_v45  ;;  %v14262_v45 = vld [vmem:[%s15447_s16 + $0x16c4] ss:$72 sps:$4 sm:$0xff]  }
 0x57e   : > { %6999 = vmatpush1.bf16.msra.mxu0 %v14218_v2  ;;  %v14259_v2 = vld [vmem:[%s15447_s16 + $0x1634] ss:$72 sps:$4 sm:$0xff]  }
 0x57f   : > { %7000 = vmatprep.subr.bf16.mxu0 %v14223_v5  ;;  %v14257_v5 = vld [vmem:[%s15447_s16 + $0x1630] ss:$72 sps:$4 sm:$0xff]  }
 0x582   : > { %7001 = vmatpush1.bf16.msra.mxu0 %v14221_v13  ;;  %v14260_v13 = vld [vmem:[%s15447_s16 + $0x16c0] ss:$72 sps:$4 sm:$0xff]  }
 0x583   : > { %7002 = vmatprep.subr.bf16.mxu0 %v14226_v52  ;;  %v14265_v52 = vld [vmem:[%s15447_s16 + $0x1754] ss:$72 sps:$4 sm:$0xff]  }
 0x586   : > { %7003 = vmatpush1.bf16.msra.mxu0 %v14224_v11  ;;  %v14263_v11 = vld [vmem:[%s15447_s16 + $0x1750] ss:$72 sps:$4 sm:$0xff]  }
 0x587   : > { %7004 = vmatprep.subr.bf16.mxu0 %v14229_v58  ;;  %v14268_v58 = vld [vmem:[%s15447_s16 + $0x17e4] ss:$72 sps:$4 sm:$0xff]  }
 0x58a   : > { %7005 = vmatpush1.bf16.msra.mxu0 %v14227_v40  ;;  %v14266_v40 = vld [vmem:[%s15447_s16 + $0x17e0] ss:$72 sps:$4 sm:$0xff]  }
 0x58b   : > { %7006 = vmatprep.subr.bf16.mxu0 %v14232_v15  ;;  %v14271_v15 = vld [vmem:[%s15447_s16 + $0x1874] ss:$72 sps:$4 sm:$0xff]  }
 0x58e   : > { %7295 = vrot.lane.b32.xlu1 %v7072_v54, %s15171_s18  ;;  %7007 = vmatpush1.bf16.msra.mxu0 %v14230_v7  ;;  %v14247_v54 = vld [vmem:[%s15447_s16 + $0x13f4] ss:$72 sps:$4 sm:$0xff]   ;;  %v14269_v7 = vld [vmem:[%s15447_s16 + $0x1870] ss:$72 sps:$4 sm:$0xff]  }
 0x58f   : > { %7008 = vmatprep.subr.bf16.mxu0 %v14235_v14  ;;  %v14274_v14 = vld [vmem:[%s15447_s16 + $0x1904] ss:$72 sps:$4 sm:$0xff]  }
 0x592   : > { %7284 = vrot.lane.b32.xlu1 %v16075_v16, %s15171_s18  ;;  %7009 = vmatpush1.bf16.msra.mxu0 %v14233_v19  ;;  %v14242_v16 = vld [vmem:[%s15447_s16 + $0x1360] ss:$72 sps:$4 sm:$0xff]  }
 0x593   : > { %7021 = vmatprep.subr.bf16.mxu0 %v14238_v24  ;;  %v14272_v19 = vld [vmem:[%s15447_s16 + $0x1900] ss:$72 sps:$4 sm:$0xff]   ;;  %v14277_v24 = vld [vmem:[%s15447_s16 + $0x1994] ss:$72 sps:$4 sm:$0xff]  }
 0x595   : > { %7011 = vmatmul.mubr.bf16.vlgmr.msra.gmra.mrb[20].mxu0 %v15672_v47  ;;  %v14250_v47 = vld [vmem:[%s15447_s16 + $0x1484] ss:$72 sps:$4 sm:$0xff]  }
 0x596   : > { %7022 = vmatpush1.bf16.msra.mxu0 %v14236_v29  ;;  %7053 = vmatprep.mubr.bf16.mxu0 %v15678_v51  ;;  %v14253_v51 = vld [vmem:[%s15447_s16 + $0x1514] ss:$72 sps:$4 sm:$0xff]   ;;  %v14275_v29 = vld [vmem:[%s15447_s16 + $0x1990] ss:$72 sps:$4 sm:$0xff]  }
 0x597   : > { %7023 = vmatprep.subr.bf16.mxu0 %v14241_v26  ;;  %v14280_v26 = vld [vmem:[%s15447_s16 + $0x1a24] ss:$72 sps:$4 sm:$0xff]  }
 0x59a   : > { %7024 = vmatpush1.bf16.msra.mxu0 %v14239_v30  ;;  %v14278_v30 = vld [vmem:[%s15447_s16 + $0x1a20] ss:$72 sps:$4 sm:$0xff]  }
 0x59b   : > { %7025 = vmatprep.subr.bf16.mxu0 %v14244_v31  ;;  %v14283_v31 = vld [vmem:[%s15447_s16 + $0x1ab4] ss:$72 sps:$4 sm:$0xff]  }
 0x59e   : > { %7026 = vmatpush1.bf16.msra.mxu0 %v14242_v16  ;;  %v14281_v16 = vld [vmem:[%s15447_s16 + $0x1ab0] ss:$72 sps:$4 sm:$0xff]  }
 0x59f   : > { %7027 = vmatprep.subr.bf16.mxu0 %v14247_v54  ;;  %v14896_v54 = vld [vmem:[%s15468_s19 + $0x60] sm:$0xff] }
 0x5a2   : > { %7028 = vmatpush1.bf16.msra.mxu0 %v14245_v46  ;;  %v1562_v46 = vrot.slane %v14896_v54, %v16047_v59 }
 0x5a3   : > { %7029 = vmatprep.subr.bf16.mxu0 %v14250_v47 }
 0x5a6   : > { %7030 = vmatpush1.bf16.msra.mxu0 %v14248_v49  ;;  %v14897_v49 = vld [vmem:[%s15468_s19 + $0x68] sm:$0xff] }
 0x5a7   : > { %7031 = vmatprep.subr.bf16.mxu0 %v14253_v51  ;;  %v1566_v51 = vrot.slane %v14897_v49, %v16047_v59  ;;  %v14899_v49 = vld [vmem:[%s15468_s19 + $0x88] sm:$0xff] }
 0x5aa   : > { %7032 = vmatpush1.bf16.msra.mxu0 %v14251_v36 }
 0x5ab   : > { %7033 = vmatprep.subr.bf16.mxu0 %v14256_v39 }
 0x5ae   : > { %7034 = vmatpush1.bf16.msra.mxu0 %v14254_v0 }
 0x5af   : > { %7035 = vmatprep.subr.bf16.mxu0 %v14259_v2 }
 0x5b2   : > { %7036 = vmatpush1.bf16.msra.mxu0 %v14257_v5 }
 0x5b3   : > { %7037 = vmatprep.subr.bf16.mxu0 %v14262_v45 }
 0x5b6   : > { %7038 = vmatpush1.bf16.msra.mxu0 %v14260_v13 }
 0x5b7   : > { %7039 = vmatprep.subr.bf16.mxu0 %v14265_v52 }
 0x5ba   : > { %7040 = vmatpush1.bf16.msra.mxu0 %v14263_v11 }
 0x5bb   : > { %7041 = vmatprep.subr.bf16.mxu0 %v14268_v58 }
 0x5be   : > { %7042 = vmatpush1.bf16.msra.mxu0 %v14266_v40 }
 0x5bf   : > { %7043 = vmatprep.subr.bf16.mxu0 %v14271_v15 }
 0x5c2   : > { %7044 = vmatpush1.bf16.msra.mxu0 %v14269_v7 }
 0x5c3   : > { %7045 = vmatprep.subr.bf16.mxu0 %v14274_v14 }
 0x5c6   : > { %7046 = vmatpush1.bf16.msra.mxu0 %v14272_v19 }
 0x5c7   : > { %7047 = vmatprep.subr.bf16.mxu0 %v14277_v24 }
 0x5ca   : > { %7048 = vmatpush1.bf16.msra.mxu0 %v14275_v29 }
 0x5cb   : > { %7049 = vmatprep.subr.bf16.mxu0 %v14280_v26 }
 0x5ce   : > { %7050 = vmatpush1.bf16.msra.mxu0 %v14278_v30 }
 0x5cf   : > { %7051 = vmatprep.subr.bf16.mxu0 %v14283_v31 }
 0x5d2   : > { %7052 = vmatpush1.bf16.msra.mxu0 %v14281_v16  ;;  %v14898_v16 = vld [vmem:[%s15468_s19 + $0x80] sm:$0xff] }
 0x5d3   : > { %v1578_v54 = vrot.slane %v14898_v16, %v16047_v59  ;;  %v14298_v16 = vld [vmem:[%s15454_s17 + $0x304] ss:$24 sps:$4 sm:$0xff]  }
 0x5d5   : > { %7054 = vmatmul.mubr.bf16.vlgmr.msra.gmra.mrb[20].mxu0 %v15683_v55 }
 0x5e8   : > { %v6797_v47 = vpop.f32.mrb[16].mxu0 }
 0x5e9   : > { %v6799_v36 = vpop.f32.mrb[17].mxu0  ;;  %v12782_v0 = vadd.f32 %v6797_v47, %v1562_v46 }
 0x5ea   : > { %v6801_v39 = vpop.f32.mrb[18].mxu0  ;;  %v12783_v45 = vadd.f32 %v6799_v36, %v1566_v51 }
 0x5eb   : > { %v12784_v2 = vadd.f32 %v6801_v39, %v1562_v46  ;;  %v6803_v5 = vpop.f32.mrb[19].mxu0 }
 0x5ec   : > { %v12785_v13 = vadd.f32 %v6803_v5, %v1566_v51  ;;  %v1582_v51 = vrot.slane %v14899_v49, %v16047_v59  ;;  %v14304_v49 = vld [vmem:[%s15454_s17 + $0x364] ss:$24 sps:$4 sm:$0xff]  }
 0x5ed   : > { %v7076_v52 = vpack.c.bf16 %v12784_v2, %v12782_v0 }
 0x5ee   : > { %v16701_v11 = vpack.c.bf16 %v12785_v13, %v12783_v45 }
 0x5f0   : > { %7165 = vmatprep.subr.bf16.mxu1 %v16701_v11 }
 0x5f1   : > { %7166 = vmatpush1.bf16.msra.mxu1 %v7076_v52 }
 0x608   : > { %v7141_v55 = vpop.xlane.xlu0 %7140 }
 0x609   : > { %v7145_v58 = vsub.f32 %v16634_v60, %v7141_v55  ;;  %v15172_v60 = vmov 0  }
 0x60a   : > { %v7144_v40 = vpop.xlane.xlu1 %7143  ;;  %7197 = vmatprep.mubr.bf16.mxu1 %v15172_v60 }
 0x60b   : > { %v7147_v15 = vmul.f32 1.442695, %v7145_v58  ;;  %v7146_v7 = vsub.f32 %v16642_v3, %v7144_v40 }
 0x60d   : > { %14840 = vpow2.f32 %v7147_v15  ;;  %v7149_v14 = vmul.f32 1.442695, %v7146_v7 }
 0x60e   : > { %v7296_v19 = vpop.permute.xlu1 %7295 }
 0x60f   : > { %14842 = vpow2.f32 %v7149_v14  ;;  %12278 = vmatprep.subr.msk.bf16.mxu1 %vm7084_vm0, %v7296_v19  ;;  %v14284_v14 = vld [vmem:[%s15454_s17 + $0x240] ss:$24 sps:$4 sm:$0xff]  }
 0x612   : > { %v7285_v3 = vpop.permute.xlu1 %7284 }
 0x617   : > { %v14841_v24 = vpop.eup %14840 }
 0x618   : > { %v7151_v29 = vsel %vm7138_vm2, %v14841_v24, 0.0 }
 0x619   : > { %v14843_v26 = vpop.eup %14842  ;;  %7152 = vadd.xlane.f32.xlu0 %v7151_v29  ;;  %v14289_v29 = vld [vmem:[%s15454_s17 + $0x274] ss:$24 sps:$4 sm:$0xff]  }
 0x61a   : > { %v7154_v30 = vsel %vm7138_vm2, %v14843_v26, 0.0 }
 0x61b   : > { %7155 = vadd.xlane.f32.xlu1 %v7154_v30  ;;  %v14290_v30 = vld [vmem:[%s15454_s17 + $0x2a0] ss:$24 sps:$4 sm:$0xff]  }
 0x62c   : > { %7286 = vrot.lane.b32.xlu1 %v7066_v18, %s15171_s18 }
 0x62f   : > { %7293 = vrot.lane.b32.xlu0 %v16250_v62, %s15171_s18 }
 0x6a6   : > { %v7153_v31 = vpop.xlane.xlu0 %7152 }
 0x6a7   : > { %14844 = vrcp.f32 %v7153_v31  ;;  %v14293_v31 = vld [vmem:[%s15454_s17 + $0x2d0] ss:$24 sps:$4 sm:$0xff]  }
 0x6a8   : > { %v7156_v46 = vpop.xlane.xlu1 %7155  ;;  %v7055_v47 = vpop.f32.mrb[20].mxu0 }
 0x6a9   : > { %14846 = vrcp.f32 %v7156_v46  ;;  %v7057_v57 = vpop.f32.mrb[21].mxu0  ;;  %v12790_v18 = vadd.f32 %v7055_v47, %v1578_v54  ;;  %v14301_v46 = vld [vmem:[%s15454_s17 + $0x334] ss:$24 sps:$4 sm:$0xff]   ;;  %v14299_v47 = vld [vmem:[%s15454_s17 + $0x330] ss:$24 sps:$4 sm:$0xff]  }
 0x6aa   : > { %v7059_v4 = vpop.f32.mrb[22].mxu0  ;;  %v16720_v39 = vadd.f32 %v7057_v57, %v1582_v51  ;;  %v7294_v55 = vpop.permute.xlu0 %7293  ;;  %v14307_v57 = vld [vmem:[%s15454_s17 + $0x394] ss:$24 sps:$4 sm:$0xff]  }
 0x6ab   : > { %v12792_v36 = vadd.f32 %v7059_v4, %v1578_v54  ;;  %v7061_v62 = vpop.f32.mrb[23].mxu0  ;;  %v7297_v40 = vsel %vm7084_vm0, %v7294_v55, %v7296_v19  ;;  %v14287_v19 = vld [vmem:[%s15454_s17 + $0x270] ss:$24 sps:$4 sm:$0xff]   ;;  %v14296_v54 = vld [vmem:[%s15454_s17 + $0x300] ss:$24 sps:$4 sm:$0xff]  }
 0x6ac   : > { %v16722_v0 = vadd.f32 %v7061_v62, %v1582_v51  ;;  %v7287_v15 = vpop.permute.xlu1 %7286  ;;  %v14302_v51 = vld [vmem:[%s15454_s17 + $0x360] ss:$24 sps:$4 sm:$0xff]   ;;  %v14305_v4 = vld [vmem:[%s15454_s17 + $0x390] ss:$24 sps:$4 sm:$0xff]  }
 0x6ad   : > { %v16724_v2 = vpack.c.bf16 %v12792_v36, %v12790_v18  ;;  %v7289_v7 = vsel %vm7084_vm0, %v7285_v3, %v7287_v15  ;;  %v14295_v3 = vld [vmem:[%s15454_s17 + $0x2d4] ss:$24 sps:$4 sm:$0xff]  }
 0x6ae   : > { %v7081_v5 = vpack.c.bf16 %v16722_v0, %v16720_v39 }
 0x6b1   : > { %v14845_v45 = vpop.eup %14844 }
 0x6b2   : > { %v7159_v13 = vmul.f32 %v14845_v45, %v14841_v24  ;;  %v14286_v24 = vld [vmem:[%s15454_s17 + $0x244] ss:$24 sps:$4 sm:$0xff]  }
 0x6b3   : > { %v14847_v59 = vpop.eup %14846  ;;  %7865 = vmatprep.subr.bf16.mxu0 %v14286_v24 }
 0x6b4   : > { %v7160_v52 = vmul.f32 %v14847_v59, %v14843_v26  ;;  %7866 = vmatpush1.bf16.msra.mxu0 %v14284_v14  ;;  %v14292_v26 = vld [vmem:[%s15454_s17 + $0x2a4] ss:$24 sps:$4 sm:$0xff]  }
 0x6b5   : > { %7867 = vmatprep.subr.bf16.mxu0 %v14289_v29 }
 0x6b6   : > { %v7161_v58 = vpack.c.bf16 %v7160_v52, %v7159_v13 }
 0x6b8   : > { %12277 = vmatmul.mubr.msk.bf16.vlgmr.msra.gmra.mrb[20].mxu1 %vm7138_vm2, %v7161_v58  ;;  %7868 = vmatpush1.bf16.msra.mxu0 %v14287_v19 }
 0x6b9   : > { %7306 = vmatpush1.bf16.xpose.msra.mxu1 %v7297_v40  ;;  %12279 = vmatprep.mubr.msk.bf16.mxu1 %vm7084_vm0, %v7287_v15 }
 0x6ba   : > { %7869 = vmatprep.subr.bf16.mxu0 %v14292_v26  ;;  %v14310_v26 = vld [vmem:[%s15454_s17 + $0x3c4] ss:$24 sps:$4 sm:$0xff]  }
 0x6bc   : > { %7870 = vmatpush1.bf16.msra.mxu0 %v14290_v30  ;;  %v14308_v30 = vld [vmem:[%s15454_s17 + $0x3c0] ss:$24 sps:$4 sm:$0xff]  }
 0x6bd   : > { %7871 = vmatprep.subr.bf16.mxu0 %v14295_v3  ;;  %v14313_v3 = vld [vmem:[%s15454_s17 + $0x3f4] ss:$24 sps:$4 sm:$0xff]  }
 0x6c0   : > { %7338 = vmatmul.mubr.bf16.vlgmr.msra.gmra.mrb[24].mxu1 %v7289_v7  ;;  %7872 = vmatpush1.bf16.msra.mxu0 %v14293_v31  ;;  %v14311_v31 = vld [vmem:[%s15454_s17 + $0x3f0] ss:$24 sps:$4 sm:$0xff]  }
 0x6c1   : > { %7417 = vmatprep.mubr.bf16.mxu1 %v15172_v60  ;;  %7873 = vmatprep.subr.bf16.mxu0 %v14298_v16  ;;  %v14314_v16 = vld [vmem:[%s15454_s17 + $0x420] ss:$24 sps:$4 sm:$0xff]  }
 0x6c4   : > { %7874 = vmatpush1.bf16.msra.mxu0 %v14296_v54  ;;  %v14316_v54 = vld [vmem:[%s15454_s17 + $0x424] ss:$24 sps:$4 sm:$0xff]  }
 0x6c5   : > { %7875 = vmatprep.subr.bf16.mxu0 %v14301_v46  ;;  %v14319_v46 = vld [vmem:[%s15454_s17 + $0x454] ss:$24 sps:$4 sm:$0xff]  }
 0x6c8   : > { %7876 = vmatpush1.bf16.msra.mxu0 %v14299_v47  ;;  %v14317_v47 = vld [vmem:[%s15454_s17 + $0x450] ss:$24 sps:$4 sm:$0xff]  }
 0x6c9   : > { %7877 = vmatprep.subr.bf16.mxu0 %v14304_v49 }
 0x6cc   : > { %7878 = vmatpush1.bf16.msra.mxu0 %v14302_v51 }
 0x6cd   : > { %7879 = vmatprep.subr.bf16.mxu0 %v14307_v57 }
 0x6d0   : > { %7880 = vmatpush1.bf16.msra.mxu0 %v14305_v4 }
 0x6d1   : > { %7881 = vmatprep.subr.bf16.mxu0 %v14310_v26  ;;  %v14326_v26 = vld [vmem:[%s15454_s17 + $0x2a8] ss:$24 sps:$4 sm:$0xff]  }
 0x6d4   : > { %7882 = vmatpush1.bf16.msra.mxu0 %v14308_v30  ;;  %v14331_v30 = vld [vmem:[%s15454_s17 + $0x2dc] ss:$24 sps:$4 sm:$0xff]  }
 0x6d5   : > { %7883 = vmatprep.subr.bf16.mxu0 %v14313_v3  ;;  %v14329_v3 = vld [vmem:[%s15454_s17 + $0x2d8] ss:$24 sps:$4 sm:$0xff]  }
 0x6d8   : > { %7884 = vmatpush1.bf16.msra.mxu0 %v14311_v31  ;;  %v14334_v31 = vld [vmem:[%s15454_s17 + $0x30c] ss:$24 sps:$4 sm:$0xff]  }
 0x6d9   : > { %7885 = vmatprep.subr.bf16.mxu0 %v14316_v54  ;;  %v14337_v54 = vld [vmem:[%s15454_s17 + $0x33c] ss:$24 sps:$4 sm:$0xff]  }
 0x6dc   : > { %7886 = vmatpush1.bf16.msra.mxu0 %v14314_v16  ;;  %v14332_v16 = vld [vmem:[%s15454_s17 + $0x308] ss:$24 sps:$4 sm:$0xff]  }
 0x6dd   : > { %7887 = vmatprep.subr.bf16.mxu0 %v14319_v46  ;;  %v14335_v46 = vld [vmem:[%s15454_s17 + $0x338] ss:$24 sps:$4 sm:$0xff]  }
 0x6e0   : > { %7888 = vmatpush1.bf16.msra.mxu0 %v14317_v47  ;;  %v14340_v47 = vld [vmem:[%s15454_s17 + $0x36c] ss:$24 sps:$4 sm:$0xff]  }
 0x78b   : > { %v7199_v18 = vpop.f32.mrb[20].mxu1 }
 0x78c   : > { %v7201_v36 = vpop.f32.mrb[21].mxu1 }
 0x78d   : > { %v7203_v62 = vpop.f32.mrb[22].mxu1 }
 0x78e   : > { %v16749_v45 = vpack.c.bf16 %v7203_v62, %v7199_v18  ;;  %v7205_v59 = vpop.f32.mrb[23].mxu1 }
 0x78f   : > { %v16751_v13 = vpack.c.bf16 %v7205_v59, %v7201_v36  ;;  %v14322_v59 = vld [vmem:[%s15454_s17 + $0x24c] ss:$24 sps:$4 sm:$0xff]  }
 0x793   : > { %v7339_v52 = vpop.f32.mrb[24].mxu1 }
 0x794   : > { %v7346_v55 = vmul.f32 0.07216878, %v7339_v52  ;;  %v7341_v58 = vpop.f32.mrb[25].mxu1 }
 0x795   : > { %v7342_v40 = vpop.f32.mrb[26].mxu1 }
 0x796   : > { %v7347_v15 = vmul.f32 0.07216878, %v7342_v40  ;;  %v7344_v7 = vpop.f32.mrb[27].mxu1  ;;  %v7348_v14 = vsel %vm7134_vm1, %v7346_v55, %v16620_v12 }
 0x797   : > { %v7350_v24 = vsel %vm7138_vm2, %v7348_v14, -inf  ;;  %v14320_v7 = vld [vmem:[%s15454_s17 + $0x248] ss:$24 sps:$4 sm:$0xff]  }
 0x798   : > { %7351 = vmax.xlane.f32.xlu0 %v7350_v24  ;;  %v7349_v29 = vsel %vm7135_vm3, %v7347_v15, %v16625_v17  ;;  %v14325_v24 = vld [vmem:[%s15454_s17 + $0x27c] ss:$24 sps:$4 sm:$0xff]  }
 0x799   : > { %v7353_v19 = vsel %vm7138_vm2, %v7349_v29, -inf }
 0x79a   : > { %7354 = vmax.xlane.f32.xlu1 %v7353_v19  ;;  %v14328_v19 = vld [vmem:[%s15454_s17 + $0x2ac] ss:$24 sps:$4 sm:$0xff]  }
 0x7ab   : > { %7377 = vrot.lane.b32.xlu1 %v7078_v9, %s15171_s18 }
 0x7af   : > { %9194 = vrot.lane.b32.xlu1 %v16475_v22, %s15171_s18 }
 0x7b3   : > { %9196 = vrot.lane.b32.xlu1 %v7075_v25, %s15171_s18 }
 0x7b7   : > { %9188 = vrot.lane.b32.xlu1 %v7069_v35, %s15171_s18 }
 0x825   : > { %v7352_v42 = vpop.xlane.xlu0 %7351 }
 0x826   : > { %v7356_v44 = vsub.f32 %v7348_v14, %v7352_v42  ;;  %v14338_v42 = vld [vmem:[%s15454_s17 + $0x368] ss:$24 sps:$4 sm:$0xff]  }
 0x827   : > { %v7355_v9 = vpop.xlane.xlu1 %7354 }
 0x828   : > { %v7358_v49 = vmul.f32 1.442695, %v7356_v44  ;;  %v7357_v51 = vsub.f32 %v7349_v29, %v7355_v9  ;;  %v14323_v29 = vld [vmem:[%s15454_s17 + $0x278] ss:$24 sps:$4 sm:$0xff]   ;;  %v14343_v44 = vld [vmem:[%s15454_s17 + $0x39c] ss:$24 sps:$4 sm:$0xff]  }
 0x829   : > { %v14341_v9 = vld [vmem:[%s15454_s17 + $0x398] ss:$24 sps:$4 sm:$0xff]  }
 0x82a   : > { %14848 = vpow2.f32 %v7358_v49  ;;  %v7360_v57 = vmul.f32 1.442695, %v7357_v51  ;;  %v14346_v49 = vld [vmem:[%s15454_s17 + $0x3cc] ss:$24 sps:$4 sm:$0xff]   ;;  %v14344_v51 = vld [vmem:[%s15454_s17 + $0x3c8] ss:$24 sps:$4 sm:$0xff]  }
 0x82b   : > { %v7378_v4 = vpop.permute.xlu1 %7377 }
 0x82c   : > { %14850 = vpow2.f32 %v7360_v57  ;;  %7385 = vmatprep.subr.bf16.mxu1 %v7378_v4  ;;  %v14349_v57 = vld [vmem:[%s15454_s17 + $0x3fc] ss:$24 sps:$4 sm:$0xff]  }
 0x82f   : > { %v9195_v18 = vpop.permute.xlu1 %9194 }
 0x833   : > { %v9197_v20 = vpop.permute.xlu1 %9196 }
 0x834   : > { %v14849_v21 = vpop.eup %14848  ;;  %v16784_v25 = vsel %vm7084_vm0, %v9195_v18, %v9197_v20  ;;  %12509 = vmatprep.subr.msk.bf16.mxu0 %vm7084_vm0, %v9197_v20  ;;  %v14352_v18 = vld [vmem:[%s15454_s17 + $0x42c] ss:$24 sps:$4 sm:$0xff]   ;;  %v14350_v20 = vld [vmem:[%s15454_s17 + $0x428] ss:$24 sps:$4 sm:$0xff]  }
 0x835   : > { %v7362_v27 = vsel %vm7138_vm2, %v14849_v21, 0.0 }
 0x836   : > { %v14851_v32 = vpop.eup %14850  ;;  %7363 = vadd.xlane.f32.xlu0 %v7362_v27  ;;  %v14353_v27 = vld [vmem:[%s15454_s17 + $0x458] ss:$24 sps:$4 sm:$0xff]  }
 0x837   : > { %v7365_v35 = vsel %vm7138_vm2, %v14851_v32, 0.0 }
 0x83a   : > { %7366 = vadd.xlane.f32.xlu0 %v7365_v35 }
 0x850   : > { %7375 = vrot.lane.b32.xlu0 %v16701_v11, %s15171_s18 }
 0x854   : > { %9186 = vrot.lane.b32.xlu0 %v16401_v34, %s15171_s18 }
 0x8c3   : > { %v7364_v36 = vpop.xlane.xlu0 %7363 }
 0x8c4   : > { %14852 = vrcp.f32 %v7364_v36 }
 0x8c7   : > { %v7367_v62 = vpop.xlane.xlu0 %7366 }
 0x8c8   : > { %14854 = vrcp.f32 %v7367_v62 }
 0x8cb   : > { %v7376_v52 = vpop.permute.xlu0 %7375 }
 0x8cc   : > { %v7379_v55 = vsel %vm7084_vm0, %v7376_v52, %v7378_v4  ;;  %v14347_v4 = vld [vmem:[%s15454_s17 + $0x3f8] ss:$24 sps:$4 sm:$0xff]  }
 0x8cd   : > { %7386 = vmatpush1.bf16.msra.mxu1 %v7379_v55 }
 0x8ce   : > { %7908 = vmatprep.subr.bf16.mxu1 %v14322_v59  ;;  %v14853_v58 = vpop.eup %14852 }
 0x8cf   : > { %v7370_v40 = vmul.f32 %v14853_v58, %v14849_v21  ;;  %v14355_v21 = vld [vmem:[%s15454_s17 + $0x45c] ss:$24 sps:$4 sm:$0xff]   ;;  %v14356_v58 = vld [vmem:[%s15454_s17 + $0x250] ss:$24 sps:$4 sm:$0xff]  }
 0x8d2   : > { %v14855_v11 = vpop.eup %14854 }
 0x8d3   : > { %v7371_v15 = vmul.f32 %v14855_v11, %v14851_v32  ;;  %v14358_v32 = vld [vmem:[%s15454_s17 + $0x254] ss:$24 sps:$4 sm:$0xff]   ;;  %v14361_v11 = vld [vmem:[%s15454_s17 + $0x284] ss:$24 sps:$4 sm:$0xff]  }
 0x8d5   : > { %v7372_v14 = vpack.c.bf16 %v7371_v15, %v7370_v40  ;;  %v9189_v40 = vpop.permute.xlu1 %9188  ;;  %v14359_v15 = vld [vmem:[%s15454_s17 + $0x280] ss:$24 sps:$4 sm:$0xff]  }
 0x8d7   : > { %12280 = vmatmul.mubr.msk.bf16.vlgmr.msra.gmra.mrb[28].mxu1 %vm7138_vm2, %v7372_v14  ;;  %v9187_v14 = vpop.permute.xlu0 %9186 }
 0x8d8   : > { %7909 = vmatpush1.bf16.msra.mxu1 %v14320_v7  ;;  %v14364_v7 = vld [vmem:[%s15454_s17 + $0x2b4] ss:$24 sps:$4 sm:$0xff]  }
 0x8d9   : > { %7910 = vmatprep.subr.bf16.mxu1 %v14325_v24  ;;  %v14362_v24 = vld [vmem:[%s15454_s17 + $0x2b0] ss:$24 sps:$4 sm:$0xff]  }
 0x8dc   : > { %7911 = vmatpush1.bf16.msra.mxu1 %v14323_v29  ;;  %v14367_v29 = vld [vmem:[%s15454_s17 + $0x2e4] ss:$24 sps:$4 sm:$0xff]  }
 0x8dd   : > { %7912 = vmatprep.subr.bf16.mxu1 %v14328_v19  ;;  %v9190_v19 = vsel %vm7084_vm0, %v9187_v14, %v9189_v40  ;;  %v14413_v14 = vld [vmem:[%s15454_s17 + $0x150] ss:$24 sps:$4 sm:$0xff]  }
 0x8e0   : > { %7913 = vmatpush1.bf16.msra.mxu1 %v14326_v26  ;;  %v14370_v26 = vld [vmem:[%s15454_s17 + $0x314] ss:$24 sps:$4 sm:$0xff]  }
 0x8e1   : > { %7914 = vmatprep.subr.bf16.mxu1 %v14331_v30  ;;  %v14368_v30 = vld [vmem:[%s15454_s17 + $0x310] ss:$24 sps:$4 sm:$0xff]  }
 0x8e4   : > { %7915 = vmatpush1.bf16.msra.mxu1 %v14329_v3  ;;  %v14373_v3 = vld [vmem:[%s15454_s17 + $0x344] ss:$24 sps:$4 sm:$0xff]  }
 0x8e5   : > { %7916 = vmatprep.subr.bf16.mxu1 %v14334_v31  ;;  %v14371_v31 = vld [vmem:[%s15454_s17 + $0x340] ss:$24 sps:$4 sm:$0xff]  }
 0x8e8   : > { %7917 = vmatpush1.bf16.msra.mxu1 %v14332_v16  ;;  %v14376_v16 = vld [vmem:[%s15454_s17 + $0x374] ss:$24 sps:$4 sm:$0xff]  }
 0x8e9   : > { %7918 = vmatprep.subr.bf16.mxu1 %v14337_v54  ;;  %v14374_v54 = vld [vmem:[%s15454_s17 + $0x370] ss:$24 sps:$4 sm:$0xff]  }
 0x8ec   : > { %7919 = vmatpush1.bf16.msra.mxu1 %v14335_v46  ;;  %v14379_v46 = vld [vmem:[%s15454_s17 + $0x3a4] ss:$24 sps:$4 sm:$0xff]  }
 0x8ed   : > { %7920 = vmatprep.subr.bf16.mxu1 %v14340_v47  ;;  %v14377_v47 = vld [vmem:[%s15454_s17 + $0x3a0] ss:$24 sps:$4 sm:$0xff]  }
 0x8f0   : > { %7921 = vmatpush1.bf16.msra.mxu1 %v14338_v42  ;;  %v14382_v42 = vld [vmem:[%s15454_s17 + $0x3d4] ss:$24 sps:$4 sm:$0xff]  }
 0x8f1   : > { %7922 = vmatprep.subr.bf16.mxu1 %v14343_v44  ;;  %v14380_v44 = vld [vmem:[%s15454_s17 + $0x3d0] ss:$24 sps:$4 sm:$0xff]  }
 0x8f4   : > { %7923 = vmatpush1.bf16.msra.mxu1 %v14341_v9  ;;  %v14385_v9 = vld [vmem:[%s15454_s17 + $0x404] ss:$24 sps:$4 sm:$0xff]  }
 0x8f5   : > { %7924 = vmatprep.subr.bf16.mxu1 %v14346_v49  ;;  %v14383_v49 = vld [vmem:[%s15454_s17 + $0x400] ss:$24 sps:$4 sm:$0xff]  }
 0x8f8   : > { %7925 = vmatpush1.bf16.msra.mxu1 %v14344_v51  ;;  %v14388_v51 = vld [vmem:[%s15454_s17 + $0x434] ss:$24 sps:$4 sm:$0xff]  }
 0x8f9   : > { %7926 = vmatprep.subr.bf16.mxu1 %v14349_v57  ;;  %v14386_v57 = vld [vmem:[%s15454_s17 + $0x430] ss:$24 sps:$4 sm:$0xff]  }
 0x8fc   : > { %7927 = vmatpush1.bf16.msra.mxu1 %v14347_v4  ;;  %v14391_v4 = vld [vmem:[%s15454_s17 + $0x464] ss:$24 sps:$4 sm:$0xff]  }
 0x8fd   : > { %7928 = vmatprep.subr.bf16.mxu1 %v14352_v18  ;;  %v14389_v18 = vld [vmem:[%s15454_s17 + $0x460] ss:$24 sps:$4 sm:$0xff]  }
 0x900   : > { %7929 = vmatpush1.bf16.msra.mxu1 %v14350_v20  ;;  %v14394_v20 = vld [vmem:[%s15454_s17 + $0x4] ss:$24 sps:$4 sm:$0xff]  }
 0x901   : > { %7930 = vmatprep.subr.bf16.mxu1 %v14355_v21  ;;  %v14392_v21 = vld [vmem:[%s15454_s17] ss:$24 sps:$4 sm:$0xff]  }
 0x904   : > { %7931 = vmatpush1.bf16.msra.mxu1 %v14353_v27  ;;  %v14397_v27 = vld [vmem:[%s15454_s17 + $0x34] ss:$24 sps:$4 sm:$0xff]  }
 0x905   : > { %7951 = vmatprep.subr.bf16.mxu1 %v14358_v32  ;;  %v14395_v32 = vld [vmem:[%s15454_s17 + $0x30] ss:$24 sps:$4 sm:$0xff]  }
 0x9aa   : > { %v7419_v35 = vpop.f32.mrb[28].mxu1 }
 0x9ab   : > { %v7421_v36 = vpop.f32.mrb[29].mxu1 }
 0x9ac   : > { %v7423_v62 = vpop.f32.mrb[30].mxu1 }
 0x9ad   : > { %v16820_v59 = vpack.c.bf16 %v7423_v62, %v7419_v35  ;;  %v7425_v52 = vpop.f32.mrb[31].mxu1  ;;  %v14400_v35 = vld [vmem:[%s15454_s17 + $0x64] ss:$24 sps:$4 sm:$0xff]   ;;  %v14403_v62 = vld [vmem:[%s15454_s17 + $0x94] ss:$24 sps:$4 sm:$0xff]  }
 0x9ae   : > { %v7429_v55 = vpack.c.bf16 %v7425_v52, %v7421_v36  ;;  %v14398_v36 = vld [vmem:[%s15454_s17 + $0x60] ss:$24 sps:$4 sm:$0xff]   ;;  %v14401_v52 = vld [vmem:[%s15454_s17 + $0x90] ss:$24 sps:$4 sm:$0xff]  }
 0x9b0   : > { %12353 = vmatprep.mubr.msk.bf16.mxu0 %vm7084_vm0, %v7429_v55  ;;  %12354 = vmatprep.mubr.msk.bf16.mxu1 %vm7084_vm0, %v7429_v55 }
 0x9b1   : > { %7898 = vmatmul.mubr.bf16.vlgmr.msra.gmra.mrb[24].mxu0 %v16820_v59  ;;  %7941 = vmatmul.mubr.bf16.vlgmr.msra.gmra.mrb[32].mxu1 %v16820_v59 }
 0x9b2   : > { %7952 = vmatpush1.bf16.msra.mxu1 %v14356_v58  ;;  %9207 = vmatpush1.bf16.xpose.msra.mxu0 %v16784_v25  ;;  %v14365_v25 = vld [vmem:[%s15454_s17 + $0x2e0] ss:$24 sps:$4 sm:$0xff]   ;;  %v14409_v58 = vld [vmem:[%s15454_s17 + $0xf4] ss:$24 sps:$4 sm:$0xff]  }
 0x9b3   : > { %12355 = vmatprep.mubr.msk.bf16.mxu1 %vm7084_vm0, %v7429_v55  ;;  %12510 = vmatprep.mubr.msk.bf16.mxu0 %vm7084_vm0, %v9189_v40  ;;  %v14404_v55 = vld [vmem:[%s15454_s17 + $0xc0] ss:$24 sps:$4 sm:$0xff]   ;;  %v14412_v40 = vld [vmem:[%s15454_s17 + $0x124] ss:$24 sps:$4 sm:$0xff]  }
 0x9b4   : > { %7953 = vmatprep.subr.bf16.mxu1 %v14361_v11  ;;  %v14407_v11 = vld [vmem:[%s15454_s17 + $0xf0] ss:$24 sps:$4 sm:$0xff]  }
 0x9b6   : > { %7954 = vmatpush1.bf16.msra.mxu1 %v14359_v15  ;;  %v14410_v15 = vld [vmem:[%s15454_s17 + $0x120] ss:$24 sps:$4 sm:$0xff]  }
 0x9b7   : > { %7955 = vmatprep.subr.bf16.mxu1 %v14364_v7  ;;  %v14415_v7 = vld [vmem:[%s15454_s17 + $0x154] ss:$24 sps:$4 sm:$0xff]  }
 0x9b9   : > { %9239 = vmatmul.mubr.bf16.vlgmr.msra.gmra.mrb[28].mxu0 %v9190_v19  ;;  %v14421_v19 = vld [vmem:[%s15454_s17 + $0x1b4] ss:$24 sps:$4 sm:$0xff]  }
 0x9ba   : > { %7956 = vmatpush1.bf16.msra.mxu1 %v14362_v24  ;;  %9318 = vmatprep.mubr.bf16.mxu0 %v15172_v60  ;;  %v14418_v24 = vld [vmem:[%s15454_s17 + $0x184] ss:$24 sps:$4 sm:$0xff]  }
 0x9bb   : > { %7957 = vmatprep.subr.bf16.mxu1 %v14367_v29  ;;  %v14416_v29 = vld [vmem:[%s15454_s17 + $0x180] ss:$24 sps:$4 sm:$0xff]  }
 0x9be   : > { %7958 = vmatpush1.bf16.msra.mxu1 %v14365_v25  ;;  %v14419_v25 = vld [vmem:[%s15454_s17 + $0x1b0] ss:$24 sps:$4 sm:$0xff]  }
 0x9bf   : > { %7959 = vmatprep.subr.bf16.mxu1 %v14370_v26  ;;  %v14424_v26 = vld [vmem:[%s15454_s17 + $0x1e4] ss:$24 sps:$4 sm:$0xff]  }
 0x9c2   : > { %7960 = vmatpush1.bf16.msra.mxu1 %v14368_v30  ;;  %v14422_v30 = vld [vmem:[%s15454_s17 + $0x1e0] ss:$24 sps:$4 sm:$0xff]  }
 0x9c3   : > { %7961 = vmatprep.subr.bf16.mxu1 %v14373_v3  ;;  %v14427_v3 = vld [vmem:[%s15454_s17 + $0x214] ss:$24 sps:$4 sm:$0xff]  }
 0x9c6   : > { %7962 = vmatpush1.bf16.msra.mxu1 %v14371_v31  ;;  %v14425_v31 = vld [vmem:[%s15454_s17 + $0x210] ss:$24 sps:$4 sm:$0xff]  }
 0x9c7   : > { %7963 = vmatprep.subr.bf16.mxu1 %v14376_v16  ;;  %v14430_v16 = vld [vmem:[%s15454_s17 + $0xc] ss:$24 sps:$4 sm:$0xff]  }
 0x9ca   : > { %7964 = vmatpush1.bf16.msra.mxu1 %v14374_v54  ;;  %v14428_v54 = vld [vmem:[%s15454_s17 + $0x8] ss:$24 sps:$4 sm:$0xff]  }
 0x9cb   : > { %7965 = vmatprep.subr.bf16.mxu1 %v14379_v46  ;;  %v14433_v46 = vld [vmem:[%s15454_s17 + $0x3c] ss:$24 sps:$4 sm:$0xff]  }
 0x9ce   : > { %7966 = vmatpush1.bf16.msra.mxu1 %v14377_v47  ;;  %v14431_v47 = vld [vmem:[%s15454_s17 + $0x38] ss:$24 sps:$4 sm:$0xff]  }
 0x9cf   : > { %7967 = vmatprep.subr.bf16.mxu1 %v14382_v42  ;;  %v14436_v42 = vld [vmem:[%s15454_s17 + $0x6c] ss:$24 sps:$4 sm:$0xff]  }
 0x9d2   : > { %7968 = vmatpush1.bf16.msra.mxu1 %v14380_v44  ;;  %v14434_v44 = vld [vmem:[%s15454_s17 + $0x68] ss:$24 sps:$4 sm:$0xff]  }
 0x9d3   : > { %7969 = vmatprep.subr.bf16.mxu1 %v14385_v9  ;;  %v14439_v9 = vld [vmem:[%s15454_s17 + $0x9c] ss:$24 sps:$4 sm:$0xff]  }
 0x9d6   : > { %7970 = vmatpush1.bf16.msra.mxu1 %v14383_v49  ;;  %v14437_v49 = vld [vmem:[%s15454_s17 + $0x98] ss:$24 sps:$4 sm:$0xff]  }
 0x9d7   : > { %7971 = vmatprep.subr.bf16.mxu1 %v14388_v51  ;;  %v14442_v51 = vld [vmem:[%s15454_s17 + $0xcc] ss:$24 sps:$4 sm:$0xff]  }
 0x9da   : > { %7972 = vmatpush1.bf16.msra.mxu1 %v14386_v57  ;;  %v14440_v57 = vld [vmem:[%s15454_s17 + $0xc8] ss:$24 sps:$4 sm:$0xff]  }
 0x9db   : > { %7973 = vmatprep.subr.bf16.mxu1 %v14391_v4  ;;  %v14445_v4 = vld [vmem:[%s15454_s17 + $0xfc] ss:$24 sps:$4 sm:$0xff]  }
 0x9de   : > { %7974 = vmatpush1.bf16.msra.mxu1 %v14389_v18  ;;  %v14443_v18 = vld [vmem:[%s15454_s17 + $0xf8] ss:$24 sps:$4 sm:$0xff]  }
 0x9df   : > { %8357 = vmatprep.subr.bf16.mxu1 %v14394_v20  ;;  %v14448_v20 = vld [vmem:[%s15454_s17 + $0x12c] ss:$24 sps:$4 sm:$0xff]  }
 0x9e1   : > { %7984 = vmatmul.mubr.bf16.vlgmr.msra.gmra.mrb[36].mxu1 %v16820_v59  ;;  %v14406_v59 = vld [vmem:[%s15454_s17 + $0xc4] ss:$24 sps:$4 sm:$0xff]  }
 0x9e2   : > { %8358 = vmatpush1.bf16.msra.mxu1 %v14392_v21  ;;  %12428 = vmatprep.mubr.msk.bf16.mxu1 %vm7084_vm0, %v16751_v13  ;;  %v14446_v21 = vld [vmem:[%s15454_s17 + $0x128] ss:$24 sps:$4 sm:$0xff]  }
 0x9e3   : > { %8359 = vmatprep.subr.bf16.mxu1 %v14397_v27  ;;  %v14451_v27 = vld [vmem:[%s15454_s17 + $0x15c] ss:$24 sps:$4 sm:$0xff]  }
 0x9e6   : > { %8360 = vmatpush1.bf16.msra.mxu1 %v14395_v32  ;;  %v14449_v32 = vld [vmem:[%s15454_s17 + $0x158] ss:$24 sps:$4 sm:$0xff]  }
 0x9e7   : > { %8361 = vmatprep.subr.bf16.mxu1 %v14400_v35  ;;  %v14454_v35 = vld [vmem:[%s15454_s17 + $0x18c] ss:$24 sps:$4 sm:$0xff]  }
 0x9ea   : > { %8362 = vmatpush1.bf16.msra.mxu1 %v14398_v36  ;;  %v14452_v36 = vld [vmem:[%s15454_s17 + $0x188] ss:$24 sps:$4 sm:$0xff]  }
 0x9eb   : > { %8363 = vmatprep.subr.bf16.mxu1 %v14403_v62  ;;  %v14457_v62 = vld [vmem:[%s15454_s17 + $0x1bc] ss:$24 sps:$4 sm:$0xff]  }
 0x9ee   : > { %8364 = vmatpush1.bf16.msra.mxu1 %v14401_v52  ;;  %v14455_v52 = vld [vmem:[%s15454_s17 + $0x1b8] ss:$24 sps:$4 sm:$0xff]  }
 0x9ef   : > { %8365 = vmatprep.subr.bf16.mxu1 %v14406_v59  ;;  %v14460_v59 = vld [vmem:[%s15454_s17 + $0x1ec] ss:$24 sps:$4 sm:$0xff]  }
 0x9f2   : > { %8366 = vmatpush1.bf16.msra.mxu1 %v14404_v55  ;;  %v14458_v55 = vld [vmem:[%s15454_s17 + $0x1e8] ss:$24 sps:$4 sm:$0xff]  }
 0x9f3   : > { %8367 = vmatprep.subr.bf16.mxu1 %v14409_v58  ;;  %v14463_v58 = vld [vmem:[%s15454_s17 + $0x21c] ss:$24 sps:$4 sm:$0xff]  }
 0x9f6   : > { %8368 = vmatpush1.bf16.msra.mxu1 %v14407_v11  ;;  %v14461_v11 = vld [vmem:[%s15454_s17 + $0x218] ss:$24 sps:$4 sm:$0xff]  }
 0x9f7   : > { %8369 = vmatprep.subr.bf16.mxu1 %v14412_v40  ;;  %v14466_v40 = vld [vmem:[%s15454_s17 + $0x14] ss:$24 sps:$4 sm:$0xff]  }
 0x9fa   : > { %8370 = vmatpush1.bf16.msra.mxu1 %v14410_v15  ;;  %v14464_v15 = vld [vmem:[%s15454_s17 + $0x10] ss:$24 sps:$4 sm:$0xff]  }
 0x9fb   : > { %8371 = vmatprep.subr.bf16.mxu1 %v14415_v7  ;;  %v14469_v7 = vld [vmem:[%s15454_s17 + $0x44] ss:$24 sps:$4 sm:$0xff]  }
 0x9fe   : > { %8372 = vmatpush1.bf16.msra.mxu1 %v14413_v14  ;;  %v14467_v14 = vld [vmem:[%s15454_s17 + $0x40] ss:$24 sps:$4 sm:$0xff]  }
 0x9ff   : > { %8373 = vmatprep.subr.bf16.mxu1 %v14418_v24  ;;  %v14472_v24 = vld [vmem:[%s15454_s17 + $0x74] ss:$24 sps:$4 sm:$0xff]  }
 0xa02   : > { %8374 = vmatpush1.bf16.msra.mxu1 %v14416_v29  ;;  %v14470_v29 = vld [vmem:[%s15454_s17 + $0x70] ss:$24 sps:$4 sm:$0xff]  }
 0xa03   : > { %8375 = vmatprep.subr.bf16.mxu1 %v14421_v19  ;;  %v14475_v19 = vld [vmem:[%s15454_s17 + $0xa4] ss:$24 sps:$4 sm:$0xff]  }
 0xa06   : > { %8376 = vmatpush1.bf16.msra.mxu1 %v14419_v25  ;;  %v14473_v25 = vld [vmem:[%s15454_s17 + $0xa0] ss:$24 sps:$4 sm:$0xff]  }
 0xa07   : > { %8377 = vmatprep.subr.bf16.mxu1 %v14424_v26  ;;  %v14478_v26 = vld [vmem:[%s15454_s17 + $0xd4] ss:$24 sps:$4 sm:$0xff]  }
 0xa0a   : > { %8378 = vmatpush1.bf16.msra.mxu1 %v14422_v30  ;;  %v14476_v30 = vld [vmem:[%s15454_s17 + $0xd0] ss:$24 sps:$4 sm:$0xff]  }
 0xa0b   : > { %8379 = vmatprep.subr.bf16.mxu1 %v14427_v3  ;;  %v14479_v3 = vld [vmem:[%s15454_s17 + $0x100] ss:$24 sps:$4 sm:$0xff]  }
 0xa0e   : > { %8380 = vmatpush1.bf16.msra.mxu1 %v14425_v31  ;;  %v14484_v31 = vld [vmem:[%s15454_s17 + $0x134] ss:$24 sps:$4 sm:$0xff]  }
 0xa0f   : > { %8400 = vmatprep.subr.bf16.mxu1 %v14430_v16  ;;  %v14482_v16 = vld [vmem:[%s15454_s17 + $0x130] ss:$24 sps:$4 sm:$0xff]  }
 0xa11   : > { %8390 = vmatmul.mubr.bf16.vlgmr.msra.gmra.mrb[40].mxu1 %v16749_v45 }
 0xa12   : > { %8401 = vmatpush1.bf16.msra.mxu1 %v14428_v54  ;;  %12429 = vmatprep.mubr.msk.bf16.mxu1 %vm7084_vm0, %v16751_v13  ;;  %v14487_v54 = vld [vmem:[%s15454_s17 + $0x164] ss:$24 sps:$4 sm:$0xff]  }
 0xa13   : > { %8402 = vmatprep.subr.bf16.mxu1 %v14433_v46  ;;  %v14485_v46 = vld [vmem:[%s15454_s17 + $0x160] ss:$24 sps:$4 sm:$0xff]  }
 0xa16   : > { %8403 = vmatpush1.bf16.msra.mxu1 %v14431_v47  ;;  %v14490_v47 = vld [vmem:[%s15454_s17 + $0x194] ss:$24 sps:$4 sm:$0xff]  }
 0xa17   : > { %8404 = vmatprep.subr.bf16.mxu1 %v14436_v42  ;;  %v14488_v42 = vld [vmem:[%s15454_s17 + $0x190] ss:$24 sps:$4 sm:$0xff]  }
 0xa1a   : > { %8405 = vmatpush1.bf16.msra.mxu1 %v14434_v44  ;;  %v14493_v44 = vld [vmem:[%s15454_s17 + $0x1c4] ss:$24 sps:$4 sm:$0xff]  }
 0xa1b   : > { %8406 = vmatprep.subr.bf16.mxu1 %v14439_v9  ;;  %v14491_v9 = vld [vmem:[%s15454_s17 + $0x1c0] ss:$24 sps:$4 sm:$0xff]  }
 0xa1e   : > { %8407 = vmatpush1.bf16.msra.mxu1 %v14437_v49  ;;  %v14496_v49 = vld [vmem:[%s15454_s17 + $0x1f4] ss:$24 sps:$4 sm:$0xff]  }
 0xa1f   : > { %8408 = vmatprep.subr.bf16.mxu1 %v14442_v51  ;;  %v14494_v51 = vld [vmem:[%s15454_s17 + $0x1f0] ss:$24 sps:$4 sm:$0xff]  }
 0xa22   : > { %8409 = vmatpush1.bf16.msra.mxu1 %v14440_v57  ;;  %v14499_v57 = vld [vmem:[%s15454_s17 + $0x224] ss:$24 sps:$4 sm:$0xff]  }
 0xa23   : > { %8410 = vmatprep.subr.bf16.mxu1 %v14445_v4  ;;  %v14497_v4 = vld [vmem:[%s15454_s17 + $0x220] ss:$24 sps:$4 sm:$0xff]  }
 0xa26   : > { %8411 = vmatpush1.bf16.msra.mxu1 %v14443_v18 }
 0xa27   : > { %8412 = vmatprep.subr.bf16.mxu1 %v14448_v20 }
 0xa2a   : > { %8413 = vmatpush1.bf16.msra.mxu1 %v14446_v21 }
 0xa2b   : > { %8414 = vmatprep.subr.bf16.mxu1 %v14451_v27  ;;  %v14900_v27 = vld [vmem:[%s17573_s1] sm:$0xff] }
 0xa2e   : > { %8415 = vmatpush1.bf16.msra.mxu1 %v14449_v32 }
 0xa2f   : > { %8416 = vmatprep.subr.bf16.mxu1 %v14454_v35 }
 0xa32   : > { %8417 = vmatpush1.bf16.msra.mxu1 %v14452_v36  ;;  %v14901_v36 = vld [vmem:[%s17573_s1 + $0x8] sm:$0xff] }
 0xa33   : > { %8418 = vmatprep.subr.bf16.mxu1 %v14457_v62 }
 0xa36   : > { %8419 = vmatpush1.bf16.msra.mxu1 %v14455_v52 }
 0xa37   : > { %8420 = vmatprep.subr.bf16.mxu1 %v14460_v59 }
 0xa3a   : > { %8421 = vmatpush1.bf16.msra.mxu1 %v14458_v55 }
 0xa3b   : > { %8422 = vmatprep.subr.bf16.mxu1 %v14463_v58 }
 0xa3e   : > { %8423 = vmatpush1.bf16.msra.mxu1 %v14461_v11 }
 0xa3f   : > { %8443 = vmatprep.subr.bf16.mxu1 %v14466_v40 }
 0xa41   : > { %8433 = vmatmul.mubr.bf16.vlgmr.msra.gmra.mrb[32].mxu1 %v16749_v45 }
 0xa42   : > { %8444 = vmatpush1.bf16.msra.mxu1 %v14464_v15  ;;  %12430 = vmatprep.mubr.msk.bf16.mxu1 %vm7084_vm0, %v16751_v13  ;;  %v14481_v13 = vld [vmem:[%s15454_s17 + $0x104] ss:$24 sps:$4 sm:$0xff]  }
 0xa43   : > { %8445 = vmatprep.subr.bf16.mxu1 %v14469_v7 }
 0xa46   : > { %8446 = vmatpush1.bf16.msra.mxu1 %v14467_v14 }
 0xa47   : > { %8447 = vmatprep.subr.bf16.mxu1 %v14472_v24 }
 0xa4a   : > { %8448 = vmatpush1.bf16.msra.mxu1 %v14470_v29 }
 0xa4b   : > { %8449 = vmatprep.subr.bf16.mxu1 %v14475_v19 }
 0xa4e   : > { %8450 = vmatpush1.bf16.msra.mxu1 %v14473_v25 }
 0xa4f   : > { %8451 = vmatprep.subr.bf16.mxu1 %v14478_v26 }
 0xa52   : > { %8452 = vmatpush1.bf16.msra.mxu1 %v14476_v30 }
 0xa53   : > { %8453 = vmatprep.subr.bf16.mxu1 %v14481_v13 }
 0xa56   : > { %8454 = vmatpush1.bf16.msra.mxu1 %v14479_v3 }
 0xa57   : > { %8455 = vmatprep.subr.bf16.mxu1 %v14484_v31 }
 0xa5a   : > { %8456 = vmatpush1.bf16.msra.mxu1 %v14482_v16 }
 0xa5b   : > { %8457 = vmatprep.subr.bf16.mxu1 %v14487_v54 }
 0xa5e   : > { %8458 = vmatpush1.bf16.msra.mxu1 %v14485_v46 }
 0xa5f   : > { %8459 = vmatprep.subr.bf16.mxu1 %v14490_v47 }
 0xa62   : > { %8460 = vmatpush1.bf16.msra.mxu1 %v14488_v42 }
 0xa63   : > { %8461 = vmatprep.subr.bf16.mxu1 %v14493_v44 }
 0xa66   : > { %8462 = vmatpush1.bf16.msra.mxu1 %v14491_v9 }
 0xa67   : > { %8463 = vmatprep.subr.bf16.mxu1 %v14496_v49 }
 0xa6a   : > { %8464 = vmatpush1.bf16.msra.mxu1 %v14494_v51 }
 0xa6b   : > { %8465 = vmatprep.subr.bf16.mxu1 %v14499_v57 }
 0xa6e   : > { %8466 = vmatpush1.bf16.msra.mxu1 %v14497_v4 }
 0xa6f   : > { %12431 = vmatprep.subr.msk.bf16.mxu1 %vm7084_vm0, %v16475_v22 }
 0xa71   : > { %8476 = vmatmul.mubr.bf16.vlgmr.msra.gmra.mrb[36].mxu1 %v16749_v45 }
 0xa72   : > { %12432 = vmatprep.mubr.msk.bf16.mxu1 %vm7084_vm0, %v16401_v34 }
 0xa77   : > { %8493 = vmatpush1.bf16.xpose.msra.mxu1 %v7073_v56 }
 0xa78   : > { %8563 = vmatprep.subr.bf16.mxu1 %v16724_v2 }
 0xa7e   : > { %8525 = vmatmul.mubr.bf16.vlgmr.msra.gmra.mrb[44].mxu1 %v7067_v48 }
 0xa7f   : > { %8564 = vmatpush1.bf16.msra.mxu1 %v7079_v10  ;;  %8595 = vmatprep.mubr.bf16.mxu1 %v15172_v60 }
 0xa84   : > { %v16951_v22 = vpop.f32.mrb[24].mxu0 }
 0xa85   : > { %v16953_v45 = vpop.f32.mrb[25].mxu0 }
 0xa86   : > { %v16955_v34 = vpop.f32.mrb[26].mxu0 }
 0xa87   : > { %v16957_v50 = vpop.f32.mrb[27].mxu0 }
 0xa8c   : > { %v9240_v53 = vpop.f32.mrb[28].mxu0 }
 0xa8d   : > { %v9242_v56 = vpop.f32.mrb[29].mxu0  ;;  %v9247_v30 = vmul.f32 0.07216878, %v9240_v53 }
 0xa8e   : > { %v9243_v18 = vpop.f32.mrb[30].mxu0  ;;  %v14500_v56 = vld [vmem:[%s15454_s17 + $0x480] ss:$24 sps:$4 sm:$0xff]  }
 0xa8f   : > { %v9245_v20 = vpop.f32.mrb[31].mxu0  ;;  %v9248_v8 = vmul.f32 0.07216878, %v9243_v18  ;;  %v9249_v31 = vsel %vm7134_vm1, %v9247_v30, %v14900_v27  ;;  %v14502_v18 = vld [vmem:[%s15454_s17 + $0x484] ss:$24 sps:$4 sm:$0xff]  }
 0xa90   : > { %v9251_v54 = vsel %vm7138_vm2, %v9249_v31, -inf  ;;  %v14505_v20 = vld [vmem:[%s15454_s17 + $0x4b4] ss:$24 sps:$4 sm:$0xff]   ;;  %9043 = vmatprep.subr.bf16.mxu1 %v14502_v18 }
 0xa91   : > { %v9250_v59 = vsel %vm7135_vm3, %v9248_v8, %v14901_v36  ;;  %v14514_v8 = vld [vmem:[%s15454_s17 + $0x544] ss:$24 sps:$4 sm:$0xff]  }
 0xa92   : > { %v9254_v55 = vsel %vm7138_vm2, %v9250_v59, -inf  ;;  %v14559_v18 = vld [vmem:[%s15454_s17 + $0x5dc] ss:$24 sps:$4 sm:$0xff]  }
 0xb51   : > { %v8526_v1 = vpop.f32.mrb[44].mxu1 }
 0xb52   : > { %v8533_v43 = vmul.f32 0.07216878, %v8526_v1  ;;  %v8528_v48 = vpop.f32.mrb[45].mxu1  ;;  %v14503_v1 = vld [vmem:[%s15454_s17 + $0x4b0] ss:$24 sps:$4 sm:$0xff]  }
 0xb53   : > { %v8529_v21 = vpop.f32.mrb[46].mxu1  ;;  %v14506_v48 = vld [vmem:[%s15454_s17 + $0x4e0] ss:$24 sps:$4 sm:$0xff]  }
 0xb54   : > { %v8534_v23 = vmul.f32 0.07216878, %v8529_v21  ;;  %v8531_v10 = vpop.f32.mrb[47].mxu1  ;;  %v8535_v32 = vsel %vm7134_vm1, %v8533_v43, %v14900_v27  ;;  %v14508_v43 = vld [vmem:[%s15454_s17 + $0x4e4] ss:$24 sps:$4 sm:$0xff]  }
 0xb55   : > { %v8537_v35 = vsel %vm7138_vm2, %v8535_v32, -inf  ;;  %v14511_v21 = vld [vmem:[%s15454_s17 + $0x514] ss:$24 sps:$4 sm:$0xff]   ;;  %v14515_v27 = vld [vmem:[%s15454_s17 + $0x570] ss:$24 sps:$4 sm:$0xff]  }
 0xb56   : > { %8538 = vmax.xlane.f32.xlu0 %v8537_v35  ;;  %v8536_v62 = vsel %vm7135_vm3, %v8534_v23, %v14901_v36  ;;  %v14512_v23 = vld [vmem:[%s15454_s17 + $0x540] ss:$24 sps:$4 sm:$0xff]   ;;  %v14517_v10 = vld [vmem:[%s15454_s17 + $0x574] ss:$24 sps:$4 sm:$0xff]  }
 0xb57   : > { %v8540_v52 = vsel %vm7138_vm2, %v8536_v62, -inf  ;;  %v14518_v35 = vld [vmem:[%s15454_s17 + $0x5a0] ss:$24 sps:$4 sm:$0xff]   ;;  %v14523_v36 = vld [vmem:[%s15454_s17 + $0x5d4] ss:$24 sps:$4 sm:$0xff]  }
 0xb58   : > { %8541 = vmax.xlane.f32.xlu1 %v8540_v52  ;;  %v14526_v52 = vld [vmem:[%s15454_s17 + $0x604] ss:$24 sps:$4 sm:$0xff]  }
 0xb5c   : > { %9255 = vmax.xlane.f32.xlu1 %v9254_v55  ;;  %v14529_v55 = vld [vmem:[%s15454_s17 + $0x634] ss:$24 sps:$4 sm:$0xff]  }
 0xbe3   : > { %v8539_v58 = vpop.xlane.xlu0 %8538 }
 0xbe4   : > { %v8543_v11 = vsub.f32 %v8535_v32, %v8539_v58  ;;  %v14520_v32 = vld [vmem:[%s15454_s17 + $0x5a4] ss:$24 sps:$4 sm:$0xff]   ;;  %v14527_v58 = vld [vmem:[%s15454_s17 + $0x630] ss:$24 sps:$4 sm:$0xff]  }
 0xbe5   : > { %v8542_v40 = vpop.xlane.xlu1 %8541 }
 0xbe6   : > { %v8545_v15 = vmul.f32 1.442695, %v8543_v11  ;;  %v8544_v7 = vsub.f32 %v8536_v62, %v8542_v40  ;;  %v14521_v62 = vld [vmem:[%s15454_s17 + $0x5d0] ss:$24 sps:$4 sm:$0xff]   ;;  %v14532_v11 = vld [vmem:[%s15454_s17 + $0x664] ss:$24 sps:$4 sm:$0xff]  }
 0xbe7   : > { %v14530_v40 = vld [vmem:[%s15454_s17 + $0x660] ss:$24 sps:$4 sm:$0xff]  }
 0xbe8   : > { %14856 = vpow2.f32 %v8545_v15  ;;  %v8547_v14 = vmul.f32 1.442695, %v8544_v7  ;;  %v14535_v15 = vld [vmem:[%s15454_s17 + $0x694] ss:$24 sps:$4 sm:$0xff]   ;;  %v14533_v7 = vld [vmem:[%s15454_s17 + $0x690] ss:$24 sps:$4 sm:$0xff]  }
 0xbe9   : > { %v9256_v24 = vpop.xlane.xlu1 %9255 }
 0xbea   : > { %14858 = vpow2.f32 %v8547_v14  ;;  %v9258_v29 = vsub.f32 %v9250_v59, %v9256_v24  ;;  %v14524_v59 = vld [vmem:[%s15454_s17 + $0x600] ss:$24 sps:$4 sm:$0xff]   ;;  %v14538_v14 = vld [vmem:[%s15454_s17 + $0x48c] ss:$24 sps:$4 sm:$0xff]  }
 0xbec   : > { %v9261_v19 = vmul.f32 1.442695, %v9258_v29 }
 0xbee   : > { %14860 = vpow2.f32 %v9261_v19 }
 0xbf2   : > { %v14857_v25 = vpop.eup %14856 }
 0xbf3   : > { %v8549_v26 = vsel %vm7138_vm2, %v14857_v25, 0.0 }
 0xbf4   : > { %v14859_v17 = vpop.eup %14858  ;;  %8550 = vadd.xlane.f32.xlu0 %v8549_v26 }
 0xbf5   : > { %v8552_v13 = vsel %vm7138_vm2, %v14859_v17, 0.0 }
 0xbf8   : > { %v16976_v3 = vpop.eup %14860  ;;  %8553 = vadd.xlane.f32.xlu0 %v8552_v13 }
 0xbf9   : > { %v9266_v16 = vsel %vm7138_vm2, %v16976_v3, 0.0 }
 0xbfa   : > { %9267 = vadd.xlane.f32.xlu1 %v9266_v16 }
 0xbfc   : > { %9252 = vmax.xlane.f32.xlu0 %v9251_v54 }
 0xc0b   : > { %9278 = vrot.lane.b32.xlu1 %v7081_v5, %s15171_s18 }
 0xc81   : > { %v8551_v46 = vpop.xlane.xlu0 %8550 }
 0xc82   : > { %14862 = vrcp.f32 %v8551_v46 }
 0xc85   : > { %v8554_v47 = vpop.xlane.xlu0 %8553 }
 0xc86   : > { %14864 = vrcp.f32 %v8554_v47 }
 0xc87   : > { %v16987_v42 = vpop.xlane.xlu1 %9267 }
 0xc89   : > { %v9253_v12 = vpop.xlane.xlu0 %9252 }
 0xc8a   : > { %v9257_v44 = vsub.f32 %v9249_v31, %v9253_v12  ;;  %v14536_v12 = vld [vmem:[%s15454_s17 + $0x488] ss:$24 sps:$4 sm:$0xff]  }
 0xc8b   : > { %v16989_v9 = vpop.permute.xlu1 %9278 }
 0xc8c   : > { %v9259_v49 = vmul.f32 1.442695, %v9257_v44  ;;  %9286 = vmatprep.subr.bf16.mxu0 %v16989_v9  ;;  %v14863_v51 = vpop.eup %14862  ;;  %v14539_v44 = vld [vmem:[%s15454_s17 + $0x4b8] ss:$24 sps:$4 sm:$0xff]  }
 0xc8d   : > { %v8557_v0 = vmul.f32 %v14863_v51, %v14857_v25  ;;  %v14547_v51 = vld [vmem:[%s15454_s17 + $0x51c] ss:$24 sps:$4 sm:$0xff]  }
 0xc8e   : > { %14866 = vpow2.f32 %v9259_v49  ;;  %v14542_v49 = vld [vmem:[%s15454_s17 + $0x4e8] ss:$24 sps:$4 sm:$0xff]  }
 0xc8f   : > { %14868 = vrcp.f32 %v16987_v42 }
 0xc90   : > { %v14865_v39 = vpop.eup %14864 }
 0xc91   : > { %v8558_v5 = vmul.f32 %v14865_v39, %v14859_v17  ;;  %v14545_v39 = vld [vmem:[%s15454_s17 + $0x518] ss:$24 sps:$4 sm:$0xff]  }
 0xc93   : > { %v8559_v57 = vpack.c.bf16 %v8558_v5, %v8557_v0  ;;  %v14550_v0 = vld [vmem:[%s15454_s17 + $0x54c] ss:$24 sps:$4 sm:$0xff]   ;;  %v14548_v5 = vld [vmem:[%s15454_s17 + $0x548] ss:$24 sps:$4 sm:$0xff]  }
 0xc95   : > { %12433 = vmatmul.mubr.msk.bf16.vlgmr.msra.gmra.mrb[48].mxu1 %vm7138_vm2, %v8559_v57  ;;  %v14553_v57 = vld [vmem:[%s15454_s17 + $0x57c] ss:$24 sps:$4 sm:$0xff]  }
 0xc96   : > { %9044 = vmatpush1.bf16.msra.mxu1 %v14500_v56  ;;  %v14554_v56 = vld [vmem:[%s15454_s17 + $0x5a8] ss:$24 sps:$4 sm:$0xff]  }
 0xc97   : > { %9045 = vmatprep.subr.bf16.mxu1 %v14505_v20  ;;  %v14557_v20 = vld [vmem:[%s15454_s17 + $0x5d8] ss:$24 sps:$4 sm:$0xff]  }
 0xc98   : > { %v16993_v4 = vpop.eup %14866 }
 0xc99   : > { %v9263_v53 = vsel %vm7138_vm2, %v16993_v4, 0.0  ;;  %v14869_v25 = vpop.eup %14868 }
 0xc9a   : > { %9264 = vadd.xlane.f32.xlu0 %v9263_v53  ;;  %9046 = vmatpush1.bf16.msra.mxu1 %v14503_v1  ;;  %v9272_v17 = vmul.f32 %v14869_v25, %v16976_v3  ;;  %v14541_v3 = vld [vmem:[%s15454_s17 + $0x4bc] ss:$24 sps:$4 sm:$0xff]   ;;  %v14556_v53 = vld [vmem:[%s15454_s17 + $0x5ac] ss:$24 sps:$4 sm:$0xff]   ;;  %v14596_v25 = vld [vmem:[%s15454_s17 + $0x610] ss:$24 sps:$4 sm:$0xff]  }
 0xc9b   : > { %9047 = vmatprep.subr.bf16.mxu1 %v14508_v43  ;;  %v14562_v1 = vld [vmem:[%s15454_s17 + $0x60c] ss:$24 sps:$4 sm:$0xff]   ;;  %v14560_v43 = vld [vmem:[%s15454_s17 + $0x608] ss:$24 sps:$4 sm:$0xff]  }
 0xc9e   : > { %9048 = vmatpush1.bf16.msra.mxu1 %v14506_v48  ;;  %v14565_v48 = vld [vmem:[%s15454_s17 + $0x63c] ss:$24 sps:$4 sm:$0xff]  }
 0xc9f   : > { %9049 = vmatprep.subr.bf16.mxu1 %v14511_v21  ;;  %v14563_v21 = vld [vmem:[%s15454_s17 + $0x638] ss:$24 sps:$4 sm:$0xff]  }
 0xcb0   : > { %9276 = vrot.lane.b32.xlu0 %v16724_v2, %s15171_s18  ;;  %v14509_v2 = vld [vmem:[%s15454_s17 + $0x510] ss:$24 sps:$4 sm:$0xff]  }
 0xcb1   : > { %9050 = vmatpush1.bf16.msra.mxu1 %v14509_v2  ;;  %v14568_v2 = vld [vmem:[%s15454_s17 + $0x66c] ss:$24 sps:$4 sm:$0xff]  }
 0xcb2   : > { %9051 = vmatprep.subr.bf16.mxu1 %v14514_v8  ;;  %v14566_v8 = vld [vmem:[%s15454_s17 + $0x668] ss:$24 sps:$4 sm:$0xff]  }
 0xcb5   : > { %9052 = vmatpush1.bf16.msra.mxu1 %v14512_v23  ;;  %v14571_v23 = vld [vmem:[%s15454_s17 + $0x69c] ss:$24 sps:$4 sm:$0xff]  }
 0xcb6   : > { %9053 = vmatprep.subr.bf16.mxu1 %v14517_v10  ;;  %v14569_v10 = vld [vmem:[%s15454_s17 + $0x698] ss:$24 sps:$4 sm:$0xff]  }
 0xcb9   : > { %9054 = vmatpush1.bf16.msra.mxu1 %v14515_v27  ;;  %v14574_v27 = vld [vmem:[%s15454_s17 + $0x494] ss:$24 sps:$4 sm:$0xff]  }
 0xcba   : > { %9055 = vmatprep.subr.bf16.mxu1 %v14520_v32  ;;  %v14572_v32 = vld [vmem:[%s15454_s17 + $0x490] ss:$24 sps:$4 sm:$0xff]  }
 0xcbd   : > { %9056 = vmatpush1.bf16.msra.mxu1 %v14518_v35  ;;  %v14577_v35 = vld [vmem:[%s15454_s17 + $0x4c4] ss:$24 sps:$4 sm:$0xff]  }
 0xcbe   : > { %9057 = vmatprep.subr.bf16.mxu1 %v14523_v36  ;;  %v14575_v36 = vld [vmem:[%s15454_s17 + $0x4c0] ss:$24 sps:$4 sm:$0xff]  }
 0xcc1   : > { %9058 = vmatpush1.bf16.msra.mxu1 %v14521_v62  ;;  %v14580_v62 = vld [vmem:[%s15454_s17 + $0x4f4] ss:$24 sps:$4 sm:$0xff]  }
 0xcc2   : > { %9059 = vmatprep.subr.bf16.mxu1 %v14526_v52  ;;  %v14578_v52 = vld [vmem:[%s15454_s17 + $0x4f0] ss:$24 sps:$4 sm:$0xff]  }
 0xcc5   : > { %9060 = vmatpush1.bf16.msra.mxu1 %v14524_v59  ;;  %v14583_v59 = vld [vmem:[%s15454_s17 + $0x524] ss:$24 sps:$4 sm:$0xff]  }
 0xcc6   : > { %9061 = vmatprep.subr.bf16.mxu1 %v14529_v55  ;;  %v14581_v55 = vld [vmem:[%s15454_s17 + $0x520] ss:$24 sps:$4 sm:$0xff]  }
 0xcc9   : > { %9062 = vmatpush1.bf16.msra.mxu1 %v14527_v58  ;;  %v14586_v58 = vld [vmem:[%s15454_s17 + $0x554] ss:$24 sps:$4 sm:$0xff]  }
 0xcca   : > { %9063 = vmatprep.subr.bf16.mxu1 %v14532_v11  ;;  %v14584_v11 = vld [vmem:[%s15454_s17 + $0x550] ss:$24 sps:$4 sm:$0xff]  }
 0xccd   : > { %9064 = vmatpush1.bf16.msra.mxu1 %v14530_v40  ;;  %v14589_v40 = vld [vmem:[%s15454_s17 + $0x584] ss:$24 sps:$4 sm:$0xff]  }
 0xcce   : > { %9065 = vmatprep.subr.bf16.mxu1 %v14535_v15  ;;  %v14587_v15 = vld [vmem:[%s15454_s17 + $0x580] ss:$24 sps:$4 sm:$0xff]  }
 0xcd1   : > { %9066 = vmatpush1.bf16.msra.mxu1 %v14533_v7  ;;  %v14592_v7 = vld [vmem:[%s15454_s17 + $0x5b4] ss:$24 sps:$4 sm:$0xff]  }
 0xcd2   : > { %9086 = vmatprep.subr.bf16.mxu1 %v14538_v14  ;;  %v14590_v14 = vld [vmem:[%s15454_s17 + $0x5b0] ss:$24 sps:$4 sm:$0xff]  }
 0xd27   : > { %v9265_v24 = vpop.xlane.xlu0 %9264 }
 0xd28   : > { %14870 = vrcp.f32 %v9265_v24  ;;  %v14595_v24 = vld [vmem:[%s15454_s17 + $0x5e4] ss:$24 sps:$4 sm:$0xff]  }
 0xd2b   : > { %v9277_v29 = vpop.permute.xlu0 %9276 }
 0xd2c   : > { %v9280_v19 = vsel %vm7084_vm0, %v9277_v29, %v16989_v9  ;;  %v14544_v9 = vld [vmem:[%s15454_s17 + $0x4ec] ss:$24 sps:$4 sm:$0xff]   ;;  %v14593_v29 = vld [vmem:[%s15454_s17 + $0x5e0] ss:$24 sps:$4 sm:$0xff]  }
 0xd2d   : > { %9287 = vmatpush1.bf16.msra.mxu0 %v9280_v19  ;;  %v14598_v19 = vld [vmem:[%s15454_s17 + $0x614] ss:$24 sps:$4 sm:$0xff]  }
 0xd32   : > { %v14871_v26 = vpop.eup %14870 }
 0xd33   : > { %v9271_v30 = vmul.f32 %v14871_v26, %v16993_v4  ;;  %v14551_v4 = vld [vmem:[%s15454_s17 + $0x578] ss:$24 sps:$4 sm:$0xff]   ;;  %v14601_v26 = vld [vmem:[%s15454_s17 + $0x644] ss:$24 sps:$4 sm:$0xff]  }
 0xd35   : > { %v9273_v13 = vpack.c.bf16 %v9272_v17, %v9271_v30  ;;  %v14599_v17 = vld [vmem:[%s15454_s17 + $0x640] ss:$24 sps:$4 sm:$0xff]   ;;  %v14604_v30 = vld [vmem:[%s15454_s17 + $0x674] ss:$24 sps:$4 sm:$0xff]  }
 0xd37   : > { %12511 = vmatmul.mubr.msk.bf16.vlgmr.msra.gmra.mrb[32].mxu0 %vm7138_vm2, %v9273_v13  ;;  %v14602_v13 = vld [vmem:[%s15454_s17 + $0x670] ss:$24 sps:$4 sm:$0xff]  }
 0xd68   : > { %v8597_v31 = vpop.f32.mrb[48].mxu1 }
 0xd69   : > { %v8599_v16 = vpop.f32.mrb[49].mxu1 }
 0xd6a   : > { %v8601_v54 = vpop.f32.mrb[50].mxu1 }
 0xd6b   : > { %v17030_v46 = vpack.c.bf16 %v8601_v54, %v8597_v31  ;;  %v8603_v47 = vpop.f32.mrb[51].mxu1  ;;  %v14607_v31 = vld [vmem:[%s15454_s17 + $0x6a4] ss:$24 sps:$4 sm:$0xff]  }
 0xd6c   : > { %v8607_v42 = vpack.c.bf16 %v8603_v47, %v8599_v16  ;;  %v14605_v16 = vld [vmem:[%s15454_s17 + $0x6a0] ss:$24 sps:$4 sm:$0xff]   ;;  %v14610_v54 = vld [vmem:[%s15454_s17 + $0x6c4] ss:$24 sps:$4 sm:$0xff]  }
 0xd6d   : > { %v14608_v47 = vld [vmem:[%s15454_s17 + $0x6c0] ss:$24 sps:$4 sm:$0xff]  }
 0xd6e   : > { %12506 = vmatprep.mubr.msk.bf16.mxu1 %vm7084_vm0, %v8607_v42 }
 0xd6f   : > { %9076 = vmatmul.mubr.bf16.vlgmr.msra.gmra.mrb[40].mxu1 %v17030_v46 }
 0xd70   : > { %9087 = vmatpush1.bf16.msra.mxu1 %v14536_v12  ;;  %12507 = vmatprep.mubr.msk.bf16.mxu1 %vm7084_vm0, %v8607_v42  ;;  %v14611_v12 = vld [vmem:[%s15454_s17 + $0x6f0] ss:$24 sps:$4 sm:$0xff]  }
 0xd71   : > { %9088 = vmatprep.subr.bf16.mxu1 %v14541_v3  ;;  %v14616_v3 = vld [vmem:[%s15454_s17 + $0x724] ss:$24 sps:$4 sm:$0xff]  }
 0xd74   : > { %9089 = vmatpush1.bf16.msra.mxu1 %v14539_v44  ;;  %v14614_v44 = vld [vmem:[%s15454_s17 + $0x720] ss:$24 sps:$4 sm:$0xff]  }
 0xd75   : > { %9090 = vmatprep.subr.bf16.mxu1 %v14544_v9  ;;  %v14619_v9 = vld [vmem:[%s15454_s17 + $0x754] ss:$24 sps:$4 sm:$0xff]  }
 0xd78   : > { %9091 = vmatpush1.bf16.msra.mxu1 %v14542_v49  ;;  %v14617_v49 = vld [vmem:[%s15454_s17 + $0x750] ss:$24 sps:$4 sm:$0xff]  }
 0xd79   : > { %9092 = vmatprep.subr.bf16.mxu1 %v14547_v51  ;;  %v14622_v51 = vld [vmem:[%s15454_s17 + $0x784] ss:$24 sps:$4 sm:$0xff]  }
 0xd7c   : > { %9093 = vmatpush1.bf16.msra.mxu1 %v14545_v39  ;;  %v14625_v39 = vld [vmem:[%s15454_s17 + $0x7b4] ss:$24 sps:$4 sm:$0xff]  }
 0xd7d   : > { %9094 = vmatprep.subr.bf16.mxu1 %v14550_v0  ;;  %v14623_v0 = vld [vmem:[%s15454_s17 + $0x7b0] ss:$24 sps:$4 sm:$0xff]  }
 0xd80   : > { %9095 = vmatpush1.bf16.msra.mxu1 %v14548_v5  ;;  %v14628_v5 = vld [vmem:[%s15454_s17 + $0x7e4] ss:$24 sps:$4 sm:$0xff]  }
 0xd81   : > { %9096 = vmatprep.subr.bf16.mxu1 %v14553_v57  ;;  %v14626_v57 = vld [vmem:[%s15454_s17 + $0x7e0] ss:$24 sps:$4 sm:$0xff]  }
 0xd84   : > { %9097 = vmatpush1.bf16.msra.mxu1 %v14551_v4  ;;  %v14631_v4 = vld [vmem:[%s15454_s17 + $0x814] ss:$24 sps:$4 sm:$0xff]  }
 0xd85   : > { %9098 = vmatprep.subr.bf16.mxu1 %v14556_v53  ;;  %v14629_v53 = vld [vmem:[%s15454_s17 + $0x810] ss:$24 sps:$4 sm:$0xff]  }
 0xd88   : > { %9099 = vmatpush1.bf16.msra.mxu1 %v14554_v56  ;;  %v14634_v56 = vld [vmem:[%s15454_s17 + $0x844] ss:$24 sps:$4 sm:$0xff]  }
 0xd89   : > { %9100 = vmatprep.subr.bf16.mxu1 %v14559_v18  ;;  %v14632_v18 = vld [vmem:[%s15454_s17 + $0x840] ss:$24 sps:$4 sm:$0xff]  }
 0xd8c   : > { %9101 = vmatpush1.bf16.msra.mxu1 %v14557_v20  ;;  %v14637_v20 = vld [vmem:[%s15454_s17 + $0x874] ss:$24 sps:$4 sm:$0xff]  }
 0xd8d   : > { %9102 = vmatprep.subr.bf16.mxu1 %v14562_v1  ;;  %v14635_v1 = vld [vmem:[%s15454_s17 + $0x870] ss:$24 sps:$4 sm:$0xff]  }
 0xd90   : > { %9103 = vmatpush1.bf16.msra.mxu1 %v14560_v43  ;;  %v14640_v43 = vld [vmem:[%s15454_s17 + $0x8a4] ss:$24 sps:$4 sm:$0xff]  }
 0xd91   : > { %9104 = vmatprep.subr.bf16.mxu1 %v14565_v48  ;;  %v14638_v48 = vld [vmem:[%s15454_s17 + $0x8a0] ss:$24 sps:$4 sm:$0xff]  }
 0xd94   : > { %9105 = vmatpush1.bf16.msra.mxu1 %v14563_v21  ;;  %v14643_v21 = vld [vmem:[%s15454_s17 + $0x8d4] ss:$24 sps:$4 sm:$0xff]  }
 0xd95   : > { %9106 = vmatprep.subr.bf16.mxu1 %v14568_v2  ;;  %v14641_v2 = vld [vmem:[%s15454_s17 + $0x8d0] ss:$24 sps:$4 sm:$0xff]  }
 0xd98   : > { %9107 = vmatpush1.bf16.msra.mxu1 %v14566_v8  ;;  %v14646_v8 = vld [vmem:[%s15454_s17 + $0x6cc] ss:$24 sps:$4 sm:$0xff]  }
 0xd99   : > { %9108 = vmatprep.subr.bf16.mxu1 %v14571_v23 }
 0xd9c   : > { %9109 = vmatpush1.bf16.msra.mxu1 %v14569_v10 }
 0xd9d   : > { %9129 = vmatprep.subr.bf16.mxu1 %v14574_v27 }
 0xd9f   : > { %9119 = vmatmul.mubr.bf16.vlgmr.msra.gmra.mrb[32].mxu1 %v17030_v46 }
 0xda0   : > { %9130 = vmatpush1.bf16.msra.mxu1 %v14572_v32  ;;  %12508 = vmatprep.mubr.msk.bf16.mxu1 %vm7084_vm0, %v8607_v42  ;;  %v14613_v42 = vld [vmem:[%s15454_s17 + $0x6f4] ss:$24 sps:$4 sm:$0xff]  }
 0xda1   : > { %9131 = vmatprep.subr.bf16.mxu1 %v14577_v35 }
 0xda4   : > { %9132 = vmatpush1.bf16.msra.mxu1 %v14575_v36 }
 0xda5   : > { %9133 = vmatprep.subr.bf16.mxu1 %v14580_v62  ;;  %v14644_v62 = vld [vmem:[%s15454_s17 + $0x6c8] ss:$24 sps:$4 sm:$0xff]  }
 0xda8   : > { %9134 = vmatpush1.bf16.msra.mxu1 %v14578_v52  ;;  %v14649_v52 = vld [vmem:[%s15454_s17 + $0x6fc] ss:$24 sps:$4 sm:$0xff]  }
 0xda9   : > { %9135 = vmatprep.subr.bf16.mxu1 %v14583_v59  ;;  %v14647_v59 = vld [vmem:[%s15454_s17 + $0x6f8] ss:$24 sps:$4 sm:$0xff]  }
 0xdac   : > { %9136 = vmatpush1.bf16.msra.mxu1 %v14581_v55  ;;  %v14652_v55 = vld [vmem:[%s15454_s17 + $0x72c] ss:$24 sps:$4 sm:$0xff]  }
 0xdad   : > { %9137 = vmatprep.subr.bf16.mxu1 %v14586_v58  ;;  %v14650_v58 = vld [vmem:[%s15454_s17 + $0x728] ss:$24 sps:$4 sm:$0xff]  }
 0xdb0   : > { %9138 = vmatpush1.bf16.msra.mxu1 %v14584_v11  ;;  %v14655_v11 = vld [vmem:[%s15454_s17 + $0x75c] ss:$24 sps:$4 sm:$0xff]  }
 0xdb1   : > { %9139 = vmatprep.subr.bf16.mxu1 %v14589_v40  ;;  %v14653_v40 = vld [vmem:[%s15454_s17 + $0x758] ss:$24 sps:$4 sm:$0xff]  }
 0xdb4   : > { %9140 = vmatpush1.bf16.msra.mxu1 %v14587_v15  ;;  %v14658_v15 = vld [vmem:[%s15454_s17 + $0x78c] ss:$24 sps:$4 sm:$0xff]  }
 0xdb5   : > { %9141 = vmatprep.subr.bf16.mxu1 %v14592_v7  ;;  %v14656_v7 = vld [vmem:[%s15454_s17 + $0x788] ss:$24 sps:$4 sm:$0xff]  }
 0xdb8   : > { %9142 = vmatpush1.bf16.msra.mxu1 %v14590_v14  ;;  %v14661_v14 = vld [vmem:[%s15454_s17 + $0x7bc] ss:$24 sps:$4 sm:$0xff]  }
 0xdb9   : > { %9143 = vmatprep.subr.bf16.mxu1 %v14595_v24  ;;  %v14659_v24 = vld [vmem:[%s15454_s17 + $0x7b8] ss:$24 sps:$4 sm:$0xff]  }
 0xdbc   : > { %9144 = vmatpush1.bf16.msra.mxu1 %v14593_v29  ;;  %v14664_v29 = vld [vmem:[%s15454_s17 + $0x7ec] ss:$24 sps:$4 sm:$0xff]  }
 0xdbd   : > { %9145 = vmatprep.subr.bf16.mxu1 %v14598_v19  ;;  %v14662_v19 = vld [vmem:[%s15454_s17 + $0x7e8] ss:$24 sps:$4 sm:$0xff]  }
 0xdc0   : > { %9146 = vmatpush1.bf16.msra.mxu1 %v14596_v25  ;;  %v14667_v25 = vld [vmem:[%s15454_s17 + $0x81c] ss:$24 sps:$4 sm:$0xff]  }
 0xdc1   : > { %9147 = vmatprep.subr.bf16.mxu1 %v14601_v26  ;;  %v14665_v26 = vld [vmem:[%s15454_s17 + $0x818] ss:$24 sps:$4 sm:$0xff]  }
 0xdc4   : > { %9148 = vmatpush1.bf16.msra.mxu1 %v14599_v17  ;;  %v14670_v17 = vld [vmem:[%s15454_s17 + $0x84c] ss:$24 sps:$4 sm:$0xff]  }
 0xdc5   : > { %9149 = vmatprep.subr.bf16.mxu1 %v14604_v30  ;;  %v14668_v30 = vld [vmem:[%s15454_s17 + $0x848] ss:$24 sps:$4 sm:$0xff]  }
 0xdc8   : > { %9150 = vmatpush1.bf16.msra.mxu1 %v14602_v13  ;;  %v14673_v13 = vld [vmem:[%s15454_s17 + $0x87c] ss:$24 sps:$4 sm:$0xff]  }
 0xdc9   : > { %9151 = vmatprep.subr.bf16.mxu1 %v14607_v31  ;;  %v14671_v31 = vld [vmem:[%s15454_s17 + $0x878] ss:$24 sps:$4 sm:$0xff]  }
 0xdcc   : > { %9152 = vmatpush1.bf16.msra.mxu1 %v14605_v16  ;;  %v14676_v16 = vld [vmem:[%s15454_s17 + $0x8ac] ss:$24 sps:$4 sm:$0xff]  }
 0xdcd   : > { %9766 = vmatprep.subr.bf16.mxu1 %v14610_v54  ;;  %v14674_v54 = vld [vmem:[%s15454_s17 + $0x8a8] ss:$24 sps:$4 sm:$0xff]  }
 0xdcf   : > { %9162 = vmatmul.mubr.bf16.vlgmr.msra.gmra.mrb[36].mxu1 %v17030_v46  ;;  %v14620_v46 = vld [vmem:[%s15454_s17 + $0x780] ss:$24 sps:$4 sm:$0xff]  }
 0xdd0   : > { %9767 = vmatpush1.bf16.msra.mxu1 %v14608_v47  ;;  %v14679_v47 = vld [vmem:[%s15454_s17 + $0x8dc] ss:$24 sps:$4 sm:$0xff]  }
 0xdd1   : > { %9768 = vmatprep.subr.bf16.mxu1 %v14613_v42  ;;  %v14677_v42 = vld [vmem:[%s15454_s17 + $0x8d8] ss:$24 sps:$4 sm:$0xff]  }
 0xdd4   : > { %9769 = vmatpush1.bf16.msra.mxu1 %v14611_v12  ;;  %v14682_v12 = vld [vmem:[%s15454_s17 + $0x6d4] ss:$24 sps:$4 sm:$0xff]  }
 0xdd5   : > { %9770 = vmatprep.subr.bf16.mxu1 %v14616_v3  ;;  %v14680_v3 = vld [vmem:[%s15454_s17 + $0x6d0] ss:$24 sps:$4 sm:$0xff]  }
 0xdd8   : > { %9771 = vmatpush1.bf16.msra.mxu1 %v14614_v44  ;;  %v14685_v44 = vld [vmem:[%s15454_s17 + $0x704] ss:$24 sps:$4 sm:$0xff]  }
 0xdd9   : > { %9772 = vmatprep.subr.bf16.mxu1 %v14619_v9  ;;  %v14683_v9 = vld [vmem:[%s15454_s17 + $0x700] ss:$24 sps:$4 sm:$0xff]  }
 0xddc   : > { %9773 = vmatpush1.bf16.msra.mxu1 %v14617_v49  ;;  %v14688_v49 = vld [vmem:[%s15454_s17 + $0x734] ss:$24 sps:$4 sm:$0xff]  }
 0xddd   : > { %9774 = vmatprep.subr.bf16.mxu1 %v14622_v51  ;;  %v14686_v51 = vld [vmem:[%s15454_s17 + $0x730] ss:$24 sps:$4 sm:$0xff]  }
 0xde0   : > { %9775 = vmatpush1.bf16.msra.mxu1 %v14620_v46  ;;  %v14691_v46 = vld [vmem:[%s15454_s17 + $0x764] ss:$24 sps:$4 sm:$0xff]  }
 0xde1   : > { %9776 = vmatprep.subr.bf16.mxu1 %v14625_v39  ;;  %v14689_v39 = vld [vmem:[%s15454_s17 + $0x760] ss:$24 sps:$4 sm:$0xff]  }
 0xde4   : > { %9777 = vmatpush1.bf16.msra.mxu1 %v14623_v0  ;;  %v14694_v0 = vld [vmem:[%s15454_s17 + $0x794] ss:$24 sps:$4 sm:$0xff]  }
 0xde5   : > { %9778 = vmatprep.subr.bf16.mxu1 %v14628_v5  ;;  %v14692_v5 = vld [vmem:[%s15454_s17 + $0x790] ss:$24 sps:$4 sm:$0xff]  }
 0xde8   : > { %9779 = vmatpush1.bf16.msra.mxu1 %v14626_v57  ;;  %v14697_v57 = vld [vmem:[%s15454_s17 + $0x7c4] ss:$24 sps:$4 sm:$0xff]  }
 0xde9   : > { %9780 = vmatprep.subr.bf16.mxu1 %v14631_v4  ;;  %v14695_v4 = vld [vmem:[%s15454_s17 + $0x7c0] ss:$24 sps:$4 sm:$0xff]  }
 0xdec   : > { %9781 = vmatpush1.bf16.msra.mxu1 %v14629_v53  ;;  %v14700_v53 = vld [vmem:[%s15454_s17 + $0x7f4] ss:$24 sps:$4 sm:$0xff]  }
 0xded   : > { %9782 = vmatprep.subr.bf16.mxu1 %v14634_v56  ;;  %v14698_v56 = vld [vmem:[%s15454_s17 + $0x7f0] ss:$24 sps:$4 sm:$0xff]  }
 0xdf0   : > { %9783 = vmatpush1.bf16.msra.mxu1 %v14632_v18  ;;  %v14703_v18 = vld [vmem:[%s15454_s17 + $0x824] ss:$24 sps:$4 sm:$0xff]  }
 0xdf1   : > { %9784 = vmatprep.subr.bf16.mxu1 %v14637_v20  ;;  %v14701_v20 = vld [vmem:[%s15454_s17 + $0x820] ss:$24 sps:$4 sm:$0xff]  }
 0xdf4   : > { %9785 = vmatpush1.bf16.msra.mxu1 %v14635_v1  ;;  %v14706_v1 = vld [vmem:[%s15454_s17 + $0x854] ss:$24 sps:$4 sm:$0xff]  }
 0xdf5   : > { %9786 = vmatprep.subr.bf16.mxu1 %v14640_v43  ;;  %v14704_v43 = vld [vmem:[%s15454_s17 + $0x850] ss:$24 sps:$4 sm:$0xff]  }
 0xdf8   : > { %9787 = vmatpush1.bf16.msra.mxu1 %v14638_v48  ;;  %v14709_v48 = vld [vmem:[%s15454_s17 + $0x884] ss:$24 sps:$4 sm:$0xff]  }
 0xdf9   : > { %9788 = vmatprep.subr.bf16.mxu1 %v14643_v21  ;;  %v14707_v21 = vld [vmem:[%s15454_s17 + $0x880] ss:$24 sps:$4 sm:$0xff]  }
 0xdfc   : > { %9789 = vmatpush1.bf16.msra.mxu1 %v14641_v2  ;;  %v14712_v2 = vld [vmem:[%s15454_s17 + $0x8b4] ss:$24 sps:$4 sm:$0xff]  }
 0xdfd   : > { %9809 = vmatprep.subr.bf16.mxu1 %v14646_v8  ;;  %v14710_v8 = vld [vmem:[%s15454_s17 + $0x8b0] ss:$24 sps:$4 sm:$0xff]  }
 0xe0a   : > { %v9320_v23 = vpop.f32.mrb[32].mxu0 }
 0xe0b   : > { %v9322_v10 = vpop.f32.mrb[33].mxu0 }
 0xe0c   : > { %v9324_v27 = vpop.f32.mrb[34].mxu0 }
 0xe0d   : > { %v17110_v32 = vpack.c.bf16 %v9324_v27, %v9320_v23  ;;  %v9326_v35 = vpop.f32.mrb[35].mxu0  ;;  %v14715_v23 = vld [vmem:[%s15454_s17 + $0x8e4] ss:$24 sps:$4 sm:$0xff]  }
 0xe0e   : > { %v9330_v36 = vpack.c.bf16 %v9326_v35, %v9322_v10  ;;  %v14713_v10 = vld [vmem:[%s15454_s17 + $0x8e0] ss:$24 sps:$4 sm:$0xff]  }
 0xe10   : > { %12584 = vmatprep.mubr.msk.bf16.mxu1 %vm7084_vm0, %v9330_v36 }
 0xe11   : > { %9799 = vmatmul.mubr.bf16.vlgmr.msra.gmra.mrb[40].mxu1 %v17110_v32 }
 0xe12   : > { %9810 = vmatpush1.bf16.msra.mxu1 %v14644_v62  ;;  %12585 = vmatprep.mubr.msk.bf16.mxu1 %vm7084_vm0, %v9330_v36 }
 0xe13   : > { %9811 = vmatprep.subr.bf16.mxu1 %v14649_v52 }
 0xe16   : > { %9812 = vmatpush1.bf16.msra.mxu1 %v14647_v59 }
 0xe17   : > { %9813 = vmatprep.subr.bf16.mxu1 %v14652_v55 }
 0xe1a   : > { %9814 = vmatpush1.bf16.msra.mxu1 %v14650_v58 }
 0xe1b   : > { %9815 = vmatprep.subr.bf16.mxu1 %v14655_v11 }
 0xe1e   : > { %9816 = vmatpush1.bf16.msra.mxu1 %v14653_v40 }
 0xe1f   : > { %9817 = vmatprep.subr.bf16.mxu1 %v14658_v15 }
 0xe22   : > { %9818 = vmatpush1.bf16.msra.mxu1 %v14656_v7 }
 0xe23   : > { %9819 = vmatprep.subr.bf16.mxu1 %v14661_v14  ;;  %v14902_v14 = vld [vmem:[#allocation2] sm:$0xff] }
 0xe26   : > { %9820 = vmatpush1.bf16.msra.mxu1 %v14659_v24  ;;  %v17170_v24 = vld [vmem:[%s15468_s19] sm:$0xff] }
 0xe27   : > { %9821 = vmatprep.subr.bf16.mxu1 %v14664_v29  ;;  %v14904_v29 = vld [vmem:[#allocation2 + $0x8] sm:$0xff] }
 0xe2a   : > { %9822 = vmatpush1.bf16.msra.mxu1 %v14662_v19  ;;  %v17175_v19 = vld [vmem:[%s15468_s19 + $0x8] sm:$0xff] }
 0xe2b   : > { %9823 = vmatprep.subr.bf16.mxu1 %v14667_v25 }
 0xe2e   : > { %9824 = vmatpush1.bf16.msra.mxu1 %v14665_v26  ;;  %v14907_v26 = vld [vmem:[#allocation2 + $0x38] sm:$0xff] }
 0xe2f   : > { %9825 = vmatprep.subr.bf16.mxu1 %v14670_v17 }
 0xe32   : > { %9826 = vmatpush1.bf16.msra.mxu1 %v14668_v30  ;;  %v14908_v30 = vld [vmem:[#allocation2 + $0x10] sm:$0xff] }
 0xe33   : > { %9827 = vmatprep.subr.bf16.mxu1 %v14673_v13 }
 0xe36   : > { %9828 = vmatpush1.bf16.msra.mxu1 %v14671_v31  ;;  %v17180_v31 = vld [vmem:[%s15468_s19 + $0x10] sm:$0xff] }
 0xe37   : > { %9829 = vmatprep.subr.bf16.mxu1 %v14676_v16  ;;  %v9930_v16 = vrot.slane %v17180_v31, %v15625_v41 }
 0xe3a   : > { %9830 = vmatpush1.bf16.msra.mxu1 %v14674_v54 }
 0xe3b   : > { %9831 = vmatprep.subr.bf16.mxu1 %v14679_v47 }
 0xe3e   : > { %9832 = vmatpush1.bf16.msra.mxu1 %v14677_v42  ;;  %v14910_v42 = vld [vmem:[#allocation2 + $0x40] sm:$0xff] }
 0xe3f   : > { %9852 = vmatprep.subr.bf16.mxu1 %v14682_v12 }
 0xe41   : > { %9842 = vmatmul.mubr.bf16.vlgmr.msra.gmra.mrb[32].mxu1 %v17110_v32 }
 0xe42   : > { %9853 = vmatpush1.bf16.msra.mxu1 %v14680_v3  ;;  %12586 = vmatprep.mubr.msk.bf16.mxu1 %vm7084_vm0, %v9330_v36  ;;  %v17189_v3 = vld [vmem:[%s15468_s19 + $0x18] sm:$0xff] }
 0xe43   : > { %9854 = vmatprep.subr.bf16.mxu1 %v14685_v44  ;;  %v9934_v44 = vrot.slane %v17189_v3, %v15625_v41 }
 0xe46   : > { %9855 = vmatpush1.bf16.msra.mxu1 %v14683_v9 }
 0xe47   : > { %9856 = vmatprep.subr.bf16.mxu1 %v14688_v49 }
 0xe4a   : > { %9857 = vmatpush1.bf16.msra.mxu1 %v14686_v51 }
 0xe4b   : > { %9858 = vmatprep.subr.bf16.mxu1 %v14691_v46  ;;  %v14912_v46 = vld [vmem:[#allocation2 + $0x18] sm:$0xff] }
 0xe4e   : > { %9859 = vmatpush1.bf16.msra.mxu1 %v14689_v39 }
 0xe4f   : > { %9860 = vmatprep.subr.bf16.mxu1 %v14694_v0 }
 0xe52   : > { %9861 = vmatpush1.bf16.msra.mxu1 %v14692_v5 }
 0xe53   : > { %9862 = vmatprep.subr.bf16.mxu1 %v14697_v57  ;;  %v14913_v57 = vld [vmem:[#allocation2 + $0x48] sm:$0xff] }
 0xe56   : > { %9863 = vmatpush1.bf16.msra.mxu1 %v14695_v4 }
 0xe57   : > { %9864 = vmatprep.subr.bf16.mxu1 %v14700_v53 }
 0xe5a   : > { %9865 = vmatpush1.bf16.msra.mxu1 %v14698_v56 }
 0xe5b   : > { %9866 = vmatprep.subr.bf16.mxu1 %v14703_v18 }
 0xe5e   : > { %9867 = vmatpush1.bf16.msra.mxu1 %v14701_v20  ;;  %v17209_v20 = vld [vmem:[%s15468_s19 + $0x20] sm:$0xff] }
 0xe5f   : > { %9868 = vmatprep.subr.bf16.mxu1 %v14706_v1  ;;  %v9938_v1 = vrot.slane %v17209_v20, %v15625_v41 }
 0xe62   : > { %9869 = vmatpush1.bf16.msra.mxu1 %v14704_v43 }
 0xe63   : > { %9870 = vmatprep.subr.bf16.mxu1 %v14709_v48  ;;  %v17214_v48 = vld [vmem:[%s15468_s19 + $0x28] sm:$0xff] }
 0xe66   : > { %9871 = vmatpush1.bf16.msra.mxu1 %v14707_v21  ;;  %v9942_v21 = vrot.slane %v17214_v48, %v15625_v41 }
 0xe67   : > { %9872 = vmatprep.subr.bf16.mxu1 %v14712_v2 }
 0xe6a   : > { %9873 = vmatpush1.bf16.msra.mxu1 %v14710_v8 }
 0xe6b   : > { %9874 = vmatprep.subr.bf16.mxu1 %v14715_v23  ;;  %v14916_v23 = vld [vmem:[#allocation2 + $0x20] sm:$0xff] }
 0xe6e   : > { %9875 = vmatpush1.bf16.msra.mxu1 %v14713_v10 }
 0xe71   : > { %9885 = vmatmul.mubr.bf16.vlgmr.msra.gmra.mrb[36].mxu1 %v17110_v32 }
 0xee4   : > { %v9800_v27 = vpop.f32.mrb[40].mxu1 }
 0xee5   : > { %v12794_v35 = vadd.f32 %v9800_v27, %v16951_v22  ;;  %v9802_v36 = vpop.f32.mrb[41].mxu1  ;;  %v9922_v22 = vrot.slane %v17170_v24, %v15625_v41 }
 0xee6   : > { %v12795_v62 = vadd.f32 %v9802_v36, %v16953_v45  ;;  %v9804_v52 = vpop.f32.mrb[42].mxu1 }
 0xee7   : > { %v12796_v59 = vadd.f32 %v9804_v52, %v16955_v34  ;;  %v9806_v55 = vpop.f32.mrb[43].mxu1  ;;  %v9907_v32 = vadd.f32 %v14902_v14, %v12794_v35  ;;  %v9926_v34 = vrot.slane %v17175_v19, %v15625_v41  ;;  %v14917_v35 = vld [vmem:[#allocation2 + $0x28] sm:$0xff] }
 0xee8   : > { %v12797_v58 = vadd.f32 %v9806_v55, %v16957_v50  ;;  %v9908_v45 = vadd.f32 %v14904_v29, %v12795_v62  ;;  %v14906_v50 = vld [vmem:[#allocation2 + $0x30] sm:$0xff] }
 0xee9   : > { %v9913_v25 = vadd.f32 %v14906_v50, %v12796_v59  ;;  %v17184_v54 = vadd.f32 %v9922_v22, %v9907_v32  ;;  %v14918_v59 = vld [vmem:[#allocation2 + $0x50] sm:$0xff]  ;;  %v14716_v50 = vld [vmem:[%s15460_s8 + $0x40] sm:$0xff]  }
 0xeea   : > { %v9914_v17 = vadd.f32 %v14907_v26, %v12797_v58  ;;  %v17186_v47 = vadd.f32 %v9926_v34, %v9908_v45  ;;  %v14718_v26 = vld [vmem:[%s15460_s8 + $0x48] sm:$0xff]   ;;  %12688 = vmatprep.subr.bf16.mxu0 %v14716_v50 }
 0xeeb   : > { %v17193_v9 = vadd.f32 %v9922_v22, %v9913_v25  ;;  %v14717_v25 = vld [vmem:[%s15460_s8] sm:$0xff]  }
 0xeec   : > { %v17195_v49 = vadd.f32 %v9926_v34, %v9914_v17  ;;  %v9955_v0 = vadd.f32 %v17186_v47, %v17184_v54  ;;  %12689 = vmatpush3.bf16.msra.mxu0 %v14717_v25  ;;  %v14719_v17 = vld [vmem:[%s15460_s8 + $0x8] sm:$0xff]  }
 0xeed   : > { %12690 = vmatprep.subr.bf16.mxu0 %v14718_v26 }
 0xeee   : > { %v9962_v18 = vadd.f32 %v17195_v49, %v17193_v9 }
 0xef0   : > { %12691 = vmatpush3.bf16.msra.mxu0 %v14719_v17 }
 0xf14   : > { %v9843_v11 = vpop.f32.mrb[32].mxu1 }
 0xf15   : > { %v9845_v40 = vpop.f32.mrb[33].mxu1  ;;  %v9909_v13 = vadd.f32 %v14908_v30, %v9843_v11 }
 0xf16   : > { %v9847_v15 = vpop.f32.mrb[34].mxu1  ;;  %v9910_v39 = vadd.f32 %v14912_v46, %v9845_v40  ;;  %v14919_v40 = vld [vmem:[#allocation2 + $0x58] sm:$0xff] }
 0xf17   : > { %v9849_v7 = vpop.f32.mrb[35].mxu1  ;;  %v9915_v12 = vadd.f32 %v14910_v42, %v9847_v15  ;;  %v17197_v51 = vadd.f32 %v9930_v16, %v9909_v13 }
 0xf18   : > { %v9916_v4 = vadd.f32 %v14913_v57, %v9849_v7  ;;  %v17204_v56 = vadd.f32 %v9934_v44, %v9910_v39 }
 0xf19   : > { %v17201_v5 = vadd.f32 %v9930_v16, %v9915_v12  ;;  %v9956_v53 = vadd.f32 %v9955_v0, %v17197_v51 }
 0xf1a   : > { %v17219_v8 = vadd.f32 %v9934_v44, %v9916_v4 }
 0xf1b   : > { %v9963_v2 = vadd.f32 %v9962_v18, %v17201_v5  ;;  %v9957_v41 = vadd.f32 %v9956_v53, %v17204_v56 }
 0xf1d   : > { %v9964_v32 = vadd.f32 %v9963_v2, %v17219_v8 }
 0xf44   : > { %v9886_v43 = vpop.f32.mrb[36].mxu1 }
 0xf45   : > { %v9911_v10 = vadd.f32 %v14916_v23, %v9886_v43  ;;  %v9888_v27 = vpop.f32.mrb[37].mxu1 }
 0xf46   : > { %v9912_v36 = vadd.f32 %v14917_v35, %v9888_v27  ;;  %v9890_v62 = vpop.f32.mrb[38].mxu1 }
 0xf47   : > { %v17221_v52 = vadd.f32 %v9938_v1, %v9911_v10  ;;  %v9917_v55 = vadd.f32 %v14918_v59, %v9890_v62  ;;  %v9892_v58 = vpop.f32.mrb[39].mxu1 }
 0xf48   : > { %v17224_v11 = vadd.f32 %v9942_v21, %v9912_v36  ;;  %v9918_v15 = vadd.f32 %v14919_v40, %v9892_v58 }
 0xf49   : > { %v17226_v7 = vadd.f32 %v9938_v1, %v9917_v55  ;;  %v9958_v14 = vadd.f32 %v9957_v41, %v17221_v52 }
 0xf4a   : > { %v17230_v22 = vadd.f32 %v9942_v21, %v9918_v15 }
 0xf4b   : > { %v9959_v29 = vadd.f32 %v9958_v14, %v17224_v11  ;;  %v9965_v45 = vadd.f32 %v9964_v32, %v17226_v7 }
 0xf4d   : > { %9960 = vadd.xlane.f32.xlu1 %v9959_v29  ;;  %v9966_v34 = vadd.f32 %v9965_v45, %v17230_v22 }
 0xf4f   : > { %9967 = vadd.xlane.f32.xlu0 %v9966_v34 }
 0xfda   : > { %v9961_v30 = vpop.xlane.xlu1 %9960 }
 0xfdb   : > { %v9969_v13 = vmul.f32 0.0013020834, %v9961_v30  ;;  %v14720_v30 = vld [vmem:[%s15460_s8 + $0x50] sm:$0xff]  }
 0xfdc   : > { %v9968_v16 = vpop.xlane.xlu0 %9967  ;;  %12692 = vmatprep.subr.bf16.mxu0 %v14720_v30 }
 0xfdd   : > { %v9970_v42 = vmul.f32 0.0013020834, %v9968_v16  ;;  %v17240_v12 = vsub.f32 %v17184_v54, %v9969_v13  ;;  %v17243_v44 = vsub.f32 %v17186_v47, %v9969_v13  ;;  %v17246_v46 = vsub.f32 %v17197_v51, %v9969_v13  ;;  %v14722_v16 = vld [vmem:[%s15460_s8 + $0x58] sm:$0xff]  }
 0xfde   : > { %v17249_v39 = vsub.f32 %v17204_v56, %v9969_v13  ;;  %v17262_v18 = vsub.f32 %v17221_v52, %v9969_v13  ;;  %v17277_v27 = vsub.f32 %v17224_v11, %v9969_v13  ;;  %v14721_v13 = vld [vmem:[%s15460_s8 + $0x10] sm:$0xff]  }
 0xfdf   : > { %v9983_v0 = vmul.f32 %v17240_v12, %v17240_v12  ;;  %v9984_v57 = vmul.f32 %v17243_v44, %v17243_v44  ;;  %v17256_v4 = vsub.f32 %v17193_v9, %v9970_v42  ;;  %v17259_v53 = vsub.f32 %v17195_v49, %v9970_v42  ;;  %12693 = vmatpush3.bf16.msra.mxu0 %v14721_v13 }
 0xfe0   : > { %v9985_v1 = vmul.f32 %v17246_v46, %v17246_v46  ;;  %v17267_v21 = vsub.f32 %v17201_v5, %v9970_v42  ;;  %v17270_v2 = vsub.f32 %v17219_v8, %v9970_v42  ;;  %v9986_v35 = vmul.f32 %v17249_v39, %v17249_v39  ;;  %12694 = vmatprep.subr.bf16.mxu0 %v14722_v16  ;;  %v14922_v16 = vld [vmem:[%s15468_s19 + $0x48] sm:$0xff] }
 0xfe1   : > { %v9995_v43 = vadd.f32 %v9984_v57, %v9983_v0  ;;  %v9989_v23 = vmul.f32 %v17256_v4, %v17256_v4  ;;  %v9990_v10 = vmul.f32 %v17259_v53, %v17259_v53  ;;  %v17282_v62 = vsub.f32 %v17226_v7, %v9970_v42  ;;  %v14724_v0 = vld [vmem:[%s15460_s8 + $0x60] sm:$0xff]  }
 0xfe2   : > { %v9991_v59 = vmul.f32 %v17267_v21, %v17267_v21  ;;  %v9987_v58 = vmul.f32 %v17262_v18, %v17262_v18  ;;  %v17289_v40 = vsub.f32 %v17230_v22, %v9970_v42  ;;  %v9992_v15 = vmul.f32 %v17270_v2, %v17270_v2  ;;  %v14723_v42 = vld [vmem:[%s15460_s8 + $0x18] sm:$0xff]   ;;  %v14725_v57 = vld [vmem:[%s15460_s8 + $0x20] sm:$0xff]  }
 0xfe3   : > { %v9996_v36 = vadd.f32 %v9995_v43, %v9985_v1  ;;  %v10002_v55 = vadd.f32 %v9990_v10, %v9989_v23  ;;  %v9988_v32 = vmul.f32 %v17277_v27, %v17277_v27  ;;  %v9993_v45 = vmul.f32 %v17282_v62, %v17282_v62  ;;  %12695 = vmatpush3.bf16.msra.mxu0 %v14723_v42  ;;  %v14726_v1 = vld [vmem:[%s15460_s8 + $0x68] sm:$0xff]   ;;  %v14728_v23 = vld [vmem:[%s15460_s8 + $0x70] sm:$0xff]  }
 0xfe4   : > { %v9994_v25 = vmul.f32 %v17289_v40, %v17289_v40  ;;  %12696 = vmatprep.subr.bf16.mxu0 %v14724_v0  ;;  %v14727_v43 = vld [vmem:[%s15460_s8 + $0x28] sm:$0xff]   ;;  %v14729_v10 = vld [vmem:[%s15460_s8 + $0x30] sm:$0xff]  }
 0xfe5   : > { %v9997_v41 = vadd.f32 %v9996_v36, %v9986_v35  ;;  %v10003_v14 = vadd.f32 %v10002_v55, %v9991_v59  ;;  %v14730_v35 = vld [vmem:[%s15460_s8 + $0x78] sm:$0xff]   ;;  %v14732_v59 = vld [vmem:[%s15460_s8 + $0xc0] sm:$0xff]  }
 0xfe6   : > { %v14731_v36 = vld [vmem:[%s15460_s8 + $0x38] sm:$0xff]   ;;  %v14923_v0 = vld [vmem:[%s15468_s19 + $0x50] sm:$0xff] }
 0xfe7   : > { %v9998_v29 = vadd.f32 %v9997_v41, %v9987_v58  ;;  %v10004_v34 = vadd.f32 %v10003_v14, %v9992_v15  ;;  %12697 = vmatpush3.bf16.msra.mxu0 %v14725_v57 }
 0xfe8   : > { %12698 = vmatprep.subr.bf16.mxu0 %v14726_v1 }
 0xfe9   : > { %v9999_v50 = vadd.f32 %v9998_v29, %v9988_v32  ;;  %v10005_v26 = vadd.f32 %v10004_v34, %v9993_v45  ;;  %v17313_v29 = vsub.s32 2, %v15621_v38  ;;  %v14920_v45 = vld [vmem:[%s15468_s19 + $0x38] sm:$0xff] }
 0xfeb   : > { %10000 = vadd.xlane.f32.xlu0 %v9999_v50  ;;  %v10006_v17 = vadd.f32 %v10005_v26, %v9994_v25  ;;  %12699 = vmatpush3.bf16.msra.mxu0 %v14727_v43  ;;  %v10034_v34 = vrot.slane %v14920_v45, %v17313_v29  ;;  %v14921_v25 = vld [vmem:[%s15468_s19 + $0x30] sm:$0xff]  ;;  %v10042_v42 = vrot.slane %v14922_v16, %v17313_v29  ;;  %v14927_v16 = vld [vmem:[%s15468_s19 + $0x80] sm:$0xff] }
 0xfec   : > { %12700 = vmatprep.subr.bf16.mxu0 %v14728_v23  ;;  %v10030_v26 = vrot.slane %v14921_v25, %v17313_v29  ;;  %v10046_v57 = vrot.slane %v14923_v0, %v17313_v29  ;;  %v14924_v23 = vld [vmem:[%s15468_s19 + $0x68] sm:$0xff] }
 0xfed   : > { %10007 = vadd.xlane.f32.xlu1 %v10006_v17 }
 0xfef   : > { %12701 = vmatpush3.bf16.msra.mxu0 %v14729_v10  ;;  %v10070_v10 = vrot.slane %v14924_v23, %v17313_v29 }
 0xff0   : > { %12702 = vmatprep.subr.bf16.mxu0 %v14730_v35  ;;  %v14925_v35 = vld [vmem:[%s15468_s19 + $0x60] sm:$0xff] }
 0xff3   : > { %12703 = vmatpush3.bf16.msra.mxu0 %v14731_v36 }
 0xff4   : > { %12710 = vmatprep.subr.bf16.mxu0 %v14732_v59 }
0x1078   : > { %v10001_v55 = vpop.xlane.xlu0 %10000 }
0x1079   : > { %v10009_v58 = vmul.f32 0.0013020834, %v10001_v55 }
0x107a   : > { %v10008_v15 = vpop.xlane.xlu1 %10007 }
0x107b   : > { %v10011_v41 = vadd.f32 1e-05, %v10009_v58  ;;  %v10010_v14 = vmul.f32 0.0013020834, %v10008_v15  ;;  %v14926_v58 = vld [vmem:[%s15468_s19 + $0x78] sm:$0xff] }
0x107d   : > { %14872 = vrsqrt.f32 %v10011_v41  ;;  %v10012_v32 = vadd.f32 1e-05, %v10010_v14  ;;  %v10078_v41 = vrot.slane %v14926_v58, %v17313_v29  ;;  %v14741_v58 = vld [vmem:[%s15460_s8 + $0xa0] sm:$0xff]  }
0x107f   : > { %14874 = vrsqrt.f32 %v10012_v32 }
0x1087   : > { %v17317_v50 = vpop.eup %14872 }
0x1088   : > { %v10016_v17 = vmul.f32 %v17317_v50, %v17243_v44  ;;  %v10015_v30 = vmul.f32 %v17317_v50, %v17240_v12  ;;  %v10018_v13 = vmul.f32 %v17317_v50, %v17249_v39  ;;  %v10066_v44 = vrot.slane %v14925_v35, %v17313_v29 }
0x1089   : > { %v14875_v1 = vpop.eup %14874  ;;  %v10019_v12 = vmul.f32 %v17317_v50, %v17262_v18 }
0x108a   : > { %v10052_v43 = vmul.f32 %v10034_v34, %v10016_v17  ;;  %v10022_v39 = vmul.f32 %v14875_v1, %v17259_v53  ;;  %v10021_v36 = vmul.f32 %v14875_v1, %v17256_v4  ;;  %v10051_v59 = vmul.f32 %v10030_v26, %v10015_v30 }
0x108b   : > { %v10024_v55 = vmul.f32 %v14875_v1, %v17270_v2  ;;  %v10054_v32 = vmul.f32 %v10042_v42, %v10018_v13  ;;  %v10025_v17 = vmul.f32 %v14875_v1, %v17282_v62  ;;  %v10055_v18 = vmul.f32 %v10046_v57, %v10019_v12  ;;  %v14736_v12 = vld [vmem:[%s15460_s8 + $0xd0] sm:$0xff]  }
0x108c   : > { %v10058_v15 = vmul.f32 %v10034_v34, %v10022_v39  ;;  %v10057_v14 = vmul.f32 %v10030_v26, %v10021_v36  ;;  %v10088_v25 = vadd.f32 %v10070_v10, %v10052_v43  ;;  %v10082_v53 = vrot.slane %v14927_v16, %v17313_v29  ;;  %v14733_v26 = vld [vmem:[%s15460_s8 + $0x80] sm:$0xff]   ;;  %v14737_v39 = vld [vmem:[%s15460_s8 + $0x90] sm:$0xff]   ;;  %v14738_v36 = vld [vmem:[%s15460_s8 + $0xd8] sm:$0xff]  }
0x108d   : > { %v10060_v45 = vmul.f32 %v10042_v42, %v10024_v55  ;;  %v10087_v30 = vadd.f32 %v10066_v44, %v10051_v59  ;;  %v10061_v23 = vmul.f32 %v10046_v57, %v10025_v17  ;;  %v10090_v13 = vadd.f32 %v10078_v41, %v10054_v32  ;;  %v14734_v42 = vld [vmem:[%s15460_s8 + $0xc8] sm:$0xff]   ;;  %v14739_v59 = vld [vmem:[%s15460_s8 + $0x98] sm:$0xff]   ;;  %v14740_v55 = vld [vmem:[%s15460_s8 + $0xe0] sm:$0xff]  }
0x108e   : > { %v10094_v4 = vadd.f32 %v10070_v10, %v10058_v15  ;;  %v10093_v0 = vadd.f32 %v10066_v44, %v10057_v14  ;;  %v17347_v43 = vadd.f32 %v10082_v53, %v10055_v18  ;;  %v14735_v44 = vld [vmem:[%s15460_s8 + $0x88] sm:$0xff]   ;;  %v14744_v14 = vld [vmem:[%s15460_s8 + $0xf0] sm:$0xff]   ;;  %v10023_v32 = vmul.f32 %v14875_v1, %v17267_v21  ;;  %v14746_v21 = vld [vmem:[%s15460_s8 + $0xf8] sm:$0xff]  }
0x108f   : > { %v10096_v2 = vadd.f32 %v10078_v41, %v10060_v45  ;;  %v17349_v62 = vadd.f32 %v10082_v53, %v10061_v23  ;;  %v14742_v41 = vld [vmem:[%s15460_s8 + $0xe8] sm:$0xff]   ;;  %v10026_v45 = vmul.f32 %v14875_v1, %v17289_v40  ;;  %v14928_v17 = vld [vmem:[%s15468_s19 + $0x40] sm:$0xff]  ;;  %v10020_v53 = vmul.f32 %v17317_v50, %v17277_v27  ;;  %v14747_v23 = vld [vmem:[%s15460_s8 + $0xb8] sm:$0xff]  }
0x1090   : > { %v10100_v34 = vpack.c.bf16 %v10094_v4, %v10088_v25  ;;  %v10099_v35 = vpack.c.bf16 %v10093_v0, %v10087_v30  ;;  %v14743_v15 = vld [vmem:[%s15460_s8 + $0xa8] sm:$0xff]   ;;  %v10017_v25 = vmul.f32 %v17317_v50, %v17246_v46  ;;  %v10038_v18 = vrot.slane %v14928_v17, %v17313_v29  ;;  %v14745_v16 = vld [vmem:[%s15460_s8 + $0xb0] sm:$0xff]  }
0x1091   : > { %v10102_v10 = vpack.c.bf16 %v10096_v2, %v10090_v13  ;;  %v10103_v57 = vpack.c.bf16 %v17349_v62, %v17347_v43  ;;  %v14929_v4 = vld [vmem:[%s15468_s19 + $0x58] sm:$0xff]  ;;  %v14930_v0 = vld [vmem:[%s15468_s19 + $0x70] sm:$0xff] }
0x1092   : > { %10525 = vmatprep.mubr.bf16.mxu0 %v10100_v34  ;;  %v10050_v30 = vrot.slane %v14929_v4, %v17313_v29  ;;  %v10059_v40 = vmul.f32 %v10038_v18, %v10023_v32  ;;  %v10053_v46 = vmul.f32 %v10038_v18, %v10017_v25  ;;  %v10074_v2 = vrot.slane %v14930_v0, %v17313_v29  ;;  %v14757_v32 = vld [vmem:[%s15460_s8 + $0x120] sm:$0xff]   ;;  %v14759_v25 = vld [vmem:[%s15460_s8 + $0x128] sm:$0xff]   ;;  %v14760_v17 = vld [vmem:[%s15460_s8 + $0x170] sm:$0xff]  }
0x1093   : > { %10526 = vmatmul.mubr.bf16.vlgmr.msra.gmra.mrb[36].mxu0 %v10099_v35  ;;  %v14931_v35 = vld [vmem:[%s15468_s19 + $0x88] sm:$0xff]  ;;  %v14761_v18 = vld [vmem:[%s15460_s8 + $0x130] sm:$0xff]  }
0x1094   : > { %12711 = vmatpush3.bf16.msra.mxu0 %v14733_v26  ;;  %10566 = vmatprep.mubr.bf16.mxu0 %v10102_v10  ;;  %v10062_v1 = vmul.f32 %v10050_v30, %v10026_v45  ;;  %v10056_v34 = vmul.f32 %v10050_v30, %v10020_v53  ;;  %v10086_v27 = vrot.slane %v14931_v35, %v17313_v29  ;;  %v14748_v26 = vld [vmem:[%s15460_s8 + $0x140] sm:$0xff]   ;;  %v14758_v45 = vld [vmem:[%s15460_s8 + $0x168] sm:$0xff]   ;;  %v14763_v53 = vld [vmem:[%s15460_s8 + $0x138] sm:$0xff]  }
0x1095   : > { %12712 = vmatprep.subr.bf16.mxu0 %v14734_v42  ;;  %v10095_v50 = vadd.f32 %v10074_v2, %v10059_v40  ;;  %v10089_v42 = vadd.f32 %v10074_v2, %v10053_v46  ;;  %v14749_v10 = vld [vmem:[%s15460_s8 + $0x100] sm:$0xff]   ;;  %v14767_v40 = vld [vmem:[%s15462_s3 + $0x30] ss:$24 sps:$4 sm:$0xff]   ;;  %v14775_v43 = vld [vmem:[%s15462_s3 + $0x94] ss:$24 sps:$4 sm:$0xff]  }
0x1096   : > { %v10098_v13 = vadd.f32 %v10086_v27, %v10062_v1  ;;  %v14764_v4 = vld [vmem:[%s15462_s3] ss:$24 sps:$4 sm:$0xff]   ;;  %v14766_v30 = vld [vmem:[%s15462_s3 + $0x4] ss:$24 sps:$4 sm:$0xff]   ;;  %v14773_v62 = vld [vmem:[%s15462_s3 + $0x90] ss:$24 sps:$4 sm:$0xff]  }
0x1097   : > { %v14772_v1 = vld [vmem:[%s15462_s3 + $0x64] ss:$24 sps:$4 sm:$0xff]   ;;  %v14770_v46 = vld [vmem:[%s15462_s3 + $0x60] ss:$24 sps:$4 sm:$0xff]   ;;  %v14781_v2 = vld [vmem:[%s15462_s3 + $0xf4] ss:$24 sps:$4 sm:$0xff]  }
0x1098   : > { %12713 = vmatpush3.bf16.msra.mxu0 %v14735_v44  ;;  %v10092_v44 = vadd.f32 %v10086_v27, %v10056_v34  ;;  %v14776_v0 = vld [vmem:[%s15462_s3 + $0xc0] ss:$24 sps:$4 sm:$0xff]   ;;  %v14784_v34 = vld [vmem:[%s15462_s3 + $0x124] ss:$24 sps:$4 sm:$0xff]   ;;  %v14787_v27 = vld [vmem:[%s15462_s3 + $0x154] ss:$24 sps:$4 sm:$0xff]  }
0x1099   : > { %12714 = vmatprep.subr.bf16.mxu0 %v14736_v12  ;;  %v10101_v12 = vpack.c.bf16 %v10095_v50, %v10089_v42  ;;  %v14782_v35 = vld [vmem:[%s15462_s3 + $0x120] ss:$24 sps:$4 sm:$0xff]   ;;  %v14785_v50 = vld [vmem:[%s15462_s3 + $0x150] ss:$24 sps:$4 sm:$0xff]  }
0x109c   : > { %12715 = vmatpush3.bf16.msra.mxu0 %v14737_v39  ;;  %v14750_v39 = vld [vmem:[%s15460_s8 + $0x148] sm:$0xff]  }
0x109d   : > { %12716 = vmatprep.subr.bf16.mxu0 %v14738_v36  ;;  %v10104_v36 = vpack.c.bf16 %v10098_v13, %v10092_v44 }
0x10a0   : > { %12717 = vmatpush3.bf16.msra.mxu0 %v14739_v59  ;;  %v14751_v59 = vld [vmem:[%s15460_s8 + $0x108] sm:$0xff]  }
0x10a1   : > { %12718 = vmatprep.subr.bf16.mxu0 %v14740_v55  ;;  %v14752_v55 = vld [vmem:[%s15460_s8 + $0x150] sm:$0xff]  }
0x10a4   : > { %12719 = vmatpush3.bf16.msra.mxu0 %v14741_v58  ;;  %v14753_v58 = vld [vmem:[%s15460_s8 + $0x110] sm:$0xff]  }
0x10a5   : > { %12720 = vmatprep.subr.bf16.mxu0 %v14742_v41  ;;  %v14754_v41 = vld [vmem:[%s15460_s8 + $0x158] sm:$0xff]  }
0x10a8   : > { %12721 = vmatpush3.bf16.msra.mxu0 %v14743_v15  ;;  %v14755_v15 = vld [vmem:[%s15460_s8 + $0x118] sm:$0xff]  }
0x10a9   : > { %12722 = vmatprep.subr.bf16.mxu0 %v14744_v14  ;;  %v14756_v14 = vld [vmem:[%s15460_s8 + $0x160] sm:$0xff]  }
0x10ac   : > { %12723 = vmatpush3.bf16.msra.mxu0 %v14745_v16  ;;  %v14762_v16 = vld [vmem:[%s15460_s8 + $0x178] sm:$0xff]  }
0x10ad   : > { %12724 = vmatprep.subr.bf16.mxu0 %v14746_v21  ;;  %v14769_v21 = vld [vmem:[%s15462_s3 + $0x34] ss:$24 sps:$4 sm:$0xff]  }
0x10b0   : > { %12725 = vmatpush3.bf16.msra.mxu0 %v14747_v23  ;;  %v14779_v23 = vld [vmem:[%s15462_s3 + $0xf0] ss:$24 sps:$4 sm:$0xff]  }
0x10b1   : > { %12732 = vmatprep.subr.bf16.mxu0 %v14748_v26  ;;  %v14790_v26 = vld [vmem:[%s15462_s3 + $0xc] ss:$24 sps:$4 sm:$0xff]  }
0x10b3   : > { %10567 = vmatmul.mubr.bf16.vlgmr.msra.gmra.mrb[40].mxu0 %v10101_v12 }
0x10b4   : > { %12733 = vmatpush3.bf16.msra.mxu0 %v14749_v10  ;;  %10607 = vmatprep.mubr.bf16.mxu0 %v10104_v36  ;;  %v10203_v36 = vsub.s32 3, %v15621_v38 }
0x10b5   : > { %12734 = vmatprep.subr.bf16.mxu0 %v14750_v39 }
0x10b8   : > { %12735 = vmatpush3.bf16.msra.mxu0 %v14751_v59  ;;  %v10204_v59 = vrot.slane %v17170_v24, %v10203_v36  ;;  %v14809_v36 = vld [vmem:[%s15462_s3 + $0x158] ss:$24 sps:$4 sm:$0xff]  }
0x10b9   : > { %12736 = vmatprep.subr.bf16.mxu0 %v14752_v55 }
0x10bc   : > { %12737 = vmatpush3.bf16.msra.mxu0 %v14753_v58 }
0x10bd   : > { %12738 = vmatprep.subr.bf16.mxu0 %v14754_v41 }
0x10c0   : > { %12739 = vmatpush3.bf16.msra.mxu0 %v14755_v15 }
0x10c1   : > { %12740 = vmatprep.subr.bf16.mxu0 %v14756_v14 }
0x10c4   : > { %12741 = vmatpush3.bf16.msra.mxu0 %v14757_v32 }
0x10c5   : > { %12742 = vmatprep.subr.bf16.mxu0 %v14758_v45 }
0x10c8   : > { %12743 = vmatpush3.bf16.msra.mxu0 %v14759_v25 }
0x10c9   : > { %12744 = vmatprep.subr.bf16.mxu0 %v14760_v17 }
0x10cc   : > { %12745 = vmatpush3.bf16.msra.mxu0 %v14761_v18 }
0x10cd   : > { %12746 = vmatprep.subr.bf16.mxu0 %v14762_v16 }
0x10d0   : > { %12747 = vmatpush3.bf16.msra.mxu0 %v14763_v53 }
0x10d1   : > { %10907 = vmatprep.subr.bf16.mxu0 %v14766_v30 }
0x10d3   : > { %10608 = vmatmul.mubr.bf16.vlgmr.msra.gmra.mrb[44].mxu0 %v10103_v57  ;;  %v14778_v57 = vld [vmem:[%s15462_s3 + $0xc4] ss:$24 sps:$4 sm:$0xff]  }
0x10d4   : > { %10939 = vmatprep.mubr.bf16.mxu0 %v15172_v60  ;;  %10908 = vmatpush1.bf16.msra.mxu0 %v14764_v4 }
0x10d5   : > { %10909 = vmatprep.subr.bf16.mxu0 %v14769_v21 }
0x10d8   : > { %10910 = vmatpush1.bf16.msra.mxu0 %v14767_v40 }
0x10d9   : > { %10911 = vmatprep.subr.bf16.mxu0 %v14772_v1 }
0x10dc   : > { %10912 = vmatpush1.bf16.msra.mxu0 %v14770_v46 }
0x10dd   : > { %10913 = vmatprep.subr.bf16.mxu0 %v14775_v43 }
0x10e0   : > { %10914 = vmatpush1.bf16.msra.mxu0 %v14773_v62 }
0x10e1   : > { %10915 = vmatprep.subr.bf16.mxu0 %v14778_v57  ;;  %v14788_v57 = vld [vmem:[%s15462_s3 + $0x8] ss:$24 sps:$4 sm:$0xff]  }
0x10e4   : > { %10916 = vmatpush1.bf16.msra.mxu0 %v14776_v0 }
0x10e5   : > { %10917 = vmatprep.subr.bf16.mxu0 %v14781_v2  ;;  %v14793_v2 = vld [vmem:[%s15462_s3 + $0x3c] ss:$24 sps:$4 sm:$0xff]  }
0x10e8   : > { %10918 = vmatpush1.bf16.msra.mxu0 %v14779_v23  ;;  %v14791_v23 = vld [vmem:[%s15462_s3 + $0x38] ss:$24 sps:$4 sm:$0xff]  }
0x10e9   : > { %10919 = vmatprep.subr.bf16.mxu0 %v14784_v34  ;;  %v14796_v34 = vld [vmem:[%s15462_s3 + $0x6c] ss:$24 sps:$4 sm:$0xff]  }
0x10ec   : > { %10920 = vmatpush1.bf16.msra.mxu0 %v14782_v35  ;;  %v14794_v35 = vld [vmem:[%s15462_s3 + $0x68] ss:$24 sps:$4 sm:$0xff]  }
0x10ed   : > { %10921 = vmatprep.subr.bf16.mxu0 %v14787_v27  ;;  %v14799_v27 = vld [vmem:[%s15462_s3 + $0x9c] ss:$24 sps:$4 sm:$0xff]  }
0x10f0   : > { %10922 = vmatpush1.bf16.msra.mxu0 %v14785_v50  ;;  %v14797_v50 = vld [vmem:[%s15462_s3 + $0x98] ss:$24 sps:$4 sm:$0xff]  }
0x10f1   : > { %10950 = vmatprep.subr.bf16.mxu0 %v14790_v26  ;;  %v14802_v26 = vld [vmem:[%s15462_s3 + $0xcc] ss:$24 sps:$4 sm:$0xff]  }
0x1166   : > { %v12704_v13 = vpop.f32.mrb[36].mxu0 }
0x1167   : > { %v12705_v42 = vpop.f32.mrb[37].mxu0 }
0x1168   : > { %v12706_v10 = vadd.f32 %v12705_v42, %v12704_v13  ;;  %v12707_v44 = vpop.f32.mrb[38].mxu0  ;;  %v14800_v13 = vld [vmem:[%s15462_s3 + $0xc8] ss:$24 sps:$4 sm:$0xff]   ;;  %v14805_v42 = vld [vmem:[%s15462_s3 + $0xfc] ss:$24 sps:$4 sm:$0xff]  }
0x1169   : > { %v12708_v12 = vpop.f32.mrb[39].mxu0 }
0x116a   : > { %v12709_v39 = vadd.f32 %v12708_v12, %v12707_v44  ;;  %v10528_v41 = vadd.f32 %v12706_v10, %v10204_v59  ;;  %v14803_v10 = vld [vmem:[%s15462_s3 + $0xf8] ss:$24 sps:$4 sm:$0xff]   ;;  %v14808_v44 = vld [vmem:[%s15462_s3 + $0x12c] ss:$24 sps:$4 sm:$0xff]   ;;  %v14806_v12 = vld [vmem:[%s15462_s3 + $0x128] ss:$24 sps:$4 sm:$0xff]  }
0x116c   : > { %v10531_v45 = vadd.f32 %v12709_v39, %v10204_v59  ;;  %v14811_v39 = vld [vmem:[%s15462_s3 + $0x15c] ss:$24 sps:$4 sm:$0xff]  }
0x116d   : > { %v14814_v59 = vld [vmem:[%s15462_s3 + $0x14] ss:$24 sps:$4 sm:$0xff]  }
0x1186   : > { %v12726_v55 = vpop.f32.mrb[40].mxu0 }
0x1187   : > { %v12727_v58 = vpop.f32.mrb[41].mxu0 }
0x1188   : > { %v12728_v15 = vadd.f32 %v12727_v58, %v12726_v55  ;;  %v12729_v14 = vpop.f32.mrb[42].mxu0  ;;  %v14812_v55 = vld [vmem:[%s15462_s3 + $0x10] ss:$24 sps:$4 sm:$0xff]   ;;  %v14817_v58 = vld [vmem:[%s15462_s3 + $0x44] ss:$24 sps:$4 sm:$0xff]  }
0x1189   : > { %v12730_v32 = vpop.f32.mrb[43].mxu0 }
0x118a   : > { %v10569_v25 = vadd.f32 %v12728_v15, %v10528_v41  ;;  %v12731_v17 = vadd.f32 %v12730_v32, %v12729_v14  ;;  %v14815_v41 = vld [vmem:[%s15462_s3 + $0x40] ss:$24 sps:$4 sm:$0xff]   ;;  %v14820_v15 = vld [vmem:[%s15462_s3 + $0x74] ss:$24 sps:$4 sm:$0xff]   ;;  %v14818_v14 = vld [vmem:[%s15462_s3 + $0x70] ss:$24 sps:$4 sm:$0xff]  }
0x118b   : > { %v14823_v32 = vld [vmem:[%s15462_s3 + $0xa4] ss:$24 sps:$4 sm:$0xff]  }
0x118c   : > { %v10572_v18 = vadd.f32 %v12731_v17, %v10531_v45  ;;  %v14821_v45 = vld [vmem:[%s15462_s3 + $0xa0] ss:$24 sps:$4 sm:$0xff]   ;;  %v14824_v17 = vld [vmem:[%s15462_s3 + $0xd0] ss:$24 sps:$4 sm:$0xff]  }
0x11a6   : > { %v12748_v16 = vpop.f32.mrb[44].mxu0 }
0x11a7   : > { %v12749_v53 = vpop.f32.mrb[45].mxu0 }
0x11a8   : > { %v12750_v4 = vadd.f32 %v12749_v53, %v12748_v16  ;;  %v12751_v30 = vpop.f32.mrb[46].mxu0  ;;  %v14832_v16 = vld [vmem:[%s15462_s3 + $0x134] ss:$24 sps:$4 sm:$0xff]   ;;  %v14830_v53 = vld [vmem:[%s15462_s3 + $0x130] ss:$24 sps:$4 sm:$0xff]  }
0x11a9   : > { %v12752_v21 = vpop.f32.mrb[47].mxu0 }
0x11aa   : > { %v10610_v40 = vadd.f32 %v12750_v4, %v10569_v25  ;;  %v12753_v1 = vadd.f32 %v12752_v21, %v12751_v30  ;;  %v14826_v25 = vld [vmem:[%s15462_s3 + $0xd4] ss:$24 sps:$4 sm:$0xff]   ;;  %v14835_v4 = vld [vmem:[%s15462_s3 + $0x164] ss:$24 sps:$4 sm:$0xff]   ;;  %v14833_v30 = vld [vmem:[%s15462_s3 + $0x160] ss:$24 sps:$4 sm:$0xff]   ;;  %v11051_v21 = vrot.slane %v17170_v24, %v17313_v29 }
0x11ac   : > { %v10613_v46 = vadd.f32 %v12753_v1, %v10572_v18  ;;  %v10616_v43 = vmax.f32 %v10610_v40, 0.0  ;;  %v14829_v18 = vld [vmem:[%s15462_s3 + $0x104] ss:$24 sps:$4 sm:$0xff]   ;;  %v11055_v1 = vrot.slane %v17175_v19, %v17313_v29 }
0x11ae   : > { %v10617_v62 = vmax.f32 %v10613_v46, 0.0 }
0x11b0   : > { %v17420_v0 = vpack.c.bf16 %v10617_v62, %v10616_v43 }
0x11b2   : > { %10940 = vmatmul.mubr.bf16.vlgmr.msra.gmra.mrb[48].mxu0 %v17420_v0 }
0x11b3   : > { %10951 = vmatpush1.bf16.msra.mxu0 %v14788_v57  ;;  %10982 = vmatprep.mubr.bf16.mxu0 %v15172_v60 }
0x11b4   : > { %10952 = vmatprep.subr.bf16.mxu0 %v14793_v2 }
0x11b7   : > { %10953 = vmatpush1.bf16.msra.mxu0 %v14791_v23 }
0x11b8   : > { %10954 = vmatprep.subr.bf16.mxu0 %v14796_v34 }
0x11bb   : > { %10955 = vmatpush1.bf16.msra.mxu0 %v14794_v35 }
0x11bc   : > { %10956 = vmatprep.subr.bf16.mxu0 %v14799_v27 }
0x11bf   : > { %10957 = vmatpush1.bf16.msra.mxu0 %v14797_v50 }
0x11c0   : > { %10958 = vmatprep.subr.bf16.mxu0 %v14802_v26 }
0x11c3   : > { %10959 = vmatpush1.bf16.msra.mxu0 %v14800_v13 }
0x11c4   : > { %10960 = vmatprep.subr.bf16.mxu0 %v14805_v42 }
0x11c7   : > { %10961 = vmatpush1.bf16.msra.mxu0 %v14803_v10 }
0x11c8   : > { %10962 = vmatprep.subr.bf16.mxu0 %v14808_v44 }
0x11cb   : > { %10963 = vmatpush1.bf16.msra.mxu0 %v14806_v12 }
0x11cc   : > { %10964 = vmatprep.subr.bf16.mxu0 %v14811_v39 }
0x11cf   : > { %10965 = vmatpush1.bf16.msra.mxu0 %v14809_v36 }
0x11d0   : > { %10993 = vmatprep.subr.bf16.mxu0 %v14814_v59 }
0x11d2   : > { %10983 = vmatmul.mubr.bf16.vlgmr.msra.gmra.mrb[52].mxu0 %v17420_v0 }
0x11d3   : > { %10994 = vmatpush1.bf16.msra.mxu0 %v14812_v55  ;;  %11025 = vmatprep.mubr.bf16.mxu0 %v15172_v60  ;;  %v14827_v60 = vld [vmem:[%s15462_s3 + $0x100] ss:$24 sps:$4 sm:$0xff]  }
0x11d4   : > { %10995 = vmatprep.subr.bf16.mxu0 %v14817_v58 }
0x11d7   : > { %10996 = vmatpush1.bf16.msra.mxu0 %v14815_v41 }
0x11d8   : > { %10997 = vmatprep.subr.bf16.mxu0 %v14820_v15 }
0x11db   : > { %10998 = vmatpush1.bf16.msra.mxu0 %v14818_v14 }
0x11dc   : > { %10999 = vmatprep.subr.bf16.mxu0 %v14823_v32 }
0x11df   : > { %11000 = vmatpush1.bf16.msra.mxu0 %v14821_v45 }
0x11e0   : > { %11001 = vmatprep.subr.bf16.mxu0 %v14826_v25 }
0x11e3   : > { %11002 = vmatpush1.bf16.msra.mxu0 %v14824_v17 }
0x11e4   : > { %11003 = vmatprep.subr.bf16.mxu0 %v14829_v18 }
0x11e7   : > { %11004 = vmatpush1.bf16.msra.mxu0 %v14827_v60 }
0x11e8   : > { %11005 = vmatprep.subr.bf16.mxu0 %v14832_v16 }
0x11eb   : > { %11006 = vmatpush1.bf16.msra.mxu0 %v14830_v53 }
0x11ec   : > { %11007 = vmatprep.subr.bf16.mxu0 %v14835_v4 }
0x11ef   : > { %11008 = vmatpush1.bf16.msra.mxu0 %v14833_v30 }
0x11f2   : > { %11026 = vmatmul.mubr.bf16.vlgmr.msra.gmra.mrb[56].mxu0 %v17420_v0 }
0x1285   : > { %v10941_v40 = vpop.f32.mrb[48].mxu0 }
0x1286   : > { %v11036_v46 = vadd.f32 %v10941_v40, %v17184_v54  ;;  %v10943_v43 = vpop.f32.mrb[49].mxu0  ;;  %v11059_v54 = vrot.slane %v17180_v31, %v17313_v29 }
0x1287   : > { %v11037_v62 = vadd.f32 %v10943_v43, %v17186_v47  ;;  %v10945_v57 = vpop.f32.mrb[50].mxu0 }
0x1288   : > { %v17463_v2 = vadd.f32 %v11051_v21, %v11036_v46  ;;  %v11042_v23 = vadd.f32 %v10945_v57, %v17193_v9  ;;  %v10947_v34 = vpop.f32.mrb[51].mxu0  ;;  %v11063_v9 = vrot.slane %v17189_v3, %v17313_v29  ;;  %v11067_v3 = vrot.slane %v17209_v20, %v17313_v29 }
0x1289   : > { %v11073_v35 = vadd.f32 %v11055_v1, %v11037_v62  ;;  %v11043_v0 = vadd.f32 %v10947_v34, %v17195_v49 }
0x128a   : > { %11084 = vst [vmem:[#allocation2] sm:$0xff] %v17463_v2  ;;  %v17468_v24 = vadd.f32 %v11051_v21, %v11042_v23 }
0x128b   : > { %11085 = vst [vmem:[#allocation2 + $0x8] sm:$0xff] %v11073_v35  ;;  %v17470_v19 = vadd.f32 %v11055_v1, %v11043_v0 }
0x128c   : > { %11090 = vst [vmem:[#allocation2 + $0x30] sm:$0xff] %v17468_v24 }
0x128d   : > { %11091 = vst [vmem:[#allocation2 + $0x38] sm:$0xff] %v17470_v19 }
0x12a5   : > { %v10984_v47 = vpop.f32.mrb[52].mxu0 }
0x12a6   : > { %v11038_v49 = vadd.f32 %v10984_v47, %v17197_v51  ;;  %v10986_v27 = vpop.f32.mrb[53].mxu0 }
0x12a7   : > { %v11039_v50 = vadd.f32 %v10986_v27, %v17204_v56  ;;  %v10988_v26 = vpop.f32.mrb[54].mxu0  ;;  %v11071_v56 = vrot.slane %v17214_v48, %v17313_v29  ;;  %v11100_v48 = vadd.f32 (!%p12683_p4), %v11073_v35, %v17463_v2 }
0x12a8   : > { %v11074_v13 = vadd.f32 %v11059_v54, %v11038_v49  ;;  %v11044_v42 = vadd.f32 %v10988_v26, %v17201_v5  ;;  %v10990_v10 = vpop.f32.mrb[55].mxu0 }
0x12a9   : > { %v11075_v44 = vadd.f32 %v11063_v9, %v11039_v50  ;;  %v11045_v12 = vadd.f32 %v10990_v10, %v17219_v8 }
0x12aa   : > { %11086 = vst [vmem:[#allocation2 + $0x10] sm:$0xff] %v11074_v13  ;;  %v11080_v39 = vadd.f32 %v11059_v54, %v11044_v42 }
0x12ab   : > { %11087 = vst [vmem:[#allocation2 + $0x18] sm:$0xff] %v11075_v44  ;;  %v11081_v31 = vadd.f32 %v11063_v9, %v11045_v12 }
0x12ac   : > { %11092 = vst [vmem:[#allocation2 + $0x40] sm:$0xff] %v11080_v39 }
0x12ad   : > { %11093 = vst [vmem:[#allocation2 + $0x48] sm:$0xff] %v11081_v31 }
0x12c5   : > { %v11027_v51 = vpop.f32.mrb[56].mxu0 }
0x12c6   : > { %v11040_v36 = vadd.f32 %v11027_v51, %v17221_v52  ;;  %v11029_v5 = vpop.f32.mrb[57].mxu0  ;;  %v11107_v52 = vadd.f32 (!%p12683_p4), %v17470_v19, %v17468_v24 }
0x12c7   : > { %v11041_v59 = vadd.f32 %v11029_v5, %v17224_v11  ;;  %v11031_v55 = vpop.f32.mrb[58].mxu0  ;;  %11099 = sbr.rel (%p12683_p4) target bundleno = 5144 (0x1418), region = 76  ;;  %v11101_v11 = vadd.f32 (!%p12683_p4), %v11100_v48, %v11074_v13 }
0x12c8   : > { %v11076_v8 = vadd.f32 %v11067_v3, %v11040_v36  ;;  %v11046_v58 = vadd.f32 %v11031_v55, %v17226_v7  ;;  %v11033_v41 = vpop.f32.mrb[59].mxu0  ;;  %v11108_v7 = vadd.f32 (!%p12683_p4), %v11107_v52, %v11080_v39 }
0x12c9   : > { %v11077_v15 = vadd.f32 %v11071_v56, %v11041_v59  ;;  %v11047_v14 = vadd.f32 %v11033_v41, %v17230_v22  ;;  %v11102_v29 = vadd.f32 (!%p12683_p4), %v11101_v11, %v11075_v44 }
0x12ca   : > { %11088 = vst [vmem:[#allocation2 + $0x20] sm:$0xff] %v11076_v8  ;;  %v11082_v32 = vadd.f32 %v11067_v3, %v11046_v58  ;;  %v11109_v45 = vadd.f32 (!%p12683_p4), %v11108_v7, %v11081_v31 }
0x12cb   : > { %11089 = vst [vmem:[#allocation2 + $0x28] sm:$0xff] %v11077_v15  ;;  %v11083_v20 = vadd.f32 %v11071_v56, %v11047_v14  ;;  %v11103_v25 = vadd.f32 (!%p12683_p4), %v11102_v29, %v11076_v8  ;;  %v11174_v14 = vsub.s32 (!%p12683_p4), 4, %v15621_v38 }
0x12cc   : > { %11094 = vst [vmem:[#allocation2 + $0x50] sm:$0xff] %v11082_v32  ;;  %v11110_v22 = vadd.f32 (!%p12683_p4), %v11109_v45, %v11082_v32 }
0x12cd   : > { %11095 = vst [vmem:[#allocation2 + $0x58] sm:$0xff] %v11083_v20  ;;  %v11104_v17 = vadd.f32 (!%p12683_p4), %v11103_v25, %v11077_v15  ;;  %v11179_v48 = vrot.slane (!%p12683_p4), %v16055_v63, %v11174_v14  ;;  %v11183_v52 = vrot.slane (!%p12683_p4), %v16135_v37, %v11174_v14  ;;  %v11187_v11 = vrot.slane (!%p12683_p4), %v16139_v28, %v11174_v14 }
0x12ce   : > { %v11111_v18 = vadd.f32 %v11110_v22, %v11083_v20  ;;  %v11191_v7 = vrot.slane %v16379_v6, %v11174_v14  ;;  %v11195_v29 = vrot.slane %v16383_v33, %v11174_v14 }
0x12cf   : > { %11105 = vadd.xlane.f32.xlu0 %v11104_v17 }
0x12d3   : > { %11112 = vadd.xlane.f32.xlu0 %v11111_v18 }
0x135c   : > { %v11106_v60 = vpop.xlane.xlu0 %11105 }
0x135d   : > { %v11114_v16 = vmul.f32 0.0013020834, %v11106_v60 }
0x135f   : > { %v11116_v53 = vsub.f32 %v17463_v2, %v11114_v16  ;;  %v11117_v4 = vsub.f32 %v11073_v35, %v11114_v16  ;;  %v11118_v30 = vsub.f32 %v11074_v13, %v11114_v16  ;;  %v11119_v40 = vsub.f32 %v11075_v44, %v11114_v16 }
0x1360   : > { %v11113_v21 = vpop.xlane.xlu0 %11112  ;;  %v11120_v62 = vsub.f32 %v11076_v8, %v11114_v16  ;;  %v11121_v47 = vsub.f32 %v11077_v15, %v11114_v16 }
0x1361   : > { %v11115_v1 = vmul.f32 0.0013020834, %v11113_v21  ;;  %v11128_v46 = vmul.f32 %v11116_v53, %v11116_v53  ;;  %v11129_v43 = vmul.f32 %v11117_v4, %v11117_v4  ;;  %v11130_v57 = vmul.f32 %v11118_v30, %v11118_v30 }
0x1362   : > { %v11131_v2 = vmul.f32 %v11119_v40, %v11119_v40  ;;  %v11132_v50 = vmul.f32 %v11120_v62, %v11120_v62  ;;  %v11133_v42 = vmul.f32 %v11121_v47, %v11121_v47 }
0x1363   : > { %v11140_v23 = vadd.f32 %v11129_v43, %v11128_v46  ;;  %v17496_v34 = vsub.f32 %v17468_v24, %v11115_v1  ;;  %v17499_v0 = vsub.f32 %v17470_v19, %v11115_v1  ;;  %v17501_v54 = vsub.f32 %v11080_v39, %v11115_v1 }
0x1364   : > { %v17503_v9 = vsub.f32 %v11081_v31, %v11115_v1  ;;  %v17509_v24 = vsub.f32 %v11082_v32, %v11115_v1  ;;  %v11127_v44 = vsub.f32 %v11083_v20, %v11115_v1  ;;  %v11210_v32 = vsub.s32 5, %v15621_v38 }
0x1365   : > { %v11141_v35 = vadd.f32 %v11140_v23, %v11130_v57  ;;  %v11134_v49 = vmul.f32 %v17496_v34, %v17496_v34  ;;  %v11135_v27 = vmul.f32 %v17499_v0, %v17499_v0  ;;  %v11136_v19 = vmul.f32 %v17501_v54, %v17501_v54 }
0x1366   : > { %v11137_v12 = vmul.f32 %v17503_v9, %v17503_v9  ;;  %v11138_v3 = vmul.f32 %v17509_v24, %v17509_v24  ;;  %v11139_v56 = vmul.f32 %v11127_v44, %v11127_v44  ;;  %v11175_v20 = vrot.slane %v16051_v61, %v11174_v14 }
0x1367   : > { %v11142_v26 = vadd.f32 %v11141_v35, %v11131_v2  ;;  %v11147_v13 = vadd.f32 %v11135_v27, %v11134_v49  ;;  %v11211_v25 = vrot.slane %v16051_v61, %v11210_v32  ;;  %v11215_v22 = vrot.slane %v16055_v63, %v11210_v32 }
0x1368   : > { %v11219_v17 = vrot.slane %v16135_v37, %v11210_v32  ;;  %v11223_v38 = vrot.slane %v16139_v28, %v11210_v32  ;;  %v11227_v1 = vrot.slane %v16379_v6, %v11210_v32  ;;  %v11231_v46 = vrot.slane %v16383_v33, %v11210_v32 }
0x1369   : > { %v11143_v10 = vadd.f32 %v11142_v26, %v11132_v50  ;;  %v11148_v39 = vadd.f32 %v11147_v13, %v11136_v19 }
0x136b   : > { %v11144_v31 = vadd.f32 %v11143_v10, %v11133_v42  ;;  %v11149_v51 = vadd.f32 %v11148_v39, %v11137_v12 }
0x136d   : > { %11145 = vadd.xlane.f32.xlu1 %v11144_v31  ;;  %v11150_v36 = vadd.f32 %v11149_v51, %v11138_v3 }
0x136f   : > { %v11151_v5 = vadd.f32 %v11150_v36, %v11139_v56 }
0x1371   : > { %11152 = vadd.xlane.f32.xlu1 %v11151_v5 }
0x13fa   : > { %v11146_v59 = vpop.xlane.xlu1 %11145 }
0x13fb   : > { %v11154_v55 = vmul.f32 0.0013020834, %v11146_v59 }
0x13fd   : > { %v11156_v8 = vadd.f32 1e-05, %v11154_v55 }
0x13fe   : > { %v11153_v58 = vpop.xlane.xlu1 %11152 }
0x13ff   : > { %14932 = vrsqrt.f32 %v11156_v8  ;;  %v11155_v41 = vmul.f32 0.0013020834, %v11153_v58 }
0x1401   : > { %v11157_v15 = vadd.f32 1e-05, %v11155_v41 }
0x1403   : > { %14934 = vrsqrt.f32 %v11157_v15 }
0x1409   : > { %v14933_v45 = vpop.eup %14932 }
0x140a   : > { %v11160_v18 = vmul.f32 %v14933_v45, %v11116_v53  ;;  %v11161_v60 = vmul.f32 %v14933_v45, %v11117_v4  ;;  %v11162_v16 = vmul.f32 %v14933_v45, %v11118_v30  ;;  %v11163_v21 = vmul.f32 %v14933_v45, %v11119_v40 }
0x140b   : > { %v11164_v43 = vmul.f32 %v14933_v45, %v11120_v62  ;;  %v11165_v57 = vmul.f32 %v14933_v45, %v11121_v47 }
0x140c   : > { %v11196_v23 = vmul.f32 %v11175_v20, %v11160_v18  ;;  %v11197_v2 = vmul.f32 %v11179_v48, %v11161_v60  ;;  %v11198_v35 = vmul.f32 %v11183_v52, %v11162_v16  ;;  %v11199_v61 = vmul.f32 %v11187_v11, %v11163_v21 }
0x140d   : > { %v14935_v49 = vpop.eup %14934  ;;  %v11200_v63 = vmul.f32 %v11191_v7, %v11164_v43  ;;  %v11201_v27 = vmul.f32 %v11195_v29, %v11165_v57 }
0x140e   : > { %v11232_v37 = vadd.f32 %v11211_v25, %v11196_v23  ;;  %v11233_v50 = vadd.f32 %v11215_v22, %v11197_v2  ;;  %v11234_v28 = vadd.f32 %v11219_v17, %v11198_v35  ;;  %v11235_v53 = vadd.f32 %v11223_v38, %v11199_v61 }
0x140f   : > { %v11236_v4 = vadd.f32 %v11227_v1, %v11200_v63  ;;  %v11237_v30 = vadd.f32 %v11231_v46, %v11201_v27  ;;  %v11166_v40 = vmul.f32 %v14935_v49, %v17496_v34  ;;  %v11167_v6 = vmul.f32 %v14935_v49, %v17499_v0 }
0x1410   : > { %11244 = vst [vmem:[#allocation12] sm:$0xff] %v11232_v37  ;;  %11245 = vst [vmem:[#allocation12 + $0x8] sm:$0xff] %v11233_v50  ;;  %v11168_v33 = vmul.f32 %v14935_v49, %v17501_v54  ;;  %v11169_v62 = vmul.f32 %v14935_v49, %v17503_v9  ;;  %v11170_v47 = vmul.f32 %v14935_v49, %v17509_v24 }
0x1411   : > { %11246 = vst [vmem:[#allocation12 + $0x10] sm:$0xff] %v11234_v28  ;;  %11247 = vst [vmem:[#allocation12 + $0x18] sm:$0xff] %v11235_v53  ;;  %v11171_v26 = vmul.f32 %v14935_v49, %v11127_v44  ;;  %v11202_v19 = vmul.f32 %v11175_v20, %v11166_v40  ;;  %v11203_v13 = vmul.f32 %v11179_v48, %v11167_v6 }
0x1412   : > { %11248 = vst [vmem:[#allocation12 + $0x20] sm:$0xff] %v11236_v4  ;;  %11249 = vst [vmem:[#allocation12 + $0x28] sm:$0xff] %v11237_v30  ;;  %v11204_v42 = vmul.f32 %v11183_v52, %v11168_v33  ;;  %v11205_v10 = vmul.f32 %v11187_v11, %v11169_v62  ;;  %v11206_v34 = vmul.f32 %v11191_v7, %v11170_v47 }
0x1413   : > { %v11207_v12 = vmul.f32 %v11195_v29, %v11171_v26  ;;  %v11238_v0 = vadd.f32 %v11211_v25, %v11202_v19  ;;  %v11239_v39 = vadd.f32 %v11215_v22, %v11203_v13 }
0x1414   : > { %v11240_v31 = vadd.f32 %v11219_v17, %v11204_v42  ;;  %v11241_v3 = vadd.f32 %v11223_v38, %v11205_v10  ;;  %v11242_v51 = vadd.f32 %v11227_v1, %v11206_v34 }
0x1415   : > { %v11243_v56 = vadd.f32 %v11231_v46, %v11207_v12  ;;  %11250 = vst [vmem:[#allocation12 + $0x30] sm:$0xff] %v11238_v0  ;;  %11251 = vst [vmem:[#allocation12 + $0x38] sm:$0xff] %v11239_v39 }
0x1416   : > { %11252 = vst [vmem:[#allocation12 + $0x40] sm:$0xff] %v11240_v31  ;;  %11253 = vst [vmem:[#allocation12 + $0x48] sm:$0xff] %v11241_v3 }
0x1417   : > { %11254 = vst [vmem:[#allocation12 + $0x50] sm:$0xff] %v11242_v51  ;;  %11255 = vst [vmem:[#allocation12 + $0x58] sm:$0xff] %v11243_v56 }
0x1418 PF: > { %p12943_p11 = scmp.eq.s32.totalorder %s15235_s28, 5  ;;  %s15173_s17 = smov [#allocation12]  }
0x1419   : > { %s11262_s8 = sshll.u32 %s15173_s17, 4  ;;  %s11263_s8 = int_to_ptr.vmem [resolvable:$true] %s11262_s8 }
0x141a   : > { %s15086_s3 = scalar_lea.vmem %s11263_s8, 1536  ;;  %p15093_p12 = scmp.lt.s32.totalorder %s11263_s8, %s11263_s8 }
0x141b   : > { %p15087_p13 = scmp.ne.s32.totalorder %s11263_s8, %s15086_s3  ;;  %p15094_p2 = scmp.lt.s32.totalorder %s15086_s3, %s15086_s3 }
0x141d   : > { %p15088_p9 = pnand %p15087_p13, %p12943_p11  ;;  %p15095_p7 = por %p15094_p2, %p15093_p12 }
0x141f   : > { %p15089_p0 = pneg %p15088_p9 }
0x1421   : > { %p15096_p3 = pnand %p15095_p7, %p15089_p0 }
0x1423   : > { %15099 = shalt.err (!%p15096_p3)
}
0x1424   : > { %s15100_s2 = scalar_lea.hbm %s17579_s7, 1536 }
0x1425   : > { %p15101_p1 = scmp.ne.s32.totalorder %s17579_s7, %s15100_s2  ;;  %p15106_p10 = scmp.lt.u32.totalorder %s15100_s2, %s17579_s7 }
0x1427   : > { %p15102_p6 = pnand %p15101_p1, %p12943_p11 }
0x1429   : > { %p15103_p5 = pneg %p15102_p6 }
0x142b   : > { %p15108_p8 = pnand %p15106_p10, %p15103_p5 }
0x142d   : > { %15111 = shalt.err (!%p15108_p8)
}
0x142e   : > { %s15174_s20 = smov 768   ;;  %s15175_s24 = smov 48  }
0x142f   : > { %12923 = dma.vmem_to_hbm [thread:$0]  (%p12943_p11), %s11263_s8, 1536, %s17579_s7, [#allocation5], %s15174_s20, %s15174_s20, %s15175_s24  }
0x1430   : > { %15141 = dma.done.wait (%p12943_p11), [#allocation5], 1536  }
0x1431   : > { %15143 = vsyncadd (%p12943_p11), [#allocation5], 4294965760 }
0x1432 PF: > { %s17608_s21 = sld [smem:[#allocation17_spill]]  ;;  %s17609_s26 = sld [smem:[#allocation18_spill]] }
0x1433   : > { %p24_p4 = scmp.ge.s32.totalorder %s15238_s29, 8   ;;  %s17610_s24 = smov %s15150_s25 }
0x1434   : > { %s17612_s27 = smov %s15238_s29 }
0x1435   :  { %26 = sbr.rel (!%p24_p4) target bundleno = 13 (0xd), region = 141 }
0x1438   : > { %s17611_s25 = smov %s17608_s21 }
0x143c   :  { %11278 = vsyncpa [#allocation4], 1 }
0x143d   :  { %11280 = vsyncpa [#allocation4 + $0x1], 1 }
0x143e   :  { %11281 = vsyncpa [#allocation7], 1 }
0x143f   :  { %11283 = vsyncpa [#allocation7 + $0x1], 1 }
0x1440   :  { %11284 = vsyncpa [#allocation10], 1 }
0x1441   :  { %11286 = vsyncpa [#allocation10 + $0x1], 1 }
0x1442   :  { %11287 = vsyncpa [#allocation5], 1 }
0x1443   :  { %11289 = vsyncpa [#allocation5 + $0x1], 1 }

</bundles_post_ra>
